<compile_context>
chip_gen: v7x
topology: tpu7x:2x2x1
jax: 0.10.0
libtpu: 0.0.40
codegen_flags: <defaults>
</compile_context>

<pallas_src>
import functools

import jax
import jax.numpy as jnp
from jax import lax
from jax.experimental import pallas as pl
from jax.experimental.pallas import tpu as pltpu

COMPUTE_DTYPE = jnp.bfloat16   # MXU operand dtype; all elementwise math stays f32


def _loop(n, body, unroll_limit):
    """Statically unroll short loops; fall back to pl.loop for long ones."""
    if n <= unroll_limit:
        for i in range(n):
            body(i)
    else:
        pl.loop(0, n)(body)


def _pick_rows_per_chunk(H, W, Cout, max_acc_vregs=16):
    """Image rows per accumulation chunk.

    The per-chunk f32 accumulator is (rows*(W+2), Cout); keep it within
    ~max_acc_vregs (8,128)-tiles so the 9-tap accumulation chain can live in
    vregs instead of round-tripping VMEM.  Must divide H (no remainder path).
    """
    Wp = W + 2
    lane_tiles = max(1, -(-Cout // 128))
    best = 1
    for r in range(1, H + 1):
        if H % r:
            continue
        sub_tiles = -(-(r * Wp) // 8)
        if sub_tiles * lane_tiles <= max_acc_vregs:
            best = r
    return best


def basic_block_kernel(x_ref, w1_ref, s1_ref, b1_ref, w2_ref, s2_ref, b2_ref,
                       o_ref, xpad_ref, hpad_ref, *, rows_per_chunk):
    """One batch element per grid step.

    x_ref    : (1, H, W, Cin)      input block (f32; also the residual)
    w1_ref   : (9, Cin, Cout)      conv1 weight, tap-major (kh*3+kw), bf16
    s1/b1    : (1, Cout)           folded BN1 scale / bias (f32)
    w2_ref   : (9, Cout, Cout)     conv2 weight (bf16)
    s2/b2    : (1, Cout)           folded BN2 scale / bias (f32)
    o_ref    : (1, H, W, Cout)     output block (f32)
    xpad_ref : ((H+3)*(W+2), Cin)  flat zero-padded input slab (bf16)
    hpad_ref : ((H+3)*(W+2), Cout) flat zero-padded intermediate slab (bf16)

    Flat slab layout: row (r+1)*(W+2) + (c+1) holds pixel (r, c); row 0, row
    H+1 and columns 0 / W+1 of the (H+2)x(W+2) picture are the zero halo.  One
    extra (W+2)-row band at the bottom absorbs the over-read of bottom-right
    taps (those products only land in discarded "wide" rows).
    """
    _, H, W, Cin = x_ref.shape
    Cout = o_ref.shape[3]
    Wp = W + 2
    RPC = rows_per_chunk
    RC = RPC * Wp                   # "wide" rows (incl. 2 garbage cols) per chunk
    n_chunks = H // RPC
    cdt = xpad_ref.dtype

    s1 = s1_ref[...]
    b1 = b1_ref[...]
    s2 = s2_ref[...]
    b2 = b2_ref[...]

    zero_top_x = jnp.zeros((Wp + 1, Cin), cdt)
    zero_bot_x = jnp.zeros((2 * Wp - 1, Cin), cdt)
    zero2_x = jnp.zeros((2, Cin), cdt)
    zero_top_h = jnp.zeros((Wp + 1, Cout), cdt)
    zero_bot_h = jnp.zeros((2 * Wp - 1, Cout), cdt)
    zero2_h = jnp.zeros((2, Cout), cdt)

    # ---- halo rows of both slabs.  Every other slab row is overwritten below,
    # so the scratches carry no state across grid steps (megacore-safe). -------
    xpad_ref[0:Wp + 1, :] = zero_top_x
    xpad_ref[pl.ds((H + 1) * Wp + 1, 2 * Wp - 1), :] = zero_bot_x
    hpad_ref[0:Wp + 1, :] = zero_top_h
    hpad_ref[pl.ds((H + 1) * Wp + 1, 2 * Wp - 1), :] = zero_bot_h

    # ---- stage x into the flat padded slab (single bf16 pass) ---------------
    def stage_row(h):
        base = (h + 1) * Wp + 1
        xpad_ref[pl.ds(base, W), :] = x_ref[0, h].astype(cdt)
        xpad_ref[pl.ds(base + W, 2), :] = zero2_x      # right / next-left halo cols
    _loop(H, stage_row, unroll_limit=64)

    def conv3x3(src_ref, w_ref, scale, bias, consume):
        """3x3 / stride 1 / pad 1 conv: 9 shifted-slab MXU dots, value-chain acc."""
        def chunk(c):
            base = c * RC
            acc = None
            for kh in range(3):
                for kw in range(3):
                    lhs = src_ref[pl.ds(base + kh * Wp + kw, RC), :]
                    d = jnp.dot(lhs, w_ref[kh * 3 + kw],
                                preferred_element_type=jnp.float32)
                    acc = d if acc is None else acc + d
            consume(c, acc * scale + bias)
        _loop(n_chunks, chunk, unroll_limit=8)

    # ---- conv1 -> bn1 -> relu, written straight into conv2's padded slab ----
    def consume1(c, y):
        y = jnp.maximum(y, 0.0)
        for rr in range(RPC):
            h = c * RPC + rr
            row = y[rr * Wp:rr * Wp + W, :].astype(cdt)   # drop 2 garbage cols
            base = (h + 1) * Wp + 1
            hpad_ref[pl.ds(base, W), :] = row
            hpad_ref[pl.ds(base + W, 2), :] = zero2_h
    conv3x3(xpad_ref, w1_ref, s1, b1, consume1)

    # ---- conv2 -> bn2 -> + identity -> relu -> output (all f32) -------------
    def consume2(c, y):
        for rr in range(RPC):
            h = c * RPC + rr
            row = y[rr * Wp:rr * Wp + W, :]               # (W, Cout), f32
            o_ref[0, h] = jnp.maximum(row + x_ref[0, h], 0.0).astype(o_ref.dtype)
    conv3x3(hpad_ref, w2_ref, s2, b2, consume2)


@jax.jit
def basic_block_pallas(x_nchw, w1_oihw, s1, b1, w2_oihw, s2, b2):
    """x_nchw: (N, C, H, W) float32.  Returns (N, C, H, W) float32."""
    N, Cin, H, W = x_nchw.shape
    Cout = w1_oihw.shape[0]
    assert Cin == Cout, "residual add requires inplanes == planes (no downsample)"

    # TODO(synk): if the surrounding model kept NHWC, these two extra HBM
    # passes (XLA transposes) go away.
    x_nhwc = jnp.transpose(x_nchw, (0, 2, 3, 1))

    # OIHW -> (kh, kw, I, O) -> tap-major (9, I, O); bf16 MXU operands.
    w1 = jnp.transpose(w1_oihw, (2, 3, 1, 0)).reshape(9, Cin, Cout).astype(COMPUTE_DTYPE)
    w2 = jnp.transpose(w2_oihw, (2, 3, 1, 0)).reshape(9, Cout, Cout).astype(COMPUTE_DTYPE)
    s1_ = s1.reshape(1, Cout).astype(jnp.float32)
    b1_ = b1.reshape(1, Cout).astype(jnp.float32)
    s2_ = s2.reshape(1, Cout).astype(jnp.float32)
    b2_ = b2.reshape(1, Cout).astype(jnp.float32)

    rpc = _pick_rows_per_chunk(H, W, Cout)
    slab_rows = (H + 3) * (W + 2)

    kernel = functools.partial(basic_block_kernel, rows_per_chunk=rpc)

    out_nhwc = pl.pallas_call(
        kernel,
        out_shape=jax.ShapeDtypeStruct((N, H, W, Cout), jnp.float32),
        grid_spec=pltpu.PrefetchScalarGridSpec(
            num_scalar_prefetch=0,
            grid=(N,),
            in_specs=[
                pl.BlockSpec((1, H, W, Cin),        lambda n: (n, 0, 0, 0)),
                pl.BlockSpec((9, Cin, Cout),        lambda n: (0, 0, 0)),
                pl.BlockSpec((1, Cout),             lambda n: (0, 0)),
                pl.BlockSpec((1, Cout),             lambda n: (0, 0)),
                pl.BlockSpec((9, Cout, Cout),       lambda n: (0, 0, 0)),
                pl.BlockSpec((1, Cout),             lambda n: (0, 0)),
                pl.BlockSpec((1, Cout),             lambda n: (0, 0)),
            ],
            out_specs=pl.BlockSpec((1, H, W, Cout), lambda n: (n, 0, 0, 0)),
            scratch_shapes=[
                pltpu.VMEM((slab_rows, Cin), COMPUTE_DTYPE),    # padded input slab
                pltpu.VMEM((slab_rows, Cout), COMPUTE_DTYPE),   # padded intermediate
            ],
        ),
        compiler_params=pltpu.CompilerParams(
            dimension_semantics=("parallel",),
            # 48 MiB is safe on v7x (64 MiB physical); v5e/v6e (128 MiB) can go
            # higher when H*W*C tiles are large.
            vmem_limit_bytes=48 * 1024 * 1024),
    )(x_nhwc, w1, s1_, b1_, w2, s2_, b2_)

    return jnp.transpose(out_nhwc, (0, 3, 1, 2))   # back to NCHW


# ---------------- pure-JAX references (for correctness check) ----------------
def conv3x3_ref(x_nchw, w_oihw, conv_dtype=None):
    if conv_dtype is not None:
        x_nchw = x_nchw.astype(conv_dtype)
        w_oihw = w_oihw.astype(conv_dtype)
    return lax.conv_general_dilated(
        x_nchw, w_oihw, window_strides=(1, 1), padding=((1, 1), (1, 1)),
        dimension_numbers=("NCHW", "OIHW", "NCHW"),
        preferred_element_type=jnp.float32)


def basic_block_ref(x, w1, s1, b1, w2, s2, b2, conv_dtype=None):
    h = conv3x3_ref(x, w1, conv_dtype)
    h = h * s1[None, :, None, None] + b1[None, :, None, None]
    h = jnp.maximum(h, 0.0)
    h = conv3x3_ref(h, w2, conv_dtype)
    h = h * s2[None, :, None, None] + b2[None, :, None, None]
    return jnp.maximum(h + x, 0.0)


if __name__ == "__main__":
    # Small shapes consistent with BasicBlock(inplanes=8, planes=8, stride=1)
    N, C, H, W = 2, 8, 16, 16
    key = jax.random.PRNGKey(0)
    kx, kw1, kw2, kg1, kb1, km1, kv1, kg2, kb2, km2, kv2 = jax.random.split(key, 11)

    x = jax.random.normal(kx, (N, C, H, W), jnp.float32)

    # conv weights (torch OIHW layout), no bias (conv3x3 has bias=False)
    w1 = jax.random.normal(kw1, (C, C, 3, 3), jnp.float32) * 0.1
    w2 = jax.random.normal(kw2, (C, C, 3, 3), jnp.float32) * 0.1

    # BatchNorm2d params (eval mode), folded into per-channel scale/bias
    eps = 1e-5
    g1 = 1.0 + 0.1 * jax.random.normal(kg1, (C,), jnp.float32)
    be1 = 0.1 * jax.random.normal(kb1, (C,), jnp.float32)
    rm1 = 0.1 * jax.random.normal(km1, (C,), jnp.float32)
    rv1 = jnp.abs(jax.random.normal(kv1, (C,), jnp.float32)) + 0.5
    g2 = 1.0 + 0.1 * jax.random.normal(kg2, (C,), jnp.float32)
    be2 = 0.1 * jax.random.normal(kb2, (C,), jnp.float32)
    rm2 = 0.1 * jax.random.normal(km2, (C,), jnp.float32)
    rv2 = jnp.abs(jax.random.normal(kv2, (C,), jnp.float32)) + 0.5

    s1 = g1 / jnp.sqrt(rv1 + eps)
    b1 = be1 - rm1 * s1
    s2 = g2 / jnp.sqrt(rv2 + eps)
    b2 = be2 - rm2 * s2

    out = basic_block_pallas(x, w1, s1, b1, w2, s2, b2)
    out = jax.block_until_ready(out)
    assert out.shape == (N, C, H, W)

    # Matched-precision reference: bf16 conv operands, f32 accumulation /
    # BN / residual / relu — exactly what the kernel computes.
    ref_bf16 = basic_block_ref(x, w1, s1, b1, w2, s2, b2,
                               conv_dtype=COMPUTE_DTYPE)
    err_m = float(jnp.max(jnp.abs(out - ref_bf16)))
    assert jnp.allclose(out, ref_bf16, atol=2e-3, rtol=2e-3), (
        f"matched-precision max abs err {err_m}")

    # Sanity check vs the full-f32 reference (bf16 matmul operands => loose tol).
    ref_f32 = basic_block_ref(x, w1, s1, b1, w2, s2, b2)
    err_f = float(jnp.max(jnp.abs(out - ref_f32)))
    assert err_f < 1e-1, f"f32-reference max abs err {err_f}"

    print("KERNEL_OK")
</pallas_src>

<mosaic_0001>
module attributes {stable_mosaic.version = 11 : i64} {
  func.func @basic_block_kernel(%arg0: i32, %arg1: memref<1x16x16x8xf32, #tpu.memory_space<vmem>>, %arg2: memref<9x8x8xbf16, #tpu.memory_space<vmem>>, %arg3: memref<1x8xf32, #tpu.memory_space<vmem>>, %arg4: memref<1x8xf32, #tpu.memory_space<vmem>>, %arg5: memref<9x8x8xbf16, #tpu.memory_space<vmem>>, %arg6: memref<1x8xf32, #tpu.memory_space<vmem>>, %arg7: memref<1x8xf32, #tpu.memory_space<vmem>>, %arg8: memref<1x16x16x8xf32, #tpu.memory_space<vmem>>, %arg9: memref<342x8xbf16, #tpu.memory_space<vmem>>, %arg10: memref<342x8xbf16, #tpu.memory_space<vmem>>) attributes {dimension_semantics = [#tpu.dimension_semantics<parallel>], iteration_bounds = array<i64: 2>, scalar_prefetch = 0 : i64, scratch_operands = 2 : i64, tpu.core_type = #tpu.core_type<tc>, window_params = [{transform_indices = @transform_0, window_bounds = array<i64: 1, 16, 16, 8>}, {pipeline_mode = #tpu.pipeline_mode<synchronous>, transform_indices = @transform_1, window_bounds = array<i64: 9, 8, 8>}, {pipeline_mode = #tpu.pipeline_mode<synchronous>, transform_indices = @transform_2, window_bounds = array<i64: 1, 8>}, {pipeline_mode = #tpu.pipeline_mode<synchronous>, transform_indices = @transform_3, window_bounds = array<i64: 1, 8>}, {pipeline_mode = #tpu.pipeline_mode<synchronous>, transform_indices = @transform_4, window_bounds = array<i64: 9, 8, 8>}, {pipeline_mode = #tpu.pipeline_mode<synchronous>, transform_indices = @transform_5, window_bounds = array<i64: 1, 8>}, {pipeline_mode = #tpu.pipeline_mode<synchronous>, transform_indices = @transform_6, window_bounds = array<i64: 1, 8>}, {transform_indices = @transform_7, window_bounds = array<i64: 1, 16, 16, 8>}]} {
    %c0 = arith.constant 0 : index
    %c0_0 = arith.constant 0 : index
    %0 = vector.load %arg3[%c0, %c0_0] : memref<1x8xf32, #tpu.memory_space<vmem>>, vector<1x8xf32>
    %c0_1 = arith.constant 0 : index
    %c0_2 = arith.constant 0 : index
    %1 = vector.load %arg4[%c0_1, %c0_2] : memref<1x8xf32, #tpu.memory_space<vmem>>, vector<1x8xf32>
    %c0_3 = arith.constant 0 : index
    %c0_4 = arith.constant 0 : index
    %2 = vector.load %arg6[%c0_3, %c0_4] : memref<1x8xf32, #tpu.memory_space<vmem>>, vector<1x8xf32>
    %c0_5 = arith.constant 0 : index
    %c0_6 = arith.constant 0 : index
    %3 = vector.load %arg7[%c0_5, %c0_6] : memref<1x8xf32, #tpu.memory_space<vmem>>, vector<1x8xf32>
    %cst = arith.constant 0.000000e+00 : bf16
    %4 = vector.broadcast %cst : bf16 to vector<19x8xbf16>
    %cst_7 = arith.constant 0.000000e+00 : bf16
    %5 = vector.broadcast %cst_7 : bf16 to vector<35x8xbf16>
    %cst_8 = arith.constant 0.000000e+00 : bf16
    %6 = vector.broadcast %cst_8 : bf16 to vector<2x8xbf16>
    %cst_9 = arith.constant 0.000000e+00 : bf16
    %7 = vector.broadcast %cst_9 : bf16 to vector<19x8xbf16>
    %cst_10 = arith.constant 0.000000e+00 : bf16
    %8 = vector.broadcast %cst_10 : bf16 to vector<35x8xbf16>
    %cst_11 = arith.constant 0.000000e+00 : bf16
    %9 = vector.broadcast %cst_11 : bf16 to vector<2x8xbf16>
    %c0_12 = arith.constant 0 : index
    %c0_13 = arith.constant 0 : index
    %10 = vector.load %arg9[%c0_12, %c0_13] : memref<342x8xbf16, #tpu.memory_space<vmem>>, vector<19x8xbf16>
    tpu.vector_store %arg9[%c0_12, %c0_13], %4 {strides = array<i32>} : memref<342x8xbf16, #tpu.memory_space<vmem>>, vector<19x8xbf16>,
    %c307 = arith.constant 307 : index
    %c0_14 = arith.constant 0 : index
    %11 = vector.load %arg9[%c307, %c0_14] : memref<342x8xbf16, #tpu.memory_space<vmem>>, vector<35x8xbf16>
    tpu.vector_store %arg9[%c307, %c0_14], %5 {strides = array<i32>} : memref<342x8xbf16, #tpu.memory_space<vmem>>, vector<35x8xbf16>,
    %c0_15 = arith.constant 0 : index
    %c0_16 = arith.constant 0 : index
    %12 = vector.load %arg10[%c0_15, %c0_16] : memref<342x8xbf16, #tpu.memory_space<vmem>>, vector<19x8xbf16>
    tpu.vector_store %arg10[%c0_15, %c0_16], %7 {strides = array<i32>} : memref<342x8xbf16, #tpu.memory_space<vmem>>, vector<19x8xbf16>,
    %c307_17 = arith.constant 307 : index
    %c0_18 = arith.constant 0 : index
    %13 = vector.load %arg10[%c307_17, %c0_18] : memref<342x8xbf16, #tpu.memory_space<vmem>>, vector<35x8xbf16>
    tpu.vector_store %arg10[%c307_17, %c0_18], %8 {strides = array<i32>} : memref<342x8xbf16, #tpu.memory_space<vmem>>, vector<35x8xbf16>,
    %c0_19 = arith.constant 0 : index
    %c0_20 = arith.constant 0 : index
    %c0_21 = arith.constant 0 : index
    %c0_22 = arith.constant 0 : index
    %14 = vector.load %arg1[%c0_19, %c0_20, %c0_21, %c0_22] : memref<1x16x16x8xf32, #tpu.memory_space<vmem>>, vector<1x1x16x8xf32>
    %15 = vector.shape_cast %14 : vector<1x1x16x8xf32> to vector<16x8xf32>
    %16 = arith.truncf %15 : vector<16x8xf32> to vector<16x8xbf16>
    %c19 = arith.constant 19 : index
    %c0_23 = arith.constant 0 : index
    %17 = vector.load %arg9[%c19, %c0_23] : memref<342x8xbf16, #tpu.memory_space<vmem>>, vector<16x8xbf16>
    tpu.vector_store %arg9[%c19, %c0_23], %16 {strides = array<i32>} : memref<342x8xbf16, #tpu.memory_space<vmem>>, vector<16x8xbf16>,
    %c35 = arith.constant 35 : index
    %c0_24 = arith.constant 0 : index
    %18 = vector.load %arg9[%c35, %c0_24] : memref<342x8xbf16, #tpu.memory_space<vmem>>, vector<2x8xbf16>
    tpu.vector_store %arg9[%c35, %c0_24], %6 {strides = array<i32>} : memref<342x8xbf16, #tpu.memory_space<vmem>>, vector<2x8xbf16>,
    %c0_25 = arith.constant 0 : index
    %c1 = arith.constant 1 : index
    %c0_26 = arith.constant 0 : index
    %c0_27 = arith.constant 0 : index
    %19 = vector.load %arg1[%c0_25, %c1, %c0_26, %c0_27] : memref<1x16x16x8xf32, #tpu.memory_space<vmem>>, vector<1x1x16x8xf32>
    %20 = vector.shape_cast %19 : vector<1x1x16x8xf32> to vector<16x8xf32>
    %21 = arith.truncf %20 : vector<16x8xf32> to vector<16x8xbf16>
    %c37 = arith.constant 37 : index
    %c0_28 = arith.constant 0 : index
    %22 = vector.load %arg9[%c37, %c0_28] : memref<342x8xbf16, #tpu.memory_space<vmem>>, vector<16x8xbf16>
    tpu.vector_store %arg9[%c37, %c0_28], %21 {strides = array<i32>} : memref<342x8xbf16, #tpu.memory_space<vmem>>, vector<16x8xbf16>,
    %c53 = arith.constant 53 : index
    %c0_29 = arith.constant 0 : index
    %23 = vector.load %arg9[%c53, %c0_29] : memref<342x8xbf16, #tpu.memory_space<vmem>>, vector<2x8xbf16>
    tpu.vector_store %arg9[%c53, %c0_29], %6 {strides = array<i32>} : memref<342x8xbf16, #tpu.memory_space<vmem>>, vector<2x8xbf16>,
    %c0_30 = arith.constant 0 : index
    %c2 = arith.constant 2 : index
    %c0_31 = arith.constant 0 : index
    %c0_32 = arith.constant 0 : index
    %24 = vector.load %arg1[%c0_30, %c2, %c0_31, %c0_32] : memref<1x16x16x8xf32, #tpu.memory_space<vmem>>, vector<1x1x16x8xf32>
    %25 = vector.shape_cast %24 : vector<1x1x16x8xf32> to vector<16x8xf32>
    %26 = arith.truncf %25 : vector<16x8xf32> to vector<16x8xbf16>
    %c55 = arith.constant 55 : index
    %c0_33 = arith.constant 0 : index
    %27 = vector.load %arg9[%c55, %c0_33] : memref<342x8xbf16, #tpu.memory_space<vmem>>, vector<16x8xbf16>
    tpu.vector_store %arg9[%c55, %c0_33], %26 {strides = array<i32>} : memref<342x8xbf16, #tpu.memory_space<vmem>>, vector<16x8xbf16>,
    %c71 = arith.constant 71 : index
    %c0_34 = arith.constant 0 : index
    %28 = vector.load %arg9[%c71, %c0_34] : memref<342x8xbf16, #tpu.memory_space<vmem>>, vector<2x8xbf16>
    tpu.vector_store %arg9[%c71, %c0_34], %6 {strides = array<i32>} : memref<342x8xbf16, #tpu.memory_space<vmem>>, vector<2x8xbf16>,
    %c0_35 = arith.constant 0 : index
    %c3 = arith.constant 3 : index
    %c0_36 = arith.constant 0 : index
    %c0_37 = arith.constant 0 : index
    %29 = vector.load %arg1[%c0_35, %c3, %c0_36, %c0_37] : memref<1x16x16x8xf32, #tpu.memory_space<vmem>>, vector<1x1x16x8xf32>
    %30 = vector.shape_cast %29 : vector<1x1x16x8xf32> to vector<16x8xf32>
    %31 = arith.truncf %30 : vector<16x8xf32> to vector<16x8xbf16>
    %c73 = arith.constant 73 : index
    %c0_38 = arith.constant 0 : index
    %32 = vector.load %arg9[%c73, %c0_38] : memref<342x8xbf16, #tpu.memory_space<vmem>>, vector<16x8xbf16>
    tpu.vector_store %arg9[%c73, %c0_38], %31 {strides = array<i32>} : memref<342x8xbf16, #tpu.memory_space<vmem>>, vector<16x8xbf16>,
    %c89 = arith.constant 89 : index
    %c0_39 = arith.constant 0 : index
    %33 = vector.load %arg9[%c89, %c0_39] : memref<342x8xbf16, #tpu.memory_space<vmem>>, vector<2x8xbf16>
    tpu.vector_store %arg9[%c89, %c0_39], %6 {strides = array<i32>} : memref<342x8xbf16, #tpu.memory_space<vmem>>, vector<2x8xbf16>,
    %c0_40 = arith.constant 0 : index
    %c4 = arith.constant 4 : index
    %c0_41 = arith.constant 0 : index
    %c0_42 = arith.constant 0 : index
    %34 = vector.load %arg1[%c0_40, %c4, %c0_41, %c0_42] : memref<1x16x16x8xf32, #tpu.memory_space<vmem>>, vector<1x1x16x8xf32>
    %35 = vector.shape_cast %34 : vector<1x1x16x8xf32> to vector<16x8xf32>
    %36 = arith.truncf %35 : vector<16x8xf32> to vector<16x8xbf16>
    %c91 = arith.constant 91 : index
    %c0_43 = arith.constant 0 : index
    %37 = vector.load %arg9[%c91, %c0_43] : memref<342x8xbf16, #tpu.memory_space<vmem>>, vector<16x8xbf16>
    tpu.vector_store %arg9[%c91, %c0_43], %36 {strides = array<i32>} : memref<342x8xbf16, #tpu.memory_space<vmem>>, vector<16x8xbf16>,
    %c107 = arith.constant 107 : index
    %c0_44 = arith.constant 0 : index
    %38 = vector.load %arg9[%c107, %c0_44] : memref<342x8xbf16, #tpu.memory_space<vmem>>, vector<2x8xbf16>
    tpu.vector_store %arg9[%c107, %c0_44], %6 {strides = array<i32>} : memref<342x8xbf16, #tpu.memory_space<vmem>>, vector<2x8xbf16>,
    %c0_45 = arith.constant 0 : index
    %c5 = arith.constant 5 : index
    %c0_46 = arith.constant 0 : index
    %c0_47 = arith.constant 0 : index
    %39 = vector.load %arg1[%c0_45, %c5, %c0_46, %c0_47] : memref<1x16x16x8xf32, #tpu.memory_space<vmem>>, vector<1x1x16x8xf32>
    %40 = vector.shape_cast %39 : vector<1x1x16x8xf32> to vector<16x8xf32>
    %41 = arith.truncf %40 : vector<16x8xf32> to vector<16x8xbf16>
    %c109 = arith.constant 109 : index
    %c0_48 = arith.constant 0 : index
    %42 = vector.load %arg9[%c109, %c0_48] : memref<342x8xbf16, #tpu.memory_space<vmem>>, vector<16x8xbf16>
    tpu.vector_store %arg9[%c109, %c0_48], %41 {strides = array<i32>} : memref<342x8xbf16, #tpu.memory_space<vmem>>, vector<16x8xbf16>,
    %c125 = arith.constant 125 : index
    %c0_49 = arith.constant 0 : index
    %43 = vector.load %arg9[%c125, %c0_49] : memref<342x8xbf16, #tpu.memory_space<vmem>>, vector<2x8xbf16>
    tpu.vector_store %arg9[%c125, %c0_49], %6 {strides = array<i32>} : memref<342x8xbf16, #tpu.memory_space<vmem>>, vector<2x8xbf16>,
    %c0_50 = arith.constant 0 : index
    %c6 = arith.constant 6 : index
    %c0_51 = arith.constant 0 : index
    %c0_52 = arith.constant 0 : index
    %44 = vector.load %arg1[%c0_50, %c6, %c0_51, %c0_52] : memref<1x16x16x8xf32, #tpu.memory_space<vmem>>, vector<1x1x16x8xf32>
    %45 = vector.shape_cast %44 : vector<1x1x16x8xf32> to vector<16x8xf32>
    %46 = arith.truncf %45 : vector<16x8xf32> to vector<16x8xbf16>
    %c127 = arith.constant 127 : index
    %c0_53 = arith.constant 0 : index
    %47 = vector.load %arg9[%c127, %c0_53] : memref<342x8xbf16, #tpu.memory_space<vmem>>, vector<16x8xbf16>
    tpu.vector_store %arg9[%c127, %c0_53], %46 {strides = array<i32>} : memref<342x8xbf16, #tpu.memory_space<vmem>>, vector<16x8xbf16>,
    %c143 = arith.constant 143 : index
    %c0_54 = arith.constant 0 : index
    %48 = vector.load %arg9[%c143, %c0_54] : memref<342x8xbf16, #tpu.memory_space<vmem>>, vector<2x8xbf16>
    tpu.vector_store %arg9[%c143, %c0_54], %6 {strides = array<i32>} : memref<342x8xbf16, #tpu.memory_space<vmem>>, vector<2x8xbf16>,
    %c0_55 = arith.constant 0 : index
    %c7 = arith.constant 7 : index
    %c0_56 = arith.constant 0 : index
    %c0_57 = arith.constant 0 : index
    %49 = vector.load %arg1[%c0_55, %c7, %c0_56, %c0_57] : memref<1x16x16x8xf32, #tpu.memory_space<vmem>>, vector<1x1x16x8xf32>
    %50 = vector.shape_cast %49 : vector<1x1x16x8xf32> to vector<16x8xf32>
    %51 = arith.truncf %50 : vector<16x8xf32> to vector<16x8xbf16>
    %c145 = arith.constant 145 : index
    %c0_58 = arith.constant 0 : index
    %52 = vector.load %arg9[%c145, %c0_58] : memref<342x8xbf16, #tpu.memory_space<vmem>>, vector<16x8xbf16>
    tpu.vector_store %arg9[%c145, %c0_58], %51 {strides = array<i32>} : memref<342x8xbf16, #tpu.memory_space<vmem>>, vector<16x8xbf16>,
    %c161 = arith.constant 161 : index
    %c0_59 = arith.constant 0 : index
    %53 = vector.load %arg9[%c161, %c0_59] : memref<342x8xbf16, #tpu.memory_space<vmem>>, vector<2x8xbf16>
    tpu.vector_store %arg9[%c161, %c0_59], %6 {strides = array<i32>} : memref<342x8xbf16, #tpu.memory_space<vmem>>, vector<2x8xbf16>,
    %c0_60 = arith.constant 0 : index
    %c8 = arith.constant 8 : index
    %c0_61 = arith.constant 0 : index
    %c0_62 = arith.constant 0 : index
    %54 = vector.load %arg1[%c0_60, %c8, %c0_61, %c0_62] : memref<1x16x16x8xf32, #tpu.memory_space<vmem>>, vector<1x1x16x8xf32>
    %55 = vector.shape_cast %54 : vector<1x1x16x8xf32> to vector<16x8xf32>
    %56 = arith.truncf %55 : vector<16x8xf32> to vector<16x8xbf16>
    %c163 = arith.constant 163 : index
    %c0_63 = arith.constant 0 : index
    %57 = vector.load %arg9[%c163, %c0_63] : memref<342x8xbf16, #tpu.memory_space<vmem>>, vector<16x8xbf16>
    tpu.vector_store %arg9[%c163, %c0_63], %56 {strides = array<i32>} : memref<342x8xbf16, #tpu.memory_space<vmem>>, vector<16x8xbf16>,
    %c179 = arith.constant 179 : index
    %c0_64 = arith.constant 0 : index
    %58 = vector.load %arg9[%c179, %c0_64] : memref<342x8xbf16, #tpu.memory_space<vmem>>, vector<2x8xbf16>
    tpu.vector_store %arg9[%c179, %c0_64], %6 {strides = array<i32>} : memref<342x8xbf16, #tpu.memory_space<vmem>>, vector<2x8xbf16>,
    %c0_65 = arith.constant 0 : index
    %c9 = arith.constant 9 : index
    %c0_66 = arith.constant 0 : index
    %c0_67 = arith.constant 0 : index
    %59 = vector.load %arg1[%c0_65, %c9, %c0_66, %c0_67] : memref<1x16x16x8xf32, #tpu.memory_space<vmem>>, vector<1x1x16x8xf32>
    %60 = vector.shape_cast %59 : vector<1x1x16x8xf32> to vector<16x8xf32>
    %61 = arith.truncf %60 : vector<16x8xf32> to vector<16x8xbf16>
    %c181 = arith.constant 181 : index
    %c0_68 = arith.constant 0 : index
    %62 = vector.load %arg9[%c181, %c0_68] : memref<342x8xbf16, #tpu.memory_space<vmem>>, vector<16x8xbf16>
    tpu.vector_store %arg9[%c181, %c0_68], %61 {strides = array<i32>} : memref<342x8xbf16, #tpu.memory_space<vmem>>, vector<16x8xbf16>,
    %c197 = arith.constant 197 : index
    %c0_69 = arith.constant 0 : index
    %63 = vector.load %arg9[%c197, %c0_69] : memref<342x8xbf16, #tpu.memory_space<vmem>>, vector<2x8xbf16>
    tpu.vector_store %arg9[%c197, %c0_69], %6 {strides = array<i32>} : memref<342x8xbf16, #tpu.memory_space<vmem>>, vector<2x8xbf16>,
    %c0_70 = arith.constant 0 : index
    %c10 = arith.constant 10 : index
    %c0_71 = arith.constant 0 : index
    %c0_72 = arith.constant 0 : index
    %64 = vector.load %arg1[%c0_70, %c10, %c0_71, %c0_72] : memref<1x16x16x8xf32, #tpu.memory_space<vmem>>, vector<1x1x16x8xf32>
    %65 = vector.shape_cast %64 : vector<1x1x16x8xf32> to vector<16x8xf32>
    %66 = arith.truncf %65 : vector<16x8xf32> to vector<16x8xbf16>
    %c199 = arith.constant 199 : index
    %c0_73 = arith.constant 0 : index
    %67 = vector.load %arg9[%c199, %c0_73] : memref<342x8xbf16, #tpu.memory_space<vmem>>, vector<16x8xbf16>
    tpu.vector_store %arg9[%c199, %c0_73], %66 {strides = array<i32>} : memref<342x8xbf16, #tpu.memory_space<vmem>>, vector<16x8xbf16>,
    %c215 = arith.constant 215 : index
    %c0_74 = arith.constant 0 : index
    %68 = vector.load %arg9[%c215, %c0_74] : memref<342x8xbf16, #tpu.memory_space<vmem>>, vector<2x8xbf16>
    tpu.vector_store %arg9[%c215, %c0_74], %6 {strides = array<i32>} : memref<342x8xbf16, #tpu.memory_space<vmem>>, vector<2x8xbf16>,
    %c0_75 = arith.constant 0 : index
    %c11 = arith.constant 11 : index
    %c0_76 = arith.constant 0 : index
    %c0_77 = arith.constant 0 : index
    %69 = vector.load %arg1[%c0_75, %c11, %c0_76, %c0_77] : memref<1x16x16x8xf32, #tpu.memory_space<vmem>>, vector<1x1x16x8xf32>
    %70 = vector.shape_cast %69 : vector<1x1x16x8xf32> to vector<16x8xf32>
    %71 = arith.truncf %70 : vector<16x8xf32> to vector<16x8xbf16>
    %c217 = arith.constant 217 : index
    %c0_78 = arith.constant 0 : index
    %72 = vector.load %arg9[%c217, %c0_78] : memref<342x8xbf16, #tpu.memory_space<vmem>>, vector<16x8xbf16>
    tpu.vector_store %arg9[%c217, %c0_78], %71 {strides = array<i32>} : memref<342x8xbf16, #tpu.memory_space<vmem>>, vector<16x8xbf16>,
    %c233 = arith.constant 233 : index
    %c0_79 = arith.constant 0 : index
    %73 = vector.load %arg9[%c233, %c0_79] : memref<342x8xbf16, #tpu.memory_space<vmem>>, vector<2x8xbf16>
    tpu.vector_store %arg9[%c233, %c0_79], %6 {strides = array<i32>} : memref<342x8xbf16, #tpu.memory_space<vmem>>, vector<2x8xbf16>,
    %c0_80 = arith.constant 0 : index
    %c12 = arith.constant 12 : index
    %c0_81 = arith.constant 0 : index
    %c0_82 = arith.constant 0 : index
    %74 = vector.load %arg1[%c0_80, %c12, %c0_81, %c0_82] : memref<1x16x16x8xf32, #tpu.memory_space<vmem>>, vector<1x1x16x8xf32>
    %75 = vector.shape_cast %74 : vector<1x1x16x8xf32> to vector<16x8xf32>
    %76 = arith.truncf %75 : vector<16x8xf32> to vector<16x8xbf16>
    %c235 = arith.constant 235 : index
    %c0_83 = arith.constant 0 : index
    %77 = vector.load %arg9[%c235, %c0_83] : memref<342x8xbf16, #tpu.memory_space<vmem>>, vector<16x8xbf16>
    tpu.vector_store %arg9[%c235, %c0_83], %76 {strides = array<i32>} : memref<342x8xbf16, #tpu.memory_space<vmem>>, vector<16x8xbf16>,
    %c251 = arith.constant 251 : index
    %c0_84 = arith.constant 0 : index
    %78 = vector.load %arg9[%c251, %c0_84] : memref<342x8xbf16, #tpu.memory_space<vmem>>, vector<2x8xbf16>
    tpu.vector_store %arg9[%c251, %c0_84], %6 {strides = array<i32>} : memref<342x8xbf16, #tpu.memory_space<vmem>>, vector<2x8xbf16>,
    %c0_85 = arith.constant 0 : index
    %c13 = arith.constant 13 : index
    %c0_86 = arith.constant 0 : index
    %c0_87 = arith.constant 0 : index
    %79 = vector.load %arg1[%c0_85, %c13, %c0_86, %c0_87] : memref<1x16x16x8xf32, #tpu.memory_space<vmem>>, vector<1x1x16x8xf32>
    %80 = vector.shape_cast %79 : vector<1x1x16x8xf32> to vector<16x8xf32>
    %81 = arith.truncf %80 : vector<16x8xf32> to vector<16x8xbf16>
    %c253 = arith.constant 253 : index
    %c0_88 = arith.constant 0 : index
    %82 = vector.load %arg9[%c253, %c0_88] : memref<342x8xbf16, #tpu.memory_space<vmem>>, vector<16x8xbf16>
    tpu.vector_store %arg9[%c253, %c0_88], %81 {strides = array<i32>} : memref<342x8xbf16, #tpu.memory_space<vmem>>, vector<16x8xbf16>,
    %c269 = arith.constant 269 : index
    %c0_89 = arith.constant 0 : index
    %83 = vector.load %arg9[%c269, %c0_89] : memref<342x8xbf16, #tpu.memory_space<vmem>>, vector<2x8xbf16>
    tpu.vector_store %arg9[%c269, %c0_89], %6 {strides = array<i32>} : memref<342x8xbf16, #tpu.memory_space<vmem>>, vector<2x8xbf16>,
    %c0_90 = arith.constant 0 : index
    %c14 = arith.constant 14 : index
    %c0_91 = arith.constant 0 : index
    %c0_92 = arith.constant 0 : index
    %84 = vector.load %arg1[%c0_90, %c14, %c0_91, %c0_92] : memref<1x16x16x8xf32, #tpu.memory_space<vmem>>, vector<1x1x16x8xf32>
    %85 = vector.shape_cast %84 : vector<1x1x16x8xf32> to vector<16x8xf32>
    %86 = arith.truncf %85 : vector<16x8xf32> to vector<16x8xbf16>
    %c271 = arith.constant 271 : index
    %c0_93 = arith.constant 0 : index
    %87 = vector.load %arg9[%c271, %c0_93] : memref<342x8xbf16, #tpu.memory_space<vmem>>, vector<16x8xbf16>
    tpu.vector_store %arg9[%c271, %c0_93], %86 {strides = array<i32>} : memref<342x8xbf16, #tpu.memory_space<vmem>>, vector<16x8xbf16>,
    %c287 = arith.constant 287 : index
    %c0_94 = arith.constant 0 : index
    %88 = vector.load %arg9[%c287, %c0_94] : memref<342x8xbf16, #tpu.memory_space<vmem>>, vector<2x8xbf16>
    tpu.vector_store %arg9[%c287, %c0_94], %6 {strides = array<i32>} : memref<342x8xbf16, #tpu.memory_space<vmem>>, vector<2x8xbf16>,
    %c0_95 = arith.constant 0 : index
    %c15 = arith.constant 15 : index
    %c0_96 = arith.constant 0 : index
    %c0_97 = arith.constant 0 : index
    %89 = vector.load %arg1[%c0_95, %c15, %c0_96, %c0_97] : memref<1x16x16x8xf32, #tpu.memory_space<vmem>>, vector<1x1x16x8xf32>
    %90 = vector.shape_cast %89 : vector<1x1x16x8xf32> to vector<16x8xf32>
    %91 = arith.truncf %90 : vector<16x8xf32> to vector<16x8xbf16>
    %c289 = arith.constant 289 : index
    %c0_98 = arith.constant 0 : index
    %92 = vector.load %arg9[%c289, %c0_98] : memref<342x8xbf16, #tpu.memory_space<vmem>>, vector<16x8xbf16>
    tpu.vector_store %arg9[%c289, %c0_98], %91 {strides = array<i32>} : memref<342x8xbf16, #tpu.memory_space<vmem>>, vector<16x8xbf16>,
    %c305 = arith.constant 305 : index
    %c0_99 = arith.constant 0 : index
    %93 = vector.load %arg9[%c305, %c0_99] : memref<342x8xbf16, #tpu.memory_space<vmem>>, vector<2x8xbf16>
    tpu.vector_store %arg9[%c305, %c0_99], %6 {strides = array<i32>} : memref<342x8xbf16, #tpu.memory_space<vmem>>, vector<2x8xbf16>,
    %c0_100 = arith.constant 0 : index
    %c0_101 = arith.constant 0 : index
    %94 = vector.load %arg9[%c0_100, %c0_101] : memref<342x8xbf16, #tpu.memory_space<vmem>>, vector<72x8xbf16>
    %c0_102 = arith.constant 0 : index
    %c0_103 = arith.constant 0 : index
    %c0_104 = arith.constant 0 : index
    %95 = vector.load %arg2[%c0_102, %c0_103, %c0_104] : memref<9x8x8xbf16, #tpu.memory_space<vmem>>, vector<1x8x8xbf16>
    %96 = vector.shape_cast %95 : vector<1x8x8xbf16> to vector<8x8xbf16>
    %cst_105 = arith.constant dense<0.000000e+00> : vector<72x8xf32>
    %97 = tpu.matmul %94, %96, %cst_105 {dimension_numbers = #tpu.dot_dimension_numbers<[1], [0], [0], [1], [0, 0, 1, 1], [], []>} : vector<72x8xbf16>, vector<8x8xbf16>, vector<72x8xf32> -> vector<72x8xf32>
    %c1_106 = arith.constant 1 : index
    %c0_107 = arith.constant 0 : index
    %98 = vector.load %arg9[%c1_106, %c0_107] : memref<342x8xbf16, #tpu.memory_space<vmem>>, vector<72x8xbf16>
    %c1_108 = arith.constant 1 : index
    %c0_109 = arith.constant 0 : index
    %c0_110 = arith.constant 0 : index
    %99 = vector.load %arg2[%c1_108, %c0_109, %c0_110] : memref<9x8x8xbf16, #tpu.memory_space<vmem>>, vector<1x8x8xbf16>
    %100 = vector.shape_cast %99 : vector<1x8x8xbf16> to vector<8x8xbf16>
    %cst_111 = arith.constant dense<0.000000e+00> : vector<72x8xf32>
    %101 = tpu.matmul %98, %100, %cst_111 {dimension_numbers = #tpu.dot_dimension_numbers<[1], [0], [0], [1], [0, 0, 1, 1], [], []>} : vector<72x8xbf16>, vector<8x8xbf16>, vector<72x8xf32> -> vector<72x8xf32>
    %102 = arith.addf %97, %101 : vector<72x8xf32>
    %c2_112 = arith.constant 2 : index
    %c0_113 = arith.constant 0 : index
    %103 = vector.load %arg9[%c2_112, %c0_113] : memref<342x8xbf16, #tpu.memory_space<vmem>>, vector<72x8xbf16>
    %c2_114 = arith.constant 2 : index
    %c0_115 = arith.constant 0 : index
    %c0_116 = arith.constant 0 : index
    %104 = vector.load %arg2[%c2_114, %c0_115, %c0_116] : memref<9x8x8xbf16, #tpu.memory_space<vmem>>, vector<1x8x8xbf16>
    %105 = vector.shape_cast %104 : vector<1x8x8xbf16> to vector<8x8xbf16>
    %cst_117 = arith.constant dense<0.000000e+00> : vector<72x8xf32>
    %106 = tpu.matmul %103, %105, %cst_117 {dimension_numbers = #tpu.dot_dimension_numbers<[1], [0], [0], [1], [0, 0, 1, 1], [], []>} : vector<72x8xbf16>, vector<8x8xbf16>, vector<72x8xf32> -> vector<72x8xf32>
    %107 = arith.addf %102, %106 : vector<72x8xf32>
    %c18 = arith.constant 18 : index
    %c0_118 = arith.constant 0 : index
    %108 = vector.load %arg9[%c18, %c0_118] : memref<342x8xbf16, #tpu.memory_space<vmem>>, vector<72x8xbf16>
    %c3_119 = arith.constant 3 : index
    %c0_120 = arith.constant 0 : index
    %c0_121 = arith.constant 0 : index
    %109 = vector.load %arg2[%c3_119, %c0_120, %c0_121] : memref<9x8x8xbf16, #tpu.memory_space<vmem>>, vector<1x8x8xbf16>
    %110 = vector.shape_cast %109 : vector<1x8x8xbf16> to vector<8x8xbf16>
    %cst_122 = arith.constant dense<0.000000e+00> : vector<72x8xf32>
    %111 = tpu.matmul %108, %110, %cst_122 {dimension_numbers = #tpu.dot_dimension_numbers<[1], [0], [0], [1], [0, 0, 1, 1], [], []>} : vector<72x8xbf16>, vector<8x8xbf16>, vector<72x8xf32> -> vector<72x8xf32>
    %112 = arith.addf %107, %111 : vector<72x8xf32>
    %c19_123 = arith.constant 19 : index
    %c0_124 = arith.constant 0 : index
    %113 = vector.load %arg9[%c19_123, %c0_124] : memref<342x8xbf16, #tpu.memory_space<vmem>>, vector<72x8xbf16>
    %c4_125 = arith.constant 4 : index
    %c0_126 = arith.constant 0 : index
    %c0_127 = arith.constant 0 : index
    %114 = vector.load %arg2[%c4_125, %c0_126, %c0_127] : memref<9x8x8xbf16, #tpu.memory_space<vmem>>, vector<1x8x8xbf16>
    %115 = vector.shape_cast %114 : vector<1x8x8xbf16> to vector<8x8xbf16>
    %cst_128 = arith.constant dense<0.000000e+00> : vector<72x8xf32>
    %116 = tpu.matmul %113, %115, %cst_128 {dimension_numbers = #tpu.dot_dimension_numbers<[1], [0], [0], [1], [0, 0, 1, 1], [], []>} : vector<72x8xbf16>, vector<8x8xbf16>, vector<72x8xf32> -> vector<72x8xf32>
    %117 = arith.addf %112, %116 : vector<72x8xf32>
    %c20 = arith.constant 20 : index
    %c0_129 = arith.constant 0 : index
    %118 = vector.load %arg9[%c20, %c0_129] : memref<342x8xbf16, #tpu.memory_space<vmem>>, vector<72x8xbf16>
    %c5_130 = arith.constant 5 : index
    %c0_131 = arith.constant 0 : index
    %c0_132 = arith.constant 0 : index
    %119 = vector.load %arg2[%c5_130, %c0_131, %c0_132] : memref<9x8x8xbf16, #tpu.memory_space<vmem>>, vector<1x8x8xbf16>
    %120 = vector.shape_cast %119 : vector<1x8x8xbf16> to vector<8x8xbf16>
    %cst_133 = arith.constant dense<0.000000e+00> : vector<72x8xf32>
    %121 = tpu.matmul %118, %120, %cst_133 {dimension_numbers = #tpu.dot_dimension_numbers<[1], [0], [0], [1], [0, 0, 1, 1], [], []>} : vector<72x8xbf16>, vector<8x8xbf16>, vector<72x8xf32> -> vector<72x8xf32>
    %122 = arith.addf %117, %121 : vector<72x8xf32>
    %c36 = arith.constant 36 : index
    %c0_134 = arith.constant 0 : index
    %123 = vector.load %arg9[%c36, %c0_134] : memref<342x8xbf16, #tpu.memory_space<vmem>>, vector<72x8xbf16>
    %c6_135 = arith.constant 6 : index
    %c0_136 = arith.constant 0 : index
    %c0_137 = arith.constant 0 : index
    %124 = vector.load %arg2[%c6_135, %c0_136, %c0_137] : memref<9x8x8xbf16, #tpu.memory_space<vmem>>, vector<1x8x8xbf16>
    %125 = vector.shape_cast %124 : vector<1x8x8xbf16> to vector<8x8xbf16>
    %cst_138 = arith.constant dense<0.000000e+00> : vector<72x8xf32>
    %126 = tpu.matmul %123, %125, %cst_138 {dimension_numbers = #tpu.dot_dimension_numbers<[1], [0], [0], [1], [0, 0, 1, 1], [], []>} : vector<72x8xbf16>, vector<8x8xbf16>, vector<72x8xf32> -> vector<72x8xf32>
    %127 = arith.addf %122, %126 : vector<72x8xf32>
    %c37_139 = arith.constant 37 : index
    %c0_140 = arith.constant 0 : index
    %128 = vector.load %arg9[%c37_139, %c0_140] : memref<342x8xbf16, #tpu.memory_space<vmem>>, vector<72x8xbf16>
    %c7_141 = arith.constant 7 : index
    %c0_142 = arith.constant 0 : index
    %c0_143 = arith.constant 0 : index
    %129 = vector.load %arg2[%c7_141, %c0_142, %c0_143] : memref<9x8x8xbf16, #tpu.memory_space<vmem>>, vector<1x8x8xbf16>
    %130 = vector.shape_cast %129 : vector<1x8x8xbf16> to vector<8x8xbf16>
    %cst_144 = arith.constant dense<0.000000e+00> : vector<72x8xf32>
    %131 = tpu.matmul %128, %130, %cst_144 {dimension_numbers = #tpu.dot_dimension_numbers<[1], [0], [0], [1], [0, 0, 1, 1], [], []>} : vector<72x8xbf16>, vector<8x8xbf16>, vector<72x8xf32> -> vector<72x8xf32>
    %132 = arith.addf %127, %131 : vector<72x8xf32>
    %c38 = arith.constant 38 : index
    %c0_145 = arith.constant 0 : index
    %133 = vector.load %arg9[%c38, %c0_145] : memref<342x8xbf16, #tpu.memory_space<vmem>>, vector<72x8xbf16>
    %c8_146 = arith.constant 8 : index
    %c0_147 = arith.constant 0 : index
    %c0_148 = arith.constant 0 : index
    %134 = vector.load %arg2[%c8_146, %c0_147, %c0_148] : memref<9x8x8xbf16, #tpu.memory_space<vmem>>, vector<1x8x8xbf16>
    %135 = vector.shape_cast %134 : vector<1x8x8xbf16> to vector<8x8xbf16>
    %cst_149 = arith.constant dense<0.000000e+00> : vector<72x8xf32>
    %136 = tpu.matmul %133, %135, %cst_149 {dimension_numbers = #tpu.dot_dimension_numbers<[1], [0], [0], [1], [0, 0, 1, 1], [], []>} : vector<72x8xbf16>, vector<8x8xbf16>, vector<72x8xf32> -> vector<72x8xf32>
    %137 = arith.addf %132, %136 : vector<72x8xf32>
    %138 = vector.broadcast %0 : vector<1x8xf32> to vector<72x8xf32>
    %139 = arith.mulf %137, %138 : vector<72x8xf32>
    %140 = vector.broadcast %1 : vector<1x8xf32> to vector<72x8xf32>
    %141 = arith.addf %139, %140 : vector<72x8xf32>
    %cst_150 = arith.constant 0.000000e+00 : f32
    %142 = vector.broadcast %cst_150 : f32 to vector<72x8xf32>
    %143 = arith.maximumf %141, %142 : vector<72x8xf32>
    %144 = vector.extract_strided_slice %143 {offsets = [0, 0], sizes = [16, 8], strides = [1, 1]} : vector<72x8xf32> to vector<16x8xf32>
    %145 = arith.truncf %144 : vector<16x8xf32> to vector<16x8xbf16>
    %c19_151 = arith.constant 19 : index
    %c0_152 = arith.constant 0 : index
    %146 = vector.load %arg10[%c19_151, %c0_152] : memref<342x8xbf16, #tpu.memory_space<vmem>>, vector<16x8xbf16>
    tpu.vector_store %arg10[%c19_151, %c0_152], %145 {strides = array<i32>} : memref<342x8xbf16, #tpu.memory_space<vmem>>, vector<16x8xbf16>,
    %c35_153 = arith.constant 35 : index
    %c0_154 = arith.constant 0 : index
    %147 = vector.load %arg10[%c35_153, %c0_154] : memref<342x8xbf16, #tpu.memory_space<vmem>>, vector<2x8xbf16>
    tpu.vector_store %arg10[%c35_153, %c0_154], %9 {strides = array<i32>} : memref<342x8xbf16, #tpu.memory_space<vmem>>, vector<2x8xbf16>,
    %148 = vector.extract_strided_slice %143 {offsets = [18, 0], sizes = [16, 8], strides = [1, 1]} : vector<72x8xf32> to vector<16x8xf32>
    %149 = arith.truncf %148 : vector<16x8xf32> to vector<16x8xbf16>
    %c37_155 = arith.constant 37 : index
    %c0_156 = arith.constant 0 : index
    %150 = vector.load %arg10[%c37_155, %c0_156] : memref<342x8xbf16, #tpu.memory_space<vmem>>, vector<16x8xbf16>
    tpu.vector_store %arg10[%c37_155, %c0_156], %149 {strides = array<i32>} : memref<342x8xbf16, #tpu.memory_space<vmem>>, vector<16x8xbf16>,
    %c53_157 = arith.constant 53 : index
    %c0_158 = arith.constant 0 : index
    %151 = vector.load %arg10[%c53_157, %c0_158] : memref<342x8xbf16, #tpu.memory_space<vmem>>, vector<2x8xbf16>
    tpu.vector_store %arg10[%c53_157, %c0_158], %9 {strides = array<i32>} : memref<342x8xbf16, #tpu.memory_space<vmem>>, vector<2x8xbf16>,
    %152 = vector.extract_strided_slice %143 {offsets = [36, 0], sizes = [16, 8], strides = [1, 1]} : vector<72x8xf32> to vector<16x8xf32>
    %153 = arith.truncf %152 : vector<16x8xf32> to vector<16x8xbf16>
    %c55_159 = arith.constant 55 : index
    %c0_160 = arith.constant 0 : index
    %154 = vector.load %arg10[%c55_159, %c0_160] : memref<342x8xbf16, #tpu.memory_space<vmem>>, vector<16x8xbf16>
    tpu.vector_store %arg10[%c55_159, %c0_160], %153 {strides = array<i32>} : memref<342x8xbf16, #tpu.memory_space<vmem>>, vector<16x8xbf16>,
    %c71_161 = arith.constant 71 : index
    %c0_162 = arith.constant 0 : index
    %155 = vector.load %arg10[%c71_161, %c0_162] : memref<342x8xbf16, #tpu.memory_space<vmem>>, vector<2x8xbf16>
    tpu.vector_store %arg10[%c71_161, %c0_162], %9 {strides = array<i32>} : memref<342x8xbf16, #tpu.memory_space<vmem>>, vector<2x8xbf16>,
    %156 = vector.extract_strided_slice %143 {offsets = [54, 0], sizes = [16, 8], strides = [1, 1]} : vector<72x8xf32> to vector<16x8xf32>
    %157 = arith.truncf %156 : vector<16x8xf32> to vector<16x8xbf16>
    %c73_163 = arith.constant 73 : index
    %c0_164 = arith.constant 0 : index
    %158 = vector.load %arg10[%c73_163, %c0_164] : memref<342x8xbf16, #tpu.memory_space<vmem>>, vector<16x8xbf16>
    tpu.vector_store %arg10[%c73_163, %c0_164], %157 {strides = array<i32>} : memref<342x8xbf16, #tpu.memory_space<vmem>>, vector<16x8xbf16>,
    %c89_165 = arith.constant 89 : index
    %c0_166 = arith.constant 0 : index
    %159 = vector.load %arg10[%c89_165, %c0_166] : memref<342x8xbf16, #tpu.memory_space<vmem>>, vector<2x8xbf16>
    tpu.vector_store %arg10[%c89_165, %c0_166], %9 {strides = array<i32>} : memref<342x8xbf16, #tpu.memory_space<vmem>>, vector<2x8xbf16>,
    %c72 = arith.constant 72 : index
    %c0_167 = arith.constant 0 : index
    %160 = vector.load %arg9[%c72, %c0_167] : memref<342x8xbf16, #tpu.memory_space<vmem>>, vector<72x8xbf16>
    %c0_168 = arith.constant 0 : index
    %c0_169 = arith.constant 0 : index
    %c0_170 = arith.constant 0 : index
    %161 = vector.load %arg2[%c0_168, %c0_169, %c0_170] : memref<9x8x8xbf16, #tpu.memory_space<vmem>>, vector<1x8x8xbf16>
    %162 = vector.shape_cast %161 : vector<1x8x8xbf16> to vector<8x8xbf16>
    %cst_171 = arith.constant dense<0.000000e+00> : vector<72x8xf32>
    %163 = tpu.matmul %160, %162, %cst_171 {dimension_numbers = #tpu.dot_dimension_numbers<[1], [0], [0], [1], [0, 0, 1, 1], [], []>} : vector<72x8xbf16>, vector<8x8xbf16>, vector<72x8xf32> -> vector<72x8xf32>
    %c73_172 = arith.constant 73 : index
    %c0_173 = arith.constant 0 : index
    %164 = vector.load %arg9[%c73_172, %c0_173] : memref<342x8xbf16, #tpu.memory_space<vmem>>, vector<72x8xbf16>
    %c1_174 = arith.constant 1 : index
    %c0_175 = arith.constant 0 : index
    %c0_176 = arith.constant 0 : index
    %165 = vector.load %arg2[%c1_174, %c0_175, %c0_176] : memref<9x8x8xbf16, #tpu.memory_space<vmem>>, vector<1x8x8xbf16>
    %166 = vector.shape_cast %165 : vector<1x8x8xbf16> to vector<8x8xbf16>
    %cst_177 = arith.constant dense<0.000000e+00> : vector<72x8xf32>
    %167 = tpu.matmul %164, %166, %cst_177 {dimension_numbers = #tpu.dot_dimension_numbers<[1], [0], [0], [1], [0, 0, 1, 1], [], []>} : vector<72x8xbf16>, vector<8x8xbf16>, vector<72x8xf32> -> vector<72x8xf32>
    %168 = arith.addf %163, %167 : vector<72x8xf32>
    %c74 = arith.constant 74 : index
    %c0_178 = arith.constant 0 : index
    %169 = vector.load %arg9[%c74, %c0_178] : memref<342x8xbf16, #tpu.memory_space<vmem>>, vector<72x8xbf16>
    %c2_179 = arith.constant 2 : index
    %c0_180 = arith.constant 0 : index
    %c0_181 = arith.constant 0 : index
    %170 = vector.load %arg2[%c2_179, %c0_180, %c0_181] : memref<9x8x8xbf16, #tpu.memory_space<vmem>>, vector<1x8x8xbf16>
    %171 = vector.shape_cast %170 : vector<1x8x8xbf16> to vector<8x8xbf16>
    %cst_182 = arith.constant dense<0.000000e+00> : vector<72x8xf32>
    %172 = tpu.matmul %169, %171, %cst_182 {dimension_numbers = #tpu.dot_dimension_numbers<[1], [0], [0], [1], [0, 0, 1, 1], [], []>} : vector<72x8xbf16>, vector<8x8xbf16>, vector<72x8xf32> -> vector<72x8xf32>
    %173 = arith.addf %168, %172 : vector<72x8xf32>
    %c90 = arith.constant 90 : index
    %c0_183 = arith.constant 0 : index
    %174 = vector.load %arg9[%c90, %c0_183] : memref<342x8xbf16, #tpu.memory_space<vmem>>, vector<72x8xbf16>
    %c3_184 = arith.constant 3 : index
    %c0_185 = arith.constant 0 : index
    %c0_186 = arith.constant 0 : index
    %175 = vector.load %arg2[%c3_184, %c0_185, %c0_186] : memref<9x8x8xbf16, #tpu.memory_space<vmem>>, vector<1x8x8xbf16>
    %176 = vector.shape_cast %175 : vector<1x8x8xbf16> to vector<8x8xbf16>
    %cst_187 = arith.constant dense<0.000000e+00> : vector<72x8xf32>
    %177 = tpu.matmul %174, %176, %cst_187 {dimension_numbers = #tpu.dot_dimension_numbers<[1], [0], [0], [1], [0, 0, 1, 1], [], []>} : vector<72x8xbf16>, vector<8x8xbf16>, vector<72x8xf32> -> vector<72x8xf32>
    %178 = arith.addf %173, %177 : vector<72x8xf32>
    %c91_188 = arith.constant 91 : index
    %c0_189 = arith.constant 0 : index
    %179 = vector.load %arg9[%c91_188, %c0_189] : memref<342x8xbf16, #tpu.memory_space<vmem>>, vector<72x8xbf16>
    %c4_190 = arith.constant 4 : index
    %c0_191 = arith.constant 0 : index
    %c0_192 = arith.constant 0 : index
    %180 = vector.load %arg2[%c4_190, %c0_191, %c0_192] : memref<9x8x8xbf16, #tpu.memory_space<vmem>>, vector<1x8x8xbf16>
    %181 = vector.shape_cast %180 : vector<1x8x8xbf16> to vector<8x8xbf16>
    %cst_193 = arith.constant dense<0.000000e+00> : vector<72x8xf32>
    %182 = tpu.matmul %179, %181, %cst_193 {dimension_numbers = #tpu.dot_dimension_numbers<[1], [0], [0], [1], [0, 0, 1, 1], [], []>} : vector<72x8xbf16>, vector<8x8xbf16>, vector<72x8xf32> -> vector<72x8xf32>
    %183 = arith.addf %178, %182 : vector<72x8xf32>
    %c92 = arith.constant 92 : index
    %c0_194 = arith.constant 0 : index
    %184 = vector.load %arg9[%c92, %c0_194] : memref<342x8xbf16, #tpu.memory_space<vmem>>, vector<72x8xbf16>
    %c5_195 = arith.constant 5 : index
    %c0_196 = arith.constant 0 : index
    %c0_197 = arith.constant 0 : index
    %185 = vector.load %arg2[%c5_195, %c0_196, %c0_197] : memref<9x8x8xbf16, #tpu.memory_space<vmem>>, vector<1x8x8xbf16>
    %186 = vector.shape_cast %185 : vector<1x8x8xbf16> to vector<8x8xbf16>
    %cst_198 = arith.constant dense<0.000000e+00> : vector<72x8xf32>
    %187 = tpu.matmul %184, %186, %cst_198 {dimension_numbers = #tpu.dot_dimension_numbers<[1], [0], [0], [1], [0, 0, 1, 1], [], []>} : vector<72x8xbf16>, vector<8x8xbf16>, vector<72x8xf32> -> vector<72x8xf32>
    %188 = arith.addf %183, %187 : vector<72x8xf32>
    %c108 = arith.constant 108 : index
    %c0_199 = arith.constant 0 : index
    %189 = vector.load %arg9[%c108, %c0_199] : memref<342x8xbf16, #tpu.memory_space<vmem>>, vector<72x8xbf16>
    %c6_200 = arith.constant 6 : index
    %c0_201 = arith.constant 0 : index
    %c0_202 = arith.constant 0 : index
    %190 = vector.load %arg2[%c6_200, %c0_201, %c0_202] : memref<9x8x8xbf16, #tpu.memory_space<vmem>>, vector<1x8x8xbf16>
    %191 = vector.shape_cast %190 : vector<1x8x8xbf16> to vector<8x8xbf16>
    %cst_203 = arith.constant dense<0.000000e+00> : vector<72x8xf32>
    %192 = tpu.matmul %189, %191, %cst_203 {dimension_numbers = #tpu.dot_dimension_numbers<[1], [0], [0], [1], [0, 0, 1, 1], [], []>} : vector<72x8xbf16>, vector<8x8xbf16>, vector<72x8xf32> -> vector<72x8xf32>
    %193 = arith.addf %188, %192 : vector<72x8xf32>
    %c109_204 = arith.constant 109 : index
    %c0_205 = arith.constant 0 : index
    %194 = vector.load %arg9[%c109_204, %c0_205] : memref<342x8xbf16, #tpu.memory_space<vmem>>, vector<72x8xbf16>
    %c7_206 = arith.constant 7 : index
    %c0_207 = arith.constant 0 : index
    %c0_208 = arith.constant 0 : index
    %195 = vector.load %arg2[%c7_206, %c0_207, %c0_208] : memref<9x8x8xbf16, #tpu.memory_space<vmem>>, vector<1x8x8xbf16>
    %196 = vector.shape_cast %195 : vector<1x8x8xbf16> to vector<8x8xbf16>
    %cst_209 = arith.constant dense<0.000000e+00> : vector<72x8xf32>
    %197 = tpu.matmul %194, %196, %cst_209 {dimension_numbers = #tpu.dot_dimension_numbers<[1], [0], [0], [1], [0, 0, 1, 1], [], []>} : vector<72x8xbf16>, vector<8x8xbf16>, vector<72x8xf32> -> vector<72x8xf32>
    %198 = arith.addf %193, %197 : vector<72x8xf32>
    %c110 = arith.constant 110 : index
    %c0_210 = arith.constant 0 : index
    %199 = vector.load %arg9[%c110, %c0_210] : memref<342x8xbf16, #tpu.memory_space<vmem>>, vector<72x8xbf16>
    %c8_211 = arith.constant 8 : index
    %c0_212 = arith.constant 0 : index
    %c0_213 = arith.constant 0 : index
    %200 = vector.load %arg2[%c8_211, %c0_212, %c0_213] : memref<9x8x8xbf16, #tpu.memory_space<vmem>>, vector<1x8x8xbf16>
    %201 = vector.shape_cast %200 : vector<1x8x8xbf16> to vector<8x8xbf16>
    %cst_214 = arith.constant dense<0.000000e+00> : vector<72x8xf32>
    %202 = tpu.matmul %199, %201, %cst_214 {dimension_numbers = #tpu.dot_dimension_numbers<[1], [0], [0], [1], [0, 0, 1, 1], [], []>} : vector<72x8xbf16>, vector<8x8xbf16>, vector<72x8xf32> -> vector<72x8xf32>
    %203 = arith.addf %198, %202 : vector<72x8xf32>
    %204 = vector.broadcast %0 : vector<1x8xf32> to vector<72x8xf32>
    %205 = arith.mulf %203, %204 : vector<72x8xf32>
    %206 = vector.broadcast %1 : vector<1x8xf32> to vector<72x8xf32>
    %207 = arith.addf %205, %206 : vector<72x8xf32>
    %cst_215 = arith.constant 0.000000e+00 : f32
    %208 = vector.broadcast %cst_215 : f32 to vector<72x8xf32>
    %209 = arith.maximumf %207, %208 : vector<72x8xf32>
    %210 = vector.extract_strided_slice %209 {offsets = [0, 0], sizes = [16, 8], strides = [1, 1]} : vector<72x8xf32> to vector<16x8xf32>
    %211 = arith.truncf %210 : vector<16x8xf32> to vector<16x8xbf16>
    %c91_216 = arith.constant 91 : index
    %c0_217 = arith.constant 0 : index
    %212 = vector.load %arg10[%c91_216, %c0_217] : memref<342x8xbf16, #tpu.memory_space<vmem>>, vector<16x8xbf16>
    tpu.vector_store %arg10[%c91_216, %c0_217], %211 {strides = array<i32>} : memref<342x8xbf16, #tpu.memory_space<vmem>>, vector<16x8xbf16>,
    %c107_218 = arith.constant 107 : index
    %c0_219 = arith.constant 0 : index
    %213 = vector.load %arg10[%c107_218, %c0_219] : memref<342x8xbf16, #tpu.memory_space<vmem>>, vector<2x8xbf16>
    tpu.vector_store %arg10[%c107_218, %c0_219], %9 {strides = array<i32>} : memref<342x8xbf16, #tpu.memory_space<vmem>>, vector<2x8xbf16>,
    %214 = vector.extract_strided_slice %209 {offsets = [18, 0], sizes = [16, 8], strides = [1, 1]} : vector<72x8xf32> to vector<16x8xf32>
    %215 = arith.truncf %214 : vector<16x8xf32> to vector<16x8xbf16>
    %c109_220 = arith.constant 109 : index
    %c0_221 = arith.constant 0 : index
    %216 = vector.load %arg10[%c109_220, %c0_221] : memref<342x8xbf16, #tpu.memory_space<vmem>>, vector<16x8xbf16>
    tpu.vector_store %arg10[%c109_220, %c0_221], %215 {strides = array<i32>} : memref<342x8xbf16, #tpu.memory_space<vmem>>, vector<16x8xbf16>,
    %c125_222 = arith.constant 125 : index
    %c0_223 = arith.constant 0 : index
    %217 = vector.load %arg10[%c125_222, %c0_223] : memref<342x8xbf16, #tpu.memory_space<vmem>>, vector<2x8xbf16>
    tpu.vector_store %arg10[%c125_222, %c0_223], %9 {strides = array<i32>} : memref<342x8xbf16, #tpu.memory_space<vmem>>, vector<2x8xbf16>,
    %218 = vector.extract_strided_slice %209 {offsets = [36, 0], sizes = [16, 8], strides = [1, 1]} : vector<72x8xf32> to vector<16x8xf32>
    %219 = arith.truncf %218 : vector<16x8xf32> to vector<16x8xbf16>
    %c127_224 = arith.constant 127 : index
    %c0_225 = arith.constant 0 : index
    %220 = vector.load %arg10[%c127_224, %c0_225] : memref<342x8xbf16, #tpu.memory_space<vmem>>, vector<16x8xbf16>
    tpu.vector_store %arg10[%c127_224, %c0_225], %219 {strides = array<i32>} : memref<342x8xbf16, #tpu.memory_space<vmem>>, vector<16x8xbf16>,
    %c143_226 = arith.constant 143 : index
    %c0_227 = arith.constant 0 : index
    %221 = vector.load %arg10[%c143_226, %c0_227] : memref<342x8xbf16, #tpu.memory_space<vmem>>, vector<2x8xbf16>
    tpu.vector_store %arg10[%c143_226, %c0_227], %9 {strides = array<i32>} : memref<342x8xbf16, #tpu.memory_space<vmem>>, vector<2x8xbf16>,
    %222 = vector.extract_strided_slice %209 {offsets = [54, 0], sizes = [16, 8], strides = [1, 1]} : vector<72x8xf32> to vector<16x8xf32>
    %223 = arith.truncf %222 : vector<16x8xf32> to vector<16x8xbf16>
    %c145_228 = arith.constant 145 : index
    %c0_229 = arith.constant 0 : index
    %224 = vector.load %arg10[%c145_228, %c0_229] : memref<342x8xbf16, #tpu.memory_space<vmem>>, vector<16x8xbf16>
    tpu.vector_store %arg10[%c145_228, %c0_229], %223 {strides = array<i32>} : memref<342x8xbf16, #tpu.memory_space<vmem>>, vector<16x8xbf16>,
    %c161_230 = arith.constant 161 : index
    %c0_231 = arith.constant 0 : index
    %225 = vector.load %arg10[%c161_230, %c0_231] : memref<342x8xbf16, #tpu.memory_space<vmem>>, vector<2x8xbf16>
    tpu.vector_store %arg10[%c161_230, %c0_231], %9 {strides = array<i32>} : memref<342x8xbf16, #tpu.memory_space<vmem>>, vector<2x8xbf16>,
    %c144 = arith.constant 144 : index
    %c0_232 = arith.constant 0 : index
    %226 = vector.load %arg9[%c144, %c0_232] : memref<342x8xbf16, #tpu.memory_space<vmem>>, vector<72x8xbf16>
    %c0_233 = arith.constant 0 : index
    %c0_234 = arith.constant 0 : index
    %c0_235 = arith.constant 0 : index
    %227 = vector.load %arg2[%c0_233, %c0_234, %c0_235] : memref<9x8x8xbf16, #tpu.memory_space<vmem>>, vector<1x8x8xbf16>
    %228 = vector.shape_cast %227 : vector<1x8x8xbf16> to vector<8x8xbf16>
    %cst_236 = arith.constant dense<0.000000e+00> : vector<72x8xf32>
    %229 = tpu.matmul %226, %228, %cst_236 {dimension_numbers = #tpu.dot_dimension_numbers<[1], [0], [0], [1], [0, 0, 1, 1], [], []>} : vector<72x8xbf16>, vector<8x8xbf16>, vector<72x8xf32> -> vector<72x8xf32>
    %c145_237 = arith.constant 145 : index
    %c0_238 = arith.constant 0 : index
    %230 = vector.load %arg9[%c145_237, %c0_238] : memref<342x8xbf16, #tpu.memory_space<vmem>>, vector<72x8xbf16>
    %c1_239 = arith.constant 1 : index
    %c0_240 = arith.constant 0 : index
    %c0_241 = arith.constant 0 : index
    %231 = vector.load %arg2[%c1_239, %c0_240, %c0_241] : memref<9x8x8xbf16, #tpu.memory_space<vmem>>, vector<1x8x8xbf16>
    %232 = vector.shape_cast %231 : vector<1x8x8xbf16> to vector<8x8xbf16>
    %cst_242 = arith.constant dense<0.000000e+00> : vector<72x8xf32>
    %233 = tpu.matmul %230, %232, %cst_242 {dimension_numbers = #tpu.dot_dimension_numbers<[1], [0], [0], [1], [0, 0, 1, 1], [], []>} : vector<72x8xbf16>, vector<8x8xbf16>, vector<72x8xf32> -> vector<72x8xf32>
    %234 = arith.addf %229, %233 : vector<72x8xf32>
    %c146 = arith.constant 146 : index
    %c0_243 = arith.constant 0 : index
    %235 = vector.load %arg9[%c146, %c0_243] : memref<342x8xbf16, #tpu.memory_space<vmem>>, vector<72x8xbf16>
    %c2_244 = arith.constant 2 : index
    %c0_245 = arith.constant 0 : index
    %c0_246 = arith.constant 0 : index
    %236 = vector.load %arg2[%c2_244, %c0_245, %c0_246] : memref<9x8x8xbf16, #tpu.memory_space<vmem>>, vector<1x8x8xbf16>
    %237 = vector.shape_cast %236 : vector<1x8x8xbf16> to vector<8x8xbf16>
    %cst_247 = arith.constant dense<0.000000e+00> : vector<72x8xf32>
    %238 = tpu.matmul %235, %237, %cst_247 {dimension_numbers = #tpu.dot_dimension_numbers<[1], [0], [0], [1], [0, 0, 1, 1], [], []>} : vector<72x8xbf16>, vector<8x8xbf16>, vector<72x8xf32> -> vector<72x8xf32>
    %239 = arith.addf %234, %238 : vector<72x8xf32>
    %c162 = arith.constant 162 : index
    %c0_248 = arith.constant 0 : index
    %240 = vector.load %arg9[%c162, %c0_248] : memref<342x8xbf16, #tpu.memory_space<vmem>>, vector<72x8xbf16>
    %c3_249 = arith.constant 3 : index
    %c0_250 = arith.constant 0 : index
    %c0_251 = arith.constant 0 : index
    %241 = vector.load %arg2[%c3_249, %c0_250, %c0_251] : memref<9x8x8xbf16, #tpu.memory_space<vmem>>, vector<1x8x8xbf16>
    %242 = vector.shape_cast %241 : vector<1x8x8xbf16> to vector<8x8xbf16>
    %cst_252 = arith.constant dense<0.000000e+00> : vector<72x8xf32>
    %243 = tpu.matmul %240, %242, %cst_252 {dimension_numbers = #tpu.dot_dimension_numbers<[1], [0], [0], [1], [0, 0, 1, 1], [], []>} : vector<72x8xbf16>, vector<8x8xbf16>, vector<72x8xf32> -> vector<72x8xf32>
    %244 = arith.addf %239, %243 : vector<72x8xf32>
    %c163_253 = arith.constant 163 : index
    %c0_254 = arith.constant 0 : index
    %245 = vector.load %arg9[%c163_253, %c0_254] : memref<342x8xbf16, #tpu.memory_space<vmem>>, vector<72x8xbf16>
    %c4_255 = arith.constant 4 : index
    %c0_256 = arith.constant 0 : index
    %c0_257 = arith.constant 0 : index
    %246 = vector.load %arg2[%c4_255, %c0_256, %c0_257] : memref<9x8x8xbf16, #tpu.memory_space<vmem>>, vector<1x8x8xbf16>
    %247 = vector.shape_cast %246 : vector<1x8x8xbf16> to vector<8x8xbf16>
    %cst_258 = arith.constant dense<0.000000e+00> : vector<72x8xf32>
    %248 = tpu.matmul %245, %247, %cst_258 {dimension_numbers = #tpu.dot_dimension_numbers<[1], [0], [0], [1], [0, 0, 1, 1], [], []>} : vector<72x8xbf16>, vector<8x8xbf16>, vector<72x8xf32> -> vector<72x8xf32>
    %249 = arith.addf %244, %248 : vector<72x8xf32>
    %c164 = arith.constant 164 : index
    %c0_259 = arith.constant 0 : index
    %250 = vector.load %arg9[%c164, %c0_259] : memref<342x8xbf16, #tpu.memory_space<vmem>>, vector<72x8xbf16>
    %c5_260 = arith.constant 5 : index
    %c0_261 = arith.constant 0 : index
    %c0_262 = arith.constant 0 : index
    %251 = vector.load %arg2[%c5_260, %c0_261, %c0_262] : memref<9x8x8xbf16, #tpu.memory_space<vmem>>, vector<1x8x8xbf16>
    %252 = vector.shape_cast %251 : vector<1x8x8xbf16> to vector<8x8xbf16>
    %cst_263 = arith.constant dense<0.000000e+00> : vector<72x8xf32>
    %253 = tpu.matmul %250, %252, %cst_263 {dimension_numbers = #tpu.dot_dimension_numbers<[1], [0], [0], [1], [0, 0, 1, 1], [], []>} : vector<72x8xbf16>, vector<8x8xbf16>, vector<72x8xf32> -> vector<72x8xf32>
    %254 = arith.addf %249, %253 : vector<72x8xf32>
    %c180 = arith.constant 180 : index
    %c0_264 = arith.constant 0 : index
    %255 = vector.load %arg9[%c180, %c0_264] : memref<342x8xbf16, #tpu.memory_space<vmem>>, vector<72x8xbf16>
    %c6_265 = arith.constant 6 : index
    %c0_266 = arith.constant 0 : index
    %c0_267 = arith.constant 0 : index
    %256 = vector.load %arg2[%c6_265, %c0_266, %c0_267] : memref<9x8x8xbf16, #tpu.memory_space<vmem>>, vector<1x8x8xbf16>
    %257 = vector.shape_cast %256 : vector<1x8x8xbf16> to vector<8x8xbf16>
    %cst_268 = arith.constant dense<0.000000e+00> : vector<72x8xf32>
    %258 = tpu.matmul %255, %257, %cst_268 {dimension_numbers = #tpu.dot_dimension_numbers<[1], [0], [0], [1], [0, 0, 1, 1], [], []>} : vector<72x8xbf16>, vector<8x8xbf16>, vector<72x8xf32> -> vector<72x8xf32>
    %259 = arith.addf %254, %258 : vector<72x8xf32>
    %c181_269 = arith.constant 181 : index
    %c0_270 = arith.constant 0 : index
    %260 = vector.load %arg9[%c181_269, %c0_270] : memref<342x8xbf16, #tpu.memory_space<vmem>>, vector<72x8xbf16>
    %c7_271 = arith.constant 7 : index
    %c0_272 = arith.constant 0 : index
    %c0_273 = arith.constant 0 : index
    %261 = vector.load %arg2[%c7_271, %c0_272, %c0_273] : memref<9x8x8xbf16, #tpu.memory_space<vmem>>, vector<1x8x8xbf16>
    %262 = vector.shape_cast %261 : vector<1x8x8xbf16> to vector<8x8xbf16>
    %cst_274 = arith.constant dense<0.000000e+00> : vector<72x8xf32>
    %263 = tpu.matmul %260, %262, %cst_274 {dimension_numbers = #tpu.dot_dimension_numbers<[1], [0], [0], [1], [0, 0, 1, 1], [], []>} : vector<72x8xbf16>, vector<8x8xbf16>, vector<72x8xf32> -> vector<72x8xf32>
    %264 = arith.addf %259, %263 : vector<72x8xf32>
    %c182 = arith.constant 182 : index
    %c0_275 = arith.constant 0 : index
    %265 = vector.load %arg9[%c182, %c0_275] : memref<342x8xbf16, #tpu.memory_space<vmem>>, vector<72x8xbf16>
    %c8_276 = arith.constant 8 : index
    %c0_277 = arith.constant 0 : index
    %c0_278 = arith.constant 0 : index
    %266 = vector.load %arg2[%c8_276, %c0_277, %c0_278] : memref<9x8x8xbf16, #tpu.memory_space<vmem>>, vector<1x8x8xbf16>
    %267 = vector.shape_cast %266 : vector<1x8x8xbf16> to vector<8x8xbf16>
    %cst_279 = arith.constant dense<0.000000e+00> : vector<72x8xf32>
    %268 = tpu.matmul %265, %267, %cst_279 {dimension_numbers = #tpu.dot_dimension_numbers<[1], [0], [0], [1], [0, 0, 1, 1], [], []>} : vector<72x8xbf16>, vector<8x8xbf16>, vector<72x8xf32> -> vector<72x8xf32>
    %269 = arith.addf %264, %268 : vector<72x8xf32>
    %270 = vector.broadcast %0 : vector<1x8xf32> to vector<72x8xf32>
    %271 = arith.mulf %269, %270 : vector<72x8xf32>
    %272 = vector.broadcast %1 : vector<1x8xf32> to vector<72x8xf32>
    %273 = arith.addf %271, %272 : vector<72x8xf32>
    %cst_280 = arith.constant 0.000000e+00 : f32
    %274 = vector.broadcast %cst_280 : f32 to vector<72x8xf32>
    %275 = arith.maximumf %273, %274 : vector<72x8xf32>
    %276 = vector.extract_strided_slice %275 {offsets = [0, 0], sizes = [16, 8], strides = [1, 1]} : vector<72x8xf32> to vector<16x8xf32>
    %277 = arith.truncf %276 : vector<16x8xf32> to vector<16x8xbf16>
    %c163_281 = arith.constant 163 : index
    %c0_282 = arith.constant 0 : index
    %278 = vector.load %arg10[%c163_281, %c0_282] : memref<342x8xbf16, #tpu.memory_space<vmem>>, vector<16x8xbf16>
    tpu.vector_store %arg10[%c163_281, %c0_282], %277 {strides = array<i32>} : memref<342x8xbf16, #tpu.memory_space<vmem>>, vector<16x8xbf16>,
    %c179_283 = arith.constant 179 : index
    %c0_284 = arith.constant 0 : index
    %279 = vector.load %arg10[%c179_283, %c0_284] : memref<342x8xbf16, #tpu.memory_space<vmem>>, vector<2x8xbf16>
    tpu.vector_store %arg10[%c179_283, %c0_284], %9 {strides = array<i32>} : memref<342x8xbf16, #tpu.memory_space<vmem>>, vector<2x8xbf16>,
    %280 = vector.extract_strided_slice %275 {offsets = [18, 0], sizes = [16, 8], strides = [1, 1]} : vector<72x8xf32> to vector<16x8xf32>
    %281 = arith.truncf %280 : vector<16x8xf32> to vector<16x8xbf16>
    %c181_285 = arith.constant 181 : index
    %c0_286 = arith.constant 0 : index
    %282 = vector.load %arg10[%c181_285, %c0_286] : memref<342x8xbf16, #tpu.memory_space<vmem>>, vector<16x8xbf16>
    tpu.vector_store %arg10[%c181_285, %c0_286], %281 {strides = array<i32>} : memref<342x8xbf16, #tpu.memory_space<vmem>>, vector<16x8xbf16>,
    %c197_287 = arith.constant 197 : index
    %c0_288 = arith.constant 0 : index
    %283 = vector.load %arg10[%c197_287, %c0_288] : memref<342x8xbf16, #tpu.memory_space<vmem>>, vector<2x8xbf16>
    tpu.vector_store %arg10[%c197_287, %c0_288], %9 {strides = array<i32>} : memref<342x8xbf16, #tpu.memory_space<vmem>>, vector<2x8xbf16>,
    %284 = vector.extract_strided_slice %275 {offsets = [36, 0], sizes = [16, 8], strides = [1, 1]} : vector<72x8xf32> to vector<16x8xf32>
    %285 = arith.truncf %284 : vector<16x8xf32> to vector<16x8xbf16>
    %c199_289 = arith.constant 199 : index
    %c0_290 = arith.constant 0 : index
    %286 = vector.load %arg10[%c199_289, %c0_290] : memref<342x8xbf16, #tpu.memory_space<vmem>>, vector<16x8xbf16>
    tpu.vector_store %arg10[%c199_289, %c0_290], %285 {strides = array<i32>} : memref<342x8xbf16, #tpu.memory_space<vmem>>, vector<16x8xbf16>,
    %c215_291 = arith.constant 215 : index
    %c0_292 = arith.constant 0 : index
    %287 = vector.load %arg10[%c215_291, %c0_292] : memref<342x8xbf16, #tpu.memory_space<vmem>>, vector<2x8xbf16>
    tpu.vector_store %arg10[%c215_291, %c0_292], %9 {strides = array<i32>} : memref<342x8xbf16, #tpu.memory_space<vmem>>, vector<2x8xbf16>,
    %288 = vector.extract_strided_slice %275 {offsets = [54, 0], sizes = [16, 8], strides = [1, 1]} : vector<72x8xf32> to vector<16x8xf32>
    %289 = arith.truncf %288 : vector<16x8xf32> to vector<16x8xbf16>
    %c217_293 = arith.constant 217 : index
    %c0_294 = arith.constant 0 : index
    %290 = vector.load %arg10[%c217_293, %c0_294] : memref<342x8xbf16, #tpu.memory_space<vmem>>, vector<16x8xbf16>
    tpu.vector_store %arg10[%c217_293, %c0_294], %289 {strides = array<i32>} : memref<342x8xbf16, #tpu.memory_space<vmem>>, vector<16x8xbf16>,
    %c233_295 = arith.constant 233 : index
    %c0_296 = arith.constant 0 : index
    %291 = vector.load %arg10[%c233_295, %c0_296] : memref<342x8xbf16, #tpu.memory_space<vmem>>, vector<2x8xbf16>
    tpu.vector_store %arg10[%c233_295, %c0_296], %9 {strides = array<i32>} : memref<342x8xbf16, #tpu.memory_space<vmem>>, vector<2x8xbf16>,
    %c216 = arith.constant 216 : index
    %c0_297 = arith.constant 0 : index
    %292 = vector.load %arg9[%c216, %c0_297] : memref<342x8xbf16, #tpu.memory_space<vmem>>, vector<72x8xbf16>
    %c0_298 = arith.constant 0 : index
    %c0_299 = arith.constant 0 : index
    %c0_300 = arith.constant 0 : index
    %293 = vector.load %arg2[%c0_298, %c0_299, %c0_300] : memref<9x8x8xbf16, #tpu.memory_space<vmem>>, vector<1x8x8xbf16>
    %294 = vector.shape_cast %293 : vector<1x8x8xbf16> to vector<8x8xbf16>
    %cst_301 = arith.constant dense<0.000000e+00> : vector<72x8xf32>
    %295 = tpu.matmul %292, %294, %cst_301 {dimension_numbers = #tpu.dot_dimension_numbers<[1], [0], [0], [1], [0, 0, 1, 1], [], []>} : vector<72x8xbf16>, vector<8x8xbf16>, vector<72x8xf32> -> vector<72x8xf32>
    %c217_302 = arith.constant 217 : index
    %c0_303 = arith.constant 0 : index
    %296 = vector.load %arg9[%c217_302, %c0_303] : memref<342x8xbf16, #tpu.memory_space<vmem>>, vector<72x8xbf16>
    %c1_304 = arith.constant 1 : index
    %c0_305 = arith.constant 0 : index
    %c0_306 = arith.constant 0 : index
    %297 = vector.load %arg2[%c1_304, %c0_305, %c0_306] : memref<9x8x8xbf16, #tpu.memory_space<vmem>>, vector<1x8x8xbf16>
    %298 = vector.shape_cast %297 : vector<1x8x8xbf16> to vector<8x8xbf16>
    %cst_307 = arith.constant dense<0.000000e+00> : vector<72x8xf32>
    %299 = tpu.matmul %296, %298, %cst_307 {dimension_numbers = #tpu.dot_dimension_numbers<[1], [0], [0], [1], [0, 0, 1, 1], [], []>} : vector<72x8xbf16>, vector<8x8xbf16>, vector<72x8xf32> -> vector<72x8xf32>
    %300 = arith.addf %295, %299 : vector<72x8xf32>
    %c218 = arith.constant 218 : index
    %c0_308 = arith.constant 0 : index
    %301 = vector.load %arg9[%c218, %c0_308] : memref<342x8xbf16, #tpu.memory_space<vmem>>, vector<72x8xbf16>
    %c2_309 = arith.constant 2 : index
    %c0_310 = arith.constant 0 : index
    %c0_311 = arith.constant 0 : index
    %302 = vector.load %arg2[%c2_309, %c0_310, %c0_311] : memref<9x8x8xbf16, #tpu.memory_space<vmem>>, vector<1x8x8xbf16>
    %303 = vector.shape_cast %302 : vector<1x8x8xbf16> to vector<8x8xbf16>
    %cst_312 = arith.constant dense<0.000000e+00> : vector<72x8xf32>
    %304 = tpu.matmul %301, %303, %cst_312 {dimension_numbers = #tpu.dot_dimension_numbers<[1], [0], [0], [1], [0, 0, 1, 1], [], []>} : vector<72x8xbf16>, vector<8x8xbf16>, vector<72x8xf32> -> vector<72x8xf32>
    %305 = arith.addf %300, %304 : vector<72x8xf32>
    %c234 = arith.constant 234 : index
    %c0_313 = arith.constant 0 : index
    %306 = vector.load %arg9[%c234, %c0_313] : memref<342x8xbf16, #tpu.memory_space<vmem>>, vector<72x8xbf16>
    %c3_314 = arith.constant 3 : index
    %c0_315 = arith.constant 0 : index
    %c0_316 = arith.constant 0 : index
    %307 = vector.load %arg2[%c3_314, %c0_315, %c0_316] : memref<9x8x8xbf16, #tpu.memory_space<vmem>>, vector<1x8x8xbf16>
    %308 = vector.shape_cast %307 : vector<1x8x8xbf16> to vector<8x8xbf16>
    %cst_317 = arith.constant dense<0.000000e+00> : vector<72x8xf32>
    %309 = tpu.matmul %306, %308, %cst_317 {dimension_numbers = #tpu.dot_dimension_numbers<[1], [0], [0], [1], [0, 0, 1, 1], [], []>} : vector<72x8xbf16>, vector<8x8xbf16>, vector<72x8xf32> -> vector<72x8xf32>
    %310 = arith.addf %305, %309 : vector<72x8xf32>
    %c235_318 = arith.constant 235 : index
    %c0_319 = arith.constant 0 : index
    %311 = vector.load %arg9[%c235_318, %c0_319] : memref<342x8xbf16, #tpu.memory_space<vmem>>, vector<72x8xbf16>
    %c4_320 = arith.constant 4 : index
    %c0_321 = arith.constant 0 : index
    %c0_322 = arith.constant 0 : index
    %312 = vector.load %arg2[%c4_320, %c0_321, %c0_322] : memref<9x8x8xbf16, #tpu.memory_space<vmem>>, vector<1x8x8xbf16>
    %313 = vector.shape_cast %312 : vector<1x8x8xbf16> to vector<8x8xbf16>
    %cst_323 = arith.constant dense<0.000000e+00> : vector<72x8xf32>
    %314 = tpu.matmul %311, %313, %cst_323 {dimension_numbers = #tpu.dot_dimension_numbers<[1], [0], [0], [1], [0, 0, 1, 1], [], []>} : vector<72x8xbf16>, vector<8x8xbf16>, vector<72x8xf32> -> vector<72x8xf32>
    %315 = arith.addf %310, %314 : vector<72x8xf32>
    %c236 = arith.constant 236 : index
    %c0_324 = arith.constant 0 : index
    %316 = vector.load %arg9[%c236, %c0_324] : memref<342x8xbf16, #tpu.memory_space<vmem>>, vector<72x8xbf16>
    %c5_325 = arith.constant 5 : index
    %c0_326 = arith.constant 0 : index
    %c0_327 = arith.constant 0 : index
    %317 = vector.load %arg2[%c5_325, %c0_326, %c0_327] : memref<9x8x8xbf16, #tpu.memory_space<vmem>>, vector<1x8x8xbf16>
    %318 = vector.shape_cast %317 : vector<1x8x8xbf16> to vector<8x8xbf16>
    %cst_328 = arith.constant dense<0.000000e+00> : vector<72x8xf32>
    %319 = tpu.matmul %316, %318, %cst_328 {dimension_numbers = #tpu.dot_dimension_numbers<[1], [0], [0], [1], [0, 0, 1, 1], [], []>} : vector<72x8xbf16>, vector<8x8xbf16>, vector<72x8xf32> -> vector<72x8xf32>
    %320 = arith.addf %315, %319 : vector<72x8xf32>
    %c252 = arith.constant 252 : index
    %c0_329 = arith.constant 0 : index
    %321 = vector.load %arg9[%c252, %c0_329] : memref<342x8xbf16, #tpu.memory_space<vmem>>, vector<72x8xbf16>
    %c6_330 = arith.constant 6 : index
    %c0_331 = arith.constant 0 : index
    %c0_332 = arith.constant 0 : index
    %322 = vector.load %arg2[%c6_330, %c0_331, %c0_332] : memref<9x8x8xbf16, #tpu.memory_space<vmem>>, vector<1x8x8xbf16>
    %323 = vector.shape_cast %322 : vector<1x8x8xbf16> to vector<8x8xbf16>
    %cst_333 = arith.constant dense<0.000000e+00> : vector<72x8xf32>
    %324 = tpu.matmul %321, %323, %cst_333 {dimension_numbers = #tpu.dot_dimension_numbers<[1], [0], [0], [1], [0, 0, 1, 1], [], []>} : vector<72x8xbf16>, vector<8x8xbf16>, vector<72x8xf32> -> vector<72x8xf32>
    %325 = arith.addf %320, %324 : vector<72x8xf32>
    %c253_334 = arith.constant 253 : index
    %c0_335 = arith.constant 0 : index
    %326 = vector.load %arg9[%c253_334, %c0_335] : memref<342x8xbf16, #tpu.memory_space<vmem>>, vector<72x8xbf16>
    %c7_336 = arith.constant 7 : index
    %c0_337 = arith.constant 0 : index
    %c0_338 = arith.constant 0 : index
    %327 = vector.load %arg2[%c7_336, %c0_337, %c0_338] : memref<9x8x8xbf16, #tpu.memory_space<vmem>>, vector<1x8x8xbf16>
    %328 = vector.shape_cast %327 : vector<1x8x8xbf16> to vector<8x8xbf16>
    %cst_339 = arith.constant dense<0.000000e+00> : vector<72x8xf32>
    %329 = tpu.matmul %326, %328, %cst_339 {dimension_numbers = #tpu.dot_dimension_numbers<[1], [0], [0], [1], [0, 0, 1, 1], [], []>} : vector<72x8xbf16>, vector<8x8xbf16>, vector<72x8xf32> -> vector<72x8xf32>
    %330 = arith.addf %325, %329 : vector<72x8xf32>
    %c254 = arith.constant 254 : index
    %c0_340 = arith.constant 0 : index
    %331 = vector.load %arg9[%c254, %c0_340] : memref<342x8xbf16, #tpu.memory_space<vmem>>, vector<72x8xbf16>
    %c8_341 = arith.constant 8 : index
    %c0_342 = arith.constant 0 : index
    %c0_343 = arith.constant 0 : index
    %332 = vector.load %arg2[%c8_341, %c0_342, %c0_343] : memref<9x8x8xbf16, #tpu.memory_space<vmem>>, vector<1x8x8xbf16>
    %333 = vector.shape_cast %332 : vector<1x8x8xbf16> to vector<8x8xbf16>
    %cst_344 = arith.constant dense<0.000000e+00> : vector<72x8xf32>
    %334 = tpu.matmul %331, %333, %cst_344 {dimension_numbers = #tpu.dot_dimension_numbers<[1], [0], [0], [1], [0, 0, 1, 1], [], []>} : vector<72x8xbf16>, vector<8x8xbf16>, vector<72x8xf32> -> vector<72x8xf32>
    %335 = arith.addf %330, %334 : vector<72x8xf32>
    %336 = vector.broadcast %0 : vector<1x8xf32> to vector<72x8xf32>
    %337 = arith.mulf %335, %336 : vector<72x8xf32>
    %338 = vector.broadcast %1 : vector<1x8xf32> to vector<72x8xf32>
    %339 = arith.addf %337, %338 : vector<72x8xf32>
    %cst_345 = arith.constant 0.000000e+00 : f32
    %340 = vector.broadcast %cst_345 : f32 to vector<72x8xf32>
    %341 = arith.maximumf %339, %340 : vector<72x8xf32>
    %342 = vector.extract_strided_slice %341 {offsets = [0, 0], sizes = [16, 8], strides = [1, 1]} : vector<72x8xf32> to vector<16x8xf32>
    %343 = arith.truncf %342 : vector<16x8xf32> to vector<16x8xbf16>
    %c235_346 = arith.constant 235 : index
    %c0_347 = arith.constant 0 : index
    %344 = vector.load %arg10[%c235_346, %c0_347] : memref<342x8xbf16, #tpu.memory_space<vmem>>, vector<16x8xbf16>
    tpu.vector_store %arg10[%c235_346, %c0_347], %343 {strides = array<i32>} : memref<342x8xbf16, #tpu.memory_space<vmem>>, vector<16x8xbf16>,
    %c251_348 = arith.constant 251 : index
    %c0_349 = arith.constant 0 : index
    %345 = vector.load %arg10[%c251_348, %c0_349] : memref<342x8xbf16, #tpu.memory_space<vmem>>, vector<2x8xbf16>
    tpu.vector_store %arg10[%c251_348, %c0_349], %9 {strides = array<i32>} : memref<342x8xbf16, #tpu.memory_space<vmem>>, vector<2x8xbf16>,
    %346 = vector.extract_strided_slice %341 {offsets = [18, 0], sizes = [16, 8], strides = [1, 1]} : vector<72x8xf32> to vector<16x8xf32>
    %347 = arith.truncf %346 : vector<16x8xf32> to vector<16x8xbf16>
    %c253_350 = arith.constant 253 : index
    %c0_351 = arith.constant 0 : index
    %348 = vector.load %arg10[%c253_350, %c0_351] : memref<342x8xbf16, #tpu.memory_space<vmem>>, vector<16x8xbf16>
    tpu.vector_store %arg10[%c253_350, %c0_351], %347 {strides = array<i32>} : memref<342x8xbf16, #tpu.memory_space<vmem>>, vector<16x8xbf16>,
    %c269_352 = arith.constant 269 : index
    %c0_353 = arith.constant 0 : index
    %349 = vector.load %arg10[%c269_352, %c0_353] : memref<342x8xbf16, #tpu.memory_space<vmem>>, vector<2x8xbf16>
    tpu.vector_store %arg10[%c269_352, %c0_353], %9 {strides = array<i32>} : memref<342x8xbf16, #tpu.memory_space<vmem>>, vector<2x8xbf16>,
    %350 = vector.extract_strided_slice %341 {offsets = [36, 0], sizes = [16, 8], strides = [1, 1]} : vector<72x8xf32> to vector<16x8xf32>
    %351 = arith.truncf %350 : vector<16x8xf32> to vector<16x8xbf16>
    %c271_354 = arith.constant 271 : index
    %c0_355 = arith.constant 0 : index
    %352 = vector.load %arg10[%c271_354, %c0_355] : memref<342x8xbf16, #tpu.memory_space<vmem>>, vector<16x8xbf16>
    tpu.vector_store %arg10[%c271_354, %c0_355], %351 {strides = array<i32>} : memref<342x8xbf16, #tpu.memory_space<vmem>>, vector<16x8xbf16>,
    %c287_356 = arith.constant 287 : index
    %c0_357 = arith.constant 0 : index
    %353 = vector.load %arg10[%c287_356, %c0_357] : memref<342x8xbf16, #tpu.memory_space<vmem>>, vector<2x8xbf16>
    tpu.vector_store %arg10[%c287_356, %c0_357], %9 {strides = array<i32>} : memref<342x8xbf16, #tpu.memory_space<vmem>>, vector<2x8xbf16>,
    %354 = vector.extract_strided_slice %341 {offsets = [54, 0], sizes = [16, 8], strides = [1, 1]} : vector<72x8xf32> to vector<16x8xf32>
    %355 = arith.truncf %354 : vector<16x8xf32> to vector<16x8xbf16>
    %c289_358 = arith.constant 289 : index
    %c0_359 = arith.constant 0 : index
    %356 = vector.load %arg10[%c289_358, %c0_359] : memref<342x8xbf16, #tpu.memory_space<vmem>>, vector<16x8xbf16>
    tpu.vector_store %arg10[%c289_358, %c0_359], %355 {strides = array<i32>} : memref<342x8xbf16, #tpu.memory_space<vmem>>, vector<16x8xbf16>,
    %c305_360 = arith.constant 305 : index
    %c0_361 = arith.constant 0 : index
    %357 = vector.load %arg10[%c305_360, %c0_361] : memref<342x8xbf16, #tpu.memory_space<vmem>>, vector<2x8xbf16>
    tpu.vector_store %arg10[%c305_360, %c0_361], %9 {strides = array<i32>} : memref<342x8xbf16, #tpu.memory_space<vmem>>, vector<2x8xbf16>,
    %c0_362 = arith.constant 0 : index
    %c0_363 = arith.constant 0 : index
    %358 = vector.load %arg10[%c0_362, %c0_363] : memref<342x8xbf16, #tpu.memory_space<vmem>>, vector<72x8xbf16>
    %c0_364 = arith.constant 0 : index
    %c0_365 = arith.constant 0 : index
    %c0_366 = arith.constant 0 : index
    %359 = vector.load %arg5[%c0_364, %c0_365, %c0_366] : memref<9x8x8xbf16, #tpu.memory_space<vmem>>, vector<1x8x8xbf16>
    %360 = vector.shape_cast %359 : vector<1x8x8xbf16> to vector<8x8xbf16>
    %cst_367 = arith.constant dense<0.000000e+00> : vector<72x8xf32>
    %361 = tpu.matmul %358, %360, %cst_367 {dimension_numbers = #tpu.dot_dimension_numbers<[1], [0], [0], [1], [0, 0, 1, 1], [], []>} : vector<72x8xbf16>, vector<8x8xbf16>, vector<72x8xf32> -> vector<72x8xf32>
    %c1_368 = arith.constant 1 : index
    %c0_369 = arith.constant 0 : index
    %362 = vector.load %arg10[%c1_368, %c0_369] : memref<342x8xbf16, #tpu.memory_space<vmem>>, vector<72x8xbf16>
    %c1_370 = arith.constant 1 : index
    %c0_371 = arith.constant 0 : index
    %c0_372 = arith.constant 0 : index
    %363 = vector.load %arg5[%c1_370, %c0_371, %c0_372] : memref<9x8x8xbf16, #tpu.memory_space<vmem>>, vector<1x8x8xbf16>
    %364 = vector.shape_cast %363 : vector<1x8x8xbf16> to vector<8x8xbf16>
    %cst_373 = arith.constant dense<0.000000e+00> : vector<72x8xf32>
    %365 = tpu.matmul %362, %364, %cst_373 {dimension_numbers = #tpu.dot_dimension_numbers<[1], [0], [0], [1], [0, 0, 1, 1], [], []>} : vector<72x8xbf16>, vector<8x8xbf16>, vector<72x8xf32> -> vector<72x8xf32>
    %366 = arith.addf %361, %365 : vector<72x8xf32>
    %c2_374 = arith.constant 2 : index
    %c0_375 = arith.constant 0 : index
    %367 = vector.load %arg10[%c2_374, %c0_375] : memref<342x8xbf16, #tpu.memory_space<vmem>>, vector<72x8xbf16>
    %c2_376 = arith.constant 2 : index
    %c0_377 = arith.constant 0 : index
    %c0_378 = arith.constant 0 : index
    %368 = vector.load %arg5[%c2_376, %c0_377, %c0_378] : memref<9x8x8xbf16, #tpu.memory_space<vmem>>, vector<1x8x8xbf16>
    %369 = vector.shape_cast %368 : vector<1x8x8xbf16> to vector<8x8xbf16>
    %cst_379 = arith.constant dense<0.000000e+00> : vector<72x8xf32>
    %370 = tpu.matmul %367, %369, %cst_379 {dimension_numbers = #tpu.dot_dimension_numbers<[1], [0], [0], [1], [0, 0, 1, 1], [], []>} : vector<72x8xbf16>, vector<8x8xbf16>, vector<72x8xf32> -> vector<72x8xf32>
    %371 = arith.addf %366, %370 : vector<72x8xf32>
    %c18_380 = arith.constant 18 : index
    %c0_381 = arith.constant 0 : index
    %372 = vector.load %arg10[%c18_380, %c0_381] : memref<342x8xbf16, #tpu.memory_space<vmem>>, vector<72x8xbf16>
    %c3_382 = arith.constant 3 : index
    %c0_383 = arith.constant 0 : index
    %c0_384 = arith.constant 0 : index
    %373 = vector.load %arg5[%c3_382, %c0_383, %c0_384] : memref<9x8x8xbf16, #tpu.memory_space<vmem>>, vector<1x8x8xbf16>
    %374 = vector.shape_cast %373 : vector<1x8x8xbf16> to vector<8x8xbf16>
    %cst_385 = arith.constant dense<0.000000e+00> : vector<72x8xf32>
    %375 = tpu.matmul %372, %374, %cst_385 {dimension_numbers = #tpu.dot_dimension_numbers<[1], [0], [0], [1], [0, 0, 1, 1], [], []>} : vector<72x8xbf16>, vector<8x8xbf16>, vector<72x8xf32> -> vector<72x8xf32>
    %376 = arith.addf %371, %375 : vector<72x8xf32>
    %c19_386 = arith.constant 19 : index
    %c0_387 = arith.constant 0 : index
    %377 = vector.load %arg10[%c19_386, %c0_387] : memref<342x8xbf16, #tpu.memory_space<vmem>>, vector<72x8xbf16>
    %c4_388 = arith.constant 4 : index
    %c0_389 = arith.constant 0 : index
    %c0_390 = arith.constant 0 : index
    %378 = vector.load %arg5[%c4_388, %c0_389, %c0_390] : memref<9x8x8xbf16, #tpu.memory_space<vmem>>, vector<1x8x8xbf16>
    %379 = vector.shape_cast %378 : vector<1x8x8xbf16> to vector<8x8xbf16>
    %cst_391 = arith.constant dense<0.000000e+00> : vector<72x8xf32>
    %380 = tpu.matmul %377, %379, %cst_391 {dimension_numbers = #tpu.dot_dimension_numbers<[1], [0], [0], [1], [0, 0, 1, 1], [], []>} : vector<72x8xbf16>, vector<8x8xbf16>, vector<72x8xf32> -> vector<72x8xf32>
    %381 = arith.addf %376, %380 : vector<72x8xf32>
    %c20_392 = arith.constant 20 : index
    %c0_393 = arith.constant 0 : index
    %382 = vector.load %arg10[%c20_392, %c0_393] : memref<342x8xbf16, #tpu.memory_space<vmem>>, vector<72x8xbf16>
    %c5_394 = arith.constant 5 : index
    %c0_395 = arith.constant 0 : index
    %c0_396 = arith.constant 0 : index
    %383 = vector.load %arg5[%c5_394, %c0_395, %c0_396] : memref<9x8x8xbf16, #tpu.memory_space<vmem>>, vector<1x8x8xbf16>
    %384 = vector.shape_cast %383 : vector<1x8x8xbf16> to vector<8x8xbf16>
    %cst_397 = arith.constant dense<0.000000e+00> : vector<72x8xf32>
    %385 = tpu.matmul %382, %384, %cst_397 {dimension_numbers = #tpu.dot_dimension_numbers<[1], [0], [0], [1], [0, 0, 1, 1], [], []>} : vector<72x8xbf16>, vector<8x8xbf16>, vector<72x8xf32> -> vector<72x8xf32>
    %386 = arith.addf %381, %385 : vector<72x8xf32>
    %c36_398 = arith.constant 36 : index
    %c0_399 = arith.constant 0 : index
    %387 = vector.load %arg10[%c36_398, %c0_399] : memref<342x8xbf16, #tpu.memory_space<vmem>>, vector<72x8xbf16>
    %c6_400 = arith.constant 6 : index
    %c0_401 = arith.constant 0 : index
    %c0_402 = arith.constant 0 : index
    %388 = vector.load %arg5[%c6_400, %c0_401, %c0_402] : memref<9x8x8xbf16, #tpu.memory_space<vmem>>, vector<1x8x8xbf16>
    %389 = vector.shape_cast %388 : vector<1x8x8xbf16> to vector<8x8xbf16>
    %cst_403 = arith.constant dense<0.000000e+00> : vector<72x8xf32>
    %390 = tpu.matmul %387, %389, %cst_403 {dimension_numbers = #tpu.dot_dimension_numbers<[1], [0], [0], [1], [0, 0, 1, 1], [], []>} : vector<72x8xbf16>, vector<8x8xbf16>, vector<72x8xf32> -> vector<72x8xf32>
    %391 = arith.addf %386, %390 : vector<72x8xf32>
    %c37_404 = arith.constant 37 : index
    %c0_405 = arith.constant 0 : index
    %392 = vector.load %arg10[%c37_404, %c0_405] : memref<342x8xbf16, #tpu.memory_space<vmem>>, vector<72x8xbf16>
    %c7_406 = arith.constant 7 : index
    %c0_407 = arith.constant 0 : index
    %c0_408 = arith.constant 0 : index
    %393 = vector.load %arg5[%c7_406, %c0_407, %c0_408] : memref<9x8x8xbf16, #tpu.memory_space<vmem>>, vector<1x8x8xbf16>
    %394 = vector.shape_cast %393 : vector<1x8x8xbf16> to vector<8x8xbf16>
    %cst_409 = arith.constant dense<0.000000e+00> : vector<72x8xf32>
    %395 = tpu.matmul %392, %394, %cst_409 {dimension_numbers = #tpu.dot_dimension_numbers<[1], [0], [0], [1], [0, 0, 1, 1], [], []>} : vector<72x8xbf16>, vector<8x8xbf16>, vector<72x8xf32> -> vector<72x8xf32>
    %396 = arith.addf %391, %395 : vector<72x8xf32>
    %c38_410 = arith.constant 38 : index
    %c0_411 = arith.constant 0 : index
    %397 = vector.load %arg10[%c38_410, %c0_411] : memref<342x8xbf16, #tpu.memory_space<vmem>>, vector<72x8xbf16>
    %c8_412 = arith.constant 8 : index
    %c0_413 = arith.constant 0 : index
    %c0_414 = arith.constant 0 : index
    %398 = vector.load %arg5[%c8_412, %c0_413, %c0_414] : memref<9x8x8xbf16, #tpu.memory_space<vmem>>, vector<1x8x8xbf16>
    %399 = vector.shape_cast %398 : vector<1x8x8xbf16> to vector<8x8xbf16>
    %cst_415 = arith.constant dense<0.000000e+00> : vector<72x8xf32>
    %400 = tpu.matmul %397, %399, %cst_415 {dimension_numbers = #tpu.dot_dimension_numbers<[1], [0], [0], [1], [0, 0, 1, 1], [], []>} : vector<72x8xbf16>, vector<8x8xbf16>, vector<72x8xf32> -> vector<72x8xf32>
    %401 = arith.addf %396, %400 : vector<72x8xf32>
    %402 = vector.broadcast %2 : vector<1x8xf32> to vector<72x8xf32>
    %403 = arith.mulf %401, %402 : vector<72x8xf32>
    %404 = vector.broadcast %3 : vector<1x8xf32> to vector<72x8xf32>
    %405 = arith.addf %403, %404 : vector<72x8xf32>
    %406 = vector.extract_strided_slice %405 {offsets = [0, 0], sizes = [16, 8], strides = [1, 1]} : vector<72x8xf32> to vector<16x8xf32>
    %c0_416 = arith.constant 0 : index
    %c0_417 = arith.constant 0 : index
    %c0_418 = arith.constant 0 : index
    %c0_419 = arith.constant 0 : index
    %407 = vector.load %arg1[%c0_416, %c0_417, %c0_418, %c0_419] : memref<1x16x16x8xf32, #tpu.memory_space<vmem>>, vector<1x1x16x8xf32>
    %408 = vector.shape_cast %407 : vector<1x1x16x8xf32> to vector<16x8xf32>
    %409 = arith.addf %406, %408 : vector<16x8xf32>
    %cst_420 = arith.constant 0.000000e+00 : f32
    %410 = vector.broadcast %cst_420 : f32 to vector<16x8xf32>
    %411 = arith.maximumf %409, %410 : vector<16x8xf32>
    %c0_421 = arith.constant 0 : index
    %c0_422 = arith.constant 0 : index
    %c0_423 = arith.constant 0 : index
    %c0_424 = arith.constant 0 : index
    %412 = vector.load %arg8[%c0_421, %c0_422, %c0_423, %c0_424] : memref<1x16x16x8xf32, #tpu.memory_space<vmem>>, vector<1x1x16x8xf32>
    %413 = vector.shape_cast %412 : vector<1x1x16x8xf32> to vector<16x8xf32>
    %414 = vector.shape_cast %411 : vector<16x8xf32> to vector<1x1x16x8xf32>
    tpu.vector_store %arg8[%c0_421, %c0_422, %c0_423, %c0_424], %414 {strides = array<i32>} : memref<1x16x16x8xf32, #tpu.memory_space<vmem>>, vector<1x1x16x8xf32>,
    %415 = vector.extract_strided_slice %405 {offsets = [18, 0], sizes = [16, 8], strides = [1, 1]} : vector<72x8xf32> to vector<16x8xf32>
    %c0_425 = arith.constant 0 : index
    %c1_426 = arith.constant 1 : index
    %c0_427 = arith.constant 0 : index
    %c0_428 = arith.constant 0 : index
    %416 = vector.load %arg1[%c0_425, %c1_426, %c0_427, %c0_428] : memref<1x16x16x8xf32, #tpu.memory_space<vmem>>, vector<1x1x16x8xf32>
    %417 = vector.shape_cast %416 : vector<1x1x16x8xf32> to vector<16x8xf32>
    %418 = arith.addf %415, %417 : vector<16x8xf32>
    %cst_429 = arith.constant 0.000000e+00 : f32
    %419 = vector.broadcast %cst_429 : f32 to vector<16x8xf32>
    %420 = arith.maximumf %418, %419 : vector<16x8xf32>
    %c0_430 = arith.constant 0 : index
    %c1_431 = arith.constant 1 : index
    %c0_432 = arith.constant 0 : index
    %c0_433 = arith.constant 0 : index
    %421 = vector.load %arg8[%c0_430, %c1_431, %c0_432, %c0_433] : memref<1x16x16x8xf32, #tpu.memory_space<vmem>>, vector<1x1x16x8xf32>
    %422 = vector.shape_cast %421 : vector<1x1x16x8xf32> to vector<16x8xf32>
    %423 = vector.shape_cast %420 : vector<16x8xf32> to vector<1x1x16x8xf32>
    tpu.vector_store %arg8[%c0_430, %c1_431, %c0_432, %c0_433], %423 {strides = array<i32>} : memref<1x16x16x8xf32, #tpu.memory_space<vmem>>, vector<1x1x16x8xf32>,
    %424 = vector.extract_strided_slice %405 {offsets = [36, 0], sizes = [16, 8], strides = [1, 1]} : vector<72x8xf32> to vector<16x8xf32>
    %c0_434 = arith.constant 0 : index
    %c2_435 = arith.constant 2 : index
    %c0_436 = arith.constant 0 : index
    %c0_437 = arith.constant 0 : index
    %425 = vector.load %arg1[%c0_434, %c2_435, %c0_436, %c0_437] : memref<1x16x16x8xf32, #tpu.memory_space<vmem>>, vector<1x1x16x8xf32>
    %426 = vector.shape_cast %425 : vector<1x1x16x8xf32> to vector<16x8xf32>
    %427 = arith.addf %424, %426 : vector<16x8xf32>
    %cst_438 = arith.constant 0.000000e+00 : f32
    %428 = vector.broadcast %cst_438 : f32 to vector<16x8xf32>
    %429 = arith.maximumf %427, %428 : vector<16x8xf32>
    %c0_439 = arith.constant 0 : index
    %c2_440 = arith.constant 2 : index
    %c0_441 = arith.constant 0 : index
    %c0_442 = arith.constant 0 : index
    %430 = vector.load %arg8[%c0_439, %c2_440, %c0_441, %c0_442] : memref<1x16x16x8xf32, #tpu.memory_space<vmem>>, vector<1x1x16x8xf32>
    %431 = vector.shape_cast %430 : vector<1x1x16x8xf32> to vector<16x8xf32>
    %432 = vector.shape_cast %429 : vector<16x8xf32> to vector<1x1x16x8xf32>
    tpu.vector_store %arg8[%c0_439, %c2_440, %c0_441, %c0_442], %432 {strides = array<i32>} : memref<1x16x16x8xf32, #tpu.memory_space<vmem>>, vector<1x1x16x8xf32>,
    %433 = vector.extract_strided_slice %405 {offsets = [54, 0], sizes = [16, 8], strides = [1, 1]} : vector<72x8xf32> to vector<16x8xf32>
    %c0_443 = arith.constant 0 : index
    %c3_444 = arith.constant 3 : index
    %c0_445 = arith.constant 0 : index
    %c0_446 = arith.constant 0 : index
    %434 = vector.load %arg1[%c0_443, %c3_444, %c0_445, %c0_446] : memref<1x16x16x8xf32, #tpu.memory_space<vmem>>, vector<1x1x16x8xf32>
    %435 = vector.shape_cast %434 : vector<1x1x16x8xf32> to vector<16x8xf32>
    %436 = arith.addf %433, %435 : vector<16x8xf32>
    %cst_447 = arith.constant 0.000000e+00 : f32
    %437 = vector.broadcast %cst_447 : f32 to vector<16x8xf32>
    %438 = arith.maximumf %436, %437 : vector<16x8xf32>
    %c0_448 = arith.constant 0 : index
    %c3_449 = arith.constant 3 : index
    %c0_450 = arith.constant 0 : index
    %c0_451 = arith.constant 0 : index
    %439 = vector.load %arg8[%c0_448, %c3_449, %c0_450, %c0_451] : memref<1x16x16x8xf32, #tpu.memory_space<vmem>>, vector<1x1x16x8xf32>
    %440 = vector.shape_cast %439 : vector<1x1x16x8xf32> to vector<16x8xf32>
    %441 = vector.shape_cast %438 : vector<16x8xf32> to vector<1x1x16x8xf32>
    tpu.vector_store %arg8[%c0_448, %c3_449, %c0_450, %c0_451], %441 {strides = array<i32>} : memref<1x16x16x8xf32, #tpu.memory_space<vmem>>, vector<1x1x16x8xf32>,
    %c72_452 = arith.constant 72 : index
    %c0_453 = arith.constant 0 : index
    %442 = vector.load %arg10[%c72_452, %c0_453] : memref<342x8xbf16, #tpu.memory_space<vmem>>, vector<72x8xbf16>
    %c0_454 = arith.constant 0 : index
    %c0_455 = arith.constant 0 : index
    %c0_456 = arith.constant 0 : index
    %443 = vector.load %arg5[%c0_454, %c0_455, %c0_456] : memref<9x8x8xbf16, #tpu.memory_space<vmem>>, vector<1x8x8xbf16>
    %444 = vector.shape_cast %443 : vector<1x8x8xbf16> to vector<8x8xbf16>
    %cst_457 = arith.constant dense<0.000000e+00> : vector<72x8xf32>
    %445 = tpu.matmul %442, %444, %cst_457 {dimension_numbers = #tpu.dot_dimension_numbers<[1], [0], [0], [1], [0, 0, 1, 1], [], []>} : vector<72x8xbf16>, vector<8x8xbf16>, vector<72x8xf32> -> vector<72x8xf32>
    %c73_458 = arith.constant 73 : index
    %c0_459 = arith.constant 0 : index
    %446 = vector.load %arg10[%c73_458, %c0_459] : memref<342x8xbf16, #tpu.memory_space<vmem>>, vector<72x8xbf16>
    %c1_460 = arith.constant 1 : index
    %c0_461 = arith.constant 0 : index
    %c0_462 = arith.constant 0 : index
    %447 = vector.load %arg5[%c1_460, %c0_461, %c0_462] : memref<9x8x8xbf16, #tpu.memory_space<vmem>>, vector<1x8x8xbf16>
    %448 = vector.shape_cast %447 : vector<1x8x8xbf16> to vector<8x8xbf16>
    %cst_463 = arith.constant dense<0.000000e+00> : vector<72x8xf32>
    %449 = tpu.matmul %446, %448, %cst_463 {dimension_numbers = #tpu.dot_dimension_numbers<[1], [0], [0], [1], [0, 0, 1, 1], [], []>} : vector<72x8xbf16>, vector<8x8xbf16>, vector<72x8xf32> -> vector<72x8xf32>
    %450 = arith.addf %445, %449 : vector<72x8xf32>
    %c74_464 = arith.constant 74 : index
    %c0_465 = arith.constant 0 : index
    %451 = vector.load %arg10[%c74_464, %c0_465] : memref<342x8xbf16, #tpu.memory_space<vmem>>, vector<72x8xbf16>
    %c2_466 = arith.constant 2 : index
    %c0_467 = arith.constant 0 : index
    %c0_468 = arith.constant 0 : index
    %452 = vector.load %arg5[%c2_466, %c0_467, %c0_468] : memref<9x8x8xbf16, #tpu.memory_space<vmem>>, vector<1x8x8xbf16>
    %453 = vector.shape_cast %452 : vector<1x8x8xbf16> to vector<8x8xbf16>
    %cst_469 = arith.constant dense<0.000000e+00> : vector<72x8xf32>
    %454 = tpu.matmul %451, %453, %cst_469 {dimension_numbers = #tpu.dot_dimension_numbers<[1], [0], [0], [1], [0, 0, 1, 1], [], []>} : vector<72x8xbf16>, vector<8x8xbf16>, vector<72x8xf32> -> vector<72x8xf32>
    %455 = arith.addf %450, %454 : vector<72x8xf32>
    %c90_470 = arith.constant 90 : index
    %c0_471 = arith.constant 0 : index
    %456 = vector.load %arg10[%c90_470, %c0_471] : memref<342x8xbf16, #tpu.memory_space<vmem>>, vector<72x8xbf16>
    %c3_472 = arith.constant 3 : index
    %c0_473 = arith.constant 0 : index
    %c0_474 = arith.constant 0 : index
    %457 = vector.load %arg5[%c3_472, %c0_473, %c0_474] : memref<9x8x8xbf16, #tpu.memory_space<vmem>>, vector<1x8x8xbf16>
    %458 = vector.shape_cast %457 : vector<1x8x8xbf16> to vector<8x8xbf16>
    %cst_475 = arith.constant dense<0.000000e+00> : vector<72x8xf32>
    %459 = tpu.matmul %456, %458, %cst_475 {dimension_numbers = #tpu.dot_dimension_numbers<[1], [0], [0], [1], [0, 0, 1, 1], [], []>} : vector<72x8xbf16>, vector<8x8xbf16>, vector<72x8xf32> -> vector<72x8xf32>
    %460 = arith.addf %455, %459 : vector<72x8xf32>
    %c91_476 = arith.constant 91 : index
    %c0_477 = arith.constant 0 : index
    %461 = vector.load %arg10[%c91_476, %c0_477] : memref<342x8xbf16, #tpu.memory_space<vmem>>, vector<72x8xbf16>
    %c4_478 = arith.constant 4 : index
    %c0_479 = arith.constant 0 : index
    %c0_480 = arith.constant 0 : index
    %462 = vector.load %arg5[%c4_478, %c0_479, %c0_480] : memref<9x8x8xbf16, #tpu.memory_space<vmem>>, vector<1x8x8xbf16>
    %463 = vector.shape_cast %462 : vector<1x8x8xbf16> to vector<8x8xbf16>
    %cst_481 = arith.constant dense<0.000000e+00> : vector<72x8xf32>
    %464 = tpu.matmul %461, %463, %cst_481 {dimension_numbers = #tpu.dot_dimension_numbers<[1], [0], [0], [1], [0, 0, 1, 1], [], []>} : vector<72x8xbf16>, vector<8x8xbf16>, vector<72x8xf32> -> vector<72x8xf32>
    %465 = arith.addf %460, %464 : vector<72x8xf32>
    %c92_482 = arith.constant 92 : index
    %c0_483 = arith.constant 0 : index
    %466 = vector.load %arg10[%c92_482, %c0_483] : memref<342x8xbf16, #tpu.memory_space<vmem>>, vector<72x8xbf16>
    %c5_484 = arith.constant 5 : index
    %c0_485 = arith.constant 0 : index
    %c0_486 = arith.constant 0 : index
    %467 = vector.load %arg5[%c5_484, %c0_485, %c0_486] : memref<9x8x8xbf16, #tpu.memory_space<vmem>>, vector<1x8x8xbf16>
    %468 = vector.shape_cast %467 : vector<1x8x8xbf16> to vector<8x8xbf16>
    %cst_487 = arith.constant dense<0.000000e+00> : vector<72x8xf32>
    %469 = tpu.matmul %466, %468, %cst_487 {dimension_numbers = #tpu.dot_dimension_numbers<[1], [0], [0], [1], [0, 0, 1, 1], [], []>} : vector<72x8xbf16>, vector<8x8xbf16>, vector<72x8xf32> -> vector<72x8xf32>
    %470 = arith.addf %465, %469 : vector<72x8xf32>
    %c108_488 = arith.constant 108 : index
    %c0_489 = arith.constant 0 : index
    %471 = vector.load %arg10[%c108_488, %c0_489] : memref<342x8xbf16, #tpu.memory_space<vmem>>, vector<72x8xbf16>
    %c6_490 = arith.constant 6 : index
    %c0_491 = arith.constant 0 : index
    %c0_492 = arith.constant 0 : index
    %472 = vector.load %arg5[%c6_490, %c0_491, %c0_492] : memref<9x8x8xbf16, #tpu.memory_space<vmem>>, vector<1x8x8xbf16>
    %473 = vector.shape_cast %472 : vector<1x8x8xbf16> to vector<8x8xbf16>
    %cst_493 = arith.constant dense<0.000000e+00> : vector<72x8xf32>
    %474 = tpu.matmul %471, %473, %cst_493 {dimension_numbers = #tpu.dot_dimension_numbers<[1], [0], [0], [1], [0, 0, 1, 1], [], []>} : vector<72x8xbf16>, vector<8x8xbf16>, vector<72x8xf32> -> vector<72x8xf32>
    %475 = arith.addf %470, %474 : vector<72x8xf32>
    %c109_494 = arith.constant 109 : index
    %c0_495 = arith.constant 0 : index
    %476 = vector.load %arg10[%c109_494, %c0_495] : memref<342x8xbf16, #tpu.memory_space<vmem>>, vector<72x8xbf16>
    %c7_496 = arith.constant 7 : index
    %c0_497 = arith.constant 0 : index
    %c0_498 = arith.constant 0 : index
    %477 = vector.load %arg5[%c7_496, %c0_497, %c0_498] : memref<9x8x8xbf16, #tpu.memory_space<vmem>>, vector<1x8x8xbf16>
    %478 = vector.shape_cast %477 : vector<1x8x8xbf16> to vector<8x8xbf16>
    %cst_499 = arith.constant dense<0.000000e+00> : vector<72x8xf32>
    %479 = tpu.matmul %476, %478, %cst_499 {dimension_numbers = #tpu.dot_dimension_numbers<[1], [0], [0], [1], [0, 0, 1, 1], [], []>} : vector<72x8xbf16>, vector<8x8xbf16>, vector<72x8xf32> -> vector<72x8xf32>
    %480 = arith.addf %475, %479 : vector<72x8xf32>
    %c110_500 = arith.constant 110 : index
    %c0_501 = arith.constant 0 : index
    %481 = vector.load %arg10[%c110_500, %c0_501] : memref<342x8xbf16, #tpu.memory_space<vmem>>, vector<72x8xbf16>
    %c8_502 = arith.constant 8 : index
    %c0_503 = arith.constant 0 : index
    %c0_504 = arith.constant 0 : index
    %482 = vector.load %arg5[%c8_502, %c0_503, %c0_504] : memref<9x8x8xbf16, #tpu.memory_space<vmem>>, vector<1x8x8xbf16>
    %483 = vector.shape_cast %482 : vector<1x8x8xbf16> to vector<8x8xbf16>
    %cst_505 = arith.constant dense<0.000000e+00> : vector<72x8xf32>
    %484 = tpu.matmul %481, %483, %cst_505 {dimension_numbers = #tpu.dot_dimension_numbers<[1], [0], [0], [1], [0, 0, 1, 1], [], []>} : vector<72x8xbf16>, vector<8x8xbf16>, vector<72x8xf32> -> vector<72x8xf32>
    %485 = arith.addf %480, %484 : vector<72x8xf32>
    %486 = vector.broadcast %2 : vector<1x8xf32> to vector<72x8xf32>
    %487 = arith.mulf %485, %486 : vector<72x8xf32>
    %488 = vector.broadcast %3 : vector<1x8xf32> to vector<72x8xf32>
    %489 = arith.addf %487, %488 : vector<72x8xf32>
    %490 = vector.extract_strided_slice %489 {offsets = [0, 0], sizes = [16, 8], strides = [1, 1]} : vector<72x8xf32> to vector<16x8xf32>
    %c0_506 = arith.constant 0 : index
    %c4_507 = arith.constant 4 : index
    %c0_508 = arith.constant 0 : index
    %c0_509 = arith.constant 0 : index
    %491 = vector.load %arg1[%c0_506, %c4_507, %c0_508, %c0_509] : memref<1x16x16x8xf32, #tpu.memory_space<vmem>>, vector<1x1x16x8xf32>
    %492 = vector.shape_cast %491 : vector<1x1x16x8xf32> to vector<16x8xf32>
    %493 = arith.addf %490, %492 : vector<16x8xf32>
    %cst_510 = arith.constant 0.000000e+00 : f32
    %494 = vector.broadcast %cst_510 : f32 to vector<16x8xf32>
    %495 = arith.maximumf %493, %494 : vector<16x8xf32>
    %c0_511 = arith.constant 0 : index
    %c4_512 = arith.constant 4 : index
    %c0_513 = arith.constant 0 : index
    %c0_514 = arith.constant 0 : index
    %496 = vector.load %arg8[%c0_511, %c4_512, %c0_513, %c0_514] : memref<1x16x16x8xf32, #tpu.memory_space<vmem>>, vector<1x1x16x8xf32>
    %497 = vector.shape_cast %496 : vector<1x1x16x8xf32> to vector<16x8xf32>
    %498 = vector.shape_cast %495 : vector<16x8xf32> to vector<1x1x16x8xf32>
    tpu.vector_store %arg8[%c0_511, %c4_512, %c0_513, %c0_514], %498 {strides = array<i32>} : memref<1x16x16x8xf32, #tpu.memory_space<vmem>>, vector<1x1x16x8xf32>,
    %499 = vector.extract_strided_slice %489 {offsets = [18, 0], sizes = [16, 8], strides = [1, 1]} : vector<72x8xf32> to vector<16x8xf32>
    %c0_515 = arith.constant 0 : index
    %c5_516 = arith.constant 5 : index
    %c0_517 = arith.constant 0 : index
    %c0_518 = arith.constant 0 : index
    %500 = vector.load %arg1[%c0_515, %c5_516, %c0_517, %c0_518] : memref<1x16x16x8xf32, #tpu.memory_space<vmem>>, vector<1x1x16x8xf32>
    %501 = vector.shape_cast %500 : vector<1x1x16x8xf32> to vector<16x8xf32>
    %502 = arith.addf %499, %501 : vector<16x8xf32>
    %cst_519 = arith.constant 0.000000e+00 : f32
    %503 = vector.broadcast %cst_519 : f32 to vector<16x8xf32>
    %504 = arith.maximumf %502, %503 : vector<16x8xf32>
    %c0_520 = arith.constant 0 : index
    %c5_521 = arith.constant 5 : index
    %c0_522 = arith.constant 0 : index
    %c0_523 = arith.constant 0 : index
    %505 = vector.load %arg8[%c0_520, %c5_521, %c0_522, %c0_523] : memref<1x16x16x8xf32, #tpu.memory_space<vmem>>, vector<1x1x16x8xf32>
    %506 = vector.shape_cast %505 : vector<1x1x16x8xf32> to vector<16x8xf32>
    %507 = vector.shape_cast %504 : vector<16x8xf32> to vector<1x1x16x8xf32>
    tpu.vector_store %arg8[%c0_520, %c5_521, %c0_522, %c0_523], %507 {strides = array<i32>} : memref<1x16x16x8xf32, #tpu.memory_space<vmem>>, vector<1x1x16x8xf32>,
    %508 = vector.extract_strided_slice %489 {offsets = [36, 0], sizes = [16, 8], strides = [1, 1]} : vector<72x8xf32> to vector<16x8xf32>
    %c0_524 = arith.constant 0 : index
    %c6_525 = arith.constant 6 : index
    %c0_526 = arith.constant 0 : index
    %c0_527 = arith.constant 0 : index
    %509 = vector.load %arg1[%c0_524, %c6_525, %c0_526, %c0_527] : memref<1x16x16x8xf32, #tpu.memory_space<vmem>>, vector<1x1x16x8xf32>
    %510 = vector.shape_cast %509 : vector<1x1x16x8xf32> to vector<16x8xf32>
    %511 = arith.addf %508, %510 : vector<16x8xf32>
    %cst_528 = arith.constant 0.000000e+00 : f32
    %512 = vector.broadcast %cst_528 : f32 to vector<16x8xf32>
    %513 = arith.maximumf %511, %512 : vector<16x8xf32>
    %c0_529 = arith.constant 0 : index
    %c6_530 = arith.constant 6 : index
    %c0_531 = arith.constant 0 : index
    %c0_532 = arith.constant 0 : index
    %514 = vector.load %arg8[%c0_529, %c6_530, %c0_531, %c0_532] : memref<1x16x16x8xf32, #tpu.memory_space<vmem>>, vector<1x1x16x8xf32>
    %515 = vector.shape_cast %514 : vector<1x1x16x8xf32> to vector<16x8xf32>
    %516 = vector.shape_cast %513 : vector<16x8xf32> to vector<1x1x16x8xf32>
    tpu.vector_store %arg8[%c0_529, %c6_530, %c0_531, %c0_532], %516 {strides = array<i32>} : memref<1x16x16x8xf32, #tpu.memory_space<vmem>>, vector<1x1x16x8xf32>,
    %517 = vector.extract_strided_slice %489 {offsets = [54, 0], sizes = [16, 8], strides = [1, 1]} : vector<72x8xf32> to vector<16x8xf32>
    %c0_533 = arith.constant 0 : index
    %c7_534 = arith.constant 7 : index
    %c0_535 = arith.constant 0 : index
    %c0_536 = arith.constant 0 : index
    %518 = vector.load %arg1[%c0_533, %c7_534, %c0_535, %c0_536] : memref<1x16x16x8xf32, #tpu.memory_space<vmem>>, vector<1x1x16x8xf32>
    %519 = vector.shape_cast %518 : vector<1x1x16x8xf32> to vector<16x8xf32>
    %520 = arith.addf %517, %519 : vector<16x8xf32>
    %cst_537 = arith.constant 0.000000e+00 : f32
    %521 = vector.broadcast %cst_537 : f32 to vector<16x8xf32>
    %522 = arith.maximumf %520, %521 : vector<16x8xf32>
    %c0_538 = arith.constant 0 : index
    %c7_539 = arith.constant 7 : index
    %c0_540 = arith.constant 0 : index
    %c0_541 = arith.constant 0 : index
    %523 = vector.load %arg8[%c0_538, %c7_539, %c0_540, %c0_541] : memref<1x16x16x8xf32, #tpu.memory_space<vmem>>, vector<1x1x16x8xf32>
    %524 = vector.shape_cast %523 : vector<1x1x16x8xf32> to vector<16x8xf32>
    %525 = vector.shape_cast %522 : vector<16x8xf32> to vector<1x1x16x8xf32>
    tpu.vector_store %arg8[%c0_538, %c7_539, %c0_540, %c0_541], %525 {strides = array<i32>} : memref<1x16x16x8xf32, #tpu.memory_space<vmem>>, vector<1x1x16x8xf32>,
    %c144_542 = arith.constant 144 : index
    %c0_543 = arith.constant 0 : index
    %526 = vector.load %arg10[%c144_542, %c0_543] : memref<342x8xbf16, #tpu.memory_space<vmem>>, vector<72x8xbf16>
    %c0_544 = arith.constant 0 : index
    %c0_545 = arith.constant 0 : index
    %c0_546 = arith.constant 0 : index
    %527 = vector.load %arg5[%c0_544, %c0_545, %c0_546] : memref<9x8x8xbf16, #tpu.memory_space<vmem>>, vector<1x8x8xbf16>
    %528 = vector.shape_cast %527 : vector<1x8x8xbf16> to vector<8x8xbf16>
    %cst_547 = arith.constant dense<0.000000e+00> : vector<72x8xf32>
    %529 = tpu.matmul %526, %528, %cst_547 {dimension_numbers = #tpu.dot_dimension_numbers<[1], [0], [0], [1], [0, 0, 1, 1], [], []>} : vector<72x8xbf16>, vector<8x8xbf16>, vector<72x8xf32> -> vector<72x8xf32>
    %c145_548 = arith.constant 145 : index
    %c0_549 = arith.constant 0 : index
    %530 = vector.load %arg10[%c145_548, %c0_549] : memref<342x8xbf16, #tpu.memory_space<vmem>>, vector<72x8xbf16>
    %c1_550 = arith.constant 1 : index
    %c0_551 = arith.constant 0 : index
    %c0_552 = arith.constant 0 : index
    %531 = vector.load %arg5[%c1_550, %c0_551, %c0_552] : memref<9x8x8xbf16, #tpu.memory_space<vmem>>, vector<1x8x8xbf16>
    %532 = vector.shape_cast %531 : vector<1x8x8xbf16> to vector<8x8xbf16>
    %cst_553 = arith.constant dense<0.000000e+00> : vector<72x8xf32>
    %533 = tpu.matmul %530, %532, %cst_553 {dimension_numbers = #tpu.dot_dimension_numbers<[1], [0], [0], [1], [0, 0, 1, 1], [], []>} : vector<72x8xbf16>, vector<8x8xbf16>, vector<72x8xf32> -> vector<72x8xf32>
    %534 = arith.addf %529, %533 : vector<72x8xf32>
    %c146_554 = arith.constant 146 : index
    %c0_555 = arith.constant 0 : index
    %535 = vector.load %arg10[%c146_554, %c0_555] : memref<342x8xbf16, #tpu.memory_space<vmem>>, vector<72x8xbf16>
    %c2_556 = arith.constant 2 : index
    %c0_557 = arith.constant 0 : index
    %c0_558 = arith.constant 0 : index
    %536 = vector.load %arg5[%c2_556, %c0_557, %c0_558] : memref<9x8x8xbf16, #tpu.memory_space<vmem>>, vector<1x8x8xbf16>
    %537 = vector.shape_cast %536 : vector<1x8x8xbf16> to vector<8x8xbf16>
    %cst_559 = arith.constant dense<0.000000e+00> : vector<72x8xf32>
    %538 = tpu.matmul %535, %537, %cst_559 {dimension_numbers = #tpu.dot_dimension_numbers<[1], [0], [0], [1], [0, 0, 1, 1], [], []>} : vector<72x8xbf16>, vector<8x8xbf16>, vector<72x8xf32> -> vector<72x8xf32>
    %539 = arith.addf %534, %538 : vector<72x8xf32>
    %c162_560 = arith.constant 162 : index
    %c0_561 = arith.constant 0 : index
    %540 = vector.load %arg10[%c162_560, %c0_561] : memref<342x8xbf16, #tpu.memory_space<vmem>>, vector<72x8xbf16>
    %c3_562 = arith.constant 3 : index
    %c0_563 = arith.constant 0 : index
    %c0_564 = arith.constant 0 : index
    %541 = vector.load %arg5[%c3_562, %c0_563, %c0_564] : memref<9x8x8xbf16, #tpu.memory_space<vmem>>, vector<1x8x8xbf16>
    %542 = vector.shape_cast %541 : vector<1x8x8xbf16> to vector<8x8xbf16>
    %cst_565 = arith.constant dense<0.000000e+00> : vector<72x8xf32>
    %543 = tpu.matmul %540, %542, %cst_565 {dimension_numbers = #tpu.dot_dimension_numbers<[1], [0], [0], [1], [0, 0, 1, 1], [], []>} : vector<72x8xbf16>, vector<8x8xbf16>, vector<72x8xf32> -> vector<72x8xf32>
    %544 = arith.addf %539, %543 : vector<72x8xf32>
    %c163_566 = arith.constant 163 : index
    %c0_567 = arith.constant 0 : index
    %545 = vector.load %arg10[%c163_566, %c0_567] : memref<342x8xbf16, #tpu.memory_space<vmem>>, vector<72x8xbf16>
    %c4_568 = arith.constant 4 : index
    %c0_569 = arith.constant 0 : index
    %c0_570 = arith.constant 0 : index
    %546 = vector.load %arg5[%c4_568, %c0_569, %c0_570] : memref<9x8x8xbf16, #tpu.memory_space<vmem>>, vector<1x8x8xbf16>
    %547 = vector.shape_cast %546 : vector<1x8x8xbf16> to vector<8x8xbf16>
    %cst_571 = arith.constant dense<0.000000e+00> : vector<72x8xf32>
    %548 = tpu.matmul %545, %547, %cst_571 {dimension_numbers = #tpu.dot_dimension_numbers<[1], [0], [0], [1], [0, 0, 1, 1], [], []>} : vector<72x8xbf16>, vector<8x8xbf16>, vector<72x8xf32> -> vector<72x8xf32>
    %549 = arith.addf %544, %548 : vector<72x8xf32>
    %c164_572 = arith.constant 164 : index
    %c0_573 = arith.constant 0 : index
    %550 = vector.load %arg10[%c164_572, %c0_573] : memref<342x8xbf16, #tpu.memory_space<vmem>>, vector<72x8xbf16>
    %c5_574 = arith.constant 5 : index
    %c0_575 = arith.constant 0 : index
    %c0_576 = arith.constant 0 : index
    %551 = vector.load %arg5[%c5_574, %c0_575, %c0_576] : memref<9x8x8xbf16, #tpu.memory_space<vmem>>, vector<1x8x8xbf16>
    %552 = vector.shape_cast %551 : vector<1x8x8xbf16> to vector<8x8xbf16>
    %cst_577 = arith.constant dense<0.000000e+00> : vector<72x8xf32>
    %553 = tpu.matmul %550, %552, %cst_577 {dimension_numbers = #tpu.dot_dimension_numbers<[1], [0], [0], [1], [0, 0, 1, 1], [], []>} : vector<72x8xbf16>, vector<8x8xbf16>, vector<72x8xf32> -> vector<72x8xf32>
    %554 = arith.addf %549, %553 : vector<72x8xf32>
    %c180_578 = arith.constant 180 : index
    %c0_579 = arith.constant 0 : index
    %555 = vector.load %arg10[%c180_578, %c0_579] : memref<342x8xbf16, #tpu.memory_space<vmem>>, vector<72x8xbf16>
    %c6_580 = arith.constant 6 : index
    %c0_581 = arith.constant 0 : index
    %c0_582 = arith.constant 0 : index
    %556 = vector.load %arg5[%c6_580, %c0_581, %c0_582] : memref<9x8x8xbf16, #tpu.memory_space<vmem>>, vector<1x8x8xbf16>
    %557 = vector.shape_cast %556 : vector<1x8x8xbf16> to vector<8x8xbf16>
    %cst_583 = arith.constant dense<0.000000e+00> : vector<72x8xf32>
    %558 = tpu.matmul %555, %557, %cst_583 {dimension_numbers = #tpu.dot_dimension_numbers<[1], [0], [0], [1], [0, 0, 1, 1], [], []>} : vector<72x8xbf16>, vector<8x8xbf16>, vector<72x8xf32> -> vector<72x8xf32>
    %559 = arith.addf %554, %558 : vector<72x8xf32>
    %c181_584 = arith.constant 181 : index
    %c0_585 = arith.constant 0 : index
    %560 = vector.load %arg10[%c181_584, %c0_585] : memref<342x8xbf16, #tpu.memory_space<vmem>>, vector<72x8xbf16>
    %c7_586 = arith.constant 7 : index
    %c0_587 = arith.constant 0 : index
    %c0_588 = arith.constant 0 : index
    %561 = vector.load %arg5[%c7_586, %c0_587, %c0_588] : memref<9x8x8xbf16, #tpu.memory_space<vmem>>, vector<1x8x8xbf16>
    %562 = vector.shape_cast %561 : vector<1x8x8xbf16> to vector<8x8xbf16>
    %cst_589 = arith.constant dense<0.000000e+00> : vector<72x8xf32>
    %563 = tpu.matmul %560, %562, %cst_589 {dimension_numbers = #tpu.dot_dimension_numbers<[1], [0], [0], [1], [0, 0, 1, 1], [], []>} : vector<72x8xbf16>, vector<8x8xbf16>, vector<72x8xf32> -> vector<72x8xf32>
    %564 = arith.addf %559, %563 : vector<72x8xf32>
    %c182_590 = arith.constant 182 : index
    %c0_591 = arith.constant 0 : index
    %565 = vector.load %arg10[%c182_590, %c0_591] : memref<342x8xbf16, #tpu.memory_space<vmem>>, vector<72x8xbf16>
    %c8_592 = arith.constant 8 : index
    %c0_593 = arith.constant 0 : index
    %c0_594 = arith.constant 0 : index
    %566 = vector.load %arg5[%c8_592, %c0_593, %c0_594] : memref<9x8x8xbf16, #tpu.memory_space<vmem>>, vector<1x8x8xbf16>
    %567 = vector.shape_cast %566 : vector<1x8x8xbf16> to vector<8x8xbf16>
    %cst_595 = arith.constant dense<0.000000e+00> : vector<72x8xf32>
    %568 = tpu.matmul %565, %567, %cst_595 {dimension_numbers = #tpu.dot_dimension_numbers<[1], [0], [0], [1], [0, 0, 1, 1], [], []>} : vector<72x8xbf16>, vector<8x8xbf16>, vector<72x8xf32> -> vector<72x8xf32>
    %569 = arith.addf %564, %568 : vector<72x8xf32>
    %570 = vector.broadcast %2 : vector<1x8xf32> to vector<72x8xf32>
    %571 = arith.mulf %569, %570 : vector<72x8xf32>
    %572 = vector.broadcast %3 : vector<1x8xf32> to vector<72x8xf32>
    %573 = arith.addf %571, %572 : vector<72x8xf32>
    %574 = vector.extract_strided_slice %573 {offsets = [0, 0], sizes = [16, 8], strides = [1, 1]} : vector<72x8xf32> to vector<16x8xf32>
    %c0_596 = arith.constant 0 : index
    %c8_597 = arith.constant 8 : index
    %c0_598 = arith.constant 0 : index
    %c0_599 = arith.constant 0 : index
    %575 = vector.load %arg1[%c0_596, %c8_597, %c0_598, %c0_599] : memref<1x16x16x8xf32, #tpu.memory_space<vmem>>, vector<1x1x16x8xf32>
    %576 = vector.shape_cast %575 : vector<1x1x16x8xf32> to vector<16x8xf32>
    %577 = arith.addf %574, %576 : vector<16x8xf32>
    %cst_600 = arith.constant 0.000000e+00 : f32
    %578 = vector.broadcast %cst_600 : f32 to vector<16x8xf32>
    %579 = arith.maximumf %577, %578 : vector<16x8xf32>
    %c0_601 = arith.constant 0 : index
    %c8_602 = arith.constant 8 : index
    %c0_603 = arith.constant 0 : index
    %c0_604 = arith.constant 0 : index
    %580 = vector.load %arg8[%c0_601, %c8_602, %c0_603, %c0_604] : memref<1x16x16x8xf32, #tpu.memory_space<vmem>>, vector<1x1x16x8xf32>
    %581 = vector.shape_cast %580 : vector<1x1x16x8xf32> to vector<16x8xf32>
    %582 = vector.shape_cast %579 : vector<16x8xf32> to vector<1x1x16x8xf32>
    tpu.vector_store %arg8[%c0_601, %c8_602, %c0_603, %c0_604], %582 {strides = array<i32>} : memref<1x16x16x8xf32, #tpu.memory_space<vmem>>, vector<1x1x16x8xf32>,
    %583 = vector.extract_strided_slice %573 {offsets = [18, 0], sizes = [16, 8], strides = [1, 1]} : vector<72x8xf32> to vector<16x8xf32>
    %c0_605 = arith.constant 0 : index
    %c9_606 = arith.constant 9 : index
    %c0_607 = arith.constant 0 : index
    %c0_608 = arith.constant 0 : index
    %584 = vector.load %arg1[%c0_605, %c9_606, %c0_607, %c0_608] : memref<1x16x16x8xf32, #tpu.memory_space<vmem>>, vector<1x1x16x8xf32>
    %585 = vector.shape_cast %584 : vector<1x1x16x8xf32> to vector<16x8xf32>
    %586 = arith.addf %583, %585 : vector<16x8xf32>
    %cst_609 = arith.constant 0.000000e+00 : f32
    %587 = vector.broadcast %cst_609 : f32 to vector<16x8xf32>
    %588 = arith.maximumf %586, %587 : vector<16x8xf32>
    %c0_610 = arith.constant 0 : index
    %c9_611 = arith.constant 9 : index
    %c0_612 = arith.constant 0 : index
    %c0_613 = arith.constant 0 : index
    %589 = vector.load %arg8[%c0_610, %c9_611, %c0_612, %c0_613] : memref<1x16x16x8xf32, #tpu.memory_space<vmem>>, vector<1x1x16x8xf32>
    %590 = vector.shape_cast %589 : vector<1x1x16x8xf32> to vector<16x8xf32>
    %591 = vector.shape_cast %588 : vector<16x8xf32> to vector<1x1x16x8xf32>
    tpu.vector_store %arg8[%c0_610, %c9_611, %c0_612, %c0_613], %591 {strides = array<i32>} : memref<1x16x16x8xf32, #tpu.memory_space<vmem>>, vector<1x1x16x8xf32>,
    %592 = vector.extract_strided_slice %573 {offsets = [36, 0], sizes = [16, 8], strides = [1, 1]} : vector<72x8xf32> to vector<16x8xf32>
    %c0_614 = arith.constant 0 : index
    %c10_615 = arith.constant 10 : index
    %c0_616 = arith.constant 0 : index
    %c0_617 = arith.constant 0 : index
    %593 = vector.load %arg1[%c0_614, %c10_615, %c0_616, %c0_617] : memref<1x16x16x8xf32, #tpu.memory_space<vmem>>, vector<1x1x16x8xf32>
    %594 = vector.shape_cast %593 : vector<1x1x16x8xf32> to vector<16x8xf32>
    %595 = arith.addf %592, %594 : vector<16x8xf32>
    %cst_618 = arith.constant 0.000000e+00 : f32
    %596 = vector.broadcast %cst_618 : f32 to vector<16x8xf32>
    %597 = arith.maximumf %595, %596 : vector<16x8xf32>
    %c0_619 = arith.constant 0 : index
    %c10_620 = arith.constant 10 : index
    %c0_621 = arith.constant 0 : index
    %c0_622 = arith.constant 0 : index
    %598 = vector.load %arg8[%c0_619, %c10_620, %c0_621, %c0_622] : memref<1x16x16x8xf32, #tpu.memory_space<vmem>>, vector<1x1x16x8xf32>
    %599 = vector.shape_cast %598 : vector<1x1x16x8xf32> to vector<16x8xf32>
    %600 = vector.shape_cast %597 : vector<16x8xf32> to vector<1x1x16x8xf32>
    tpu.vector_store %arg8[%c0_619, %c10_620, %c0_621, %c0_622], %600 {strides = array<i32>} : memref<1x16x16x8xf32, #tpu.memory_space<vmem>>, vector<1x1x16x8xf32>,
    %601 = vector.extract_strided_slice %573 {offsets = [54, 0], sizes = [16, 8], strides = [1, 1]} : vector<72x8xf32> to vector<16x8xf32>
    %c0_623 = arith.constant 0 : index
    %c11_624 = arith.constant 11 : index
    %c0_625 = arith.constant 0 : index
    %c0_626 = arith.constant 0 : index
    %602 = vector.load %arg1[%c0_623, %c11_624, %c0_625, %c0_626] : memref<1x16x16x8xf32, #tpu.memory_space<vmem>>, vector<1x1x16x8xf32>
    %603 = vector.shape_cast %602 : vector<1x1x16x8xf32> to vector<16x8xf32>
    %604 = arith.addf %601, %603 : vector<16x8xf32>
    %cst_627 = arith.constant 0.000000e+00 : f32
    %605 = vector.broadcast %cst_627 : f32 to vector<16x8xf32>
    %606 = arith.maximumf %604, %605 : vector<16x8xf32>
    %c0_628 = arith.constant 0 : index
    %c11_629 = arith.constant 11 : index
    %c0_630 = arith.constant 0 : index
    %c0_631 = arith.constant 0 : index
    %607 = vector.load %arg8[%c0_628, %c11_629, %c0_630, %c0_631] : memref<1x16x16x8xf32, #tpu.memory_space<vmem>>, vector<1x1x16x8xf32>
    %608 = vector.shape_cast %607 : vector<1x1x16x8xf32> to vector<16x8xf32>
    %609 = vector.shape_cast %606 : vector<16x8xf32> to vector<1x1x16x8xf32>
    tpu.vector_store %arg8[%c0_628, %c11_629, %c0_630, %c0_631], %609 {strides = array<i32>} : memref<1x16x16x8xf32, #tpu.memory_space<vmem>>, vector<1x1x16x8xf32>,
    %c216_632 = arith.constant 216 : index
    %c0_633 = arith.constant 0 : index
    %610 = vector.load %arg10[%c216_632, %c0_633] : memref<342x8xbf16, #tpu.memory_space<vmem>>, vector<72x8xbf16>
    %c0_634 = arith.constant 0 : index
    %c0_635 = arith.constant 0 : index
    %c0_636 = arith.constant 0 : index
    %611 = vector.load %arg5[%c0_634, %c0_635, %c0_636] : memref<9x8x8xbf16, #tpu.memory_space<vmem>>, vector<1x8x8xbf16>
    %612 = vector.shape_cast %611 : vector<1x8x8xbf16> to vector<8x8xbf16>
    %cst_637 = arith.constant dense<0.000000e+00> : vector<72x8xf32>
    %613 = tpu.matmul %610, %612, %cst_637 {dimension_numbers = #tpu.dot_dimension_numbers<[1], [0], [0], [1], [0, 0, 1, 1], [], []>} : vector<72x8xbf16>, vector<8x8xbf16>, vector<72x8xf32> -> vector<72x8xf32>
    %c217_638 = arith.constant 217 : index
    %c0_639 = arith.constant 0 : index
    %614 = vector.load %arg10[%c217_638, %c0_639] : memref<342x8xbf16, #tpu.memory_space<vmem>>, vector<72x8xbf16>
    %c1_640 = arith.constant 1 : index
    %c0_641 = arith.constant 0 : index
    %c0_642 = arith.constant 0 : index
    %615 = vector.load %arg5[%c1_640, %c0_641, %c0_642] : memref<9x8x8xbf16, #tpu.memory_space<vmem>>, vector<1x8x8xbf16>
    %616 = vector.shape_cast %615 : vector<1x8x8xbf16> to vector<8x8xbf16>
    %cst_643 = arith.constant dense<0.000000e+00> : vector<72x8xf32>
    %617 = tpu.matmul %614, %616, %cst_643 {dimension_numbers = #tpu.dot_dimension_numbers<[1], [0], [0], [1], [0, 0, 1, 1], [], []>} : vector<72x8xbf16>, vector<8x8xbf16>, vector<72x8xf32> -> vector<72x8xf32>
    %618 = arith.addf %613, %617 : vector<72x8xf32>
    %c218_644 = arith.constant 218 : index
    %c0_645 = arith.constant 0 : index
    %619 = vector.load %arg10[%c218_644, %c0_645] : memref<342x8xbf16, #tpu.memory_space<vmem>>, vector<72x8xbf16>
    %c2_646 = arith.constant 2 : index
    %c0_647 = arith.constant 0 : index
    %c0_648 = arith.constant 0 : index
    %620 = vector.load %arg5[%c2_646, %c0_647, %c0_648] : memref<9x8x8xbf16, #tpu.memory_space<vmem>>, vector<1x8x8xbf16>
    %621 = vector.shape_cast %620 : vector<1x8x8xbf16> to vector<8x8xbf16>
    %cst_649 = arith.constant dense<0.000000e+00> : vector<72x8xf32>
    %622 = tpu.matmul %619, %621, %cst_649 {dimension_numbers = #tpu.dot_dimension_numbers<[1], [0], [0], [1], [0, 0, 1, 1], [], []>} : vector<72x8xbf16>, vector<8x8xbf16>, vector<72x8xf32> -> vector<72x8xf32>
    %623 = arith.addf %618, %622 : vector<72x8xf32>
    %c234_650 = arith.constant 234 : index
    %c0_651 = arith.constant 0 : index
    %624 = vector.load %arg10[%c234_650, %c0_651] : memref<342x8xbf16, #tpu.memory_space<vmem>>, vector<72x8xbf16>
    %c3_652 = arith.constant 3 : index
    %c0_653 = arith.constant 0 : index
    %c0_654 = arith.constant 0 : index
    %625 = vector.load %arg5[%c3_652, %c0_653, %c0_654] : memref<9x8x8xbf16, #tpu.memory_space<vmem>>, vector<1x8x8xbf16>
    %626 = vector.shape_cast %625 : vector<1x8x8xbf16> to vector<8x8xbf16>
    %cst_655 = arith.constant dense<0.000000e+00> : vector<72x8xf32>
    %627 = tpu.matmul %624, %626, %cst_655 {dimension_numbers = #tpu.dot_dimension_numbers<[1], [0], [0], [1], [0, 0, 1, 1], [], []>} : vector<72x8xbf16>, vector<8x8xbf16>, vector<72x8xf32> -> vector<72x8xf32>
    %628 = arith.addf %623, %627 : vector<72x8xf32>
    %c235_656 = arith.constant 235 : index
    %c0_657 = arith.constant 0 : index
    %629 = vector.load %arg10[%c235_656, %c0_657] : memref<342x8xbf16, #tpu.memory_space<vmem>>, vector<72x8xbf16>
    %c4_658 = arith.constant 4 : index
    %c0_659 = arith.constant 0 : index
    %c0_660 = arith.constant 0 : index
    %630 = vector.load %arg5[%c4_658, %c0_659, %c0_660] : memref<9x8x8xbf16, #tpu.memory_space<vmem>>, vector<1x8x8xbf16>
    %631 = vector.shape_cast %630 : vector<1x8x8xbf16> to vector<8x8xbf16>
    %cst_661 = arith.constant dense<0.000000e+00> : vector<72x8xf32>
    %632 = tpu.matmul %629, %631, %cst_661 {dimension_numbers = #tpu.dot_dimension_numbers<[1], [0], [0], [1], [0, 0, 1, 1], [], []>} : vector<72x8xbf16>, vector<8x8xbf16>, vector<72x8xf32> -> vector<72x8xf32>
    %633 = arith.addf %628, %632 : vector<72x8xf32>
    %c236_662 = arith.constant 236 : index
    %c0_663 = arith.constant 0 : index
    %634 = vector.load %arg10[%c236_662, %c0_663] : memref<342x8xbf16, #tpu.memory_space<vmem>>, vector<72x8xbf16>
    %c5_664 = arith.constant 5 : index
    %c0_665 = arith.constant 0 : index
    %c0_666 = arith.constant 0 : index
    %635 = vector.load %arg5[%c5_664, %c0_665, %c0_666] : memref<9x8x8xbf16, #tpu.memory_space<vmem>>, vector<1x8x8xbf16>
    %636 = vector.shape_cast %635 : vector<1x8x8xbf16> to vector<8x8xbf16>
    %cst_667 = arith.constant dense<0.000000e+00> : vector<72x8xf32>
    %637 = tpu.matmul %634, %636, %cst_667 {dimension_numbers = #tpu.dot_dimension_numbers<[1], [0], [0], [1], [0, 0, 1, 1], [], []>} : vector<72x8xbf16>, vector<8x8xbf16>, vector<72x8xf32> -> vector<72x8xf32>
    %638 = arith.addf %633, %637 : vector<72x8xf32>
    %c252_668 = arith.constant 252 : index
    %c0_669 = arith.constant 0 : index
    %639 = vector.load %arg10[%c252_668, %c0_669] : memref<342x8xbf16, #tpu.memory_space<vmem>>, vector<72x8xbf16>
    %c6_670 = arith.constant 6 : index
    %c0_671 = arith.constant 0 : index
    %c0_672 = arith.constant 0 : index
    %640 = vector.load %arg5[%c6_670, %c0_671, %c0_672] : memref<9x8x8xbf16, #tpu.memory_space<vmem>>, vector<1x8x8xbf16>
    %641 = vector.shape_cast %640 : vector<1x8x8xbf16> to vector<8x8xbf16>
    %cst_673 = arith.constant dense<0.000000e+00> : vector<72x8xf32>
    %642 = tpu.matmul %639, %641, %cst_673 {dimension_numbers = #tpu.dot_dimension_numbers<[1], [0], [0], [1], [0, 0, 1, 1], [], []>} : vector<72x8xbf16>, vector<8x8xbf16>, vector<72x8xf32> -> vector<72x8xf32>
    %643 = arith.addf %638, %642 : vector<72x8xf32>
    %c253_674 = arith.constant 253 : index
    %c0_675 = arith.constant 0 : index
    %644 = vector.load %arg10[%c253_674, %c0_675] : memref<342x8xbf16, #tpu.memory_space<vmem>>, vector<72x8xbf16>
    %c7_676 = arith.constant 7 : index
    %c0_677 = arith.constant 0 : index
    %c0_678 = arith.constant 0 : index
    %645 = vector.load %arg5[%c7_676, %c0_677, %c0_678] : memref<9x8x8xbf16, #tpu.memory_space<vmem>>, vector<1x8x8xbf16>
    %646 = vector.shape_cast %645 : vector<1x8x8xbf16> to vector<8x8xbf16>
    %cst_679 = arith.constant dense<0.000000e+00> : vector<72x8xf32>
    %647 = tpu.matmul %644, %646, %cst_679 {dimension_numbers = #tpu.dot_dimension_numbers<[1], [0], [0], [1], [0, 0, 1, 1], [], []>} : vector<72x8xbf16>, vector<8x8xbf16>, vector<72x8xf32> -> vector<72x8xf32>
    %648 = arith.addf %643, %647 : vector<72x8xf32>
    %c254_680 = arith.constant 254 : index
    %c0_681 = arith.constant 0 : index
    %649 = vector.load %arg10[%c254_680, %c0_681] : memref<342x8xbf16, #tpu.memory_space<vmem>>, vector<72x8xbf16>
    %c8_682 = arith.constant 8 : index
    %c0_683 = arith.constant 0 : index
    %c0_684 = arith.constant 0 : index
    %650 = vector.load %arg5[%c8_682, %c0_683, %c0_684] : memref<9x8x8xbf16, #tpu.memory_space<vmem>>, vector<1x8x8xbf16>
    %651 = vector.shape_cast %650 : vector<1x8x8xbf16> to vector<8x8xbf16>
    %cst_685 = arith.constant dense<0.000000e+00> : vector<72x8xf32>
    %652 = tpu.matmul %649, %651, %cst_685 {dimension_numbers = #tpu.dot_dimension_numbers<[1], [0], [0], [1], [0, 0, 1, 1], [], []>} : vector<72x8xbf16>, vector<8x8xbf16>, vector<72x8xf32> -> vector<72x8xf32>
    %653 = arith.addf %648, %652 : vector<72x8xf32>
    %654 = vector.broadcast %2 : vector<1x8xf32> to vector<72x8xf32>
    %655 = arith.mulf %653, %654 : vector<72x8xf32>
    %656 = vector.broadcast %3 : vector<1x8xf32> to vector<72x8xf32>
    %657 = arith.addf %655, %656 : vector<72x8xf32>
    %658 = vector.extract_strided_slice %657 {offsets = [0, 0], sizes = [16, 8], strides = [1, 1]} : vector<72x8xf32> to vector<16x8xf32>
    %c0_686 = arith.constant 0 : index
    %c12_687 = arith.constant 12 : index
    %c0_688 = arith.constant 0 : index
    %c0_689 = arith.constant 0 : index
    %659 = vector.load %arg1[%c0_686, %c12_687, %c0_688, %c0_689] : memref<1x16x16x8xf32, #tpu.memory_space<vmem>>, vector<1x1x16x8xf32>
    %660 = vector.shape_cast %659 : vector<1x1x16x8xf32> to vector<16x8xf32>
    %661 = arith.addf %658, %660 : vector<16x8xf32>
    %cst_690 = arith.constant 0.000000e+00 : f32
    %662 = vector.broadcast %cst_690 : f32 to vector<16x8xf32>
    %663 = arith.maximumf %661, %662 : vector<16x8xf32>
    %c0_691 = arith.constant 0 : index
    %c12_692 = arith.constant 12 : index
    %c0_693 = arith.constant 0 : index
    %c0_694 = arith.constant 0 : index
    %664 = vector.load %arg8[%c0_691, %c12_692, %c0_693, %c0_694] : memref<1x16x16x8xf32, #tpu.memory_space<vmem>>, vector<1x1x16x8xf32>
    %665 = vector.shape_cast %664 : vector<1x1x16x8xf32> to vector<16x8xf32>
    %666 = vector.shape_cast %663 : vector<16x8xf32> to vector<1x1x16x8xf32>
    tpu.vector_store %arg8[%c0_691, %c12_692, %c0_693, %c0_694], %666 {strides = array<i32>} : memref<1x16x16x8xf32, #tpu.memory_space<vmem>>, vector<1x1x16x8xf32>,
    %667 = vector.extract_strided_slice %657 {offsets = [18, 0], sizes = [16, 8], strides = [1, 1]} : vector<72x8xf32> to vector<16x8xf32>
    %c0_695 = arith.constant 0 : index
    %c13_696 = arith.constant 13 : index
    %c0_697 = arith.constant 0 : index
    %c0_698 = arith.constant 0 : index
    %668 = vector.load %arg1[%c0_695, %c13_696, %c0_697, %c0_698] : memref<1x16x16x8xf32, #tpu.memory_space<vmem>>, vector<1x1x16x8xf32>
    %669 = vector.shape_cast %668 : vector<1x1x16x8xf32> to vector<16x8xf32>
    %670 = arith.addf %667, %669 : vector<16x8xf32>
    %cst_699 = arith.constant 0.000000e+00 : f32
    %671 = vector.broadcast %cst_699 : f32 to vector<16x8xf32>
    %672 = arith.maximumf %670, %671 : vector<16x8xf32>
    %c0_700 = arith.constant 0 : index
    %c13_701 = arith.constant 13 : index
    %c0_702 = arith.constant 0 : index
    %c0_703 = arith.constant 0 : index
    %673 = vector.load %arg8[%c0_700, %c13_701, %c0_702, %c0_703] : memref<1x16x16x8xf32, #tpu.memory_space<vmem>>, vector<1x1x16x8xf32>
    %674 = vector.shape_cast %673 : vector<1x1x16x8xf32> to vector<16x8xf32>
    %675 = vector.shape_cast %672 : vector<16x8xf32> to vector<1x1x16x8xf32>
    tpu.vector_store %arg8[%c0_700, %c13_701, %c0_702, %c0_703], %675 {strides = array<i32>} : memref<1x16x16x8xf32, #tpu.memory_space<vmem>>, vector<1x1x16x8xf32>,
    %676 = vector.extract_strided_slice %657 {offsets = [36, 0], sizes = [16, 8], strides = [1, 1]} : vector<72x8xf32> to vector<16x8xf32>
    %c0_704 = arith.constant 0 : index
    %c14_705 = arith.constant 14 : index
    %c0_706 = arith.constant 0 : index
    %c0_707 = arith.constant 0 : index
    %677 = vector.load %arg1[%c0_704, %c14_705, %c0_706, %c0_707] : memref<1x16x16x8xf32, #tpu.memory_space<vmem>>, vector<1x1x16x8xf32>
    %678 = vector.shape_cast %677 : vector<1x1x16x8xf32> to vector<16x8xf32>
    %679 = arith.addf %676, %678 : vector<16x8xf32>
    %cst_708 = arith.constant 0.000000e+00 : f32
    %680 = vector.broadcast %cst_708 : f32 to vector<16x8xf32>
    %681 = arith.maximumf %679, %680 : vector<16x8xf32>
    %c0_709 = arith.constant 0 : index
    %c14_710 = arith.constant 14 : index
    %c0_711 = arith.constant 0 : index
    %c0_712 = arith.constant 0 : index
    %682 = vector.load %arg8[%c0_709, %c14_710, %c0_711, %c0_712] : memref<1x16x16x8xf32, #tpu.memory_space<vmem>>, vector<1x1x16x8xf32>
    %683 = vector.shape_cast %682 : vector<1x1x16x8xf32> to vector<16x8xf32>
    %684 = vector.shape_cast %681 : vector<16x8xf32> to vector<1x1x16x8xf32>
    tpu.vector_store %arg8[%c0_709, %c14_710, %c0_711, %c0_712], %684 {strides = array<i32>} : memref<1x16x16x8xf32, #tpu.memory_space<vmem>>, vector<1x1x16x8xf32>,
    %685 = vector.extract_strided_slice %657 {offsets = [54, 0], sizes = [16, 8], strides = [1, 1]} : vector<72x8xf32> to vector<16x8xf32>
    %c0_713 = arith.constant 0 : index
    %c15_714 = arith.constant 15 : index
    %c0_715 = arith.constant 0 : index
    %c0_716 = arith.constant 0 : index
    %686 = vector.load %arg1[%c0_713, %c15_714, %c0_715, %c0_716] : memref<1x16x16x8xf32, #tpu.memory_space<vmem>>, vector<1x1x16x8xf32>
    %687 = vector.shape_cast %686 : vector<1x1x16x8xf32> to vector<16x8xf32>
    %688 = arith.addf %685, %687 : vector<16x8xf32>
    %cst_717 = arith.constant 0.000000e+00 : f32
    %689 = vector.broadcast %cst_717 : f32 to vector<16x8xf32>
    %690 = arith.maximumf %688, %689 : vector<16x8xf32>
    %c0_718 = arith.constant 0 : index
    %c15_719 = arith.constant 15 : index
    %c0_720 = arith.constant 0 : index
    %c0_721 = arith.constant 0 : index
    %691 = vector.load %arg8[%c0_718, %c15_719, %c0_720, %c0_721] : memref<1x16x16x8xf32, #tpu.memory_space<vmem>>, vector<1x1x16x8xf32>
    %692 = vector.shape_cast %691 : vector<1x1x16x8xf32> to vector<16x8xf32>
    %693 = vector.shape_cast %690 : vector<16x8xf32> to vector<1x1x16x8xf32>
    tpu.vector_store %arg8[%c0_718, %c15_719, %c0_720, %c0_721], %693 {strides = array<i32>} : memref<1x16x16x8xf32, #tpu.memory_space<vmem>>, vector<1x1x16x8xf32>,
    return
  }
  func.func @transform_0(%arg0: i32) -> (i32, i32, i32, i32) {
    %c0_i32 = arith.constant 0 : i32
    %c0_i32_0 = arith.constant 0 : i32
    %c0_i32_1 = arith.constant 0 : i32
    %c0_i32_2 = arith.constant 0 : i32
    return %arg0, %c0_i32, %c0_i32_0, %c0_i32_1 : i32, i32, i32, i32
  }
  func.func @transform_1(%arg0: i32) -> (i32, i32, i32) {
    %c0_i32 = arith.constant 0 : i32
    %c0_i32_0 = arith.constant 0 : i32
    %c0_i32_1 = arith.constant 0 : i32
    %c0_i32_2 = arith.constant 0 : i32
    return %c0_i32, %c0_i32_0, %c0_i32_1 : i32, i32, i32
  }
  func.func @transform_2(%arg0: i32) -> (i32, i32) {
    %c0_i32 = arith.constant 0 : i32
    %c0_i32_0 = arith.constant 0 : i32
    %c0_i32_1 = arith.constant 0 : i32
    return %c0_i32, %c0_i32_0 : i32, i32
  }
  func.func @transform_3(%arg0: i32) -> (i32, i32) {
    %c0_i32 = arith.constant 0 : i32
    %c0_i32_0 = arith.constant 0 : i32
    %c0_i32_1 = arith.constant 0 : i32
    return %c0_i32, %c0_i32_0 : i32, i32
  }
  func.func @transform_4(%arg0: i32) -> (i32, i32, i32) {
    %c0_i32 = arith.constant 0 : i32
    %c0_i32_0 = arith.constant 0 : i32
    %c0_i32_1 = arith.constant 0 : i32
    %c0_i32_2 = arith.constant 0 : i32
    return %c0_i32, %c0_i32_0, %c0_i32_1 : i32, i32, i32
  }
  func.func @transform_5(%arg0: i32) -> (i32, i32) {
    %c0_i32 = arith.constant 0 : i32
    %c0_i32_0 = arith.constant 0 : i32
    %c0_i32_1 = arith.constant 0 : i32
    return %c0_i32, %c0_i32_0 : i32, i32
  }
  func.func @transform_6(%arg0: i32) -> (i32, i32) {
    %c0_i32 = arith.constant 0 : i32
    %c0_i32_0 = arith.constant 0 : i32
    %c0_i32_1 = arith.constant 0 : i32
    return %c0_i32, %c0_i32_0 : i32, i32
  }
  func.func @transform_7(%arg0: i32) -> (i32, i32, i32, i32) {
    %c0_i32 = arith.constant 0 : i32
    %c0_i32_0 = arith.constant 0 : i32
    %c0_i32_1 = arith.constant 0 : i32
    %c0_i32_2 = arith.constant 0 : i32
    return %arg0, %c0_i32, %c0_i32_0, %c0_i32_1 : i32, i32, i32, i32
  }
}

</mosaic_0001>

<bundles_post_ra>
// kernel: basic_block_pallas.1
= control target key start
LH: loop header
LB: loop body
LE: loop exit
PB: predicated region body
PF: predicated region fallthrough
CT: control target
= control target key end

     0   :  { %s16156_s24 = smov 0   ;;  %s19812_s0 = inlined_call_operand.vmem [shape: f32[2,16,16,8], index: 0, kind: input, shape index: {}]   ;;  %s19813_s1 = inlined_call_operand.vmem [shape: bf16[9,8,8], index: 1, kind: input, shape index: {}]   ;;  %s19814_s2 = inlined_call_operand.vmem [shape: f32[1,8], index: 2, kind: input, shape index: {}]   ;;  %s19815_s3 = inlined_call_operand.vmem [shape: f32[1,8], index: 3, kind: input, shape index: {}]   ;;  %s19816_s4 = inlined_call_operand.vmem [shape: bf16[9,8,8], index: 4, kind: input, shape index: {}]   ;;  %s19817_s5 = inlined_call_operand.vmem [shape: f32[1,8], index: 5, kind: input, shape index: {}]   ;;  %s19818_s6 = inlined_call_operand.vmem [shape: f32[1,8], index: 6, kind: input, shape index: {}]   ;;  %s19819_s7 = inlined_call_operand.vmem [shape: f32[2,16,16,8], index: 7, kind: output, shape index: {}]  }
   0x1 LB: > { %s11760_s25 = sadd.s32 4294967295, %s16111_s24   ;;  %p11764_p0 = scmp.ge.s32.totalorder %s16111_s24, 1  ;;  %s16111_s24 = sphi %s16156_s24, %s17_s24  }
   0x2   : > { %p237_p1 = scmp.lt.s32.totalorder %s16111_s24, 3 }
   0x4   : > { %p238_p2 = pnand %p11764_p0, %p237_p1 }
   0x6   : > { %241 = sbr.rel (%p238_p2) target bundleno = 1773 (0x6ed), region = 48 }
   0xd   : > { %v11831_v0 = vld [vmem:[%s19813_s1 + $0x4] sm:$0xf]  ;;  %vm19820_vm0 = vcmask 1043456   ;;  %p269_p3 = scmp.lt.s32.totalorder %s11760_s25, 1  ;;  %v19857_v1 = vmov 0.0   ;;  %vm19821_vm1 = vmmov 0  }
   0xe   : > { %13055 = vmatprep.subr.bf16.mxu0 %v19857_v1  ;;  %v1103_v2 = vsel %vm19820_vm0, %v11831_v0, 0  ;;  %13057 = vmatprep.mubr.msk.bf16.mxu0 %vm19821_vm1, %v19857_v1  ;;  %vm19829_vm2 = vcmask 60416   ;;  %vm19823_vm3 = vcmask 58368   ;;  %v290_v3 = vld [vmem:[#allocation2 + $0x8] sm:$0x3]  ;;  %v16115_v4 = vmov 0  }
   0xf   : > { %13056 = vmatpush3.bf16.msra.mxu0 %v1103_v2  ;;  %s20525_s25 = smov (!%p269_p3, %s11760_s25), 1  ;;  %285 = vst.msk [vmem:[#allocation2] sm:$0xf] %vm19829_vm2, %v16115_v4  ;;  %286 = vst.msk [vmem:[#allocation2 + $0x4] sm:$0xf] %vm19829_vm2, %v16115_v4  ;;  %13253 = vmatprep.subr.bf16.mxu1 %v19857_v1  ;;  %vm461_vm6 = vcmask 57344  }
  0x10   : > { %vm288_vm4 = vsmask.f32 1280  ;;  %299 = vst.msk [vmem:[#allocation2 + $0x9c] sm:$0xf] %vm19829_vm2, %v16115_v4  ;;  %300 = vst.msk [vmem:[#allocation2 + $0xa0] sm:$0xf] %vm19829_vm2, %v16115_v4  ;;  %13077 = vmatprep.subr.bf16.mxu0 %v19857_v1  ;;  %13255 = vmatprep.mubr.msk.bf16.mxu1 %vm19821_vm1, %v19857_v1 }
  0x11   : > { %304 = vst.msk [vmem:[#allocation3] sm:$0xf] %vm19829_vm2, %v16115_v4  ;;  %305 = vst.msk [vmem:[#allocation3 + $0x4] sm:$0xf] %vm19829_vm2, %v16115_v4  ;;  %s12545_s28 = sshll.u32 %s20525_s25, 8  ;;  %vm293_vm7 = vcmask 60417  }
  0x12   : > { %312 = vst.msk [vmem:[#allocation3 + $0x9c] sm:$0xf] %vm19829_vm2, %v16115_v4  ;;  %313 = vst.msk [vmem:[#allocation3 + $0xa0] sm:$0xf] %vm19829_vm2, %v16115_v4  ;;  %v11918_v7 = vld [vmem:[%s19813_s1 + $0x4] sm:$0xf]  ;;  %s16202_s10 = scalar_lea.vmem %s19812_s0, %s12545_s28  ;;  %s19328_s18 = scalar_lea.vmem %s19819_s7, %s12545_s28 }
  0x13   : > { %vm16185_vm5 = vmand %vm19823_vm3, %vm288_vm4  ;;  %v2525_v8 = vsel %vm19820_vm0, %v11918_v7, 0  ;;  %vm462_vm8 = vsmask.f32 256  ;;  %v464_v9 = vld [vmem:[#allocation2 + $0x24] sm:$0x1]  ;;  %v317_v11 = vld [vmem:[%s16202_s10 + $0x8] sm:$0xff] }
  0x14   : > { %v291_v6 = vsel %vm16185_vm5, 0, %v290_v3  ;;  %vm294_vm9 = vsmask.f32 7942  ;;  %v316_v10 = vld [vmem:[%s16202_s10] sm:$0xff]  ;;  %vm324_vm10 = vsmask.f32 5392  ;;  %13254 = vmatpush3.bf16.msra.mxu1 %v2525_v8  ;;  %vm16209_vm11 = vmand %vm461_vm6, %vm462_vm8  ;;  %v12548_v14 = vpack.c.bf16 %v317_v11, %v317_v11 }
  0x15   : > { %292 = vst [vmem:[#allocation2 + $0x8] sm:$0x3] %v291_v6  ;;  %v12547_v13 = vpack.c.bf16 %v316_v10, %v316_v10  ;;  %v465_v15 = vsel %vm16209_vm11, 0, %v464_v9  ;;  %v11779_v16 = vld [vmem:[%s16202_s10 + $0x30] sm:$0xff]  ;;  %v11780_v17 = vld [vmem:[%s16202_s10 + $0x38] sm:$0xff]  ;;  %13275 = vmatprep.subr.bf16.mxu1 %v19857_v1  ;;  %v11783_v21 = vld [vmem:[%s16202_s10 + $0x40] sm:$0xff] }
  0x16   : > { %vm476_vm12 = vsmask.f32 4368  ;;  %v1016_v18 = vld [vmem:[%s19813_s1] sm:$0xf]  ;;  %466 = vst [vmem:[#allocation2 + $0x24] sm:$0x1] %v465_v15  ;;  %v12553_v19 = vpack.c.bf16 %v11779_v16, %v11779_v16  ;;  %v12554_v20 = vpack.c.bf16 %v11780_v17, %v11780_v17  ;;  %vm16226_vm15 = vmand %vm293_vm7, %vm294_vm9  ;;  %v12555_v43 = vpack.c.bf16 %v11783_v21, %v11783_v21 }
  0x17   : > { %vm498_vm13 = vsmask.f32 7938  ;;  %vm302_vm14 = vcmask 59392   ;;  %v327_v22 = vshrl.u32 %v12547_v13, 16  ;;  %v330_v23 = vshll.u32 %v12547_v13, 16  ;;  %v11784_v37 = vld [vmem:[%s16202_s10 + $0x48] sm:$0xff]  ;;  %vm16233_vm6 = vmor %vm288_vm4, %vm324_vm10 }
  0x18   : > { %v336_v24 = vshrl.u32 %v12548_v14, 16  ;;  %v339_v25 = vshll.u32 %v12548_v14, 16  ;;  %v1007_v26 = vld [vmem:[#allocation2] sm:$0xf]  ;;  %v16222_v27 = vld [vmem:[#allocation2 + $0x4] sm:$0xf]  ;;  %vm16245_vm7 = vmand %vm19829_vm2, %vm498_vm13  ;;  %v12556_v47 = vpack.c.bf16 %v11784_v37, %v11784_v37 }
  0x19   : > { %v479_v28 = vshrl.u32 %v12553_v19, 16  ;;  %v482_v29 = vshll.u32 %v12553_v19, 16  ;;  %v487_v30 = vshrl.u32 %v12554_v20, 16  ;;  %v490_v31 = vshll.u32 %v12554_v20, 16  ;;  %vm16251_vm4 = vmor %vm462_vm8, %vm476_vm12  ;;  %v504_v52 = vld [vmem:[#allocation2 + $0x2c] sm:$0x1] }
  0x1a   : > { %v329_v33 = vrot.slane %v327_v22, 6  ;;  %v332_v34 = vrot.slane %v330_v23, 7  ;;  %v338_v35 = vrot.slane %v336_v24, 6  ;;  %v341_v36 = vrot.slane %v339_v25, 7  ;;  %v11771_v62 = vld [vmem:[%s16202_s10 + $0x10] sm:$0xff]  ;;  %v11772_v63 = vld [vmem:[%s16202_s10 + $0x18] sm:$0xff] }
  0x1b   : > { %v19865_v38 = vmov 0  ;;  %v16238_v40 = vcombine.low %v1007_v26, %v16222_v27  ;;  %v481_v41 = vrot.slane %v479_v28, 7  ;;  %v489_v42 = vrot.slane %v487_v30, 7  ;;  %v352_v6 = vld [vmem:[#allocation2 + $0x10] sm:$0x3] }
  0x1c   : > { %v19866_v38 = vsel %vm16233_vm6, 4294967295, %v19865_v38  ;;  %v348_v39 = vld [vmem:[#allocation2 + $0x8] sm:$0xe]  ;;  %v333_v44 = vor.u32 %v332_v34, %v329_v33  ;;  %v16241_v45 = vsel %vm19820_vm0, %v1016_v18, 0  ;;  %v19867_v46 = vmov 0  ;;  %v11787_v19 = vld [vmem:[%s16202_s10 + $0x50] sm:$0xff] }
  0x1d   : > { %v19868_v46 = vsel %vm16245_vm7, 4294967295, %v19867_v46  ;;  %v342_v48 = vor.u32 %v341_v36, %v338_v35  ;;  %v484_v50 = vor.u32 %v482_v29, %v481_v41  ;;  %v485_v51 = vrot.slane %v481_v41, 4  ;;  %v500_v57 = vld [vmem:[#allocation2 + $0x24] sm:$0xf]  ;;  %v547_v24 = vld [vmem:[#allocation2 + $0x34] sm:$0x3] }
  0x1e   : > { %vm507_vm9 = vsmask.f32 1282  ;;  %v334_v53 = vrot.slane %v333_v44, 4  ;;  %v349_v54 = vsel %vm16226_vm15, %v333_v44, %v348_v39  ;;  %v492_v55 = vor.u32 %v490_v31, %v489_v42  ;;  %v11788_v29 = vld [vmem:[%s16202_s10 + $0x58] sm:$0xff] }
  0x1f   : > { %v494_v56 = vrot.slane %v489_v42, 4  ;;  %350 = vst [vmem:[#allocation2 + $0x8] sm:$0xe] %v349_v54  ;;  %v1049_v58 = vshll.u32 %v16238_v40, 16  ;;  %v501_v59 = vsel %vm16245_vm7, %v484_v50, %v500_v57  ;;  %v522_v60 = vshrl.u32 %v12555_v43, 16  ;;  %vm16280_vm1 = vmand %vm19823_vm3, %vm507_vm9 }
  0x20   : > { %v525_v61 = vshll.u32 %v12555_v43, 16  ;;  %vm355_vm8 = vcmask 59393   ;;  %v343_v0 = vsel %vm16233_vm6, %v334_v53, %v342_v48  ;;  %v493_v2 = vsel %vm16251_vm4, %v485_v51, %v492_v55  ;;  %502 = vst [vmem:[#allocation2 + $0x24] sm:$0xf] %v501_v59 }
  0x21   : > { %v505_v3 = vsel %vm16209_vm11, %v494_v56, %v504_v52  ;;  %v531_v4 = vshrl.u32 %v12556_v47, 16  ;;  %351 = vst.msk [vmem:[#allocation2 + $0xc] sm:$0xf] %vm19829_vm2, %v343_v0  ;;  %503 = vst.msk [vmem:[#allocation2 + $0x28] sm:$0xf] %vm19829_vm2, %v493_v2  ;;  %v524_v7 = vrot.slane %v522_v60, 6  ;;  %v12549_v13 = vpack.c.bf16 %v11771_v62, %v11771_v62 }
  0x22   : > { %506 = vst [vmem:[#allocation2 + $0x2c] sm:$0x1] %v505_v3  ;;  %v527_v8 = vrot.slane %v525_v61, 7  ;;  %v534_v9 = vshll.u32 %v12556_v47, 16  ;;  %vm356_vm10 = vsmask.f32 2310  ;;  %v12550_v14 = vpack.c.bf16 %v11772_v63, %v11772_v63 }
  0x23   : > { %v533_v10 = vrot.slane %v531_v4, 6  ;;  %v344_v11 = vrot.slane %v342_v48, 4  ;;  %vm19824_vm12 = vsmask.f32 7424  ;;  %v1047_v15 = vshrl.u32 %v16238_v40, 16  ;;  %v11775_v56 = vld [vmem:[%s16202_s10 + $0x20] sm:$0xff]  ;;  %vm16310_vm3 = vmand %vm355_vm8, %vm356_vm10 }
  0x24   : > { %v1051_v16 = vrot.slane %v1049_v58, 1  ;;  %v16271_v17 = vor.u32 %v527_v8, %v524_v7  ;;  %v536_v18 = vrot.slane %v534_v9, 7  ;;  %v374_v21 = vshrl.u32 %v12549_v13, 16  ;;  %v11776_v8 = vld [vmem:[%s16202_s10 + $0x28] sm:$0xff] }
  0x25   : > { %v353_v20 = vsel %vm16185_vm5, %v344_v11, %v352_v6  ;;  %v377_v22 = vshll.u32 %v12549_v13, 16  ;;  %v383_v23 = vshrl.u32 %v12550_v14, 16  ;;  %vm371_vm0 = vsmask.f32 6416 }
  0x26   : > { %v529_v25 = vrot.slane %v16271_v17, 4  ;;  %v537_v26 = vor.u32 %v536_v18, %v533_v10  ;;  %354 = vst [vmem:[#allocation2 + $0x10] sm:$0x3] %v353_v20  ;;  %v386_v28 = vshll.u32 %v12550_v14, 16  ;;  %v19871_v30 = vmov 0  ;;  %v11791_v20 = vld [vmem:[%s16202_s10 + $0x60] sm:$0xff] }
  0x27   : > { %v19872_v30 = vsel %vm16280_vm1, 4294967295, %v19871_v30  ;;  %v376_v31 = vrot.slane %v374_v21, 5  ;;  %v379_v33 = vrot.slane %v377_v22, 6  ;;  %v385_v34 = vrot.slane %v383_v23, 5  ;;  %v2433_v37 = vld [vmem:[#allocation2 + $0x24] sm:$0xf] }
  0x28   : > { %v12557_v35 = vpack.c.bf16 %v11787_v19, %v11787_v19  ;;  %v538_v36 = vsel %vm16233_vm6, %v529_v25, %v537_v26  ;;  %vm370_vm13 = vsmask.f32 2304  ;;  %v388_v39 = vrot.slane %v386_v28, 6  ;;  %v16286_v42 = vld [vmem:[#allocation2 + $0x8] sm:$0xff]  }
  0x29   : > { %v539_v41 = vrot.slane %v537_v26, 4  ;;  %v509_v43 = vld [vmem:[#allocation2 + $0x2c] sm:$0x3]  ;;  %546 = vst.msk [vmem:[#allocation2 + $0x30] sm:$0xf] %vm19829_vm2, %v538_v36  ;;  %v16289_v44 = vor.u32 %v379_v33, %v376_v31  ;;  %v12558_v47 = vpack.c.bf16 %v11788_v29, %v11788_v29  ;;  %v1052_v50 = vor.u32 %v1051_v16, %v1047_v15  ;;  %vm16297_vm9 = vmor %vm370_vm13, %vm371_vm0 }
  0x2a   : > { %v563_v48 = vshrl.u32 %v12557_v35, 16  ;;  %v510_v51 = vsel %vm16280_vm1, 0, %v509_v43  ;;  %v16293_v52 = vld [vmem:[#allocation2 + $0x28] sm:$0xf]  ;;  %v19873_v53 = vmov 0  ;;  %v566_v55 = vshll.u32 %v12557_v35, 16  ;;  %vm16326_vm0 = vmand %vm302_vm14, %vm370_vm13 }
  0x2b   : > { %v19874_v53 = vsel %vm16297_vm9, 4294967295, %v19873_v53  ;;  %v548_v54 = vsel %vm16185_vm5, %v539_v41, %v547_v24  ;;  %v1054_v57 = vshll.u32 %v16286_v42, 16  ;;  %511 = vst [vmem:[#allocation2 + $0x2c] sm:$0x3] %v510_v51  ;;  %v16306_v58 = vcombine.low %v2433_v37, %v16293_v52  ;;  %v404_v16 = vld [vmem:[#allocation2 + $0x18] sm:$0x7] }
  0x2c   : > { %v381_v60 = vrot.slane %v16289_v44, 4  ;;  %v389_v61 = vor.u32 %v388_v39, %v385_v34  ;;  %549 = vst [vmem:[#allocation2 + $0x34] sm:$0x3] %v548_v54  ;;  %v565_v62 = vrot.slane %v563_v48, 5  ;;  %v568_v63 = vrot.slane %v566_v55, 6  ;;  %v11792_v24 = vld [vmem:[%s16202_s10 + $0x68] sm:$0xff] }
  0x2d   : > { %v572_v0 = vshrl.u32 %v12558_v47, 16  ;;  %v575_v2 = vshll.u32 %v12558_v47, 16  ;;  %v16315_v3 = vrot.slane %v1054_v57, 1  ;;  %v2473_v4 = vshll.u32 %v16306_v58, 16  ;;  %v358_v6 = vld [vmem:[#allocation2 + $0x10] sm:$0x6] }
  0x2e   : > { %v390_v7 = vsel %vm16297_vm9, %v381_v60, %v389_v61  ;;  %v12551_v9 = vpack.c.bf16 %v11775_v56, %v11775_v56  ;;  %v359_v10 = vsel %vm16310_vm3, 0, %v358_v6  ;;  %v19877_v11 = vmov 0  ;;  %v588_v36 = vld [vmem:[#allocation2 + $0x3c] sm:$0x7]  ;;  %v635_v43 = vld [vmem:[#allocation2 + $0x48] sm:$0x1] }
  0x2f   : > { %401 = vst.msk [vmem:[#allocation2 + $0x14] sm:$0xf] %vm19829_vm2, %v390_v7  ;;  %v19878_v11 = vsel %vm16326_vm0, 4294967295, %v19877_v11  ;;  %v16330_v13 = vor.u32 %v568_v63, %v565_v62  ;;  %v574_v14 = vrot.slane %v572_v0, 5  ;;  %v577_v15 = vrot.slane %v575_v2, 6  ;;  %v11795_v0 = vld [vmem:[%s16202_s10 + $0x70] sm:$0xff] }
  0x30   : > { %v1057_v18 = vsel %vm19824_vm12, %v1052_v50, %v16315_v3  ;;  %360 = vst [vmem:[#allocation2 + $0x10] sm:$0x6] %v359_v10  ;;  %v391_v19 = vrot.slane %v389_v61, 4  ;;  %vm19879_vm8 = vcmask 64512   ;;  %vm395_vm10 = vcmask 60418  }
  0x31   : > { %13058 = vmatmul.mubr.msk.bf16.vlgmr.msra.gmra.mrb[0].mxu0 %vm19879_vm8, %v1057_v18  ;;  %v570_v21 = vrot.slane %v16330_v13, 4  ;;  %v578_v22 = vor.u32 %v577_v15, %v574_v14  ;;  %v12552_v23 = vpack.c.bf16 %v11776_v8, %v11776_v8  ;;  %v2471_v25 = vshrl.u32 %v16306_v58, 16 }
  0x32   : > { %13078 = vmatpush3.bf16.msra.mxu0 %v16241_v45  ;;  %v2475_v26 = vrot.slane %v2473_v4, 1  ;;  %vm19880_vm14 = vmmov 0   ;;  %vm396_vm13 = vsmask.f32 7946  ;;  %v405_v28 = vsel %vm16326_vm0, %v391_v19, %v404_v16  ;;  %v543_v29 = vld [vmem:[#allocation2 + $0x2c] sm:$0xe] }
  0x33   : > { %13061 = vmatprep.mubr.msk.bf16.mxu0 %vm19880_vm14, %v19857_v1  ;;  %v550_v31 = vld [vmem:[#allocation2 + $0x34] sm:$0x6]  ;;  %v579_v33 = vsel %vm16297_vm9, %v570_v21, %v578_v22  ;;  %406 = vst [vmem:[#allocation2 + $0x18] sm:$0x7] %v405_v28  ;;  %v425_v34 = vshll.u32 %v12551_v9, 16  ;;  %v428_v35 = vshrl.u32 %v12551_v9, 16  ;;  %v12559_v45 = vpack.c.bf16 %v11791_v20, %v11791_v20  ;;  %13099 = vmatprep.subr.bf16.mxu0 %v19857_v1  ;;  %vm16355_vm12 = vmand %vm395_vm10, %vm396_vm13 }
  0x34   : > { %v544_v37 = vsel %vm16226_vm15, %v16271_v17, %v543_v29  ;;  %v551_v39 = vsel %vm16310_vm3, 0, %v550_v31  ;;  %587 = vst.msk [vmem:[#allocation2 + $0x38] sm:$0xf] %vm19829_vm2, %v579_v33  ;;  %vm407_vm8 = vsmask.f32 3338  ;;  %v434_v41 = vshll.u32 %v12552_v23, 16 }
  0x35   : > { %545 = vst [vmem:[#allocation2 + $0x2c] sm:$0xe] %v544_v37  ;;  %v19881_v47 = vmov 0  ;;  %552 = vst [vmem:[#allocation2 + $0x34] sm:$0x6] %v551_v39  ;;  %v16359_v17 = vrot.slane %v425_v34, 5  ;;  %v12560_v54 = vpack.c.bf16 %v11792_v24, %v11792_v24  ;;  %v12561_v19 = vpack.c.bf16 %v11795_v0, %v11795_v0 }
  0x36   : > { %v19882_v47 = vsel %vm16355_vm12, 4294967295, %v19881_v47  ;;  %vm421_vm9 = vsmask.f32 3328  ;;  %vm422_vm6 = vsmask.f32 7440  ;;  %v430_v48 = vrot.slane %v428_v35, 4  ;;  %vm16363_vm2 = vmand %vm395_vm10, %vm407_vm8 }
  0x37   : > { %v436_v50 = vrot.slane %v434_v41, 5  ;;  %v580_v51 = vrot.slane %v578_v22, 4  ;;  %v604_v55 = vshll.u32 %v12559_v45, 16  ;;  %v398_v56 = vld [vmem:[#allocation2 + $0x10] sm:$0xc]  ;;  %v19883_v57 = vmov 0  ;;  %vm16376_vm13 = vmor %vm421_vm9, %vm422_vm6 }
  0x38   : > { %v19884_v57 = vsel %vm16363_vm2, 4294967295, %v19883_v57  ;;  %v431_v60 = vor.u32 %v430_v48, %v16359_v17  ;;  %v607_v61 = vshrl.u32 %v12559_v45, 16  ;;  %v438_v62 = vshrl.u32 %v12552_v23, 16  ;;  %v455_v28 = vld [vmem:[#allocation2 + $0x20] sm:$0xf] }
  0x39   : > { %v636_v63 = vsel %vm16209_vm11, 0, %v635_v43  ;;  %v399_v2 = vsel %vm16355_vm12, %v16289_v44, %v398_v56  ;;  %v19885_v4 = vmov 0  ;;  %v589_v6 = vsel %vm16326_vm0, %v580_v51, %v588_v36  ;;  %v2442_v34 = vld [vmem:[%s19813_s1] sm:$0xf]  ;;  %v2686_v41 = vld [vmem:[#allocation2 + $0x24] sm:$0xe] }
  0x3a   : > { %v19886_v4 = vsel %vm16376_vm13, 4294967295, %v19885_v4  ;;  %v16382_v7 = vrot.slane %v604_v55, 5  ;;  %v613_v8 = vshll.u32 %v12560_v54, 16  ;;  %637 = vst [vmem:[#allocation2 + $0x48] sm:$0x1] %v636_v63  ;;  %v432_v9 = vrot.slane %v431_v60, 4 }
  0x3b   : > { %400 = vst [vmem:[#allocation2 + $0x10] sm:$0xc] %v399_v2  ;;  %590 = vst [vmem:[#allocation2 + $0x3c] sm:$0x7] %v589_v6  ;;  %v609_v10 = vrot.slane %v607_v61, 4  ;;  %v440_v14 = vrot.slane %v438_v62, 4  ;;  %v2476_v31 = vor.u32 %v2475_v26, %v2471_v25  ;;  %v11936_v61 = vcombine.low %v2686_v41, %v16293_v52 }
  0x3c   : > { %v617_v15 = vshrl.u32 %v12560_v54, 16  ;;  %v1058_v44 = vshrl.u32 %v16286_v42, 16  ;;  %v409_v16 = vld [vmem:[#allocation2 + $0x18] sm:$0xc]  ;;  %v615_v18 = vrot.slane %v613_v8, 5  ;;  %v437_v21 = vsel %vm16376_vm13, %v432_v9, %v436_v50  ;;  %v16396_v29 = vld [vmem:[#allocation2 + $0x2c] sm:$0xff]  }
  0x3d   : > { %v410_v20 = vsel %vm16363_vm2, 0, %v409_v16  ;;  %vm19887_vm10 = vcmask 60416   ;;  %v19888_v22 = vmov 0  ;;  %v610_v23 = vor.u32 %v609_v10, %v16382_v7  ;;  %v584_v33 = vld [vmem:[#allocation2 + $0x34] sm:$0xc] }
  0x3e   : > { %vm16391_vm8 = vmand %vm19887_vm10, %vm421_vm9  ;;  %v441_v24 = vor.u32 %v440_v14, %v436_v50  ;;  %411 = vst [vmem:[#allocation2 + $0x18] sm:$0xc] %v410_v20  ;;  %v619_v35 = vrot.slane %v617_v15, 4  ;;  %v585_v36 = vsel %vm16355_vm12, %v16330_v13, %v584_v33  ;;  %v648_v39 = vshrl.u32 %v12561_v19, 16  ;;  %v629_v26 = vld [vmem:[#allocation2 + $0x44] sm:$0xf] }
  0x3f   : > { %v19889_v22 = vsel %vm16391_vm8, 4294967295, %v19888_v22  ;;  %vm19890_vm6 = vmmov %vm19887_vm10  ;;  %v611_v45 = vrot.slane %v610_v23, 4  ;;  %v2478_v43 = vshll.u32 %v16396_v29, 16  ;;  %586 = vst [vmem:[#allocation2 + $0x34] sm:$0xc] %v585_v36  ;;  %v651_v48 = vshll.u32 %v12561_v19, 16 }
  0x40   : > { %452 = vst.msk [vmem:[#allocation2 + $0x1c] sm:$0xf] %vm19890_vm6, %v437_v21  ;;  %v442_v37 = vrot.slane %v441_v24, 4  ;;  %vm447_vm9 = vsmask.f32 7950  ;;  %v620_v25 = vor.u32 %v619_v35, %v615_v18  ;;  %v16410_v54 = vrot.slane %v648_v39, 7 }
  0x41   : > { %v616_v50 = vsel %vm16376_vm13, %v611_v45, %v615_v18  ;;  %v667_v13 = vld [vmem:[#allocation2 + $0x48] sm:$0xf]  ;;  %v2480_v55 = vrot.slane %v2478_v43, 1  ;;  %vm19891_vm10 = vcmask 60419   ;;  %v19892_v62 = vmov 0  ;;  %v11796_v18 = vld [vmem:[%s16202_s10 + $0x78] sm:$0xff] }
  0x42   : > { %v456_v51 = vsel %vm16391_vm8, %v442_v37, %v455_v28  ;;  %v16412_v56 = vld [vmem:[#allocation2 + $0x10] sm:$0xff]   ;;  %v591_v60 = vld [vmem:[#allocation2 + $0x3c] sm:$0xc]  ;;  %628 = vst.msk [vmem:[#allocation2 + $0x40] sm:$0xf] %vm19890_vm6, %v616_v50  ;;  %vm16417_vm0 = vmand %vm19891_vm10, %vm447_vm9  ;;  %vm19894_vm13 = vcmask 1043456   ;;  %v653_v6 = vor.u32 %v651_v48, %v16410_v54  ;;  %v1060_v9 = vor.u32 %v1058_v44, %v16315_v3 }
  0x43   : > { %457 = vst [vmem:[#allocation2 + $0x20] sm:$0xf] %v456_v51  ;;  %v19893_v62 = vsel %vm16417_vm0, 4294967295, %v19892_v62  ;;  %v2612_v63 = vsel %vm19894_vm13, %v2442_v34, 0  ;;  %v592_v0 = vsel %vm16363_vm2, 0, %v591_v60  ;;  %v621_v2 = vrot.slane %v620_v25, 4 }
  0x44   : > { %vm19895_vm12 = vsmask.f32 7424  ;;  %v1062_v10 = vshll.u32 %v16412_v56, 16  ;;  %593 = vst [vmem:[#allocation2 + $0x3c] sm:$0xc] %v592_v0  ;;  %vm19896_vm6 = vcmask 64512   ;;  %v668_v16 = vsel %vm16245_vm7, %v653_v6, %v667_v13 }
  0x45   : > { %v2481_v8 = vsel %vm19895_vm12, %v2476_v31, %v2480_v55  ;;  %v2482_v52 = vshrl.u32 %v16396_v29, 16  ;;  %v449_v14 = vld [vmem:[#allocation2 + $0x18] sm:$0x8]  ;;  %v630_v15 = vsel %vm16391_vm8, %v621_v2, %v629_v26  ;;  %669 = vst [vmem:[#allocation2 + $0x48] sm:$0xf] %v668_v16  ;;  %v2691_v44 = vrot.slane %v11936_v61, 1  ;;  %vm19898_vm9 = vmmov %vm19896_vm6 }
  0x46   : > { %13256 = vmatmul.mubr.msk.bf16.vlgmr.msra.gmra.mrb[0].mxu1 %vm19896_vm6, %v2481_v8  ;;  %v1064_v19 = vrot.slane %v1062_v10, 1  ;;  %v450_v3 = vsel %vm16417_vm0, %v16359_v17, %v449_v14  ;;  %631 = vst [vmem:[#allocation2 + $0x44] sm:$0xf] %v630_v15  ;;  %v2692_v20 = vrot.slane %v16396_v29, 1  ;;  %v16441_v21 = vld [vmem:[#allocation2 + $0x34] sm:$0xff]   ;;  %vm19836_vm12 = vcmask 1046528  }
  0x47   : > { %13259 = vmatprep.mubr.msk.bf16.mxu1 %vm19880_vm14, %v19857_v1  ;;  %13276 = vmatpush3.bf16.msra.mxu1 %v2612_v63  ;;  %451 = vst [vmem:[#allocation2 + $0x18] sm:$0x8] %v450_v3  ;;  %vm19897_vm13 = vsmask.f32 7424  ;;  %v12562_v28 = vpack.c.bf16 %v11796_v18, %v11796_v18  ;;  %v2484_v17 = vor.u32 %v2482_v52, %v2480_v55  ;;  %v2486_v31 = vshll.u32 %v16441_v21, 16 }
  0x48   : > { %13297 = vmatprep.subr.bf16.mxu1 %v19857_v1  ;;  %v1065_v23 = vsel %vm19897_vm13, %v1060_v9, %v1064_v19  ;;  %v16446_v24 = vsel %vm19836_vm12, %v2691_v44, %v2692_v20  ;;  %v2694_v35 = vrot.slane %v16441_v21, 1  ;;  %v1066_v45 = vshrl.u32 %v16412_v56, 16  ;;  %vm19899_vm10 = vmmov %vm19897_vm13  ;;  %v1017_v60 = vld [vmem:[#allocation2 + $0x24] sm:$0x1] }
  0x49   : > { %13062 = vmatmul.mubr.msk.bf16.gmra.mrb[4].mxu0 %vm19898_vm9, %v1065_v23  ;;  %v2488_v36 = vrot.slane %v2486_v31, 1  ;;  %v656_v43 = vshrl.u32 %v12562_v28, 16  ;;  %v659_v48 = vshll.u32 %v12562_v28, 16  ;;  %v654_v63 = vrot.slane %v16410_v54, 4  ;;  %vm19900_vm13 = vmmov %vm19899_vm10 }
  0x4a   : > { %v458_v33 = vld [vmem:[#allocation2 + $0x20] sm:$0x8]  ;;  %13065 = vmatprep.mubr.msk.bf16.mxu0 %vm19880_vm14, %v19857_v1  ;;  %v16460_v41 = vsel %vm19836_vm12, %v2692_v20, %v2694_v35  ;;  %v1068_v13 = vor.u32 %v1066_v45, %v1064_v19  ;;  %v2490_v2 = vshrl.u32 %v16441_v21, 16  ;;  %vm19901_vm9 = vmmov %vm19896_vm6 }
  0x4b   : > { %v459_v34 = vsel %vm16417_vm0, 0, %v458_v33  ;;  %v625_v37 = vld [vmem:[#allocation2 + $0x3c] sm:$0x8]  ;;  %v2489_v25 = vsel %vm19899_vm10, %v2484_v17, %v2488_v36  ;;  %v658_v0 = vrot.slane %v656_v43, 7  ;;  %vm19902_vm10 = vcmask 60416  }
  0x4c   : > { %460 = vst [vmem:[#allocation2 + $0x20] sm:$0x8] %v459_v34  ;;  %v626_v39 = vsel %vm16417_vm0, %v16382_v7, %v625_v37  ;;  %v1274_v7 = vrot.slane %v16412_v56, 1  ;;  %v2443_v15 = vld [vmem:[#allocation2 + $0x48] sm:$0x1]  ;;  %v2492_v44 = vor.u32 %v2490_v2, %v2488_v36 }
  0x4d   : > { %627 = vst [vmem:[#allocation2 + $0x3c] sm:$0x8] %v626_v39  ;;  %v632_v26 = vld [vmem:[#allocation2 + $0x44] sm:$0x8]  ;;  %v661_v52 = vor.u32 %v659_v48, %v658_v0  ;;  %v671_v48 = vld [vmem:[#allocation2 + $0x50] sm:$0x1] }
  0x4e   : > { %13260 = vmatmul.mubr.msk.bf16.gmra.mrb[4].mxu1 %vm19896_vm6, %v2489_v25  ;;  %v16464_v50 = vld [vmem:[#allocation2 + $0x18] sm:$0xff]   ;;  %v633_v51 = vsel %vm16417_vm0, 0, %v632_v26  ;;  %vm19903_vm6 = vmmov %vm19900_vm13 }
  0x4f   : > { %13263 = vmatprep.mubr.msk.bf16.mxu1 %vm19880_vm14, %v19857_v1  ;;  %634 = vst [vmem:[#allocation2 + $0x44] sm:$0x8] %v633_v51  ;;  %v1070_v55 = vshll.u32 %v16464_v50, 16  ;;  %v1276_v61 = vrot.slane %v16464_v50, 1  ;;  %v1074_v9 = vshrl.u32 %v16464_v50, 16  ;;  %v662_v18 = vsel %vm16251_vm4, %v654_v63, %v661_v52 }
  0x50   : > { %670 = vst.msk [vmem:[#allocation2 + $0x4c] sm:$0xf] %vm19902_vm10, %v662_v18  ;;  %vm19905_vm10 = vmmov %vm19901_vm9 }
  0x51   : > { %v1072_v6 = vrot.slane %v1070_v55, 1  ;;  %v16481_v10 = vsel %vm19836_vm12, %v1274_v7, %v1276_v61  ;;  %v663_v55 = vrot.slane %v658_v0, 4 }
  0x53   : > { %v16475_v8 = vld [vmem:[#allocation2 + $0x20] sm:$0xf]  ;;  %v1073_v54 = vsel %vm19900_vm13, %v1068_v13, %v1072_v6  ;;  %v1076_v23 = vor.u32 %v1074_v9, %v1072_v6  ;;  %vm19904_vm13 = vmmov %vm19903_vm6  ;;  %v672_v63 = vsel %vm16209_vm11, %v663_v55, %v671_v48  ;;  %v16659_v55 = vld [vmem:[#allocation2 + $0x30] sm:$0xf] }
  0x54   : > { %v16484_v14 = vcombine.low %v16475_v8, %v1017_v60  ;;  %v16487_v16 = vld [vmem:[#allocation2 + $0x3c] sm:$0xff]   ;;  %13066 = vmatmul.mubr.msk.bf16.gmra.mrb[8].mxu0 %vm19901_vm9, %v1073_v54  ;;  %673 = vst [vmem:[#allocation2 + $0x50] sm:$0x1] %v672_v63 }
  0x55   : > { %v2494_v20 = vshll.u32 %v16487_v16, 16  ;;  %13069 = vmatprep.mubr.msk.bf16.mxu0 %vm19880_vm14, %v19857_v1  ;;  %v2696_v17 = vrot.slane %v16487_v16, 1  ;;  %v2498_v45 = vshrl.u32 %v16487_v16, 16 }
  0x56   : > { %v1078_v19 = vshll.u32 %v16484_v14, 16  ;;  %v1278_v3 = vrot.slane %v16484_v14, 1  ;;  %v16498_v28 = vld [vmem:[#allocation2 + $0x44] sm:$0xf]  ;;  %v1082_v60 = vshrl.u32 %v16484_v14, 16 }
  0x57   : > { %v16502_v33 = vcombine.low %v16498_v28, %v2443_v15  ;;  %v2496_v36 = vrot.slane %v2494_v20, 1  ;;  %v16511_v37 = vsel %vm19836_vm12, %v2694_v35, %v2696_v17 }
  0x58   : > { %v1080_v31 = vrot.slane %v1078_v19, 1  ;;  %v16507_v34 = vsel %vm19836_vm12, %v1276_v61, %v1278_v3  ;;  %v11799_v61 = vld [vmem:[%s16202_s10 + $0x80] sm:$0xff] }
  0x59   : > { %v2502_v39 = vshll.u32 %v16502_v33, 16  ;;  %v2497_v43 = vsel %vm19903_vm6, %v2492_v44, %v2496_v36  ;;  %v2698_v26 = vrot.slane %v16502_v33, 1  ;;  %v2500_v51 = vor.u32 %v2498_v45, %v2496_v36  ;;  %v11848_v44 = vld [vmem:[%s19813_s1 + $0x8] sm:$0xf] }
  0x5a   : > { %v1081_v25 = vsel %vm19904_vm13, %v1076_v23, %v1080_v31  ;;  %13264 = vmatmul.mubr.msk.bf16.gmra.mrb[8].mxu1 %vm19901_vm9, %v2497_v43  ;;  %v12563_v6 = vpack.c.bf16 %v11799_v61, %v11799_v61  ;;  %v1084_v9 = vor.u32 %v1082_v60, %v1080_v31  ;;  %vm19906_vm13 = vmmov %vm19901_vm9  ;;  %v2506_v0 = vshrl.u32 %v16502_v33, 16  ;;  %v11935_v36 = vld [vmem:[%s19813_s1 + $0x8] sm:$0xf] }
  0x5b   : > { %13267 = vmatprep.mubr.msk.bf16.mxu1 %vm19880_vm14, %v19857_v1  ;;  %v2504_v13 = vrot.slane %v2502_v39, 1  ;;  %v16523_v35 = vsel %vm19836_vm12, %v2696_v17, %v2698_v26  ;;  %v674_v54 = vld [vmem:[#allocation2 + $0x50] sm:$0x3] }
  0x5c   : > { %13070 = vmatmul.mubr.msk.bf16.gmra.mrb[12].mxu0 %vm19905_vm10, %v1081_v25  ;;  %v687_v52 = vshrl.u32 %v12563_v6, 16  ;;  %v690_v15 = vshll.u32 %v12563_v6, 16  ;;  %v675_v19 = vsel %vm16280_vm1, 0, %v674_v54  ;;  %vm19907_vm10 = vmmov %vm19901_vm9  ;;  %v11929_v25 = vcombine.low %v16498_v28, %v16498_v28  ;;  %v712_v54 = vld [vmem:[#allocation2 + $0x58] sm:$0x3] }
  0x5d   : > { %13073 = vmatprep.mubr.msk.bf16.mxu0 %vm19880_vm14, %v19857_v1  ;;  %v2505_v2 = vsel %vm19903_vm6, %v2500_v51, %v2504_v13  ;;  %v2508_v18 = vor.u32 %v2506_v0, %v2504_v13  ;;  %676 = vst [vmem:[#allocation2 + $0x50] sm:$0x3] %v675_v19  ;;  %vm19908_vm6 = vcmask 1043456   ;;  %v2799_v13 = vld [vmem:[#allocation2 + $0x2c] sm:$0xe]  ;;  %v16674_v0 = vld [vmem:[#allocation2 + $0x18] sm:$0xff]  }
  0x5e   : > { %v689_v20 = vrot.slane %v687_v52, 6  ;;  %v692_v23 = vrot.slane %v690_v15, 7  ;;  %v1296_v17 = vsel %vm19908_vm6, %v11848_v44, 0  ;;  %v16669_v14 = vcombine.low %v2799_v13, %v16659_v55 }
  0x5f   : > { %v1419_v33 = vrot.slane %v16674_v0, 1 }
  0x60   : > { %v16549_v31 = vor.u32 %v692_v23, %v689_v20  ;;  %v16695_v23 = vld [vmem:[#allocation2 + $0x3c] sm:$0xff]  }
  0x62   : > { %13268 = vmatmul.mubr.msk.bf16.gmra.mrb[12].mxu1 %vm19906_vm13, %v2505_v2  ;;  %vm19909_vm13 = vmmov %vm19901_vm9  ;;  %v11866_v2 = vld [vmem:[%s19813_s1 + $0x10] sm:$0xf] }
  0x63   : > { %13271 = vmatprep.mubr.msk.bf16.mxu1 %vm19880_vm14, %v19857_v1 }
  0x64   : > { %13074 = vmatmul.mubr.msk.bf16.gmra.mrb[16].mxu0 %vm19901_vm9, %v1084_v9  ;;  %v708_v45 = vld [vmem:[#allocation2 + $0x50] sm:$0xe]  ;;  %vm19910_vm9 = vmmov %vm19908_vm6 }
  0x65   : > { %13079 = vmatprep.mubr.msk.bf16.mxu0 %vm19880_vm14, %v19857_v1  ;;  %v709_v39 = vsel %vm16226_vm15, %v16549_v31, %v708_v45  ;;  %v2716_v43 = vsel %vm19910_vm9, %v11935_v36, 0  ;;  %vm19911_vm6 = vmmov %vm19907_vm10  ;;  %v16699_v45 = vld [vmem:[#allocation2 + $0x20] sm:$0xff]  }
  0x66   : > { %710 = vst [vmem:[#allocation2 + $0x50] sm:$0xe] %v709_v39  ;;  %vm19913_vm9 = vmmov %vm19911_vm6  ;;  %v694_v39 = vrot.slane %v16549_v31, 4  ;;  %v1421_v31 = vrot.slane %v16699_v45, 1 }
  0x6a   : > { %13272 = vmatmul.mubr.msk.bf16.gmra.mrb[16].mxu1 %vm19907_vm10, %v2508_v18  ;;  %v2835_v18 = vrot.slane %v16669_v14, 1 }
  0x6b   : > { %13277 = vmatprep.mubr.msk.bf16.mxu1 %vm19880_vm14, %v19857_v1 }
  0x6c   : > { %13080 = vmatmul.mubr.msk.bf16.vlgmr.msra.gmra.mrb[0].mxu0 %vm19909_vm13, %v16238_v40  ;;  %vm19912_vm13 = vmmov %vm19911_vm6  ;;  %v1264_v40 = vld [vmem:[#allocation2] sm:$0xe] }
  0x6d   : > { %13100 = vmatpush3.bf16.msra.mxu0 %v1296_v17  ;;  %13083 = vmatprep.mubr.msk.bf16.mxu0 %vm19880_vm14, %v19857_v1 }
  0x6e   : > { %13121 = vmatprep.subr.bf16.mxu0 %v19857_v1 }
  0x72   : > { %13278 = vmatmul.mubr.msk.bf16.vlgmr.msra.gmra.mrb[0].mxu1 %vm19907_vm10, %v16306_v58  ;;  %vm19914_vm10 = vmmov %vm19911_vm6  ;;  %v11842_v58 = vcombine.low %v16475_v8, %v16475_v8 }
  0x73   : > { %13281 = vmatprep.mubr.msk.bf16.mxu1 %vm19880_vm14, %v19857_v1  ;;  %13298 = vmatpush3.bf16.msra.mxu1 %v2716_v43  ;;  %v2838_v43 = vrot.slane %v16695_v23, 1 }
  0x74   : > { %13084 = vmatmul.mubr.msk.bf16.gmra.mrb[4].mxu0 %vm19911_vm6, %v16286_v42  ;;  %13319 = vmatprep.subr.bf16.mxu1 %v19857_v1 }
  0x75   : > { %13087 = vmatprep.mubr.msk.bf16.mxu0 %vm19880_vm14, %v19857_v1 }
  0x7a   : > { %13282 = vmatmul.mubr.msk.bf16.gmra.mrb[4].mxu1 %vm19912_vm13, %v16396_v29  ;;  %v11849_v29 = vcombine.low %v1264_v40, %v16222_v27  ;;  %vm19915_vm13 = vmmov %vm19911_vm6  ;;  %v11855_v27 = vld [vmem:[%s19813_s1 + $0xc] sm:$0xf] }
  0x7b   : > { %13285 = vmatprep.mubr.msk.bf16.mxu1 %vm19880_vm14, %v19857_v1 }
  0x7c   : > { %13088 = vmatmul.mubr.msk.bf16.gmra.mrb[8].mxu0 %vm19913_vm9, %v16412_v56  ;;  %vm19916_vm9 = vmmov %vm19911_vm6  ;;  %v1379_v56 = vld [vmem:[#allocation2 + $0x8] sm:$0xe] }
  0x7d   : > { %13091 = vmatprep.mubr.msk.bf16.mxu0 %vm19880_vm14, %v19857_v1 }
  0x82   : > { %13286 = vmatmul.mubr.msk.bf16.gmra.mrb[8].mxu1 %vm19914_vm10, %v16441_v21  ;;  %v1271_v21 = vrot.slane %v11849_v29, 1  ;;  %vm19917_vm10 = vmmov %vm19911_vm6 }
  0x83   : > { %13289 = vmatprep.mubr.msk.bf16.mxu1 %vm19880_vm14, %v19857_v1 }
  0x84   : > { %13092 = vmatmul.mubr.msk.bf16.gmra.mrb[12].mxu0 %vm19911_vm6, %v16464_v50  ;;  %v1272_v50 = vrot.slane %v16286_v42, 1  ;;  %vm19918_vm6 = vcmask 1043456   ;;  %v11942_v42 = vld [vmem:[%s19813_s1 + $0xc] sm:$0xf] }
  0x85   : > { %13095 = vmatprep.mubr.msk.bf16.mxu0 %vm19880_vm14, %v19857_v1 }
  0x86   : > { %v1273_v8 = vsel %vm19836_vm12, %v1271_v21, %v1272_v50  ;;  %v1275_v48 = vsel %vm19836_vm12, %v1272_v50, %v1274_v7  ;;  %v16716_v21 = vld [vmem:[#allocation2 + $0x28] sm:$0xf]  ;;  %v1388_v50 = vld [vmem:[#allocation2 + $0x2c] sm:$0x1] }
  0x8a   : > { %13290 = vmatmul.mubr.msk.bf16.gmra.mrb[12].mxu1 %vm19915_vm13, %v16487_v16  ;;  %v1441_v16 = vsel %vm19918_vm6, %v11855_v27, 0  ;;  %vm19919_vm13 = vmmov %vm19916_vm9  ;;  %v16719_v27 = vld [vmem:[#allocation2 + $0x44] sm:$0xff]  }
  0x8b   : > { %13293 = vmatprep.mubr.msk.bf16.mxu1 %vm19880_vm14, %v19857_v1 }
  0x8c   : > { %13096 = vmatmul.mubr.msk.bf16.gmra.mrb[16].mxu0 %vm19916_vm9, %v11842_v58  ;;  %vm19920_vm9 = vmmov %vm19918_vm6 }
  0x8d   : > { %13101 = vmatprep.mubr.msk.bf16.mxu0 %vm19880_vm14, %v19857_v1  ;;  %v2860_v28 = vsel %vm19920_vm9, %v11942_v42, 0  ;;  %vm19921_vm6 = vmmov %vm19917_vm10  ;;  %v2840_v42 = vrot.slane %v16719_v27, 1 }
  0x8e   : > { %vm19923_vm9 = vmmov %vm19921_vm6 }
  0x92   : > { %13294 = vmatmul.mubr.msk.bf16.gmra.mrb[16].mxu1 %vm19917_vm10, %v11929_v25 }
  0x93   : > { %13299 = vmatprep.mubr.msk.bf16.mxu1 %vm19880_vm14, %v19857_v1 }
  0x94   : > { %13102 = vmatmul.mubr.msk.bf16.vlgmr.msra.gmra.mrb[0].mxu0 %vm19919_vm13, %v1273_v8  ;;  %vm19922_vm13 = vmmov %vm19921_vm6  ;;  %v1422_v8 = vsel %vm19836_vm12, %v1419_v33, %v1421_v31 }
  0x95   : > { %13122 = vmatpush3.bf16.msra.mxu0 %v1441_v16  ;;  %13105 = vmatprep.mubr.msk.bf16.mxu0 %vm19880_vm14, %v19857_v1  ;;  %v11860_v16 = vcombine.low %v16716_v21, %v1388_v50 }
  0x96   : > { %13143 = vmatprep.subr.bf16.mxu0 %v19857_v1 }
  0x9a   : > { %13300 = vmatmul.mubr.msk.bf16.vlgmr.msra.gmra.mrb[0].mxu1 %vm19917_vm10, %v16446_v24  ;;  %vm19924_vm10 = vmmov %vm19921_vm6  ;;  %v16644_v24 = vld [vmem:[#allocation2 + $0xc] sm:$0xf] }
  0x9b   : > { %13303 = vmatprep.mubr.msk.bf16.mxu1 %vm19880_vm14, %v19857_v1  ;;  %13320 = vmatpush3.bf16.msra.mxu1 %v2860_v28  ;;  %v16648_v7 = vcombine.low %v1379_v56, %v16644_v24  ;;  %v16728_v28 = vld [vmem:[#allocation2 + $0x4c] sm:$0xf]  ;;  %v11803_v56 = vld [vmem:[%s16202_s10 + $0x90] sm:$0xff] }
  0x9c   : > { %13106 = vmatmul.mubr.msk.bf16.gmra.mrb[4].mxu0 %vm19921_vm6, %v1275_v48  ;;  %13341 = vmatprep.subr.bf16.mxu1 %v19857_v1  ;;  %v2808_v48 = vld [vmem:[#allocation2 + $0x50] sm:$0x1] }
  0x9d   : > { %13109 = vmatprep.mubr.msk.bf16.mxu0 %vm19880_vm14, %v19857_v1  ;;  %v1416_v60 = vrot.slane %v16648_v7, 1 }
  0xa2   : > { %13304 = vmatmul.mubr.msk.bf16.gmra.mrb[4].mxu1 %vm19922_vm13, %v16460_v41  ;;  %v11800_v41 = vld [vmem:[%s16202_s10 + $0x88] sm:$0xff]  ;;  %vm19925_vm13 = vmmov %vm19921_vm6 }
  0xa3   : > { %13307 = vmatprep.mubr.msk.bf16.mxu1 %vm19880_vm14, %v19857_v1  ;;  %v12564_v51 = vpack.c.bf16 %v11800_v41, %v11800_v41  ;;  %v1423_v41 = vrot.slane %v11860_v16, 1 }
  0xa4   : > { %13110 = vmatmul.mubr.msk.bf16.gmra.mrb[8].mxu0 %vm19923_vm9, %v16481_v10  ;;  %v16650_v10 = vld [vmem:[#allocation2 + $0x10] sm:$0xff]   ;;  %vm19926_vm9 = vmmov %vm19921_vm6 }
  0xa5   : > { %13113 = vmatprep.mubr.msk.bf16.mxu0 %vm19880_vm14, %v19857_v1  ;;  %v1417_v61 = vrot.slane %v16650_v10, 1 }
  0xa7   : > { %v1418_v9 = vsel %vm19836_vm12, %v1416_v60, %v1417_v61  ;;  %v1420_v36 = vsel %vm19836_vm12, %v1417_v61, %v1419_v33  ;;  %v1424_v61 = vsel %vm19836_vm12, %v1421_v31, %v1423_v41  ;;  %v1552_v31 = vshll.u32 %v16674_v0, 16 }
  0xaa   : > { %13308 = vmatmul.mubr.msk.bf16.gmra.mrb[8].mxu1 %vm19924_vm10, %v16511_v37  ;;  %v699_v37 = vshll.u32 %v12564_v51, 16  ;;  %vm19927_vm10 = vmmov %vm19921_vm6 }
  0xab   : > { %13311 = vmatprep.mubr.msk.bf16.mxu1 %vm19880_vm14, %v19857_v1 }
  0xac   : > { %13114 = vmatmul.mubr.msk.bf16.gmra.mrb[12].mxu0 %vm19921_vm6, %v16507_v34  ;;  %v696_v34 = vshrl.u32 %v12564_v51, 16  ;;  %v701_v63 = vrot.slane %v699_v37, 7  ;;  %vm19928_vm6 = vcmask 1043456   ;;  %v12565_v51 = vpack.c.bf16 %v11803_v56, %v11803_v56 }
  0xad   : > { %13117 = vmatprep.mubr.msk.bf16.mxu0 %vm19880_vm14, %v19857_v1  ;;  %v1591_v15 = vsel %vm19928_vm6, %v11866_v2, 0  ;;  %v11947_v37 = vcombine.low %v16728_v28, %v2808_v48  ;;  %v1554_v56 = vrot.slane %v1552_v31, 2 }
  0xae   : > { %v728_v13 = vshrl.u32 %v12565_v51, 16  ;;  %v731_v60 = vshll.u32 %v12565_v51, 16 }
  0xb2   : > { %13312 = vmatmul.mubr.msk.bf16.gmra.mrb[12].mxu1 %vm19925_vm13, %v16523_v35  ;;  %v698_v35 = vrot.slane %v696_v34, 6  ;;  %vm19929_vm13 = vmmov %vm19926_vm9  ;;  %v2841_v34 = vsel %vm19836_vm12, %v2838_v43, %v2840_v42 }
  0xb3   : > { %13315 = vmatprep.mubr.msk.bf16.mxu1 %vm19880_vm14, %v19857_v1 }
  0xb4   : > { %13118 = vmatmul.mubr.msk.bf16.gmra.mrb[16].mxu0 %vm19926_vm9, %v1278_v3  ;;  %v16671_v3 = vld [vmem:[#allocation2 + $0x34] sm:$0xff]   ;;  %v702_v6 = vor.u32 %v701_v63, %v698_v35  ;;  %vm19930_vm9 = vmmov %vm19928_vm6  ;;  %v730_v35 = vrot.slane %v728_v13, 5  ;;  %v733_v63 = vrot.slane %v731_v60, 6  ;;  %v2969_v13 = vshll.u32 %v16695_v23, 16 }
  0xb5   : > { %13123 = vmatprep.mubr.msk.bf16.mxu0 %vm19880_vm14, %v19857_v1  ;;  %v2836_v19 = vrot.slane %v16671_v3, 1  ;;  %vm19931_vm6 = vmmov %vm19927_vm10 }
  0xb6   : > { %v704_v52 = vrot.slane %v702_v6, 4 }
  0xb7   : > { %v2837_v20 = vsel %vm19836_vm12, %v2835_v18, %v2836_v19  ;;  %v2839_v25 = vsel %vm19836_vm12, %v2836_v19, %v2838_v43  ;;  %v1543_v18 = vshll.u32 %v16650_v10, 16  ;;  %v2960_v43 = vshll.u32 %v16671_v3, 16 }
  0xb8   : > { %v713_v44 = vsel %vm16185_vm5, %v704_v52, %v712_v54  ;;  %v1532_v52 = vshrl.u32 %v16648_v7, 16  ;;  %v1540_v54 = vshrl.u32 %v16650_v10, 16 }
  0xb9   : > { %714 = vst [vmem:[#allocation2 + $0x58] sm:$0x3] %v713_v44  ;;  %v2962_v16 = vrot.slane %v2960_v43, 2 }
  0xba   : > { %13316 = vmatmul.mubr.msk.bf16.gmra.mrb[16].mxu1 %vm19927_vm10, %v2698_v26  ;;  %v11953_v26 = vld [vmem:[%s19813_s1 + $0x10] sm:$0xf]  ;;  %v1534_v33 = vrot.slane %v1532_v52, 1 }
  0xbb   : > { %13321 = vmatprep.mubr.msk.bf16.mxu1 %vm19880_vm14, %v19857_v1  ;;  %v3008_v17 = vsel %vm19930_vm9, %v11953_v26, 0  ;;  %vm19933_vm9 = vcmask 60416  }
  0xbc   : > { %13124 = vmatmul.mubr.msk.bf16.vlgmr.msra.gmra.mrb[0].mxu0 %vm19929_vm13, %v1418_v9  ;;  %vm19932_vm13 = vnez %v19866_v38  ;;  %v16739_v9 = vor.u32 %v733_v63, %v730_v35  ;;  %v1561_v35 = vshll.u32 %v16699_v45, 16  ;;  %v11960_v63 = vld [vmem:[%s19813_s1 + $0x14] sm:$0xf]  ;;  %v12313_v38 = vld [vmem:[%s19816_s4 + $0x18] sm:$0xf] }
  0xbd   : > { %13144 = vmatpush3.bf16.msra.mxu0 %v1591_v15  ;;  %13127 = vmatprep.mubr.msk.bf16.mxu0 %vm19880_vm14, %v19857_v1  ;;  %v703_v58 = vsel %vm19932_vm13, %v694_v39, %v702_v6  ;;  %v2842_v6 = vrot.slane %v11947_v37, 1  ;;  %v1535_v15 = vshll.u32 %v16648_v7, 16  ;;  %v2949_v7 = vshrl.u32 %v16669_v14, 16 }
  0xbe   : > { %13165 = vmatprep.subr.bf16.mxu0 %v19857_v1  ;;  %711 = vst.msk [vmem:[#allocation2 + $0x54] sm:$0xf] %vm19933_vm9, %v703_v58  ;;  %vm19935_vm9 = vmmov %vm19931_vm6  ;;  %v2957_v39 = vshrl.u32 %v16671_v3, 16  ;;  %v2966_v37 = vshrl.u32 %v16695_v23, 16 }
  0xbf   : > { %v2843_v44 = vsel %vm19836_vm12, %v2840_v42, %v2842_v6  ;;  %v1537_v26 = vrot.slane %v1535_v15, 2  ;;  %v2951_v50 = vrot.slane %v2949_v7, 1  ;;  %vm19939_vm12 = vcmask 1043456   ;;  %v2943_v7 = vld [vmem:[#allocation2 + $0x50] sm:$0x3] }
  0xc0   : > { %v715_v40 = vld [vmem:[#allocation2 + $0x58] sm:$0x6]  ;;  %v2968_v52 = vrot.slane %v2966_v37, 1  ;;  %v2971_v15 = vrot.slane %v2969_v13, 2  ;;  %v16801_v43 = vcombine.low %v16728_v28, %v2943_v7 }
  0xc1   : > { %v716_v29 = vsel %vm16310_vm3, 0, %v715_v40  ;;  %v1538_v40 = vor.u32 %v1537_v26, %v1534_v33  ;;  %v1563_v33 = vrot.slane %v1561_v35, 2  ;;  %v1682_v35 = vrot.slane %v16650_v10, 2 }
  0xc2   : > { %13322 = vmatmul.mubr.msk.bf16.vlgmr.msra.gmra.mrb[0].mxu1 %vm19927_vm10, %v2837_v20  ;;  %717 = vst [vmem:[#allocation2 + $0x58] sm:$0x6] %v716_v29  ;;  %vm19934_vm10 = vmmov %vm19931_vm6  ;;  %v1542_v20 = vrot.slane %v1540_v54, 1  ;;  %v1549_v29 = vshrl.u32 %v16674_v0, 16  ;;  %v2972_v26 = vor.u32 %v2971_v15, %v2968_v52 }
  0xc3   : > { %13325 = vmatprep.mubr.msk.bf16.mxu1 %vm19880_vm14, %v19857_v1  ;;  %13342 = vmatpush3.bf16.msra.mxu1 %v3008_v17  ;;  %v1545_v17 = vrot.slane %v1543_v18, 2 }
  0xc4   : > { %13128 = vmatmul.mubr.msk.bf16.gmra.mrb[4].mxu0 %vm19931_vm6, %v1420_v36  ;;  %13363 = vmatprep.subr.bf16.mxu1 %v19857_v1  ;;  %v2952_v36 = vshll.u32 %v16669_v14, 16  ;;  %v11873_v14 = vld [vmem:[%s19813_s1 + $0x14] sm:$0xf]  ;;  %v1551_v48 = vrot.slane %v1549_v29, 1 }
  0xc5   : > { %13131 = vmatprep.mubr.msk.bf16.mxu0 %vm19880_vm14, %v19857_v1  ;;  %v1546_v58 = vor.u32 %v1545_v17, %v1542_v20  ;;  %v2975_v20 = vshrl.u32 %v16719_v27, 16  ;;  %v2978_v17 = vshll.u32 %v16719_v27, 16 }
  0xc6   : > { %v1555_v60 = vor.u32 %v1554_v56, %v1551_v48 }
  0xc7   : > { %v2980_v29 = vrot.slane %v2978_v17, 2 }
  0xc9   : > { %v749_v2 = vld [vmem:[#allocation2 + $0x58] sm:$0xc] }
  0xca   : > { %13326 = vmatmul.mubr.msk.bf16.gmra.mrb[4].mxu1 %vm19934_vm10, %v2839_v25  ;;  %vm19936_vm10 = vmmov %vm19931_vm6  ;;  %v2954_v25 = vrot.slane %v2952_v36, 2 }
  0xcb   : > { %13329 = vmatprep.mubr.msk.bf16.mxu1 %vm19880_vm14, %v19857_v1 }
  0xcc   : > { %13132 = vmatmul.mubr.msk.bf16.gmra.mrb[8].mxu0 %vm19931_vm6, %v1422_v8  ;;  %vm19937_vm6 = vnez %v19882_v47  ;;  %v2959_v8 = vrot.slane %v2957_v39, 1  ;;  %v2955_v51 = vor.u32 %v2954_v25, %v2951_v50 }
  0xcd   : > { %13135 = vmatprep.mubr.msk.bf16.mxu0 %vm19880_vm14, %v19857_v1  ;;  %v750_v19 = vsel %vm19937_vm6, %v16739_v9, %v749_v2  ;;  %v1524_v2 = vld [vmem:[#allocation2 + $0x2c] sm:$0x3] }
  0xce   : > { %751 = vst [vmem:[#allocation2 + $0x58] sm:$0xc] %v750_v19  ;;  %v16786_v18 = vcombine.low %v16716_v21, %v1524_v2  ;;  %v11812_v2 = vld [vmem:[%s16202_s10 + $0xb8] sm:$0xff] }
  0xcf   : > { %v16836_v52 = vpack.c.bf16 %v11812_v2, %v11812_v2 }
  0xd0   : > { %v1567_v36 = vshrl.u32 %v16786_v18, 16  ;;  %v1570_v39 = vshll.u32 %v16786_v18, 16 }
  0xd2   : > { %13330 = vmatmul.mubr.msk.bf16.gmra.mrb[8].mxu1 %vm19935_vm9, %v2841_v34  ;;  %v2963_v34 = vor.u32 %v2962_v16, %v2959_v8  ;;  %v1572_v50 = vrot.slane %v1570_v39, 2  ;;  %v2984_v8 = vshrl.u32 %v16801_v43, 16  ;;  %v2987_v16 = vshll.u32 %v16801_v43, 16 }
  0xd3   : > { %13333 = vmatprep.mubr.msk.bf16.mxu1 %vm19880_vm14, %v19857_v1 }
  0xd4   : > { %13136 = vmatmul.mubr.msk.bf16.gmra.mrb[12].mxu0 %vm19936_vm10, %v1424_v61  ;;  %vm19938_vm10 = vmmov %vm19935_vm9  ;;  %v1558_v61 = vshrl.u32 %v16699_v45, 16  ;;  %v2986_v48 = vrot.slane %v2984_v8, 1  ;;  %v2989_v56 = vrot.slane %v2987_v16, 2  ;;  %v1686_v16 = vrot.slane %v16699_v45, 2  ;;  %v877_v45 = vld [vmem:[#allocation2 + $0x7c] sm:$0x3] }
  0xd5   : > { %13139 = vmatprep.mubr.msk.bf16.mxu0 %vm19880_vm14, %v19857_v1  ;;  %vm19940_vm8 = vmmov %vm19938_vm10 }
  0xda   : > { %13334 = vmatmul.mubr.msk.bf16.gmra.mrb[12].mxu1 %vm19935_vm9, %v2843_v44  ;;  %vm19839_vm9 = vsmask.f32 6400  ;;  %v1560_v44 = vrot.slane %v1558_v61, 1 }
  0xdb   : > { %13337 = vmatprep.mubr.msk.bf16.mxu1 %vm19880_vm14, %v19857_v1  ;;  %v1547_v42 = vsel %vm19839_vm9, %v1538_v40, %v1546_v58  ;;  %v1556_v19 = vsel %vm19839_vm9, %v1546_v58, %v1555_v60  ;;  %v2973_v40 = vsel %vm19839_vm9, %v2963_v34, %v2972_v26  ;;  %v2977_v58 = vrot.slane %v2975_v20, 1 }
  0xdc   : > { %13140 = vmatmul.mubr.msk.bf16.gmra.mrb[16].mxu0 %vm19938_vm10, %v1423_v41  ;;  %v1706_v41 = vsel %vm19939_vm12, %v11873_v14, 0  ;;  %v1564_v21 = vor.u32 %v1563_v33, %v1560_v44  ;;  %v1569_v14 = vrot.slane %v1567_v36, 1  ;;  %v11967_v44 = vld [vmem:[%s19813_s1 + $0x18] sm:$0xf] }
  0xdd   : > { %13145 = vmatprep.mubr.msk.bf16.mxu0 %vm19880_vm14, %v19857_v1  ;;  %v2981_v25 = vor.u32 %v2980_v29, %v2977_v58  ;;  %v11804_v36 = vld [vmem:[%s16202_s10 + $0x98] sm:$0xff] }
  0xde   : > { %v1565_v31 = vsel %vm19839_vm9, %v1555_v60, %v1564_v21  ;;  %v1573_v28 = vor.u32 %v1572_v50, %v1569_v14  ;;  %v3091_v60 = vld [vmem:[#allocation2 + $0x2c] sm:$0xc]  ;;  %v12566_v29 = vpack.c.bf16 %v11804_v36, %v11804_v36 }
  0xe0   : > { %v740_v8 = vshll.u32 %v12566_v29, 16 }
  0xe2   : > { %13338 = vmatmul.mubr.msk.bf16.gmra.mrb[16].mxu1 %vm19938_vm10, %v2842_v6  ;;  %v2964_v6 = vsel %vm19839_vm9, %v2955_v51, %v2963_v34  ;;  %v2990_v51 = vor.u32 %v2989_v56, %v2986_v48  ;;  %v1674_v34 = vld [vmem:[#allocation2 + $0x8] sm:$0xc]  ;;  %v742_v48 = vrot.slane %v740_v8, 6  ;;  %v11820_v56 = vld [vmem:[%s16202_s10 + $0xd8] sm:$0xff] }
  0xe3   : > { %13343 = vmatprep.mubr.msk.bf16.mxu1 %vm19880_vm14, %v19857_v1  ;;  %v11874_v13 = vcombine.low %v1674_v34, %v16644_v24  ;;  %v11961_v24 = vcombine.low %v3091_v60, %v16659_v55  ;;  %v1684_v55 = vrot.slane %v16674_v0, 2  ;;  %v11811_v34 = vld [vmem:[%s16202_s10 + $0xb0] sm:$0xff] }
  0xe4   : > { %13146 = vmatmul.mubr.msk.bf16.vlgmr.msra.gmra.mrb[0].mxu0 %vm19940_vm8, %v1547_v42  ;;  %vm19941_vm8 = vmmov %vm19939_vm12  ;;  %v2982_v42 = vsel %vm19839_vm9, %v2972_v26, %v2981_v25  ;;  %v2991_v37 = vsel %vm19839_vm9, %v2981_v25, %v2990_v51  ;;  %v11816_v26 = vld [vmem:[%s16202_s10 + $0xc8] sm:$0xff]  ;;  %v737_v25 = vshrl.u32 %v12566_v29, 16  ;;  %v12569_v60 = vpack.c.bf16 %v11811_v34, %v11811_v34 }
  0xe5   : > { %13166 = vmatpush3.bf16.msra.mxu0 %v1706_v41  ;;  %13149 = vmatprep.mubr.msk.bf16.mxu0 %vm19880_vm14, %v19857_v1  ;;  %v3121_v54 = vsel %vm19941_vm8, %v11960_v63, 0  ;;  %vm19942_vm12 = vmmov %vm19938_vm10  ;;  %v1574_v41 = vsel %vm19839_vm9, %v1564_v21, %v1573_v28  ;;  %v1681_v61 = vrot.slane %v11874_v13, 2  ;;  %v11880_v63 = vld [vmem:[%s19813_s1 + $0x18] sm:$0xf]  ;;  %v3096_v10 = vrot.slane %v11961_v24, 2  ;;  %v11808_v34 = vld [vmem:[%s16202_s10 + $0xa8] sm:$0xff] }
  0xe6   : > { %13187 = vmatprep.subr.bf16.mxu0 %v19857_v1  ;;  %vm19943_vm8 = vmmov %vm19938_vm10  ;;  %v12572_v17 = vpack.c.bf16 %v11816_v26, %v11816_v26  ;;  %v836_v21 = vld [vmem:[#allocation2 + $0x74] sm:$0x1]  ;;  %v12574_v13 = vpack.c.bf16 %v11820_v56, %v11820_v56  ;;  %v753_v26 = vld [vmem:[#allocation2 + $0x60] sm:$0x7]  ;;  %v816_v36 = vshll.u32 %v12569_v60, 16  ;;  %v735_v56 = vrot.slane %v16739_v9, 4 }
  0xe8   : > { %v864_v58 = vshll.u32 %v12572_v17, 16 }
  0xea   : > { %13344 = vmatmul.mubr.msk.bf16.vlgmr.msra.gmra.mrb[0].mxu1 %vm19942_vm12, %v2964_v6  ;;  %vm19944_vm12 = vmmov %vm19943_vm8  ;;  %v866_v50 = vrot.slane %v864_v58, 7 }
  0xeb   : > { %13347 = vmatprep.mubr.msk.bf16.mxu1 %vm19880_vm14, %v19857_v1  ;;  %13364 = vmatpush3.bf16.msra.mxu1 %v3121_v54  ;;  %v3097_v54 = vrot.slane %v16671_v3, 2 }
  0xec   : > { %13150 = vmatmul.mubr.msk.bf16.gmra.mrb[4].mxu0 %vm19938_vm10, %v1556_v19  ;;  %13385 = vmatprep.subr.bf16.mxu1 %v19857_v1  ;;  %vm19945_vm10 = vmmov %vm19943_vm8  ;;  %v821_v19 = vshrl.u32 %v16836_v52, 16 }
  0xed   : > { %13153 = vmatprep.mubr.msk.bf16.mxu0 %vm19880_vm14, %v19857_v1 }
  0xee   : > { %v16851_v33 = vrot.slane %v821_v19, 7  ;;  %v905_v19 = vshll.u32 %v12574_v13, 16 }
  0xf0   : > { %v828_v20 = vrot.slane %v16851_v33, 4  ;;  %v907_v58 = vrot.slane %v905_v19, 6 }
  0xf2   : > { %13348 = vmatmul.mubr.msk.bf16.gmra.mrb[4].mxu1 %vm19943_vm8, %v2973_v40  ;;  %v837_v39 = vsel %vm16209_vm11, %v828_v20, %v836_v21  ;;  %v861_v40 = vshrl.u32 %v12572_v17, 16 }
  0xf3   : > { %13351 = vmatprep.mubr.msk.bf16.mxu1 %vm19880_vm14, %v19857_v1  ;;  %838 = vst [vmem:[#allocation2 + $0x74] sm:$0x1] %v837_v39 }
  0xf4   : > { %13154 = vmatmul.mubr.msk.bf16.gmra.mrb[8].mxu0 %vm19944_vm12, %v1565_v31  ;;  %vm19946_vm12 = vmmov %vm19943_vm8  ;;  %v3099_v31 = vrot.slane %v16695_v23, 2  ;;  %v863_v14 = vrot.slane %v861_v40, 6  ;;  %v739_v23 = vrot.slane %v737_v25, 5 }
  0xf5   : > { %13157 = vmatprep.mubr.msk.bf16.mxu0 %vm19880_vm14, %v19857_v1 }
  0xfa   : > { %13352 = vmatmul.mubr.msk.bf16.gmra.mrb[8].mxu1 %vm19945_vm10, %v2982_v42  ;;  %vm19947_vm10 = vmmov %vm19943_vm8  ;;  %v800_v42 = vld [vmem:[#allocation2 + $0x6c] sm:$0x1]  ;;  %v839_v24 = vld [vmem:[#allocation2 + $0x74] sm:$0x3] }
  0xfb   : > { %13355 = vmatprep.mubr.msk.bf16.mxu1 %vm19880_vm14, %v19857_v1 }
  0xfc   : > { %13158 = vmatmul.mubr.msk.bf16.gmra.mrb[12].mxu0 %vm19943_vm8, %v1574_v41  ;;  %vm19840_vm8 = vcmask 1045504  }
  0xfd   : > { %13161 = vmatprep.mubr.msk.bf16.mxu0 %vm19880_vm14, %v19857_v1  ;;  %v1683_v6 = vsel %vm19840_vm8, %v1681_v61, %v1682_v35  ;;  %v3098_v3 = vsel %vm19840_vm8, %v3096_v10, %v3097_v54  ;;  %v1685_v0 = vsel %vm19840_vm8, %v1682_v35, %v1684_v55  ;;  %v3100_v41 = vsel %vm19840_vm8, %v3097_v54, %v3099_v31  ;;  %v11815_v61 = vld [vmem:[%s16202_s10 + $0xc0] sm:$0xff] }
  0xfe   : > { %v16880_v35 = vor.u32 %v742_v48, %v739_v23  ;;  %v12571_v2 = vpack.c.bf16 %v11815_v61, %v11815_v61  ;;  %v813_v10 = vshrl.u32 %v12569_v60, 16  ;;  %v840_v54 = vsel %vm16280_vm1, 0, %v839_v24  ;;  %v918_v61 = vld [vmem:[#allocation2 + $0x84] sm:$0x7] }
  0xff   : > { %841 = vst [vmem:[#allocation2 + $0x74] sm:$0x3] %v840_v54  ;;  %v12568_v60 = vpack.c.bf16 %v11808_v34, %v11808_v34  ;;  %v16962_v34 = vld [vmem:[#allocation2 + $0x38] sm:$0xf] }
 0x100   : > { %v855_v20 = vshll.u32 %v12571_v2, 16  ;;  %v815_v21 = vrot.slane %v813_v10, 7 }
 0x102   : > { %13356 = vmatmul.mubr.msk.bf16.gmra.mrb[12].mxu1 %vm19946_vm12, %v2991_v37  ;;  %vm19948_vm12 = vmmov %vm19947_vm10  ;;  %v857_v40 = vrot.slane %v855_v20, 7 }
 0x103   : > { %13359 = vmatprep.mubr.msk.bf16.mxu1 %vm19880_vm14, %v19857_v1  ;;  %vm19950_vm9 = vmmov %vm19948_vm12 }
 0x104   : > { %13162 = vmatmul.mubr.msk.bf16.gmra.mrb[16].mxu0 %vm19947_vm10, %v1573_v28  ;;  %vm19949_vm10 = vcmask 1043456   ;;  %v16871_v28 = vor.u32 %v866_v50, %v863_v14  ;;  %v818_v14 = vor.u32 %v816_v36, %v815_v21  ;;  %v819_v50 = vrot.slane %v815_v21, 4 }
 0x105   : > { %13167 = vmatprep.mubr.msk.bf16.mxu0 %vm19880_vm14, %v19857_v1  ;;  %v1851_v15 = vsel %vm19949_vm10, %v11880_v63, 0  ;;  %v1687_v63 = vsel %vm19840_vm8, %v1684_v55, %v1686_v16  ;;  %v3101_v55 = vrot.slane %v16719_v27, 2 }
 0x106   : > { %v869_v37 = vrot.slane %v16871_v28, 4  ;;  %v873_v9 = vld [vmem:[#allocation2 + $0x74] sm:$0xe] }
 0x10a   : > { %13360 = vmatmul.mubr.msk.bf16.gmra.mrb[16].mxu1 %vm19948_vm12, %v2990_v51  ;;  %v801_v51 = vsel %vm16209_vm11, 0, %v800_v42 }
 0x10b   : > { %13365 = vmatprep.mubr.msk.bf16.mxu1 %vm19880_vm14, %v19857_v1  ;;  %802 = vst [vmem:[#allocation2 + $0x6c] sm:$0x1] %v801_v51  ;;  %v11819_v51 = vld [vmem:[%s16202_s10 + $0xd0] sm:$0xff] }
 0x10c   : > { %13168 = vmatmul.mubr.msk.bf16.vlgmr.msra.gmra.mrb[0].mxu0 %vm19950_vm9, %v1683_v6  ;;  %vm19951_vm9 = vmmov %vm19949_vm10  ;;  %v878_v6 = vsel %vm16185_vm5, %v869_v37, %v877_v45  ;;  %v3103_v45 = vrot.slane %v16801_v43, 2 }
 0x10d   : > { %13188 = vmatpush3.bf16.msra.mxu0 %v1851_v15  ;;  %13171 = vmatprep.mubr.msk.bf16.mxu0 %vm19880_vm14, %v19857_v1  ;;  %v3265_v7 = vsel %vm19951_vm9, %v11967_v44, 0  ;;  %vm19952_vm10 = vmmov %vm19948_vm12  ;;  %v902_v15 = vshrl.u32 %v12574_v13, 16  ;;  %879 = vst [vmem:[#allocation2 + $0x7c] sm:$0x3] %v878_v6  ;;  %v745_v44 = vrot.slane %v16880_v35, 4  ;;  %v12573_v13 = vpack.c.bf16 %v11819_v51, %v11819_v51  ;;  %v11807_v6 = vld [vmem:[%s16202_s10 + $0xa0] sm:$0xff] }
 0x10e   : > { %13209 = vmatprep.subr.bf16.mxu0 %v19857_v1  ;;  %vm19953_vm9 = vmmov %vm19952_vm10  ;;  %v12567_v19 = vpack.c.bf16 %v11807_v6, %v11807_v6 }
 0x10f   : > { %v904_v17 = vrot.slane %v902_v15, 5  ;;  %v1789_v15 = vld [vmem:[#allocation2 + $0x10] sm:$0xc]  ;;  %v893_v10 = vshrl.u32 %v12573_v13, 16  ;;  %v896_v54 = vshll.u32 %v12573_v13, 16 }
 0x111   : > { %v16903_v23 = vor.u32 %v907_v58, %v904_v17  ;;  %v782_v17 = vshrl.u32 %v12568_v60, 16  ;;  %v895_v21 = vrot.slane %v893_v10, 5  ;;  %v898_v36 = vrot.slane %v896_v54, 6  ;;  %v11824_v58 = vld [vmem:[%s16202_s10 + $0xe8] sm:$0xff]  ;;  %v16984_v10 = vld [vmem:[#allocation2 + $0x20] sm:$0xff]  }
 0x112   : > { %13366 = vmatmul.mubr.msk.bf16.vlgmr.msra.gmra.mrb[0].mxu1 %vm19948_vm12, %v3098_v3  ;;  %v852_v3 = vshrl.u32 %v12571_v2, 16  ;;  %vm19954_vm12 = vmmov %vm19953_vm9  ;;  %v832_v8 = vld [vmem:[#allocation2 + $0x6c] sm:$0xf]  ;;  %v12576_v27 = vpack.c.bf16 %v11824_v58, %v11824_v58 }
 0x113   : > { %13369 = vmatprep.mubr.msk.bf16.mxu1 %vm19880_vm14, %v19857_v1  ;;  %13386 = vmatpush3.bf16.msra.mxu1 %v3265_v7  ;;  %v1688_v7 = vrot.slane %v16786_v18, 2  ;;  %v11891_v18 = vld [vmem:[%s19813_s1 + $0x1c] sm:$0xf] }
 0x114   : > { %13172 = vmatmul.mubr.msk.bf16.gmra.mrb[4].mxu0 %vm19952_vm10, %v1685_v0  ;;  %13407 = vmatprep.subr.bf16.mxu1 %v19857_v1  ;;  %v824_v0 = vshll.u32 %v16836_v52, 16  ;;  %v854_v39 = vrot.slane %v852_v3, 6  ;;  %vm19955_vm10 = vnez %v19878_v11  ;;  %v3102_v52 = vsel %vm19840_vm8, %v3099_v31, %v3101_v55  ;;  %v880_v37 = vld [vmem:[#allocation2 + $0x7c] sm:$0x6] }
 0x115   : > { %13175 = vmatprep.mubr.msk.bf16.mxu0 %vm19880_vm14, %v19857_v1  ;;  %v754_v29 = vsel %vm19955_vm10, %v745_v44, %v753_v26  ;;  %v1689_v48 = vsel %vm19840_vm8, %v1686_v16, %v1688_v7  ;;  %v910_v16 = vrot.slane %v16903_v23, 4  ;;  %v881_v2 = vsel %vm16310_vm3, 0, %v880_v37 }
 0x116   : > { %v826_v25 = vor.u32 %v824_v0, %v16851_v33  ;;  %755 = vst [vmem:[#allocation2 + $0x60] sm:$0x7] %v754_v29  ;;  %v858_v42 = vor.u32 %v857_v40, %v854_v39  ;;  %v833_v33 = vsel %vm16245_vm7, %v818_v14, %v832_v8  ;;  %882 = vst [vmem:[#allocation2 + $0x7c] sm:$0x6] %v881_v2  ;;  %vm19959_vm8 = vnez %v19874_v53  ;;  %v16979_v2 = vld [vmem:[#allocation2 + $0x3c] sm:$0xff]  }
 0x117   : > { %834 = vst [vmem:[#allocation2 + $0x6c] sm:$0xf] %v833_v33  ;;  %v744_v44 = vsel %vm19959_vm8, %v735_v56, %v16880_v35  ;;  %v778_v3 = vshll.u32 %v12568_v60, 16  ;;  %v919_v20 = vsel %vm19955_vm10, %v910_v16, %v918_v61  ;;  %v769_v39 = vshll.u32 %v12567_v19, 16 }
 0x118   : > { %v859_v31 = vrot.slane %v858_v42, 4  ;;  %v874_v24 = vsel %vm16226_vm15, %v858_v42, %v873_v9  ;;  %920 = vst [vmem:[#allocation2 + $0x84] sm:$0x7] %v919_v20  ;;  %v772_v40 = vshrl.u32 %v12567_v19, 16  ;;  %v899_v14 = vor.u32 %v898_v36, %v895_v21  ;;  %v11823_v42 = vld [vmem:[%s16202_s10 + $0xe0] sm:$0xff]  ;;  %v11827_v21 = vld [vmem:[%s16202_s10 + $0xf0] sm:$0xff] }
 0x119   : > { %875 = vst [vmem:[#allocation2 + $0x74] sm:$0xe] %v874_v24  ;;  %v780_v8 = vrot.slane %v778_v3, 5  ;;  %v12575_v56 = vpack.c.bf16 %v11823_v42, %v11823_v42  ;;  %v943_v61 = vshll.u32 %v12576_v27, 16  ;;  %vm19968_vm10 = vcmask 60416  }
 0x11a   : > { %13370 = vmatmul.mubr.msk.bf16.gmra.mrb[4].mxu1 %vm19953_vm9, %v3100_v41  ;;  %v827_v41 = vsel %vm16251_vm4, %v819_v50, %v826_v25  ;;  %vm19956_vm9 = vcmask 60416   ;;  %v771_v50 = vrot.slane %v769_v39, 5  ;;  %v16952_v25 = vld [vmem:[#allocation2 + $0x18] sm:$0xff]   ;;  %v794_v20 = vld [vmem:[#allocation2 + $0x68] sm:$0xf]  ;;  %v947_v39 = vshrl.u32 %v12576_v27, 16 }
 0x11b   : > { %13373 = vmatprep.mubr.msk.bf16.mxu1 %vm19880_vm14, %v19857_v1  ;;  %835 = vst.msk [vmem:[#allocation2 + $0x70] sm:$0xf] %vm19956_vm9, %v827_v41  ;;  %vm19957_vm9 = vmmov %vm19954_vm12  ;;  %v784_v41 = vrot.slane %v782_v17, 4  ;;  %v934_v13 = vshll.u32 %v12575_v56, 16  ;;  %v1827_v60 = vrot.slane %v16952_v25, 2  ;;  %v945_v36 = vrot.slane %v943_v61, 5 }
 0x11c   : > { %13176 = vmatmul.mubr.msk.bf16.gmra.mrb[8].mxu0 %vm19954_vm12, %v1687_v63  ;;  %v868_v63 = vsel %vm19932_vm13, %v859_v31, %v16871_v28  ;;  %v16933_v28 = vld [vmem:[#allocation2 + $0x14] sm:$0xf]  ;;  %v965_v17 = vld [vmem:[#allocation2 + $0x90] sm:$0x1]  ;;  %v3241_v58 = vrot.slane %v16979_v2, 2 }
 0x11d   : > { %13179 = vmatprep.mubr.msk.bf16.mxu0 %vm19880_vm14, %v19857_v1  ;;  %v756_v26 = vld [vmem:[#allocation2 + $0x60] sm:$0xc]  ;;  %v16950_v29 = vcombine.low %v1789_v15, %v16933_v28  ;;  %v914_v37 = vld [vmem:[#allocation2 + $0x7c] sm:$0xc] }
 0x11e   : > { %v757_v0 = vsel %vm16363_vm2, 0, %v756_v26  ;;  %v915_v16 = vsel %vm19937_vm6, %v899_v14, %v914_v37 }
 0x11f   : > { %758 = vst [vmem:[#allocation2 + $0x60] sm:$0xc] %v757_v0  ;;  %v1826_v51 = vrot.slane %v16950_v29, 2  ;;  %916 = vst [vmem:[#allocation2 + $0x7c] sm:$0xc] %v915_v16 }
 0x122   : > { %13374 = vmatmul.mubr.msk.bf16.gmra.mrb[8].mxu1 %vm19954_vm12, %v3102_v52  ;;  %vm19958_vm12 = vcmask 60416   ;;  %v774_v52 = vrot.slane %v772_v40, 4 }
 0x123   : > { %13377 = vmatprep.mubr.msk.bf16.mxu1 %vm19880_vm14, %v19857_v1  ;;  %876 = vst.msk [vmem:[#allocation2 + $0x78] sm:$0xf] %vm19958_vm12, %v868_v63  ;;  %v785_v63 = vor.u32 %v784_v41, %v780_v8 }
 0x124   : > { %13180 = vmatmul.mubr.msk.bf16.gmra.mrb[12].mxu0 %vm19957_vm9, %v1689_v48  ;;  %vm19960_vm9 = vmmov %vm19958_vm12  ;;  %vm19961_vm12 = vcmask 1045504   ;;  %v900_v48 = vrot.slane %v899_v14, 4  ;;  %v775_v33 = vor.u32 %v774_v52, %v771_v50  ;;  %v11978_v14 = vld [vmem:[%s19813_s1 + $0x1c] sm:$0xf]  ;;  %v949_v52 = vrot.slane %v947_v39, 4 }
 0x125   : > { %13183 = vmatprep.mubr.msk.bf16.mxu0 %vm19880_vm14, %v19857_v1  ;;  %752 = vst.msk [vmem:[#allocation2 + $0x5c] sm:$0xf] %vm19960_vm9, %v744_v44  ;;  %v3104_v35 = vsel %vm19961_vm12, %v3101_v55, %v3103_v45  ;;  %vm19962_vm9 = vcmask 64512   ;;  %v3204_v55 = vld [vmem:[#allocation2 + $0x34] sm:$0xc]  ;;  %v936_v44 = vrot.slane %v934_v13, 5 }
 0x126   : > { %vm19963_vm12 = vmmov %vm19962_vm9  ;;  %v909_v31 = vsel %vm19959_vm8, %v900_v48, %v16903_v23  ;;  %v776_v9 = vrot.slane %v775_v33, 4  ;;  %v790_v53 = vld [vmem:[#allocation2 + $0x60] sm:$0x8]  ;;  %v921_v23 = vld [vmem:[#allocation2 + $0x84] sm:$0xc]  ;;  %v16977_v24 = vcombine.low %v3204_v55, %v16962_v34  ;;  %vm19965_vm8 = vcmask 1043456  }
 0x127   : > { %v791_v6 = vsel %vm16417_vm0, %v771_v50, %v790_v53  ;;  %v2001_v15 = vsel %vm19965_vm8, %v11891_v18, 0  ;;  %v922_v19 = vsel %vm16363_vm2, 0, %v921_v23  ;;  %vm19969_vm8 = vcmask 64512   ;;  %v959_v13 = vld [vmem:[#allocation2 + $0x8c] sm:$0xf] }
 0x128   : > { %792 = vst [vmem:[#allocation2 + $0x60] sm:$0x8] %v791_v6  ;;  %923 = vst [vmem:[#allocation2 + $0x84] sm:$0xc] %v922_v19  ;;  %v786_v0 = vrot.slane %v785_v63, 4  ;;  %v3240_v40 = vrot.slane %v16977_v24, 2  ;;  %v950_v27 = vor.u32 %v949_v52, %v945_v36 }
 0x129   : > { %vm19974_vm2 = vcmask 60416   ;;  %v17044_v19 = vld [vmem:[#allocation2 + $0x30] sm:$0xf]  ;;  %v1950_v52 = vshrl.u32 %v16952_v25, 16 }
 0x12a   : > { %13378 = vmatmul.mubr.msk.bf16.gmra.mrb[12].mxu1 %vm19962_vm9, %v3104_v35  ;;  %vm19964_vm9 = vcmask 60416   ;;  %v966_v35 = vsel %vm16209_vm11, 0, %v965_v17 }
 0x12b   : > { %13381 = vmatprep.mubr.msk.bf16.mxu1 %vm19880_vm14, %v19857_v1  ;;  %917 = vst.msk [vmem:[#allocation2 + $0x80] sm:$0xf] %vm19964_vm9, %v909_v31  ;;  %vm19967_vm9 = vcmask 1045504   ;;  %967 = vst [vmem:[#allocation2 + $0x90] sm:$0x1] %v966_v35 }
 0x12c   : > { %13184 = vmatmul.mubr.msk.bf16.gmra.mrb[16].mxu0 %vm19963_vm12, %v1688_v7  ;;  %v937_v7 = vshrl.u32 %v12575_v56, 16  ;;  %vm19966_vm12 = vnez %v19886_v4  ;;  %v1828_v26 = vsel %vm19967_vm9, %v1826_v51, %v1827_v60  ;;  %vm19971_vm9 = vnez %v19889_v22  ;;  %v17011_v56 = vld [vmem:[#allocation2 + $0x44] sm:$0xff]  }
 0x12d   : > { %13189 = vmatprep.mubr.msk.bf16.mxu0 %vm19880_vm14, %v19857_v1  ;;  %v781_v54 = vsel %vm19966_vm12, %v776_v9, %v780_v8  ;;  %v795_v50 = vsel %vm19971_vm9, %v786_v0, %v794_v20  ;;  %v1829_v8 = vrot.slane %v16984_v10, 2  ;;  %v951_v9 = vrot.slane %v950_v27, 4 }
 0x12e   : > { %793 = vst.msk [vmem:[#allocation2 + $0x64] sm:$0xf] %vm19968_vm10, %v781_v54  ;;  %v939_v3 = vrot.slane %v937_v7, 4  ;;  %vm19970_vm10 = vmmov %vm19969_vm8  ;;  %v17022_v7 = vld [vmem:[#allocation2 + $0x28] sm:$0xff]   ;;  %v3243_v23 = vrot.slane %v17011_v56, 2 }
 0x12f   : > { %796 = vst [vmem:[#allocation2 + $0x68] sm:$0xf] %v795_v50  ;;  %v955_v37 = vld [vmem:[#allocation2 + $0x84] sm:$0x8]  ;;  %v1831_v6 = vrot.slane %v17022_v7, 2  ;;  %v17042_v54 = vld [vmem:[#allocation2 + $0x4c] sm:$0xff]  }
 0x130   : > { %v940_v43 = vor.u32 %v939_v3, %v936_v44  ;;  %v956_v16 = vsel %vm16417_vm0, %v936_v44, %v955_v37  ;;  %v1798_v44 = vld [vmem:[#allocation2 + $0x34] sm:$0x3]  ;;  %v3245_v17 = vrot.slane %v17042_v54, 2  ;;  %v1945_v50 = vshll.u32 %v16950_v29, 16 }
 0x131   : > { %957 = vst [vmem:[#allocation2 + $0x84] sm:$0x8] %v956_v16  ;;  %v11885_v20 = vcombine.low %v17044_v19, %v1798_v44  ;;  %v3365_v37 = vshll.u32 %v16979_v2, 16  ;;  %v1959_v16 = vshrl.u32 %v16984_v10, 16 }
 0x132   : > { %13382 = vmatmul.mubr.msk.bf16.gmra.mrb[16].mxu1 %vm19969_vm8, %v3103_v45  ;;  %v12577_v45 = vpack.c.bf16 %v11827_v21, %v11827_v21  ;;  %v941_v42 = vrot.slane %v940_v43, 4  ;;  %vm19972_vm8 = vcmask 1045504   ;;  %v997_v4 = vld [vmem:[#allocation2 + $0x90] sm:$0xf]  ;;  %v17053_v21 = vld [vmem:[#allocation2 + $0x54] sm:$0xf] }
 0x133   : > { %13387 = vmatprep.mubr.msk.bf16.mxu1 %vm19880_vm14, %v19857_v1  ;;  %v3242_v55 = vsel %vm19972_vm8, %v3240_v40, %v3241_v58  ;;  %vm19975_vm6 = vmmov %vm19972_vm8  ;;  %vm19976_vm8 = vcmask 64512   ;;  %v1833_v35 = vrot.slane %v11885_v20, 2  ;;  %v1947_v27 = vrot.slane %v1945_v50, 3 }
 0x134   : > { %13190 = vmatmul.mubr.msk.bf16.vlgmr.msra.gmra.mrb[0].mxu0 %vm19970_vm10, %v1828_v26  ;;  %v978_v48 = vshrl.u32 %v12577_v45, 16  ;;  %v981_v41 = vshll.u32 %v12577_v45, 16  ;;  %vm19973_vm10 = vcmask 1043456   ;;  %v946_v51 = vsel %vm19966_vm12, %v941_v42, %v945_v36  ;;  %vm19978_vm12 = vmmov %vm19975_vm6  ;;  %v3213_v36 = vld [vmem:[#allocation2 + $0x58] sm:$0x3] }
 0x135   : > { %13210 = vmatpush3.bf16.msra.mxu0 %v2001_v15  ;;  %13193 = vmatprep.mubr.msk.bf16.mxu0 %vm19880_vm14, %v19857_v1  ;;  %v3413_v33 = vsel %vm19973_vm10, %v11978_v14, 0  ;;  %958 = vst.msk [vmem:[#allocation2 + $0x88] sm:$0xf] %vm19974_vm2, %v946_v51  ;;  %v1830_v18 = vsel %vm19975_vm6, %v1827_v60, %v1829_v8  ;;  %v960_v60 = vsel %vm19971_vm9, %v951_v9, %v959_v13  ;;  %vm19977_vm2 = vmmov %vm19976_vm8  ;;  %v1942_v45 = vshrl.u32 %v16950_v29, 16 }
 0x136   : > { %13231 = vmatprep.subr.bf16.mxu0 %v19857_v1  ;;  %v17018_v31 = vrot.slane %v978_v48, 7  ;;  %v797_v63 = vld [vmem:[#allocation2 + $0x68] sm:$0x8]  ;;  %961 = vst [vmem:[#allocation2 + $0x8c] sm:$0xf] %v960_v60  ;;  %v3244_v26 = vsel %vm19975_vm6, %v3241_v58, %v3243_v23  ;;  %v1832_v3 = vsel %vm19978_vm12, %v1829_v8, %v1831_v6  ;;  %vm19979_vm10 = vmmov %vm19977_vm2  ;;  %v11972_v58 = vcombine.low %v17053_v21, %v3213_v36 }
 0x137   : > { %v798_v15 = vsel %vm16417_vm0, 0, %v797_v63  ;;  %v1953_v8 = vshll.u32 %v16952_v25, 16  ;;  %v1944_v48 = vrot.slane %v1942_v45, 2  ;;  %v3357_v51 = vshll.u32 %v16977_v24, 16 }
 0x138   : > { %v983_v53 = vor.u32 %v981_v41, %v17018_v31  ;;  %799 = vst [vmem:[#allocation2 + $0x68] sm:$0x8] %v798_v15  ;;  %v3247_v43 = vrot.slane %v11972_v58, 2  ;;  %v1952_v41 = vrot.slane %v1950_v52, 2  ;;  %v3362_v29 = vshrl.u32 %v16979_v2, 16 }
 0x139   : > { %v1948_v13 = vor.u32 %v1947_v27, %v1944_v48  ;;  %v1962_v9 = vshll.u32 %v16984_v10, 16  ;;  %v3367_v60 = vrot.slane %v3365_v37, 3  ;;  %v1961_v63 = vrot.slane %v1959_v16, 2 }
 0x13a   : > { %13388 = vmatmul.mubr.msk.bf16.vlgmr.msra.gmra.mrb[0].mxu1 %vm19976_vm8, %v3242_v55  ;;  %v998_v61 = vsel %vm16245_vm7, %v983_v53, %v997_v4  ;;  %vm19980_vm8 = vmmov %vm19977_vm2  ;;  %v1955_v55 = vrot.slane %v1953_v8, 3  ;;  %v3359_v4 = vrot.slane %v3357_v51, 3  ;;  %v3374_v20 = vshll.u32 %v17011_v56, 16 }
 0x13b   : > { %13391 = vmatprep.mubr.msk.bf16.mxu1 %vm19880_vm14, %v19857_v1  ;;  %13408 = vmatpush3.bf16.msra.mxu1 %v3413_v33  ;;  %999 = vst [vmem:[#allocation2 + $0x90] sm:$0xf] %v998_v61  ;;  %vm19983_vm12 = vmmov %vm19980_vm8  ;;  %v3354_v33 = vshrl.u32 %v16977_v24, 16  ;;  %v11898_v24 = vld [vmem:[%s19813_s1 + $0x20] sm:$0xf]  ;;  %v1968_v36 = vshrl.u32 %v17022_v7, 16 }
 0x13c   : > { %13194 = vmatmul.mubr.msk.bf16.gmra.mrb[4].mxu0 %vm19977_vm2, %v1830_v18  ;;  %13429 = vmatprep.subr.bf16.mxu1 %v19857_v1  ;;  %vm19981_vm2 = vmmov %vm19975_vm6  ;;  %v1956_v18 = vor.u32 %v1955_v55, %v1952_v41  ;;  %v3380_v48 = vshrl.u32 %v17042_v54, 16  ;;  %v3383_v27 = vshll.u32 %v17042_v54, 16  ;;  %v3348_v41 = vld [vmem:[#allocation2 + $0x58] sm:$0x7] }
 0x13d   : > { %13197 = vmatprep.mubr.msk.bf16.mxu0 %vm19880_vm14, %v19857_v1  ;;  %v962_v0 = vld [vmem:[#allocation2 + $0x8c] sm:$0x8]  ;;  %v3246_v40 = vsel %vm19981_vm2, %v3243_v23, %v3245_v17  ;;  %vm19982_vm6 = vmmov %vm19981_vm2  ;;  %v3356_v53 = vrot.slane %v3354_v33, 2  ;;  %v3364_v23 = vrot.slane %v3362_v29, 2  ;;  %v1970_v52 = vrot.slane %v1968_v36, 2 }
 0x13e   : > { %v963_v39 = vsel %vm16417_vm0, 0, %v962_v0  ;;  %v1834_v14 = vsel %vm19982_vm6, %v1831_v6, %v1833_v35  ;;  %v1964_v6 = vrot.slane %v1962_v9, 3  ;;  %v1971_v0 = vshll.u32 %v17022_v7, 16  ;;  %v12003_v36 = vld [vmem:[%s19813_s1 + $0x4] sm:$0xf] }
 0x13f   : > { %964 = vst [vmem:[#allocation2 + $0x8c] sm:$0x8] %v963_v39  ;;  %v3360_v44 = vor.u32 %v3359_v4, %v3356_v53  ;;  %v11985_v39 = vld [vmem:[%s19813_s1 + $0x20] sm:$0xf]  ;;  %v17123_v51 = vcombine.low %v17053_v21, %v3348_v41  ;;  %v3382_v37 = vrot.slane %v3380_v48, 2 }
 0x140   : > { %v1973_v8 = vrot.slane %v1971_v0, 3 }
 0x141   : > { %v3389_v53 = vshrl.u32 %v17123_v51, 16  ;;  %v3392_v4 = vshll.u32 %v17123_v51, 16 }
 0x142   : > { %13392 = vmatmul.mubr.msk.bf16.gmra.mrb[4].mxu1 %vm19979_vm10, %v3244_v26  ;;  %vm19984_vm10 = vmmov %vm19980_vm8  ;;  %v3368_v26 = vor.u32 %v3367_v60, %v3364_v23 }
 0x143   : > { %13395 = vmatprep.mubr.msk.bf16.mxu1 %vm19880_vm14, %v19857_v1  ;;  %v3391_v60 = vrot.slane %v3389_v53, 2 }
 0x144   : > { %13198 = vmatmul.mubr.msk.bf16.gmra.mrb[8].mxu0 %vm19980_vm8, %v1832_v3  ;;  %vm19985_vm8 = vmmov %vm19981_vm2  ;;  %v3371_v3 = vshrl.u32 %v17011_v56, 16 }
 0x145   : > { %13201 = vmatprep.mubr.msk.bf16.mxu0 %vm19880_vm14, %v19857_v1  ;;  %v3248_v42 = vsel %vm19985_vm8, %v3245_v17, %v3247_v43  ;;  %vm19986_vm2 = vmmov %vm19984_vm10  ;;  %vm19989_vm8 = vcmask 1043456   ;;  %v1965_v17 = vor.u32 %v1964_v6, %v1961_v63 }
 0x146   : > { %vm19987_vm6 = vmmov %vm19986_vm2  ;;  %v2116_v15 = vsel %vm19989_vm8, %v11898_v24, 0  ;;  %v3373_v58 = vrot.slane %v3371_v3, 2  ;;  %v3496_v3 = vld [vmem:[#allocation2 + $0x34] sm:$0x8] }
 0x14a   : > { %13396 = vmatmul.mubr.msk.bf16.gmra.mrb[8].mxu1 %vm19983_vm12, %v3246_v40  ;;  %vm19846_vm12 = vsmask.f32 5376 }
 0x14b   : > { %13399 = vmatprep.mubr.msk.bf16.mxu1 %vm19880_vm14, %v19857_v1  ;;  %v1957_v61 = vsel %vm19846_vm12, %v1948_v13, %v1956_v18  ;;  %v3369_v40 = vsel %vm19846_vm12, %v3360_v44, %v3368_v26  ;;  %v1966_v50 = vsel %vm19846_vm12, %v1956_v18, %v1965_v17  ;;  %v3385_v13 = vrot.slane %v3383_v27, 3 }
 0x14c   : > { %13202 = vmatmul.mubr.msk.bf16.gmra.mrb[12].mxu0 %vm19984_vm10, %v1834_v14  ;;  %vm19988_vm10 = vmmov %vm19986_vm2  ;;  %v3376_v14 = vrot.slane %v3374_v20, 3 }
 0x14d   : > { %13205 = vmatprep.mubr.msk.bf16.mxu0 %vm19880_vm14, %v19857_v1  ;;  %v3386_v24 = vor.u32 %v3385_v13, %v3382_v37 }
 0x152   : > { %13400 = vmatmul.mubr.msk.bf16.gmra.mrb[12].mxu1 %vm19986_vm2, %v3248_v42  ;;  %v3377_v42 = vor.u32 %v3376_v14, %v3373_v58 }
 0x153   : > { %13403 = vmatprep.mubr.msk.bf16.mxu1 %vm19880_vm14, %v19857_v1 }
 0x154   : > { %13206 = vmatmul.mubr.msk.bf16.gmra.mrb[16].mxu0 %vm19987_vm6, %v1833_v35  ;;  %v1934_v35 = vld [vmem:[#allocation2 + $0x34] sm:$0x7]  ;;  %vm19990_vm6 = vmmov %vm19989_vm8  ;;  %v3378_v29 = vsel %vm19846_vm12, %v3368_v26, %v3377_v42  ;;  %v3387_v23 = vsel %vm19846_vm12, %v3377_v42, %v3386_v24  ;;  %v3831_v42 = vld [vmem:[#allocation2 + $0x48] sm:$0xf] }
 0x155   : > { %13211 = vmatprep.mubr.msk.bf16.mxu0 %vm19880_vm14, %v19857_v1  ;;  %v17108_v45 = vcombine.low %v17044_v19, %v1934_v35  ;;  %vm19992_vm8 = vmmov %vm19986_vm2  ;;  %v1974_v19 = vor.u32 %v1973_v8, %v1970_v52 }
 0x157   : > { %v1977_v55 = vshrl.u32 %v17108_v45, 16  ;;  %v1980_v33 = vshll.u32 %v17108_v45, 16  ;;  %v1975_v18 = vsel %vm19846_vm12, %v1965_v17, %v1974_v19  ;;  %v2092_v17 = vrot.slane %v16952_v25, 3 }
 0x158   : > { %v2094_v25 = vrot.slane %v16984_v10, 3  ;;  %v2096_v10 = vrot.slane %v17022_v7, 3  ;;  %v2098_v8 = vrot.slane %v17108_v45, 3  ;;  %v17192_v7 = vld [vmem:[#allocation2 + $0x4c] sm:$0xf] }
 0x159   : > { %v1979_v16 = vrot.slane %v1977_v55, 2  ;;  %v1982_v9 = vrot.slane %v1980_v33, 3  ;;  %v17197_v41 = vcombine.low %v3831_v42, %v17192_v7  ;;  %v5229_v45 = vld [vmem:[#allocation2 + $0x6c] sm:$0xf]  ;;  %v17208_v55 = vld [vmem:[#allocation2 + $0x50] sm:$0xff]  }
 0x15a   : > { %13404 = vmatmul.mubr.msk.bf16.gmra.mrb[16].mxu1 %vm19988_vm10, %v3247_v43  ;;  %v3526_v43 = vsel %vm19990_vm6, %v11985_v39, 0  ;;  %vm19991_vm10 = vmmov %vm19986_vm2 }
 0x15b   : > { %13409 = vmatprep.mubr.msk.bf16.mxu1 %vm19880_vm14, %v19857_v1  ;;  %vm19993_vm6 = vmmov %vm19986_vm2  ;;  %v1983_v21 = vor.u32 %v1982_v9, %v1979_v16  ;;  %v3871_v33 = vshll.u32 %v17197_v41, 16  ;;  %v3869_v13 = vshrl.u32 %v17197_v41, 16  ;;  %v11828_v16 = vld [vmem:[%s16202_s10 + $0xf8] sm:$0xff] }
 0x15c   : > { %13212 = vmatmul.mubr.msk.bf16.vlgmr.msra.gmra.mrb[0].mxu0 %vm19986_vm2, %v1957_v61  ;;  %v3394_v61 = vrot.slane %v3392_v4, 3  ;;  %v17221_v9 = vld [vmem:[#allocation2 + $0x74] sm:$0xff]   ;;  %v12578_v53 = vpack.c.bf16 %v11828_v16, %v11828_v16 }
 0x15d   : > { %13232 = vmatpush3.bf16.msra.mxu0 %v2116_v15  ;;  %13215 = vmatprep.mubr.msk.bf16.mxu0 %vm19880_vm14, %v19857_v1  ;;  %v1984_v63 = vsel %vm19846_vm12, %v1974_v19, %v1983_v21  ;;  %v2084_v15 = vld [vmem:[#allocation2 + $0x10] sm:$0x8] }
 0x15e   : > { %13451 = vmatprep.subr.bf16.mxu0 %v19857_v1  ;;  %v3395_v6 = vor.u32 %v3394_v61, %v3391_v60  ;;  %v11899_v26 = vcombine.low %v2084_v15, %v16933_v28  ;;  %v11986_v28 = vcombine.low %v3496_v3, %v16962_v34  ;;  %v12088_v34 = vld [vmem:[%s19813_s1 + $0x4] sm:$0xf]  ;;  %v17204_v19 = vld [vmem:[#allocation2 + $0x70] sm:$0xf]  ;;  %v986_v60 = vshrl.u32 %v12578_v53, 16 }
 0x15f   : > { %v17213_v37 = vcombine.low %v5229_v45, %v17204_v19  ;;  %v3840_v61 = vld [vmem:[%s19813_s1] sm:$0xf]  ;;  %v5274_v15 = vshll.u32 %v17221_v9, 16  ;;  %v3880_v3 = vshrl.u32 %v17208_v55, 16  ;;  %v3841_v45 = vld [vmem:[#allocation2 + $0x6c] sm:$0x1] }
 0x160   : > { %v3396_v44 = vsel %vm19846_vm12, %v3386_v24, %v3395_v6  ;;  %v2091_v20 = vrot.slane %v11899_v26, 3  ;;  %v3501_v35 = vrot.slane %v11986_v28, 3  ;;  %v296_v28 = vld [vmem:[#allocation2 + $0x98] sm:$0xe] }
 0x161   : > { %v5269_v24 = vshll.u32 %v17213_v37, 16 }
 0x162   : > { %13410 = vmatmul.mubr.msk.bf16.vlgmr.msra.gmra.mrb[0].mxu1 %vm19991_vm10, %v3369_v40  ;;  %vm19994_vm10 = vmmov %vm19986_vm2  ;;  %v3502_v40 = vrot.slane %v16979_v2, 3 }
 0x163   : > { %13413 = vmatprep.mubr.msk.bf16.mxu1 %vm19880_vm14, %v19857_v1  ;;  %13430 = vmatpush3.bf16.msra.mxu1 %v3526_v43  ;;  %v3504_v43 = vrot.slane %v17011_v56, 3  ;;  %v3506_v56 = vrot.slane %v17042_v54, 3  ;;  %v3508_v54 = vrot.slane %v17123_v51, 3  ;;  %v3873_v51 = vrot.slane %v3871_v33, 1 }
 0x164   : > { %13216 = vmatmul.mubr.msk.bf16.gmra.mrb[4].mxu0 %vm19992_vm8, %v1966_v50  ;;  %13649 = vmatprep.subr.bf16.mxu1 %v19857_v1  ;;  %vm19995_vm8 = vmmov %vm19986_vm2  ;;  %v984_v33 = vrot.slane %v17018_v31, 4 }
 0x165   : > { %13219 = vmatprep.mubr.msk.bf16.mxu0 %vm19880_vm14, %v19857_v1  ;;  %v3874_v4 = vor.u32 %v3873_v51, %v3869_v13 }
 0x16a   : > { %13414 = vmatmul.mubr.msk.bf16.gmra.mrb[4].mxu1 %vm19986_vm2, %v3378_v29 }
 0x16b   : > { %13417 = vmatprep.mubr.msk.bf16.mxu1 %vm19880_vm14, %v19857_v1 }
 0x16c   : > { %13220 = vmatmul.mubr.msk.bf16.gmra.mrb[8].mxu0 %vm19993_vm6, %v1975_v18  ;;  %vm19996_vm6 = vmmov %vm19986_vm2  ;;  %v3876_v18 = vshll.u32 %v17208_v55, 16 }
 0x16d   : > { %13223 = vmatprep.mubr.msk.bf16.mxu0 %vm19880_vm14, %v19857_v1 }
 0x172   : > { %13418 = vmatmul.mubr.msk.bf16.gmra.mrb[8].mxu1 %vm19994_vm10, %v3387_v23  ;;  %vm19845_vm10 = vcmask 1044480   ;;  %v17227_v23 = vld [vmem:[#allocation2 + $0x58] sm:$0xff]  }
 0x173   : > { %13421 = vmatprep.mubr.msk.bf16.mxu1 %vm19880_vm14, %v19857_v1  ;;  %v2093_v0 = vsel %vm19845_vm10, %v2091_v20, %v2092_v17  ;;  %v3503_v58 = vsel %vm19845_vm10, %v3501_v35, %v3502_v40  ;;  %v2095_v2 = vsel %vm19845_vm10, %v2092_v17, %v2094_v25  ;;  %v3505_v50 = vsel %vm19845_vm10, %v3502_v40, %v3504_v43  ;;  %v17241_v40 = vld [vmem:[#allocation2 + $0x7c] sm:$0xff]  }
 0x174   : > { %13224 = vmatmul.mubr.msk.bf16.gmra.mrb[12].mxu0 %vm19995_vm8, %v1984_v63  ;;  %vm19997_vm8 = vmmov %vm19986_vm2  ;;  %v2097_v52 = vsel %vm19845_vm10, %v2094_v25, %v2096_v10  ;;  %v3507_v48 = vsel %vm19845_vm10, %v3504_v43, %v3506_v56  ;;  %v2099_v27 = vsel %vm19845_vm10, %v2096_v10, %v2098_v8  ;;  %v3509_v29 = vsel %vm19845_vm10, %v3506_v56, %v3508_v54  ;;  %v5238_v43 = vld [vmem:[%s19813_s1] sm:$0xf] }
 0x175   : > { %13227 = vmatprep.mubr.msk.bf16.mxu0 %vm19880_vm14, %v19857_v1  ;;  %v5267_v63 = vshrl.u32 %v17213_v37, 16  ;;  %v3884_v20 = vshll.u32 %v17227_v23, 16  ;;  %v5276_v35 = vrot.slane %v5274_v15, 1  ;;  %v297_v25 = vsel %vm16226_vm15, 0, %v296_v28 }
 0x176   : > { %298 = vst [vmem:[#allocation2 + $0x98] sm:$0xe] %v297_v25  ;;  %vm20011_vm10 = vcmask 64512  }
 0x17a   : > { %13422 = vmatmul.mubr.msk.bf16.gmra.mrb[12].mxu1 %vm19986_vm2, %v3396_v44  ;;  %vm19998_vm2 = vcmask 1043456   ;;  %v988_v44 = vrot.slane %v986_v60, 7 }
 0x17b   : > { %13425 = vmatprep.mubr.msk.bf16.mxu1 %vm19880_vm14, %v19857_v1  ;;  %v3923_v39 = vsel %vm19998_vm2, %v12003_v36, 0 }
 0x17c   : > { %13228 = vmatmul.mubr.msk.bf16.gmra.mrb[16].mxu0 %vm19996_vm6, %v1983_v21  ;;  %v3878_v21 = vrot.slane %v3876_v18, 1  ;;  %v993_v17 = vrot.slane %v988_v44, 4  ;;  %v17269_v18 = vld [vmem:[#allocation2 + $0x84] sm:$0xff]  }
 0x17d   : > { %13233 = vmatprep.mubr.msk.bf16.mxu0 %vm19880_vm14, %v19857_v1  ;;  %v5290_v49 = vshll.u32 %v17269_v18, 16 }
 0x182   : > { %13426 = vmatmul.mubr.msk.bf16.gmra.mrb[16].mxu1 %vm19997_vm8, %v3395_v6  ;;  %vm19999_vm8 = vmmov %vm19998_vm2  ;;  %v5271_v6 = vrot.slane %v5269_v24, 1 }
 0x183   : > { %13431 = vmatprep.mubr.msk.bf16.mxu1 %vm19880_vm14, %v19857_v1  ;;  %v5321_v14 = vsel %vm19999_vm8, %v12088_v34, 0  ;;  %vm20000_vm2 = vmmov %vm19996_vm6 }
 0x184   : > { %13234 = vmatmul.mubr.msk.bf16.vlgmr.msra.gmra.mrb[0].mxu0 %vm19996_vm6, %v2093_v0  ;;  %vm20001_vm6 = vmmov %vm20000_vm2  ;;  %v1001_v0 = vld [vmem:[#allocation2 + $0x98] sm:$0x1] }
 0x185   : > { %13452 = vmatpush3.bf16.msra.mxu0 %v3923_v39  ;;  %13237 = vmatprep.mubr.msk.bf16.mxu0 %vm19880_vm14, %v19857_v1  ;;  %vm20002_vm8 = vmmov %vm20000_vm2  ;;  %v5272_v39 = vor.u32 %v5271_v6, %v5267_v63  ;;  %v1002_v34 = vsel %vm16209_vm11, %v993_v17, %v1001_v0  ;;  %v17286_v63 = vld [vmem:[#allocation2 + $0x8c] sm:$0xf]  ;;  %v5239_v6 = vld [vmem:[#allocation2 + $0x90] sm:$0x1] }
 0x186   : > { %13473 = vmatprep.subr.bf16.mxu0 %v19857_v1  ;;  %1003 = vst [vmem:[#allocation2 + $0x98] sm:$0x1] %v1002_v34  ;;  %v17295_v17 = vcombine.low %v17286_v63, %v5239_v6 }
 0x18a   : > { %13432 = vmatmul.mubr.msk.bf16.vlgmr.msra.gmra.mrb[0].mxu1 %vm20000_vm2, %v3503_v58  ;;  %v3882_v58 = vor.u32 %v3880_v3, %v3878_v21 }
 0x18b   : > { %13435 = vmatprep.mubr.msk.bf16.mxu1 %vm19880_vm14, %v19857_v1  ;;  %13650 = vmatpush3.bf16.msra.mxu1 %v5321_v14  ;;  %v3886_v14 = vrot.slane %v3884_v20, 1  ;;  %v5292_v20 = vrot.slane %v5290_v49, 1  ;;  %v2378_v49 = vld [vmem:[#allocation3 + $0x24] sm:$0x1] }
 0x18c   : > { %13238 = vmatmul.mubr.msk.bf16.gmra.mrb[4].mxu0 %vm20001_vm6, %v2095_v2  ;;  %13671 = vmatprep.subr.bf16.mxu1 %v19857_v1  ;;  %vm20003_vm6 = vmmov %vm20000_vm2  ;;  %v17250_v2 = vld [vmem:[#allocation2 + $0x60] sm:$0xff]  }
 0x18d   : > { %13241 = vmatprep.mubr.msk.bf16.mxu0 %vm19880_vm14, %v19857_v1  ;;  %v1004_v16 = vld [vmem:[#allocation2 + $0x98] sm:$0x3]  ;;  %v4094_v6 = vrot.slane %v17250_v2, 1 }
 0x18e   : > { %v1005_v31 = vsel %vm16280_vm1, 0, %v1004_v16 }
 0x18f   : > { %1006 = vst [vmem:[#allocation2 + $0x98] sm:$0x3] %v1005_v31 }
 0x192   : > { %13436 = vmatmul.mubr.msk.bf16.gmra.mrb[4].mxu1 %vm20002_vm8, %v3505_v50  ;;  %vm20004_vm8 = vmmov %vm20000_vm2  ;;  %v5278_v50 = vshrl.u32 %v17221_v9, 16 }
 0x193   : > { %13439 = vmatprep.mubr.msk.bf16.mxu1 %vm19880_vm14, %v19857_v1 }
 0x194   : > { %13242 = vmatmul.mubr.msk.bf16.gmra.mrb[8].mxu0 %vm20000_vm2, %v2097_v52  ;;  %v5282_v52 = vshll.u32 %v17241_v40, 16  ;;  %v5280_v13 = vor.u32 %v5278_v50, %v5276_v35  ;;  %v5302_v50 = vshrl.u32 %v17295_v17, 16 }
 0x195   : > { %13245 = vmatprep.mubr.msk.bf16.mxu0 %vm19880_vm14, %v19857_v1 }
 0x196   : > { %v5284_v51 = vrot.slane %v5282_v52, 1 }
 0x19a   : > { %13440 = vmatmul.mubr.msk.bf16.gmra.mrb[8].mxu1 %vm20003_vm6, %v3507_v48  ;;  %vm20005_vm6 = vmmov %vm20000_vm2  ;;  %v3888_v48 = vshrl.u32 %v17227_v23, 16 }
 0x19b   : > { %13443 = vmatprep.mubr.msk.bf16.mxu1 %vm19880_vm14, %v19857_v1 }
 0x19c   : > { %13246 = vmatmul.mubr.msk.bf16.gmra.mrb[12].mxu0 %vm20004_vm8, %v2099_v27  ;;  %vm20006_vm8 = vsmask.f32 7424  ;;  %v3892_v27 = vshll.u32 %v17250_v2, 16 }
 0x19d   : > { %13249 = vmatprep.mubr.msk.bf16.mxu0 %vm19880_vm14, %v19857_v1  ;;  %v3879_v26 = vsel %vm20006_vm8, %v3874_v4, %v3878_v21  ;;  %vm20008_vm8 = vmmov %vm20000_vm2 }
 0x19e   : > { %v3894_v4 = vrot.slane %v3892_v27, 1 }
 0x1a2   : > { %13444 = vmatmul.mubr.msk.bf16.gmra.mrb[12].mxu1 %vm20000_vm2, %v3509_v29 }
 0x1a3   : > { %13447 = vmatprep.mubr.msk.bf16.mxu1 %vm19880_vm14, %v19857_v1 }
 0x1a4   : > { %13250 = vmatmul.mubr.msk.bf16.gmra.mrb[16].mxu0 %vm20005_vm6, %v2098_v8  ;;  %vm20007_vm6 = vcmask 1043456   ;;  %v989_v8 = vshll.u32 %v12578_v53, 16  ;;  %v3890_v53 = vor.u32 %v3888_v48, %v3886_v14  ;;  %v12105_v48 = vld [vmem:[%s19813_s1 + $0x8] sm:$0xf] }
 0x1a5   : > { %13453 = vmatprep.mubr.msk.bf16.mxu0 %vm19880_vm14, %v19857_v1  ;;  %v4010_v36 = vsel %vm20007_vm6, %v3840_v61, 0  ;;  %v5408_v56 = vsel %vm20007_vm6, %v5238_v43, 0  ;;  %v5286_v61 = vshrl.u32 %v17241_v40, 16 }
 0x1a6   : > { %v991_v29 = vor.u32 %v989_v8, %v988_v44  ;;  %v3896_v44 = vshrl.u32 %v17250_v2, 16 }
 0x1a7   : > { %v5288_v3 = vor.u32 %v5286_v61, %v5284_v51 }
 0x1a8   : > { %v992_v24 = vsel %vm16251_vm4, %v984_v33, %v991_v29  ;;  %v5482_v29 = vld [vmem:[#allocation2 + $0x6c] sm:$0xe] }
 0x1a9   : > { %v12106_v16 = vcombine.low %v5482_v29, %v17204_v19  ;;  %v4092_v19 = vrot.slane %v17227_v23, 1  ;;  %v17476_v29 = vld [vmem:[#allocation2 + $0x68] sm:$0xff]  }
 0x1aa   : > { %13448 = vmatmul.mubr.msk.bf16.gmra.mrb[16].mxu1 %vm20000_vm2, %v3508_v54  ;;  %vm20009_vm2 = vsmask.f32 7424  ;;  %v17264_v54 = vld [vmem:[#allocation2 + $0x68] sm:$0xf] }
 0x1ab   : > { %13651 = vmatprep.mubr.msk.bf16.mxu1 %vm19880_vm14, %v19857_v1  ;;  %v5277_v10 = vsel %vm20009_vm2, %v5272_v39, %v5276_v35  ;;  %v17280_v21 = vcombine.low %v17264_v54, %v3841_v45  ;;  %v5294_v39 = vshrl.u32 %v17269_v18, 16  ;;  %v5298_v35 = vshll.u32 %v17295_v17, 16 }
 0x1ac   : > { %13454 = vmatmul.mubr.msk.bf16.vlgmr.msra.gmra.mrb[20].mxu0 %vm20008_vm8, %v3879_v26  ;;  %vm20010_vm8 = vmmov %vm20009_vm2 }
 0x1ad   : > { %13474 = vmatpush3.bf16.msra.mxu0 %v4010_v36  ;;  %13457 = vmatprep.mubr.msk.bf16.mxu0 %vm19880_vm14, %v19857_v1  ;;  %v3887_v42 = vsel %vm20010_vm8, %v3882_v58, %v3886_v14  ;;  %vm20012_vm2 = vmmov %vm20011_vm10  ;;  %v3900_v26 = vshll.u32 %v17280_v21, 16  ;;  %v3898_v36 = vor.u32 %v3896_v44, %v3894_v4  ;;  %v5296_v34 = vor.u32 %v5294_v39, %v5292_v20 }
 0x1ae   : > { %13495 = vmatprep.subr.bf16.mxu0 %v19857_v1  ;;  %vm20014_vm6 = vmmov %vm20010_vm8  ;;  %v5300_v58 = vrot.slane %v5298_v35, 1  ;;  %v3904_v14 = vshrl.u32 %v17280_v21, 16  ;;  %v17434_v35 = vld [vmem:[#allocation2 + $0x58] sm:$0xff]  }
 0x1af   : > { %v5285_v60 = vsel %vm20014_vm6, %v5280_v13, %v5284_v51  ;;  %vm20015_vm4 = vmmov %vm20014_vm6  ;;  %v3902_v28 = vrot.slane %v3900_v26, 1  ;;  %v4090_v51 = vrot.slane %v17208_v55, 1  ;;  %v3776_v26 = vld [vmem:[#allocation3 + $0x48] sm:$0x1] }
 0x1b0   : > { %v3895_v15 = vsel %vm20015_vm4, %v3890_v53, %v3894_v4  ;;  %vm20016_vm8 = vmmov %vm20012_vm2  ;;  %v5304_v52 = vor.u32 %v5302_v50, %v5300_v58  ;;  %v5487_v53 = vrot.slane %v12106_v16, 1  ;;  %v12112_v4 = vld [vmem:[%s19813_s1 + $0xc] sm:$0xf] }
 0x1b1   : > { %vm20018_vm6 = vmmov %vm20015_vm4 }
 0x1b2   : > { %13652 = vmatmul.mubr.msk.bf16.vlgmr.msra.gmra.mrb[20].mxu1 %vm20011_vm10, %v5277_v10  ;;  %vm20013_vm10 = vcmask 60416   ;;  %v3903_v25 = vsel %vm20018_vm6, %v3898_v36, %v3902_v28  ;;  %v3906_v10 = vor.u32 %v3904_v14, %v3902_v28  ;;  %v17428_v28 = vld [vmem:[#allocation2 + $0x54] sm:$0xf]  ;;  %v12038_v14 = vld [vmem:[%s19813_s1 + $0x10] sm:$0xf] }
 0x1b3   : > { %13655 = vmatprep.mubr.msk.bf16.mxu1 %vm19880_vm14, %v19857_v1  ;;  %13672 = vmatpush3.bf16.msra.mxu1 %v5408_v56  ;;  %1000 = vst.msk [vmem:[#allocation2 + $0x94] sm:$0xf] %vm20013_vm10, %v992_v24  ;;  %vm20017_vm10 = vmmov %vm20015_vm4  ;;  %v12020_v56 = vld [vmem:[%s19813_s1 + $0x8] sm:$0xf] }
 0x1b4   : > { %13458 = vmatmul.mubr.msk.bf16.gmra.mrb[24].mxu0 %vm20012_vm2, %v3887_v42  ;;  %13693 = vmatprep.subr.bf16.mxu1 %v19857_v1  ;;  %v5293_v0 = vsel %vm20017_vm10, %v5288_v3, %v5292_v20  ;;  %vm20019_vm4 = vmmov %vm20012_vm2  ;;  %v306_v42 = vld [vmem:[#allocation3 + $0x8] sm:$0x3]  ;;  %v4096_v3 = vrot.slane %v17280_v21, 1  ;;  %v4197_v21 = vld [vmem:[#allocation2 + $0x50] sm:$0xe] }
 0x1b5   : > { %13461 = vmatprep.mubr.msk.bf16.mxu0 %vm19880_vm14, %v19857_v1  ;;  %vm20022_vm10 = vmmov %vm20019_vm4  ;;  %v307_v27 = vsel %vm16185_vm5, 0, %v306_v42  ;;  %v17432_v39 = vcombine.low %v4197_v21, %v17428_v28 }
 0x1b6   : > { %308 = vst [vmem:[#allocation3 + $0x8] sm:$0x3] %v307_v27  ;;  %v12123_v27 = vld [vmem:[%s19813_s1 + $0x10] sm:$0xf] }
 0x1ba   : > { %13656 = vmatmul.mubr.msk.bf16.gmra.mrb[24].mxu1 %vm20016_vm8, %v5285_v60  ;;  %vm20020_vm8 = vmmov %vm20012_vm2 }
 0x1bb   : > { %13659 = vmatprep.mubr.msk.bf16.mxu1 %vm19880_vm14, %v19857_v1 }
 0x1bc   : > { %13462 = vmatmul.mubr.msk.bf16.gmra.mrb[28].mxu0 %vm20012_vm2, %v3895_v15  ;;  %vm20021_vm2 = vmmov %vm20018_vm6 }
 0x1bd   : > { %13465 = vmatprep.mubr.msk.bf16.mxu0 %vm19880_vm14, %v19857_v1  ;;  %v5301_v43 = vsel %vm20021_vm2, %v5296_v34, %v5300_v58  ;;  %vm20023_vm6 = vmmov %vm20019_vm4  ;;  %v4233_v34 = vrot.slane %v17432_v39, 1  ;;  %v4234_v58 = vrot.slane %v17434_v35, 1 }
 0x1be   : > { %vm20025_vm2 = vmmov %vm20019_vm4 }
 0x1c2   : > { %13660 = vmatmul.mubr.msk.bf16.gmra.mrb[28].mxu1 %vm20019_vm4, %v5293_v0 }
 0x1c3   : > { %13663 = vmatprep.mubr.msk.bf16.mxu1 %vm19880_vm14, %v19857_v1 }
 0x1c4   : > { %13466 = vmatmul.mubr.msk.bf16.gmra.mrb[32].mxu0 %vm20020_vm8, %v3903_v25  ;;  %vm20024_vm8 = vcmask 1043456   ;;  %v17440_v25 = vld [vmem:[#allocation2 + $0x78] sm:$0xf] }
 0x1c5   : > { %13469 = vmatprep.mubr.msk.bf16.mxu0 %vm19880_vm14, %v19857_v1  ;;  %v4114_v8 = vsel %vm20024_vm8, %v12020_v56, 0 }
 0x1ca   : > { %13664 = vmatmul.mubr.msk.bf16.gmra.mrb[32].mxu1 %vm20022_vm10, %v5301_v43  ;;  %vm20026_vm10 = vmmov %vm20024_vm8 }
 0x1cb   : > { %13667 = vmatprep.mubr.msk.bf16.mxu1 %vm19880_vm14, %v19857_v1  ;;  %v5512_v45 = vsel %vm20026_vm10, %v12105_v48, 0  ;;  %vm20029_vm8 = vmmov %vm20025_vm2 }
 0x1cc   : > { %13470 = vmatmul.mubr.msk.bf16.gmra.mrb[36].mxu0 %vm20023_vm6, %v3906_v10  ;;  %vm20027_vm6 = vmmov %vm20025_vm2  ;;  %v17452_v10 = vld [vmem:[#allocation2 + $0x7c] sm:$0xff]  }
 0x1cd   : > { %13475 = vmatprep.mubr.msk.bf16.mxu0 %vm19880_vm14, %v19857_v1  ;;  %vm20030_vm10 = vmmov %vm20025_vm2  ;;  %v5632_v42 = vrot.slane %v17452_v10, 1  ;;  %v5753_v21 = vshrl.u32 %v17452_v10, 16 }
 0x1d2   : > { %13668 = vmatmul.mubr.msk.bf16.gmra.mrb[36].mxu1 %vm20019_vm4, %v5304_v52  ;;  %vm20028_vm4 = vmmov %vm20025_vm2  ;;  %v17455_v52 = vld [vmem:[#allocation2 + $0x60] sm:$0xff]  }
 0x1d3   : > { %13673 = vmatprep.mubr.msk.bf16.mxu1 %vm19880_vm14, %v19857_v1  ;;  %v4236_v48 = vrot.slane %v17455_v52, 1 }
 0x1d4   : > { %13476 = vmatmul.mubr.msk.bf16.vlgmr.msra.gmra.mrb[20].mxu0 %vm20025_vm2, %v17197_v41  ;;  %v4084_v41 = vld [vmem:[#allocation2 + $0x48] sm:$0xe] }
 0x1d5   : > { %13496 = vmatpush3.bf16.msra.mxu0 %v4114_v8  ;;  %13479 = vmatprep.mubr.msk.bf16.mxu0 %vm19880_vm14, %v19857_v1  ;;  %v12021_v33 = vcombine.low %v4084_v41, %v17192_v7  ;;  %v12027_v7 = vld [vmem:[%s19813_s1 + $0xc] sm:$0xf]  ;;  %v17472_v41 = vld [vmem:[#allocation2 + $0x84] sm:$0xff]  }
 0x1d6   : > { %13517 = vmatprep.subr.bf16.mxu0 %v19857_v1 }
 0x1d7   : > { %v4089_v13 = vrot.slane %v12021_v33, 1 }
 0x1da   : > { %13674 = vmatmul.mubr.msk.bf16.vlgmr.msra.gmra.mrb[20].mxu1 %vm20027_vm6, %v17213_v37  ;;  %vm20031_vm6 = vmmov %vm20025_vm2  ;;  %v12014_v37 = vcombine.low %v17264_v54, %v17264_v54  ;;  %v12099_v54 = vcombine.low %v17286_v63, %v17286_v63  ;;  %v2379_v63 = vsel %vm16209_vm11, 0, %v2378_v49 }
 0x1db   : > { %13677 = vmatprep.mubr.msk.bf16.mxu1 %vm19880_vm14, %v19857_v1  ;;  %13694 = vmatpush3.bf16.msra.mxu1 %v5512_v45  ;;  %2380 = vst [vmem:[#allocation3 + $0x24] sm:$0x1] %v2379_v63 }
 0x1dc   : > { %13480 = vmatmul.mubr.msk.bf16.gmra.mrb[24].mxu0 %vm20028_vm4, %v17208_v55  ;;  %13715 = vmatprep.subr.bf16.mxu1 %v19857_v1  ;;  %vm20032_vm4 = vmmov %vm20025_vm2  ;;  %v5488_v55 = vrot.slane %v17221_v9, 1 }
 0x1dd   : > { %13483 = vmatprep.mubr.msk.bf16.mxu0 %vm19880_vm14, %v19857_v1 }
 0x1e2   : > { %13678 = vmatmul.mubr.msk.bf16.gmra.mrb[24].mxu1 %vm20029_vm8, %v17221_v9  ;;  %vm20033_vm8 = vmmov %vm20025_vm2 }
 0x1e3   : > { %13681 = vmatprep.mubr.msk.bf16.mxu1 %vm19880_vm14, %v19857_v1 }
 0x1e4   : > { %13484 = vmatmul.mubr.msk.bf16.gmra.mrb[28].mxu0 %vm20025_vm2, %v17227_v23  ;;  %vm20034_vm2 = vcmask 1046528   ;;  %v5490_v23 = vrot.slane %v17241_v40, 1 }
 0x1e5   : > { %13487 = vmatprep.mubr.msk.bf16.mxu0 %vm19880_vm14, %v19857_v1  ;;  %v4091_v24 = vsel %vm20034_vm2, %v4089_v13, %v4090_v51  ;;  %v5634_v13 = vrot.slane %v17472_v41, 1 }
 0x1ea   : > { %13682 = vmatmul.mubr.msk.bf16.gmra.mrb[28].mxu1 %vm20030_vm10, %v17241_v40  ;;  %vm20035_vm10 = vmmov %vm20032_vm4  ;;  %v5492_v40 = vrot.slane %v17269_v18, 1 }
 0x1eb   : > { %13685 = vmatprep.mubr.msk.bf16.mxu1 %vm19880_vm14, %v19857_v1 }
 0x1ec   : > { %13488 = vmatmul.mubr.msk.bf16.gmra.mrb[32].mxu0 %vm20031_vm6, %v17250_v2  ;;  %vm20036_vm6 = vcmask 1043456   ;;  %v3777_v2 = vsel %vm16209_vm11, 0, %v3776_v26 }
 0x1ed   : > { %13491 = vmatprep.mubr.msk.bf16.mxu0 %vm19880_vm14, %v19857_v1  ;;  %v4258_v31 = vsel %vm20036_vm6, %v12027_v7, 0  ;;  %3778 = vst [vmem:[#allocation3 + $0x48] sm:$0x1] %v3777_v2  ;;  %v4206_v7 = vld [vmem:[#allocation2 + $0x74] sm:$0x1] }
 0x1f2   : > { %13686 = vmatmul.mubr.msk.bf16.gmra.mrb[32].mxu1 %vm20032_vm4, %v17269_v18  ;;  %v5494_v18 = vrot.slane %v17295_v17, 1  ;;  %v5595_v17 = vld [vmem:[#allocation2 + $0x74] sm:$0xe] }
 0x1f3   : > { %13689 = vmatprep.mubr.msk.bf16.mxu1 %vm19880_vm14, %v19857_v1  ;;  %v17450_v43 = vcombine.low %v5595_v17, %v17440_v25 }
 0x1f4   : > { %13492 = vmatmul.mubr.msk.bf16.gmra.mrb[36].mxu0 %vm20033_vm8, %v12014_v37  ;;  %vm20037_vm8 = vmmov %vm20034_vm2 }
 0x1f5   : > { %13497 = vmatprep.mubr.msk.bf16.mxu0 %vm19880_vm14, %v19857_v1  ;;  %v5489_v60 = vsel %vm20037_vm8, %v5487_v53, %v5488_v55  ;;  %vm20038_vm2 = vmmov %vm20036_vm6  ;;  %v5491_v15 = vsel %vm20037_vm8, %v5488_v55, %v5490_v23  ;;  %v5631_v8 = vrot.slane %v17450_v43, 1 }
 0x1f6   : > { %v5656_v61 = vsel %vm20038_vm2, %v12112_v4, 0  ;;  %vm20040_vm6 = vmmov %vm20032_vm4  ;;  %v5604_v4 = vld [vmem:[#allocation2 + $0x98] sm:$0x1] }
 0x1f7   : > { %vm20041_vm2 = vmmov %vm20037_vm8 }
 0x1f8   : > { %v4095_v44 = vsel %vm20041_vm2, %v4092_v19, %v4094_v6 }
 0x1fa   : > { %13690 = vmatmul.mubr.msk.bf16.gmra.mrb[36].mxu1 %vm20035_vm10, %v12099_v54  ;;  %vm20039_vm10 = vmmov %vm20037_vm8  ;;  %v4205_v54 = vld [vmem:[#allocation2 + $0x70] sm:$0xf] }
 0x1fb   : > { %13695 = vmatprep.mubr.msk.bf16.mxu1 %vm19880_vm14, %v19857_v1  ;;  %v4093_v9 = vsel %vm20039_vm10, %v4090_v51, %v4092_v19  ;;  %vm20042_vm10 = vmmov %vm20032_vm4  ;;  %v4238_v51 = vrot.slane %v17476_v29, 1  ;;  %v12032_v53 = vcombine.low %v4205_v54, %v4206_v7  ;;  %v5603_v19 = vld [vmem:[#allocation2 + $0x94] sm:$0xf]  ;;  %v5762_v7 = vshrl.u32 %v17472_v41, 16 }
 0x1fc   : > { %13498 = vmatmul.mubr.msk.bf16.vlgmr.msra.gmra.mrb[20].mxu0 %vm20032_vm4, %v4091_v24  ;;  %vm20045_vm8 = vmmov %vm20041_vm2  ;;  %v17488_v24 = vld [vmem:[#allocation2 + $0x8c] sm:$0xff]  }
 0x1fd   : > { %13518 = vmatpush3.bf16.msra.mxu0 %v4258_v31  ;;  %13501 = vmatprep.mubr.msk.bf16.mxu0 %vm19880_vm14, %v19857_v1  ;;  %v4097_v36 = vsel %vm20045_vm8, %v4094_v6, %v4096_v3  ;;  %v5636_v55 = vrot.slane %v17488_v24, 1  ;;  %v4350_v6 = vshll.u32 %v17432_v39, 16 }
 0x1fe   : > { %13539 = vmatprep.subr.bf16.mxu0 %v19857_v1 }
 0x202   : > { %13696 = vmatmul.mubr.msk.bf16.vlgmr.msra.gmra.mrb[20].mxu1 %vm20040_vm6, %v5489_v60  ;;  %vm20043_vm6 = vmmov %vm20032_vm4  ;;  %v4240_v60 = vrot.slane %v12032_v53, 1  ;;  %v4376_v53 = vshll.u32 %v17476_v29, 16 }
 0x203   : > { %13699 = vmatprep.mubr.msk.bf16.mxu1 %vm19880_vm14, %v19857_v1  ;;  %13716 = vmatpush3.bf16.msra.mxu1 %v5656_v61 }
 0x204   : > { %13502 = vmatmul.mubr.msk.bf16.gmra.mrb[24].mxu0 %vm20032_vm4, %v4093_v9  ;;  %13737 = vmatprep.subr.bf16.mxu1 %v19857_v1  ;;  %vm20044_vm4 = vmmov %vm20041_vm2  ;;  %v12117_v9 = vcombine.low %v5603_v19, %v5604_v4 }
 0x205   : > { %13505 = vmatprep.mubr.msk.bf16.mxu0 %vm19880_vm14, %v19857_v1  ;;  %v5493_v20 = vsel %vm20044_vm4, %v5490_v23, %v5492_v40  ;;  %vm20046_vm2 = vmmov %vm20043_vm6  ;;  %v4347_v23 = vshrl.u32 %v17432_v39, 16 }
 0x206   : > { %vm20050_vm8 = vmmov %vm20046_vm2  ;;  %v5638_v63 = vrot.slane %v12117_v9, 1 }
 0x207   : > { %v4349_v26 = vrot.slane %v4347_v23, 1  ;;  %v4378_v23 = vrot.slane %v4376_v53, 2 }
 0x20a   : > { %13700 = vmatmul.mubr.msk.bf16.gmra.mrb[24].mxu1 %vm20042_vm10, %v5491_v15  ;;  %vm20047_vm10 = vmmov %vm20046_vm2  ;;  %v4355_v15 = vshrl.u32 %v17434_v35, 16 }
 0x20b   : > { %13703 = vmatprep.mubr.msk.bf16.mxu1 %vm19880_vm14, %v19857_v1 }
 0x20c   : > { %13506 = vmatmul.mubr.msk.bf16.gmra.mrb[28].mxu0 %vm20043_vm6, %v4095_v44  ;;  %vm20048_vm6 = vmmov %vm20044_vm4  ;;  %v4358_v44 = vshll.u32 %v17434_v35, 16  ;;  %v4357_v2 = vrot.slane %v4355_v15, 1  ;;  %v5774_v15 = vshll.u32 %v17488_v24, 16 }
 0x20d   : > { %13509 = vmatprep.mubr.msk.bf16.mxu0 %vm19880_vm14, %v19857_v1  ;;  %v5495_v0 = vsel %vm20048_vm6, %v5492_v40, %v5494_v18  ;;  %vm20049_vm4 = vmmov %vm20046_vm2 }
 0x212   : > { %13704 = vmatmul.mubr.msk.bf16.gmra.mrb[28].mxu1 %vm20046_vm2, %v5493_v20  ;;  %vm20051_vm2 = vmmov %vm20048_vm6  ;;  %vm20053_vm6 = vcmask 1043456   ;;  %v4360_v20 = vrot.slane %v4358_v44, 2 }
 0x213   : > { %13707 = vmatprep.mubr.msk.bf16.mxu1 %vm19880_vm14, %v19857_v1  ;;  %v4235_v50 = vsel %vm20051_vm2, %v4233_v34, %v4234_v58  ;;  %v4406_v56 = vsel %vm20053_vm6, %v12038_v14, 0  ;;  %v4364_v34 = vshrl.u32 %v17455_v52, 16 }
 0x214   : > { %13510 = vmatmul.mubr.msk.bf16.gmra.mrb[32].mxu0 %vm20047_vm10, %v4097_v36  ;;  %vm20052_vm10 = vmmov %vm20049_vm4  ;;  %v5745_v36 = vshrl.u32 %v17450_v43, 16  ;;  %v4361_v17 = vor.u32 %v4360_v20, %v4357_v2  ;;  %v4489_v20 = vld [vmem:[#allocation2 + $0x50] sm:$0xc] }
 0x215   : > { %13513 = vmatprep.mubr.msk.bf16.mxu0 %vm19880_vm14, %v19857_v1 }
 0x216   : > { %v5747_v14 = vrot.slane %v5745_v36, 1 }
 0x21a   : > { %13708 = vmatmul.mubr.msk.bf16.gmra.mrb[32].mxu1 %vm20049_vm4, %v5495_v0  ;;  %v5756_v0 = vshll.u32 %v17452_v10, 16 }
 0x21b   : > { %13711 = vmatprep.mubr.msk.bf16.mxu1 %vm19880_vm14, %v19857_v1 }
 0x21c   : > { %13514 = vmatmul.mubr.msk.bf16.gmra.mrb[36].mxu0 %vm20050_vm8, %v4096_v3  ;;  %vm20054_vm8 = vmmov %vm20051_vm2  ;;  %v4352_v3 = vrot.slane %v4350_v6, 2  ;;  %v5771_v6 = vshrl.u32 %v17488_v24, 16 }
 0x21d   : > { %13519 = vmatprep.mubr.msk.bf16.mxu0 %vm19880_vm14, %v19857_v1  ;;  %v5633_v45 = vsel %vm20054_vm8, %v5631_v8, %v5632_v42  ;;  %vm20055_vm2 = vmmov %vm20053_vm6  ;;  %v5635_v16 = vsel %vm20054_vm8, %v5632_v42, %v5634_v13  ;;  %v12045_v8 = vld [vmem:[%s19813_s1 + $0x14] sm:$0xf] }
 0x21e   : > { %v5804_v37 = vsel %vm20055_vm2, %v12123_v27, 0  ;;  %vm20057_vm6 = vmmov %vm20049_vm4  ;;  %v4353_v39 = vor.u32 %v4352_v3, %v4349_v26  ;;  %v4341_v42 = vld [vmem:[#allocation2 + $0x74] sm:$0x3]  ;;  %v4366_v27 = vrot.slane %v4364_v34, 1  ;;  %v17563_v34 = vld [vmem:[%s19814_s2] ss:$0 sm:$0xff] }
 0x21f   : > { %vm20058_vm2 = vmmov %vm20054_vm8 }
 0x220   : > { %v4239_v31 = vsel %vm20058_vm2, %v4236_v48, %v4238_v51 }
 0x222   : > { %13712 = vmatmul.mubr.msk.bf16.gmra.mrb[36].mxu1 %vm20052_vm10, %v5494_v18  ;;  %vm20056_vm10 = vmmov %vm20054_vm8  ;;  %v5748_v18 = vshll.u32 %v17450_v43, 16 }
 0x223   : > { %13717 = vmatprep.mubr.msk.bf16.mxu1 %vm19880_vm14, %v19857_v1  ;;  %v4237_v33 = vsel %vm20056_vm10, %v4234_v58, %v4236_v48  ;;  %vm20059_vm10 = vmmov %vm20049_vm4  ;;  %v4367_v58 = vshll.u32 %v17455_v52, 16 }
 0x224   : > { %13520 = vmatmul.mubr.msk.bf16.vlgmr.msra.gmra.mrb[20].mxu0 %vm20049_vm4, %v4235_v50  ;;  %vm20062_vm8 = vmmov %vm20058_vm2  ;;  %v5750_v43 = vrot.slane %v5748_v18, 2  ;;  %v5755_v50 = vrot.slane %v5753_v21, 1  ;;  %v5887_v18 = vld [vmem:[#allocation2 + $0x74] sm:$0xc] }
 0x225   : > { %13540 = vmatpush3.bf16.msra.mxu0 %v4406_v56  ;;  %13523 = vmatprep.mubr.msk.bf16.mxu0 %vm19880_vm14, %v19857_v1  ;;  %v4241_v49 = vsel %vm20062_vm8, %v4238_v51, %v4240_v60  ;;  %v5758_v56 = vrot.slane %v5756_v0, 2  ;;  %v5773_v0 = vrot.slane %v5771_v6, 1 }
 0x226   : > { %13561 = vmatprep.subr.bf16.mxu0 %v19857_v1 }
 0x227   : > { %v5759_v51 = vor.u32 %v5758_v56, %v5755_v50  ;;  %v12046_v50 = vcombine.low %v4489_v20, %v17428_v28  ;;  %v12131_v56 = vcombine.low %v5887_v18, %v17440_v25 }
 0x229   : > { %v4494_v25 = vrot.slane %v12046_v50, 2 }
 0x22a   : > { %13718 = vmatmul.mubr.msk.bf16.vlgmr.msra.gmra.mrb[20].mxu1 %vm20057_vm6, %v5633_v45  ;;  %vm20060_vm6 = vmmov %vm20049_vm4  ;;  %v4369_v45 = vrot.slane %v4367_v58, 2 }
 0x22b   : > { %13721 = vmatprep.mubr.msk.bf16.mxu1 %vm19880_vm14, %v19857_v1  ;;  %13738 = vmatpush3.bf16.msra.mxu1 %v5804_v37  ;;  %v5739_v37 = vld [vmem:[#allocation2 + $0x98] sm:$0x3] }
 0x22c   : > { %13524 = vmatmul.mubr.msk.bf16.gmra.mrb[24].mxu0 %vm20049_vm4, %v4237_v33  ;;  %13759 = vmatprep.subr.bf16.mxu1 %v19857_v1  ;;  %vm20061_vm4 = vmmov %vm20058_vm2  ;;  %v17538_v4 = vcombine.low %v5603_v19, %v5739_v37 }
 0x22d   : > { %13527 = vmatprep.mubr.msk.bf16.mxu0 %vm19880_vm14, %v19857_v1  ;;  %v5637_v61 = vsel %vm20061_vm4, %v5634_v13, %v5636_v55  ;;  %vm20063_vm2 = vmmov %vm20060_vm6  ;;  %v5751_v13 = vor.u32 %v5750_v43, %v5747_v14 }
 0x22e   : > { %vm20067_vm8 = vmmov %vm20063_vm2  ;;  %v5780_v3 = vshrl.u32 %v17538_v4, 16  ;;  %v5783_v2 = vshll.u32 %v17538_v4, 16 }
 0x230   : > { %v5782_v14 = vrot.slane %v5780_v3, 1  ;;  %v5785_v43 = vrot.slane %v5783_v2, 2  ;;  %v12052_v3 = vld [vmem:[%s19813_s1 + $0x18] sm:$0xf] }
 0x232   : > { %13722 = vmatmul.mubr.msk.bf16.gmra.mrb[24].mxu1 %vm20059_vm10, %v5635_v16  ;;  %vm20064_vm10 = vmmov %vm20063_vm2  ;;  %v5765_v16 = vshll.u32 %v17472_v41, 16  ;;  %v17579_v28 = vor.u32 %v5785_v43, %v5782_v14 }
 0x233   : > { %13725 = vmatprep.mubr.msk.bf16.mxu1 %vm19880_vm14, %v19857_v1 }
 0x234   : > { %13528 = vmatmul.mubr.msk.bf16.gmra.mrb[28].mxu0 %vm20060_vm6, %v4239_v31  ;;  %vm20065_vm6 = vmmov %vm20061_vm4  ;;  %v4373_v31 = vshrl.u32 %v17476_v29, 16 }
 0x235   : > { %13531 = vmatprep.mubr.msk.bf16.mxu0 %vm19880_vm14, %v19857_v1  ;;  %v5639_v40 = vsel %vm20065_vm6, %v5636_v55, %v5638_v63  ;;  %vm20066_vm4 = vmmov %vm20063_vm2  ;;  %vm20070_vm6 = vcmask 1043456   ;;  %v17535_v55 = vcombine.low %v4205_v54, %v4341_v42  ;;  %v5767_v54 = vrot.slane %v5765_v16, 2 }
 0x236   : > { %v4519_v33 = vsel %vm20070_vm6, %v12045_v8, 0  ;;  %v17572_v8 = vld [vmem:[%s19815_s3] ss:$0 sm:$0xff] }
 0x237   : > { %v4382_v44 = vshrl.u32 %v17535_v55, 16  ;;  %v4385_v26 = vshll.u32 %v17535_v55, 16 }
 0x239   : > { %v4387_v58 = vrot.slane %v4385_v26, 2 }
 0x23a   : > { %13726 = vmatmul.mubr.msk.bf16.gmra.mrb[28].mxu1 %vm20063_vm2, %v5637_v61  ;;  %vm20068_vm2 = vsmask.f32 6400  ;;  %v12130_v61 = vld [vmem:[%s19813_s1 + $0x14] sm:$0xf] }
 0x23b   : > { %13729 = vmatprep.mubr.msk.bf16.mxu1 %vm19880_vm14, %v19857_v1  ;;  %v4362_v48 = vsel %vm20068_vm2, %v4353_v39, %v4361_v17  ;;  %v5776_v39 = vrot.slane %v5774_v15, 2 }
 0x23c   : > { %13532 = vmatmul.mubr.msk.bf16.gmra.mrb[32].mxu0 %vm20064_vm10, %v4241_v49  ;;  %vm20069_vm10 = vmmov %vm20066_vm4  ;;  %v5764_v49 = vrot.slane %v5762_v7, 1 }
 0x23d   : > { %13535 = vmatprep.mubr.msk.bf16.mxu0 %vm19880_vm14, %v19857_v1 }
 0x23e   : > { %v5768_v36 = vor.u32 %v5767_v54, %v5764_v49  ;;  %v5895_v49 = vrot.slane %v17472_v41, 2  ;;  %v4499_v54 = vrot.slane %v17476_v29, 2  ;;  %v5897_v41 = vrot.slane %v17488_v24, 2 }
 0x242   : > { %13730 = vmatmul.mubr.msk.bf16.gmra.mrb[32].mxu1 %vm20066_vm4, %v5639_v40 }
 0x243   : > { %13733 = vmatprep.mubr.msk.bf16.mxu1 %vm19880_vm14, %v19857_v1 }
 0x244   : > { %13536 = vmatmul.mubr.msk.bf16.gmra.mrb[36].mxu0 %vm20067_vm8, %v4240_v60  ;;  %v4370_v60 = vor.u32 %v4369_v45, %v4366_v27  ;;  %vm20071_vm8 = vmmov %vm20068_vm2 }
 0x245   : > { %13541 = vmatprep.mubr.msk.bf16.mxu0 %vm19880_vm14, %v19857_v1  ;;  %v5760_v9 = vsel %vm20071_vm8, %v5751_v13, %v5759_v51  ;;  %vm20072_vm2 = vmmov %vm20070_vm6  ;;  %v5777_v13 = vor.u32 %v5776_v39, %v5773_v0 }
 0x246   : > { %v5917_v19 = vsel %vm20072_vm2, %v12130_v61, 0  ;;  %vm20074_vm6 = vmmov %vm20066_vm4  ;;  %v5892_v61 = vrot.slane %v12131_v56, 2 }
 0x247   : > { %vm20075_vm2 = vmmov %vm20071_vm8 }
 0x24a   : > { %13734 = vmatmul.mubr.msk.bf16.gmra.mrb[36].mxu1 %vm20069_vm10, %v5638_v63  ;;  %v4375_v63 = vrot.slane %v4373_v31, 1  ;;  %vm20073_vm10 = vmmov %vm20071_vm8 }
 0x24b   : > { %13739 = vmatprep.mubr.msk.bf16.mxu1 %vm19880_vm14, %v19857_v1  ;;  %v4371_v40 = vsel %vm20073_vm10, %v4361_v17, %v4370_v60  ;;  %v4384_v17 = vrot.slane %v4382_v44, 1  ;;  %vm20076_vm10 = vmmov %vm20066_vm4 }
 0x24c   : > { %13542 = vmatmul.mubr.msk.bf16.vlgmr.msra.gmra.mrb[20].mxu0 %vm20066_vm4, %v4362_v48  ;;  %v4379_v21 = vor.u32 %v4378_v23, %v4375_v63  ;;  %v5769_v48 = vsel %vm20071_vm8, %v5759_v51, %v5768_v36  ;;  %v4495_v51 = vrot.slane %v17434_v35, 2  ;;  %vm20079_vm8 = vmmov %vm20075_vm2 }
 0x24d   : > { %13562 = vmatpush3.bf16.msra.mxu0 %v4519_v33  ;;  %13545 = vmatprep.mubr.msk.bf16.mxu0 %vm19880_vm14, %v19857_v1  ;;  %v17577_v7 = vor.u32 %v4387_v58, %v4384_v17 }
 0x24e   : > { %13583 = vmatprep.subr.bf16.mxu0 %v19857_v1  ;;  %v4380_v37 = vsel %vm20075_vm2, %v4370_v60, %v4379_v21  ;;  %v5893_v60 = vrot.slane %v17452_v10, 2 }
 0x24f   : > { %v4389_v10 = vsel %vm20079_vm8, %v4379_v21, %v17577_v7 }
 0x252   : > { %13740 = vmatmul.mubr.msk.bf16.vlgmr.msra.gmra.mrb[20].mxu1 %vm20074_vm6, %v5760_v9  ;;  %v4497_v9 = vrot.slane %v17455_v52, 2  ;;  %vm20077_vm6 = vmmov %vm20066_vm4  ;;  %v17600_v52 = vsel %vm20075_vm2, %v5777_v13, %v17579_v28 }
 0x253   : > { %13743 = vmatprep.mubr.msk.bf16.mxu1 %vm19880_vm14, %v19857_v1  ;;  %13760 = vmatpush3.bf16.msra.mxu1 %v5917_v19 }
 0x254   : > { %13546 = vmatmul.mubr.msk.bf16.gmra.mrb[24].mxu0 %vm20066_vm4, %v4371_v40  ;;  %13781 = vmatprep.subr.bf16.mxu1 %v19857_v1  ;;  %vm20078_vm4 = vmmov %vm20075_vm2 }
 0x255   : > { %13549 = vmatprep.mubr.msk.bf16.mxu0 %vm19880_vm14, %v19857_v1  ;;  %v5778_v35 = vsel %vm20078_vm4, %v5768_v36, %v5777_v13 }
 0x257   : > { %v2152_v42 = vpop.f32.mrb[0].mxu0 }
 0x258   : > { %v2205_v27 = vmul.f32 %v17563_v34, %v2152_v42  ;;  %v13235_v45 = vpop.f32.mrb[1].mxu0 }
 0x259   : > { %v2155_v33 = vpop.f32.mrb[2].mxu0  ;;  %v12137_v45 = vld [vmem:[%s19813_s1 + $0x18] sm:$0xf] }
 0x25a   : > { %v2220_v16 = vadd.f32 %v17572_v8, %v2205_v27  ;;  %v2206_v31 = vmul.f32 %v17563_v34, %v2155_v33  ;;  %v13236_v53 = vpop.f32.mrb[3].mxu0  ;;  %13744 = vmatmul.mubr.msk.bf16.gmra.mrb[24].mxu1 %vm20076_vm10, %v5769_v48  ;;  %vm20080_vm10 = vcmask 1045504  }
 0x25b   : > { %13747 = vmatprep.mubr.msk.bf16.mxu1 %vm19880_vm14, %v19857_v1  ;;  %v17605_v26 = vsel %vm20080_vm10, %v4494_v25, %v4495_v51  ;;  %v2266_v53 = vld [vmem:[#allocation3 + $0x8] sm:$0xe] }
 0x25c   : > { %v2229_v63 = vmax.f32 %v2220_v16, 0.0  ;;  %v2221_v23 = vadd.f32 %v17572_v8, %v2206_v31  ;;  %13550 = vmatmul.mubr.msk.bf16.gmra.mrb[28].mxu0 %vm20077_vm6, %v4380_v37  ;;  %vm20081_vm6 = vmmov %vm20080_vm10  ;;  %vm20085_vm10 = vcmask 1043456  }
 0x25d   : > { %v3562_v19 = vpop.f32.mrb[0].mxu1  ;;  %13553 = vmatprep.mubr.msk.bf16.mxu0 %vm19880_vm14, %v19857_v1  ;;  %v17611_v36 = vsel %vm20081_vm6, %v5892_v61, %v5893_v60  ;;  %vm20082_vm4 = vmmov %vm20081_vm6  ;;  %v17628_v27 = vsel %vm20085_vm10, %v12052_v3, 0 }
 0x25e   : > { %v12579_v6 = vpack.c.bf16 %v2229_v63, %v2229_v63  ;;  %v2230_v15 = vmax.f32 %v2221_v23, 0.0  ;;  %v3609_v44 = vmul.f32 %v17563_v34, %v3562_v19  ;;  %v13433_v40 = vpop.f32.mrb[1].mxu1  ;;  %v17614_v18 = vsel %vm20082_vm4, %v4495_v51, %v4497_v9  ;;  %vm20083_vm8 = vmmov %vm20082_vm4 }
 0x25f   : > { %v2160_v2 = vpop.f32.mrb[4].mxu0  ;;  %v3565_v20 = vpop.f32.mrb[2].mxu1  ;;  %v17617_v21 = vsel %vm20083_vm8, %v5893_v60, %v5895_v49  ;;  %vm20084_vm2 = vmmov %vm20082_vm4  ;;  %vm20087_vm4 = vcmask 64512  }
 0x260   : > { %v17622_v0 = vsel %vm20084_vm2, %v4497_v9, %v4499_v54  ;;  %v2245_v39 = vshrl.u32 %v12579_v6, 16  ;;  %v2248_v17 = vshll.u32 %v12579_v6, 16  ;;  %v12580_v58 = vpack.c.bf16 %v2230_v15, %v2230_v15  ;;  %v13239_v43 = vpop.f32.mrb[5].mxu0  ;;  %v13434_v50 = vpop.f32.mrb[3].mxu1  ;;  %vm20086_vm6 = vmmov %vm20084_vm2 }
 0x261   : > { %v3618_v14 = vadd.f32 %v17572_v8, %v3609_v44  ;;  %v2207_v56 = vmul.f32 %v17563_v34, %v2160_v2  ;;  %v3610_v42 = vmul.f32 %v17563_v34, %v3565_v20  ;;  %v2163_v48 = vpop.f32.mrb[6].mxu0  ;;  %v17636_v37 = vsel %vm20086_vm6, %v5895_v49, %v5897_v41  ;;  %vm20088_vm8 = vmmov %vm20087_vm4 }
 0x262   : > { %v2247_v33 = vrot.slane %v2245_v39, 6  ;;  %v2250_v13 = vrot.slane %v2248_v17, 7  ;;  %v2254_v25 = vshrl.u32 %v12580_v58, 16  ;;  %v2257_v16 = vshll.u32 %v12580_v58, 16  ;;  %v13240_v31 = vpop.f32.mrb[7].mxu0  ;;  %13748 = vmatmul.mubr.msk.bf16.gmra.mrb[28].mxu1 %vm20087_vm4, %v5778_v35  ;;  %vm20089_vm2 = vmmov %vm20085_vm10 }
 0x263   : > { %v3627_v51 = vmax.f32 %v3618_v14, 0.0  ;;  %v2222_v61 = vadd.f32 %v17572_v8, %v2207_v56  ;;  %v3619_v60 = vadd.f32 %v17572_v8, %v3610_v42  ;;  %v2208_v9 = vmul.f32 %v17563_v34, %v2163_v48  ;;  %13751 = vmatprep.mubr.msk.bf16.mxu1 %vm19880_vm14, %v19857_v1  ;;  %v2270_v17 = vld [vmem:[#allocation3 + $0x10] sm:$0x3]  ;;  %vm20091_vm6 = vmmov %vm20087_vm4 }
 0x264   : > { %v2251_v49 = vor.u32 %v2250_v13, %v2247_v33  ;;  %v2256_v63 = vrot.slane %v2254_v25, 6  ;;  %v2259_v23 = vrot.slane %v2257_v16, 7  ;;  %13554 = vmatmul.mubr.msk.bf16.gmra.mrb[32].mxu0 %vm20088_vm8, %v4389_v10  ;;  %v17646_v19 = vsel %vm20089_vm2, %v12137_v45, 0  ;;  %vm20093_vm2 = vmmov %vm20087_vm4 }
 0x265   : > { %v12590_v35 = vpack.c.bf16 %v3627_v51, %v3627_v51  ;;  %v2231_v6 = vmax.f32 %v2222_v61, 0.0  ;;  %v3628_v15 = vmax.f32 %v3619_v60, 0.0  ;;  %v2223_v44 = vadd.f32 %v17572_v8, %v2208_v9  ;;  %v3570_v40 = vpop.f32.mrb[4].mxu1  ;;  %13557 = vmatprep.mubr.msk.bf16.mxu0 %vm19880_vm14, %v19857_v1 }
 0x266   : > { %v2252_v3 = vrot.slane %v2251_v49, 4  ;;  %v2267_v2 = vsel %vm16226_vm15, %v2251_v49, %v2266_v53  ;;  %v2260_v20 = vor.u32 %v2259_v23, %v2256_v63  ;;  %v3611_v39 = vmul.f32 %v17563_v34, %v3570_v40  ;;  %v13437_v10 = vpop.f32.mrb[5].mxu1 }
 0x267   : > { %2268 = vst [vmem:[#allocation3 + $0x8] sm:$0xe] %v2267_v2  ;;  %v3643_v58 = vshrl.u32 %v12590_v35, 16  ;;  %v3646_v14 = vshll.u32 %v12590_v35, 16  ;;  %v12581_v43 = vpack.c.bf16 %v2231_v6, %v2231_v6  ;;  %v12591_v50 = vpack.c.bf16 %v3628_v15, %v3628_v15  ;;  %v2168_v56 = vpop.f32.mrb[8].mxu0  ;;  %v3573_v42 = vpop.f32.mrb[6].mxu1 }
 0x268   : > { %v2261_v48 = vsel %vm19932_vm13, %v2252_v3, %v2260_v20  ;;  %v2262_v45 = vrot.slane %v2260_v20, 4  ;;  %v2232_v33 = vmax.f32 %v2223_v44, 0.0  ;;  %v3620_v13 = vadd.f32 %v17572_v8, %v3611_v39  ;;  %v13243_v25 = vpop.f32.mrb[9].mxu0  ;;  %v13438_v16 = vpop.f32.mrb[7].mxu1 }
 0x269   : > { %vm20090_vm10 = vcmask 60416   ;;  %v3645_v31 = vrot.slane %v3643_v58, 6  ;;  %v3648_v53 = vrot.slane %v3646_v14, 7  ;;  %v2287_v51 = vshrl.u32 %v12581_v43, 16  ;;  %v2171_v60 = vpop.f32.mrb[10].mxu0 }
 0x26a   : > { %2269 = vst.msk [vmem:[#allocation3 + $0xc] sm:$0xf] %vm20090_vm10, %v2261_v48  ;;  %v2290_v61 = vshll.u32 %v12581_v43, 16  ;;  %v2271_v9 = vsel %vm16185_vm5, %v2262_v45, %v2270_v17  ;;  %v3652_v49 = vshrl.u32 %v12591_v50, 16  ;;  %v3655_v63 = vshll.u32 %v12591_v50, 16  ;;  %v13244_v35 = vpop.f32.mrb[11].mxu0  ;;  %13752 = vmatmul.mubr.msk.bf16.gmra.mrb[32].mxu1 %vm20091_vm6, %v17600_v52  ;;  %vm20092_vm8 = vmmov %vm20090_vm10 }
 0x26b   : > { %v12582_v23 = vpack.c.bf16 %v2232_v33, %v2232_v33  ;;  %2272 = vst [vmem:[#allocation3 + $0x10] sm:$0x3] %v2271_v9  ;;  %v17662_v6 = vor.u32 %v3648_v53, %v3645_v31  ;;  %v2289_v15 = vrot.slane %v2287_v51, 6  ;;  %v3629_v40 = vmax.f32 %v3620_v13, 0.0  ;;  %13755 = vmatprep.mubr.msk.bf16.mxu1 %vm19880_vm14, %v19857_v1  ;;  %v3668_v52 = vld [vmem:[#allocation3 + $0x34] sm:$0x3]  ;;  %vm20094_vm10 = vmmov %vm20092_vm8 }
 0x26c   : > { %v2292_v44 = vrot.slane %v2290_v61, 7  ;;  %v3654_v3 = vrot.slane %v3652_v49, 6  ;;  %v3657_v2 = vrot.slane %v3655_v63, 7  ;;  %13558 = vmatmul.mubr.msk.bf16.gmra.mrb[36].mxu0 %vm20087_vm4, %v17577_v7  ;;  %v2209_v14 = vmul.f32 %v17563_v34, %v2168_v56  ;;  %vm20095_vm6 = vmmov %vm20093_vm2 }
 0x26d   : > { %v2296_v20 = vshrl.u32 %v12582_v23, 16  ;;  %v2299_v39 = vshll.u32 %v12582_v23, 16  ;;  %v3650_v10 = vrot.slane %v17662_v6, 4  ;;  %v12592_v58 = vpack.c.bf16 %v3629_v40, %v3629_v40  ;;  %v3578_v43 = vpop.f32.mrb[8].mxu1  ;;  %13563 = vmatprep.mubr.msk.bf16.mxu0 %vm19880_vm14, %v19857_v1  ;;  %vm20096_vm4 = vmmov %vm20093_vm2 }
 0x26e   : > { %v17669_v17 = vor.u32 %v2292_v44, %v2289_v15  ;;  %v3658_v50 = vor.u32 %v3657_v2, %v3654_v3  ;;  %v3612_v33 = vmul.f32 %v17563_v34, %v3573_v42  ;;  %v13441_v13 = vpop.f32.mrb[9].mxu1  ;;  %v2224_v31 = vadd.f32 %v17572_v8, %v2209_v14 }
 0x26f   : > { %v2298_v48 = vrot.slane %v2296_v20, 6  ;;  %v2301_v45 = vrot.slane %v2299_v39, 7  ;;  %v3685_v25 = vshrl.u32 %v12592_v58, 16  ;;  %v3688_v16 = vshll.u32 %v12592_v58, 16  ;;  %v2176_v53 = vpop.f32.mrb[12].mxu0  ;;  %v3581_v51 = vpop.f32.mrb[10].mxu1 }
 0x270   : > { %v2294_v7 = vrot.slane %v17669_v17, 4  ;;  %v3659_v56 = vsel %vm19932_vm13, %v3650_v10, %v3658_v50  ;;  %v3660_v61 = vrot.slane %v3658_v50, 4  ;;  %v3621_v49 = vadd.f32 %v17572_v8, %v3612_v33  ;;  %v13247_v63 = vpop.f32.mrb[13].mxu0  ;;  %v13442_v23 = vpop.f32.mrb[11].mxu1 }
 0x271   : > { %v17679_v9 = vor.u32 %v2301_v45, %v2298_v48  ;;  %3667 = vst.msk [vmem:[#allocation3 + $0x30] sm:$0xf] %vm20092_vm8, %v3659_v56  ;;  %v3687_v42 = vrot.slane %v3685_v25, 6  ;;  %v3690_v35 = vrot.slane %v3688_v16, 7  ;;  %v2233_v15 = vmax.f32 %v2224_v31, 0.0  ;;  %v2179_v40 = vpop.f32.mrb[14].mxu0 }
 0x272   : > { %v2210_v44 = vmul.f32 %v17563_v34, %v2171_v60  ;;  %v2273_v3 = vld [vmem:[#allocation3 + $0x10] sm:$0x6]  ;;  %v3669_v2 = vsel %vm16185_vm5, %v3660_v61, %v3668_v52  ;;  %v3630_v10 = vmax.f32 %v3621_v49, 0.0  ;;  %v13248_v58 = vpop.f32.mrb[15].mxu0  ;;  %13756 = vmatmul.mubr.msk.bf16.gmra.mrb[36].mxu1 %vm20093_vm2, %v17579_v28  ;;  %v3613_v45 = vmul.f32 %v17563_v34, %v3578_v43  ;;  %v2321_v49 = vld [vmem:[#allocation3 + $0x18] sm:$0x7] }
 0x273   : > { %v2303_v20 = vsel %vm19932_vm13, %v2294_v7, %v17679_v9  ;;  %v2304_v39 = vrot.slane %v17679_v9, 4  ;;  %v2274_v14 = vsel %vm16310_vm3, 0, %v2273_v3  ;;  %3670 = vst [vmem:[#allocation3 + $0x34] sm:$0x3] %v3669_v2  ;;  %v17695_v60 = vor.u32 %v3690_v35, %v3687_v42  ;;  %13761 = vmatprep.mubr.msk.bf16.mxu1 %vm19880_vm14, %v19857_v1 }
 0x274   : > { %2320 = vst.msk [vmem:[#allocation3 + $0x14] sm:$0xf] %vm20094_vm10, %v2303_v20  ;;  %v12583_v52 = vpack.c.bf16 %v2233_v15, %v2233_v15  ;;  %v2225_v50 = vadd.f32 %v17572_v8, %v2210_v44  ;;  %2275 = vst [vmem:[#allocation3 + $0x10] sm:$0x6] %v2274_v14  ;;  %v12593_v48 = vpack.c.bf16 %v3630_v10, %v3630_v10  ;;  %13564 = vmatmul.mubr.msk.bf16.vlgmr.msra.gmra.mrb[20].mxu0 %vm20095_vm6, %v17605_v26  ;;  %vm20100_vm6 = vcmask 60416  }
 0x275   : > { %v2211_v28 = vmul.f32 %v17563_v34, %v2176_v53  ;;  %v3614_v33 = vmul.f32 %v17563_v34, %v3581_v51  ;;  %v3692_v13 = vrot.slane %v17695_v60, 4  ;;  %13584 = vmatpush3.bf16.msra.mxu0 %v17628_v27  ;;  %v3586_v31 = vpop.f32.mrb[12].mxu1  ;;  %13567 = vmatprep.mubr.msk.bf16.mxu0 %vm19880_vm14, %v19857_v1  ;;  %v3622_v53 = vadd.f32 %v17572_v8, %v3613_v45  ;;  %vm20099_vm10 = vmmov %vm20096_vm4 }
 0x276   : > { %v2306_v7 = vshrl.u32 %v12583_v52, 16  ;;  %v2309_v25 = vshll.u32 %v12583_v52, 16  ;;  %v2234_v16 = vmax.f32 %v2225_v50, 0.0  ;;  %v3694_v56 = vshrl.u32 %v12593_v48, 16  ;;  %v13445_v61 = vpop.f32.mrb[13].mxu1  ;;  %13605 = vmatprep.subr.bf16.mxu0 %v19857_v1 }
 0x277   : > { %v3697_v43 = vshll.u32 %v12593_v48, 16  ;;  %v2226_v51 = vadd.f32 %v17572_v8, %v2211_v28  ;;  %v3623_v27 = vadd.f32 %v17572_v8, %v3614_v33  ;;  %v17715_v23 = vpop.f32.mrb[16].mxu0  ;;  %v17717_v42 = vpop.f32.mrb[14].mxu1  ;;  %v3631_v44 = vmax.f32 %v3622_v53, 0.0 }
 0x278   : > { %v2308_v26 = vrot.slane %v2306_v7, 6  ;;  %v17712_v9 = vrot.slane %v2309_v25, 7  ;;  %v12585_v63 = vpack.c.bf16 %v2234_v16, %v2234_v16  ;;  %v3696_v35 = vrot.slane %v3694_v56, 6  ;;  %v13251_v2 = vpop.f32.mrb[17].mxu0  ;;  %v13446_v20 = vpop.f32.mrb[15].mxu1 }
 0x279   : > { %v3699_v15 = vrot.slane %v3697_v43, 7  ;;  %v2235_v3 = vmax.f32 %v2226_v51, 0.0  ;;  %v3632_v52 = vmax.f32 %v3623_v27, 0.0  ;;  %v2187_v50 = vpop.f32.mrb[18].mxu0  ;;  %v12594_v28 = vpack.c.bf16 %v3631_v44, %v3631_v44 }
 0x27a   : > { %v2312_v10 = vor.u32 %v17712_v9, %v2308_v26  ;;  %v2347_v58 = vshrl.u32 %v12585_v63, 16  ;;  %v2350_v14 = vshll.u32 %v12585_v63, 16  ;;  %v3671_v48 = vld [vmem:[#allocation3 + $0x34] sm:$0x6]  ;;  %v2212_v7 = vmul.f32 %v17563_v34, %v2179_v40  ;;  %v13252_v25 = vpop.f32.mrb[19].mxu0  ;;  %13762 = vmatmul.mubr.msk.bf16.vlgmr.msra.gmra.mrb[20].mxu1 %vm20096_vm4, %v17611_v36  ;;  %vm20101_vm4 = vmmov %vm20100_vm6 }
 0x27b   : > { %v3700_v45 = vor.u32 %v3699_v15, %v3696_v35  ;;  %v12586_v33 = vpack.c.bf16 %v2235_v3, %v2235_v3  ;;  %v2317_v16 = vld [vmem:[#allocation3 + $0x10] sm:$0xc]  ;;  %v3672_v56 = vsel %vm16310_vm3, 0, %v3671_v48  ;;  %13765 = vmatprep.mubr.msk.bf16.mxu1 %vm19880_vm14, %v19857_v1  ;;  %13782 = vmatpush3.bf16.msra.mxu1 %v17646_v19  ;;  %vm20097_vm8 = vnez %v19882_v47 }
 0x27c   : > { %v2313_v43 = vsel %vm19932_vm13, %v2304_v39, %v2312_v10  ;;  %v2345_v53 = vrot.slane %v2312_v10, 4  ;;  %v2349_v51 = vrot.slane %v2347_v58, 6  ;;  %v2318_v40 = vsel %vm20097_vm8, %v17669_v17, %v2317_v16  ;;  %3673 = vst [vmem:[#allocation3 + $0x34] sm:$0x6] %v3672_v56  ;;  %13568 = vmatmul.mubr.msk.bf16.gmra.mrb[24].mxu0 %vm20099_vm10, %v17614_v18  ;;  %13803 = vmatprep.subr.bf16.mxu1 %v19857_v1  ;;  %v2372_v16 = vld [vmem:[#allocation3 + $0x20] sm:$0xf] }
 0x27d   : > { %vm20098_vm2 = vnez %v19878_v11  ;;  %v3701_v61 = vsel %vm19932_vm13, %v3692_v13, %v3700_v45  ;;  %v3702_v26 = vrot.slane %v3700_v45, 4  ;;  %2319 = vst [vmem:[#allocation3 + $0x10] sm:$0xc] %v2318_v40  ;;  %v2352_v19 = vrot.slane %v2350_v14, 7  ;;  %v3594_v27 = vpop.f32.mrb[16].mxu1  ;;  %13571 = vmatprep.mubr.msk.bf16.mxu0 %vm19880_vm14, %v19857_v1 }
 0x27e   : > { %v2322_v36 = vsel %vm20098_vm2, %v2313_v43, %v2321_v49  ;;  %3718 = vst.msk [vmem:[#allocation3 + $0x38] sm:$0xf] %vm20100_vm6, %v3701_v61  ;;  %v3704_v39 = vshrl.u32 %v12594_v28, 16  ;;  %v3707_v17 = vshll.u32 %v12594_v28, 16  ;;  %v2357_v63 = vshrl.u32 %v12586_v33, 16  ;;  %v13449_v15 = vpop.f32.mrb[17].mxu1  ;;  %vm20102_vm6 = vmmov %vm20099_vm10 }
 0x27f   : > { %2323 = vst [vmem:[#allocation3 + $0x18] sm:$0x7] %v2322_v36  ;;  %v2360_v49 = vshll.u32 %v12586_v33, 16  ;;  %v12596_v13 = vpack.c.bf16 %v3632_v52, %v3632_v52  ;;  %v2227_v35 = vadd.f32 %v17572_v8, %v2212_v7  ;;  %v3615_v18 = vmul.f32 %v17563_v34, %v3586_v31  ;;  %v3597_v10 = vpop.f32.mrb[18].mxu1  ;;  %v3719_v7 = vld [vmem:[#allocation3 + $0x3c] sm:$0x7] }
 0x280   : > { %v2353_v44 = vor.u32 %v2352_v19, %v2349_v51  ;;  %v3706_v3 = vrot.slane %v3704_v39, 6  ;;  %v17745_v2 = vrot.slane %v3707_v17, 7  ;;  %v2359_v20 = vrot.slane %v2357_v63, 6  ;;  %v13450_v45 = vpop.f32.mrb[19].mxu1 }
 0x281   : > { %v2362_v58 = vrot.slane %v2360_v49, 7  ;;  %v3745_v14 = vshrl.u32 %v12596_v13, 16  ;;  %v3748_v50 = vshll.u32 %v12596_v13, 16  ;;  %v2236_v48 = vmax.f32 %v2227_v35, 0.0 }
 0x282   : > { %v2354_v28 = vsel %vm19932_vm13, %v2345_v53, %v2353_v44  ;;  %v2355_v52 = vrot.slane %v2353_v44, 4  ;;  %v3710_v33 = vor.u32 %v17745_v2, %v3706_v3  ;;  %v3624_v31 = vadd.f32 %v17572_v8, %v3615_v18  ;;  %13766 = vmatmul.mubr.msk.bf16.gmra.mrb[24].mxu1 %vm20099_vm10, %v17617_v21 }
 0x283   : > { %2371 = vst.msk [vmem:[#allocation3 + $0x1c] sm:$0xf] %vm20101_vm4, %v2354_v28  ;;  %v2363_v25 = vor.u32 %v2362_v58, %v2359_v20  ;;  %v3747_v56 = vrot.slane %v3745_v14, 6  ;;  %v3750_v43 = vrot.slane %v3748_v50, 7  ;;  %v12588_v51 = vpack.c.bf16 %v2236_v48, %v2236_v48  ;;  %v3715_v40 = vld [vmem:[#allocation3 + $0x34] sm:$0xc]  ;;  %13769 = vmatprep.mubr.msk.bf16.mxu1 %vm19880_vm14, %v19857_v1 }
 0x284   : > { %v3711_v53 = vsel %vm19932_vm13, %v3702_v26, %v3710_v33  ;;  %v3743_v36 = vrot.slane %v3710_v33, 4  ;;  %v3633_v61 = vmax.f32 %v3624_v31, 0.0  ;;  %v2213_v19 = vmul.f32 %v17563_v34, %v17715_v23  ;;  %13572 = vmatmul.mubr.msk.bf16.gmra.mrb[28].mxu0 %vm20102_vm6, %v17622_v0  ;;  %v2423_v14 = vld [vmem:[#allocation3 + $0x24] sm:$0xf]  ;;  %v7403_v22 = vld [vmem:[#allocation3 + $0x10] sm:$0xc] }
 0x285   : > { %v3716_v39 = vsel %vm20097_vm8, %v17695_v60, %v3715_v40  ;;  %v3720_v21 = vsel %vm20098_vm2, %v3711_v53, %v3719_v7  ;;  %v2364_v63 = vsel %vm19932_vm13, %v2355_v52, %v2363_v25  ;;  %v4501_v26 = vrot.slane %v17535_v55, 2  ;;  %13575 = vmatprep.mubr.msk.bf16.mxu0 %vm19880_vm14, %v19857_v1  ;;  %v3770_v31 = vld [vmem:[#allocation3 + $0x44] sm:$0xf] }
 0x286   : > { %v2324_v17 = vld [vmem:[#allocation3 + $0x18] sm:$0xc]  ;;  %3717 = vst [vmem:[#allocation3 + $0x34] sm:$0xc] %v3716_v39  ;;  %vm20103_vm4 = vnez %v19884_v57  ;;  %3721 = vst [vmem:[#allocation3 + $0x3c] sm:$0x7] %v3720_v21  ;;  %v2373_v60 = vsel %vm19971_vm9, %v2364_v63, %v2372_v16  ;;  %v3751_v49 = vor.u32 %v3750_v43, %v3747_v56  ;;  %v12597_v18 = vpack.c.bf16 %v3633_v61, %v3633_v61 }
 0x287   : > { %v2325_v23 = vsel %vm20103_vm4, 0, %v2324_v17  ;;  %v2401_v13 = vshrl.u32 %v12588_v51, 16  ;;  %2374 = vst [vmem:[#allocation3 + $0x20] sm:$0xf] %v2373_v60  ;;  %v2404_v35 = vshll.u32 %v12588_v51, 16  ;;  %v2228_v0 = vadd.f32 %v17572_v8, %v2213_v19 }
 0x288   : > { %2326 = vst [vmem:[#allocation3 + $0x18] sm:$0xc] %v2325_v23  ;;  %v3616_v15 = vmul.f32 %v17563_v34, %v17717_v42  ;;  %v2399_v44 = vrot.slane %v2363_v25, 4  ;;  %v3752_v3 = vsel %vm19932_vm13, %v3743_v36, %v3751_v49  ;;  %v3617_v10 = vmul.f32 %v17563_v34, %v3594_v27  ;;  %v17795_v43 = vld [vmem:[#allocation2 + $0x5c] sm:$0xf] }
 0x289   : > { %v2403_v20 = vrot.slane %v2401_v13, 6  ;;  %vm20104_vm10 = vcmask 60416   ;;  %v2406_v58 = vrot.slane %v2404_v35, 7  ;;  %v3755_v50 = vshrl.u32 %v12597_v18, 16 }
 0x28a   : > { %3769 = vst.msk [vmem:[#allocation3 + $0x40] sm:$0xf] %vm20104_vm10, %v3752_v3  ;;  %v3758_v48 = vshll.u32 %v12597_v18, 16  ;;  %v2237_v45 = vmax.f32 %v2228_v0, 0.0  ;;  %v3625_v28 = vadd.f32 %v17572_v8, %v3616_v15  ;;  %v3626_v52 = vadd.f32 %v17572_v8, %v3617_v10  ;;  %v4602_v8 = vld [vmem:[#allocation2 + $0x58] sm:$0xc] }
 0x28b   : > { %vm20105_vm6 = vcmask 1045504   ;;  %v5899_v33 = vrot.slane %v17538_v4, 2  ;;  %v2407_v34 = vor.u32 %v2406_v58, %v2403_v20  ;;  %v3757_v27 = vrot.slane %v3755_v50, 6  ;;  %v2427_v18 = vld [vmem:[#allocation3 + $0x2c] sm:$0x1] }
 0x28c   : > { %v4502_v42 = vsel %vm20105_vm6, %v4499_v54, %v4501_v26  ;;  %v3760_v7 = vrot.slane %v3758_v48, 7  ;;  %v12589_v25 = vpack.c.bf16 %v2237_v45, %v2237_v45  ;;  %vm20106_vm10 = vcmask 64512  }
 0x28d   : > { %13770 = vmatmul.mubr.msk.bf16.gmra.mrb[28].mxu1 %vm20106_vm10, %v17636_v37  ;;  %v3753_v16 = vrot.slane %v3751_v49, 4  ;;  %v3634_v56 = vmax.f32 %v3625_v28, 0.0  ;;  %v3722_v29 = vld [vmem:[#allocation3 + $0x3c] sm:$0xc]  ;;  %v2408_v54 = vsel %vm19932_vm13, %v2399_v44, %v2407_v34  ;;  %v3635_v53 = vmax.f32 %v3626_v52, 0.0  ;;  %vm20107_vm6 = vmmov %vm20106_vm10 }
 0x28e   : > { %13773 = vmatprep.mubr.msk.bf16.mxu1 %vm19880_vm14, %v19857_v1  ;;  %v3761_v51 = vor.u32 %v3760_v7, %v3757_v27  ;;  %v2411_v40 = vshrl.u32 %v12589_v25, 16  ;;  %13576 = vmatmul.mubr.msk.bf16.gmra.mrb[32].mxu0 %vm20107_vm6, %v4502_v42  ;;  %v3723_v37 = vsel %vm20103_vm4, 0, %v3722_v29  ;;  %v2375_v61 = vld [vmem:[#allocation3 + $0x20] sm:$0x8]  ;;  %v2424_v19 = vsel %vm16245_vm7, %v2408_v54, %v2423_v14  ;;  %v3821_v52 = vld [vmem:[#allocation3 + $0x48] sm:$0xf]  ;;  %vm20110_vm12 = vmmov %vm20107_vm6 }
 0x28f   : > { %v2368_v36 = vld [vmem:[#allocation3 + $0x18] sm:$0x8]  ;;  %v2414_v39 = vshll.u32 %v12589_v25, 16  ;;  %v12599_v17 = vpack.c.bf16 %v3634_v56, %v3634_v56  ;;  %13579 = vmatprep.mubr.msk.bf16.mxu0 %vm19880_vm14, %v19857_v1  ;;  %3724 = vst [vmem:[#allocation3 + $0x3c] sm:$0xc] %v3723_v37  ;;  %v2376_v63 = vsel %vm16417_vm0, 0, %v2375_v61  ;;  %v12600_v15 = vpack.c.bf16 %v3635_v53, %v3635_v53 }
 0x290   : > { %v2369_v21 = vsel %vm16417_vm0, %v17712_v9, %v2368_v36  ;;  %2425 = vst [vmem:[#allocation3 + $0x24] sm:$0xf] %v2424_v19  ;;  %v3762_v23 = vsel %vm19932_vm13, %v3753_v16, %v3761_v51  ;;  %vm20108_vm10 = vcmask 1045504   ;;  %2377 = vst [vmem:[#allocation3 + $0x20] sm:$0x8] %v2376_v63  ;;  %v2413_v9 = vrot.slane %v2411_v40, 6 }
 0x291   : > { %v5900_v60 = vsel %vm20108_vm10, %v5897_v41, %v5899_v33  ;;  %2370 = vst [vmem:[#allocation3 + $0x18] sm:$0x8] %v2369_v21  ;;  %v3771_v49 = vsel %vm19971_vm9, %v3762_v23, %v3770_v31  ;;  %v2416_v13 = vrot.slane %v2414_v39, 7  ;;  %v3799_v35 = vshrl.u32 %v12599_v17, 16  ;;  %v17823_v41 = vld [vmem:[#allocation2 + $0x60] sm:$0xff]   ;;  %v17865_v21 = vld [vmem:[#allocation2 + $0x68] sm:$0xff]  }
 0x292   : > { %3772 = vst [vmem:[#allocation3 + $0x44] sm:$0xf] %v3771_v49  ;;  %v3802_v0 = vshll.u32 %v12599_v17, 16  ;;  %v17821_v44 = vcombine.low %v4602_v8, %v17795_v43  ;;  %v2409_v3 = vrot.slane %v2407_v34, 4  ;;  %v2419_v24 = vrot.slane %v2413_v9, 4 }
 0x293   : > { %v2417_v20 = vor.u32 %v2416_v13, %v2413_v9  ;;  %v3801_v10 = vrot.slane %v3799_v35, 6  ;;  %v3797_v58 = vrot.slane %v3761_v51, 4  ;;  %v3809_v50 = vshrl.u32 %v12600_v15, 16  ;;  %v6000_v7 = vld [vmem:[#allocation2 + $0x7c] sm:$0xc]  ;;  %v17886_v35 = vld [vmem:[#allocation2 + $0x8c] sm:$0xff]  }
 0x294   : > { %v3804_v14 = vrot.slane %v3802_v0, 7  ;;  %v3812_v48 = vshll.u32 %v12600_v15, 16  ;;  %v2428_v28 = vsel %vm16209_vm11, %v2419_v24, %v2427_v18  ;;  %vm20109_vm10 = vcmask 60416   ;;  %v17836_v31 = vld [vmem:[#allocation2 + $0x80] sm:$0xf] }
 0x295   : > { %13774 = vmatmul.mubr.msk.bf16.gmra.mrb[32].mxu1 %vm20107_vm6, %v5900_v60  ;;  %v2418_v45 = vsel %vm19932_vm13, %v2409_v3, %v2417_v20  ;;  %2429 = vst [vmem:[#allocation3 + $0x2c] sm:$0x1] %v2428_v28  ;;  %v3811_v34 = vrot.slane %v3809_v50, 6  ;;  %v4638_v16 = vrot.slane %v17821_v44, 2  ;;  %v4639_v56 = vrot.slane %v17823_v41, 2  ;;  %v17890_v3 = vld [vmem:[#allocation2 + $0x70] sm:$0xff]  }
 0x296   : > { %13777 = vmatprep.mubr.msk.bf16.mxu1 %vm19880_vm14, %v19857_v1  ;;  %2426 = vst.msk [vmem:[#allocation3 + $0x28] sm:$0xf] %vm20109_vm10, %v2418_v45  ;;  %v3805_v42 = vor.u32 %v3804_v14, %v3801_v10  ;;  %v3814_v27 = vrot.slane %v3812_v48, 7  ;;  %13580 = vmatmul.mubr.msk.bf16.gmra.mrb[36].mxu0 %vm20110_vm12, %v4501_v26  ;;  %v3766_v25 = vld [vmem:[#allocation3 + $0x3c] sm:$0x8]  ;;  %v17853_v37 = vcombine.low %v6000_v7, %v17836_v31  ;;  %vm20111_vm12 = vmmov %vm20109_vm10  ;;  %vm20112_vm6 = vcmask 1045504  }
 0x297   : > { %13585 = vmatprep.mubr.msk.bf16.mxu0 %vm19880_vm14, %v19857_v1  ;;  %v3767_v8 = vsel %vm16417_vm0, %v17745_v2, %v3766_v25  ;;  %v3825_v54 = vld [vmem:[#allocation3 + $0x50] sm:$0x1]  ;;  %v3817_v53 = vrot.slane %v3811_v34, 4  ;;  %v17855_v2 = vld [vmem:[#allocation2 + $0x84] sm:$0xff]   ;;  %v4640_v17 = vsel %vm20112_vm6, %v4638_v16, %v4639_v56  ;;  %vm20113_vm10 = vcmask 64512   ;;  %v17909_v28 = vld [vmem:[#allocation2 + $0x94] sm:$0xff]  }
 0x298   : > { %v3806_v55 = vsel %vm19932_vm13, %v3797_v58, %v3805_v42  ;;  %v3807_v29 = vrot.slane %v3805_v42, 4  ;;  %v3815_v26 = vor.u32 %v3814_v27, %v3811_v34  ;;  %3768 = vst [vmem:[#allocation3 + $0x3c] sm:$0x8] %v3767_v8  ;;  %v12063_v36 = vld [vmem:[%s19813_s1 + $0x1c] sm:$0xf]  ;;  %v6036_v60 = vrot.slane %v17853_v37, 2 }
 0x299   : > { %v3773_v51 = vld [vmem:[#allocation3 + $0x44] sm:$0x8]  ;;  %v3822_v40 = vsel %vm16245_vm7, %v3806_v55, %v3821_v52  ;;  %v3826_v39 = vsel %vm16209_vm11, %v3817_v53, %v3825_v54  ;;  %v6037_v49 = vrot.slane %v17855_v2, 2  ;;  %v4641_v4 = vrot.slane %v17865_v21, 2  ;;  %v17906_v50 = vld [vmem:[#allocation2 + $0x78] sm:$0xf] }
 0x29a   : > { %v3774_v61 = vsel %vm16417_vm0, 0, %v3773_v51  ;;  %3823 = vst [vmem:[#allocation3 + $0x48] sm:$0xf] %v3822_v40  ;;  %v3816_v19 = vsel %vm19932_vm13, %v3807_v29, %v3815_v26  ;;  %3827 = vst [vmem:[#allocation3 + $0x50] sm:$0x1] %v3826_v39  ;;  %vm20114_vm0 = vcmask 1043456  }
 0x29b   : > { %3775 = vst [vmem:[#allocation3 + $0x44] sm:$0x8] %v3774_v61  ;;  %3824 = vst.msk [vmem:[#allocation3 + $0x4c] sm:$0xf] %vm20111_vm12, %v3816_v19  ;;  %v4811_v63 = vsel %vm20114_vm0, %v12063_v36, 0  ;;  %v6039_v24 = vrot.slane %v17886_v35, 2 }
 0x29c   : > { %v2430_v23 = vld [vmem:[#allocation3 + $0x2c] sm:$0x3]  ;;  %vm20115_vm12 = vmmov %vm20113_vm10  ;;  %v4643_v14 = vrot.slane %v17890_v3, 2  ;;  %v4611_v48 = vld [vmem:[#allocation2 + $0x7c] sm:$0x3]  ;;  %v4752_v55 = vshrl.u32 %v17821_v44, 16 }
 0x29d   : > { %13778 = vmatmul.mubr.msk.bf16.gmra.mrb[36].mxu1 %vm20113_vm10, %v5899_v33  ;;  %v2431_v9 = vsel %vm16280_vm1, 0, %v2430_v23  ;;  %v12148_v33 = vld [vmem:[%s19813_s1 + $0x1c] sm:$0xf]  ;;  %vm20116_vm0 = vmmov %vm20112_vm6  ;;  %vm20117_vm6 = vcmask 1043456   ;;  %v12057_v42 = vcombine.low %v17906_v50, %v4611_v48  ;;  %v6009_v27 = vld [vmem:[#allocation2 + $0xa0] sm:$0x3] }
 0x29e   : > { %13783 = vmatprep.mubr.msk.bf16.mxu1 %vm19880_vm14, %v19857_v1  ;;  %13586 = vmatmul.mubr.msk.bf16.vlgmr.msra.gmra.mrb[20].mxu0 %vm20115_vm12, %v4640_v17  ;;  %2432 = vst [vmem:[#allocation3 + $0x2c] sm:$0x3] %v2431_v9  ;;  %v6038_v13 = vsel %vm20116_vm0, %v6036_v60, %v6037_v49  ;;  %v6209_v18 = vsel %vm20117_vm6, %v12148_v33, 0  ;;  %vm20118_vm10 = vmmov %vm20116_vm0  ;;  %v17917_v34 = vld [vmem:[#allocation2 + $0x9c] sm:$0xf]  ;;  %v4755_v29 = vshll.u32 %v17821_v44, 16 }
 0x29f   : > { %13606 = vmatpush3.bf16.msra.mxu0 %v4811_v63  ;;  %13589 = vmatprep.mubr.msk.bf16.mxu0 %vm19880_vm14, %v19857_v1  ;;  %v4642_v15 = vsel %vm20118_vm10, %v4639_v56, %v4641_v4  ;;  %vm20119_vm0 = vmmov %vm20115_vm12  ;;  %v4645_v7 = vrot.slane %v12057_v42, 2  ;;  %v12142_v25 = vcombine.low %v17917_v34, %v6009_v27  ;;  %v4760_v26 = vshrl.u32 %v17823_v41, 16  ;;  %v17939_v17 = vld [vmem:[#allocation3 + $0x10] sm:$0xff]   ;;  %v17943_v23 = vld [vmem:[#allocation3 + $0xc] sm:$0xf] }
 0x2a0   : > { %13627 = vmatprep.subr.bf16.mxu0 %v19857_v1  ;;  %vm20120_vm6 = vmmov %vm20118_vm10  ;;  %v4763_v54 = vshll.u32 %v17823_v41, 16  ;;  %v4754_v40 = vrot.slane %v4752_v55, 2  ;;  %v4757_v53 = vrot.slane %v4755_v29, 3  ;;  %v6150_v19 = vshrl.u32 %v17853_v37, 16  ;;  %v17945_v60 = vld [vmem:[#allocation3 + $0x18] sm:$0xff]  }
 0x2a1   : > { %v3828_v0 = vld [vmem:[#allocation3 + $0x50] sm:$0x3]  ;;  %v6040_v45 = vsel %vm20120_vm6, %v6037_v49, %v6039_v24  ;;  %vm20121_vm10 = vmmov %vm20120_vm6  ;;  %v6043_v8 = vrot.slane %v12142_v25, 2  ;;  %v4762_v36 = vrot.slane %v4760_v26, 2  ;;  %v6153_v39 = vshll.u32 %v17853_v37, 16  ;;  %v17947_v49 = vld [vmem:[#allocation3 + $0x20] sm:$0xff]  }
 0x2a2   : > { %v3829_v20 = vsel %vm16280_vm1, 0, %v3828_v0  ;;  %v4644_v52 = vsel %vm20121_vm10, %v4641_v4, %v4643_v14  ;;  %vm20123_vm10 = vmmov %vm20120_vm6  ;;  %v4765_v61 = vrot.slane %v4763_v54, 3  ;;  %v6158_v44 = vshrl.u32 %v17855_v2, 16 }
 0x2a3   : > { %3830 = vst [vmem:[#allocation3 + $0x50] sm:$0x3] %v3829_v20  ;;  %v4646_v56 = vsel %vm20123_vm10, %v4643_v14, %v4645_v7  ;;  %vm20125_vm10 = vmmov %vm20119_vm0  ;;  %v6161_v63 = vshll.u32 %v17855_v2, 16  ;;  %v4758_v9 = vor.u32 %v4757_v53, %v4754_v40  ;;  %v6152_v37 = vrot.slane %v6150_v19, 2 }
 0x2a4   : > { %v4766_v4 = vor.u32 %v4765_v61, %v4762_v36  ;;  %v4769_v33 = vshrl.u32 %v17865_v21, 16  ;;  %v6160_v20 = vrot.slane %v6158_v44, 2  ;;  %v7296_v14 = vrot.slane %v17939_v17, 2 }
 0x2a5   : > { %13784 = vmatmul.mubr.msk.bf16.vlgmr.msra.gmra.mrb[20].mxu1 %vm20115_vm12, %v6038_v13  ;;  %v3664_v10 = vld [vmem:[#allocation3 + $0x2c] sm:$0xe]  ;;  %vm20122_vm12 = vmmov %vm20119_vm0  ;;  %v4772_v13 = vshll.u32 %v17865_v21, 16  ;;  %v6163_v48 = vrot.slane %v6161_v63, 3  ;;  %v7298_v42 = vrot.slane %v17945_v60, 2  ;;  %vm20131_vm1 = vcmask 1043456  }
 0x2a6   : > { %13787 = vmatprep.mubr.msk.bf16.mxu1 %vm19880_vm14, %v19857_v1  ;;  %13804 = vmatpush3.bf16.msra.mxu1 %v6209_v18  ;;  %v3665_v58 = vsel %vm16226_vm15, %v17662_v6, %v3664_v10  ;;  %v6041_v6 = vrot.slane %v17909_v28, 2  ;;  %v7289_v18 = vld [vmem:[#allocation3 + $0x8] sm:$0xc]  ;;  %v17958_v10 = vld [vmem:[#allocation3 + $0x3c] sm:$0xff]   ;;  %v6167_v44 = vshrl.u32 %v17886_v35, 16  ;;  %v6170_v63 = vshll.u32 %v17886_v35, 16 }
 0x2a7   : > { %13590 = vmatmul.mubr.msk.bf16.gmra.mrb[24].mxu0 %vm20119_vm0, %v4642_v15  ;;  %13825 = vmatprep.subr.bf16.mxu1 %v19857_v1  ;;  %3666 = vst [vmem:[#allocation3 + $0x2c] sm:$0xe] %v3665_v58  ;;  %v6155_v15 = vrot.slane %v6153_v39, 3  ;;  %v12216_v58 = vcombine.low %v7289_v18, %v17943_v23  ;;  %v4774_v55 = vrot.slane %v4772_v13, 3  ;;  %v17974_v29 = vsel %vm20120_vm6, %v7296_v14, %v7298_v42 }
 0x2a8   : > { %13593 = vmatprep.mubr.msk.bf16.mxu0 %vm19880_vm14, %v19857_v1  ;;  %v6042_v16 = vsel %vm20120_vm6, %v6039_v24, %v6041_v6  ;;  %v6044_v51 = vsel %vm20120_vm6, %v6041_v6, %v6043_v8  ;;  %v17956_v24 = vld [vmem:[#allocation3 + $0x34] sm:$0xff]   ;;  %v19856_v6 = vrot.slane %v17947_v49, 2  ;;  %v8582_v53 = vrot.slane %v17958_v10, 2 }
 0x2a9   : > { %v7295_v25 = vrot.slane %v12216_v58, 2  ;;  %v8580_v40 = vrot.slane %v17956_v24, 2  ;;  %v6156_v61 = vor.u32 %v6155_v15, %v6152_v37  ;;  %v6164_v19 = vor.u32 %v6163_v48, %v6160_v20  ;;  %v4746_v15 = vld [vmem:[#allocation2 + $0x7c] sm:$0x7] }
 0x2aa   : > { %v4778_v13 = vshrl.u32 %v17890_v3, 16  ;;  %v4781_v18 = vshll.u32 %v17890_v3, 16  ;;  %v6169_v58 = vrot.slane %v6167_v44, 2  ;;  %vm20151_vm7 = vcmask 64512  }
 0x2ad   : > { %13788 = vmatmul.mubr.msk.bf16.gmra.mrb[24].mxu1 %vm20122_vm12, %v6040_v45  ;;  %vm20124_vm12 = vmmov %vm20119_vm0  ;;  %v17962_v45 = vld [vmem:[#allocation3 + $0x30] sm:$0xf] }
 0x2ae   : > { %13791 = vmatprep.mubr.msk.bf16.mxu1 %vm19880_vm14, %v19857_v1  ;;  %v8574_v0 = vld [vmem:[#allocation3 + $0x2c] sm:$0xc] }
 0x2af   : > { %13594 = vmatmul.mubr.msk.bf16.gmra.mrb[28].mxu0 %vm20119_vm0, %v4644_v52  ;;  %v17964_v52 = vld [vmem:[#allocation3 + $0x44] sm:$0xff]  }
 0x2b0   : > { %13597 = vmatprep.mubr.msk.bf16.mxu0 %vm19880_vm14, %v19857_v1  ;;  %v19854_v39 = vrot.slane %v17964_v52, 2 }
 0x2b5   : > { %13792 = vmatmul.mubr.msk.bf16.gmra.mrb[28].mxu1 %vm20124_vm12, %v6042_v16  ;;  %vm20126_vm12 = vmmov %vm20119_vm0  ;;  %v12307_v16 = vcombine.low %v8574_v0, %v17962_v45  ;;  %v12155_v0 = vld [vmem:[%s19813_s1 + $0x20] sm:$0xf] }
 0x2b6   : > { %13795 = vmatprep.mubr.msk.bf16.mxu1 %vm19880_vm14, %v19857_v1 }
 0x2b7   : > { %13598 = vmatmul.mubr.msk.bf16.gmra.mrb[32].mxu0 %vm20119_vm0, %v4646_v56  ;;  %vm20127_vm0 = vsmask.f32 5376  ;;  %v4771_v56 = vrot.slane %v4769_v33, 2 }
 0x2b8   : > { %13601 = vmatprep.mubr.msk.bf16.mxu0 %vm19880_vm14, %v19857_v1  ;;  %v4767_v27 = vsel %vm20127_vm0, %v4758_v9, %v4766_v4  ;;  %vm20130_vm0 = vcmask 64512  }
 0x2b9   : > { %v4775_v37 = vor.u32 %v4774_v55, %v4771_v56  ;;  %v6179_v56 = vshll.u32 %v17909_v28, 16 }
 0x2bb   : > { %v6181_v44 = vrot.slane %v6179_v56, 3 }
 0x2bd   : > { %13796 = vmatmul.mubr.msk.bf16.gmra.mrb[32].mxu1 %vm20125_vm10, %v6044_v51  ;;  %vm20128_vm10 = vmmov %vm20120_vm6  ;;  %v8579_v51 = vrot.slane %v12307_v16, 2  ;;  %v6176_v16 = vshrl.u32 %v17909_v28, 16 }
 0x2be   : > { %13799 = vmatprep.mubr.msk.bf16.mxu1 %vm19880_vm14, %v19857_v1  ;;  %v17979_v26 = vsel %vm20128_vm10, %v7298_v42, %v19856_v6  ;;  %vm20132_vm10 = vmmov %vm20120_vm6  ;;  %v18016_v42 = vcombine.low %v17906_v50, %v4746_v15  ;;  %v16031_v15 = vld [vmem:[#allocation3 + $0x20] sm:$0xff]  }
 0x2bf   : > { %13602 = vmatmul.mubr.msk.bf16.gmra.mrb[36].mxu0 %vm20126_vm12, %v4645_v7  ;;  %v12070_v7 = vld [vmem:[%s19813_s1 + $0x20] sm:$0xf]  ;;  %vm20129_vm12 = vmmov %vm20120_vm6  ;;  %v17994_v9 = vsel %vm20120_vm6, %v8579_v51, %v8580_v40  ;;  %v17997_v33 = vsel %vm20132_vm10, %v8580_v40, %v8582_v53  ;;  %v7697_v51 = vld [vmem:[#allocation3 + $0x10] sm:$0x8] }
 0x2c0   : > { %13607 = vmatprep.mubr.msk.bf16.mxu0 %vm19880_vm14, %v19857_v1  ;;  %v17982_v54 = vsel %vm20129_vm12, %v7295_v25, %v7296_v14  ;;  %v4924_v36 = vsel %vm20131_vm1, %v12070_v7, 0  ;;  %vm20133_vm12 = vmmov %vm20130_vm0  ;;  %v6172_v14 = vrot.slane %v6170_v63, 3  ;;  %v4780_v7 = vrot.slane %v4778_v13, 2  ;;  %v6144_v40 = vld [vmem:[#allocation2 + $0xa0] sm:$0x7]  ;;  %v16030_v63 = vld [vmem:[#allocation3 + $0x18] sm:$0xff]  }
 0x2c1   : > { %vm20134_vm1 = vmmov %vm20120_vm6  ;;  %vm20136_vm6 = vcmask 1043456   ;;  %v4783_v25 = vrot.slane %v4781_v18, 3  ;;  %v18031_v18 = vcombine.low %v17917_v34, %v6144_v40  ;;  %v8688_v40 = vld [vmem:[#allocation3 + $0x38] sm:$0xf] }
 0x2c2   : > { %v6322_v48 = vsel %vm20136_vm6, %v12155_v0, 0  ;;  %v6173_v55 = vor.u32 %v6172_v14, %v6169_v58  ;;  %v16034_v58 = vld [vmem:[#allocation3 + $0x3c] sm:$0xff]  }
 0x2c3   : > { %v4784_v50 = vor.u32 %v4783_v25, %v4780_v7  ;;  %v8979_v7 = vld [vmem:[#allocation3 + $0x34] sm:$0x8]  ;;  %v6185_v34 = vshrl.u32 %v18031_v18, 16 }
 0x2c5   : > { %13800 = vmatmul.mubr.msk.bf16.gmra.mrb[36].mxu1 %vm20130_vm0, %v6043_v8  ;;  %v18003_v8 = vsel %vm20134_vm1, %v8582_v53, %v19854_v39  ;;  %vm20135_vm0 = vsmask.f32 5376  ;;  %vm20138_vm1 = vmmov %vm20133_vm12  ;;  %v4790_v53 = vshll.u32 %v18016_v42, 16 }
 0x2c6   : > { %13805 = vmatprep.mubr.msk.bf16.mxu1 %vm19880_vm14, %v19857_v1  ;;  %v6165_v20 = vsel %vm20135_vm0, %v6156_v61, %v6164_v19  ;;  %vm20137_vm10 = vmmov %vm20135_vm0  ;;  %v6178_v61 = vrot.slane %v6176_v16, 2  ;;  %v6174_v0 = vsel %vm20135_vm0, %v6164_v19, %v6173_v55  ;;  %v18038_v16 = vld [vmem:[#allocation3 + $0x44] sm:$0xff]   ;;  %v6188_v19 = vshll.u32 %v18031_v18, 16 }
 0x2c7   : > { %13608 = vmatmul.mubr.msk.bf16.vlgmr.msra.gmra.mrb[20].mxu0 %vm20133_vm12, %v4767_v27  ;;  %v4776_v27 = vsel %vm20137_vm10, %v4766_v4, %v4775_v37  ;;  %v4787_v4 = vshrl.u32 %v18016_v42, 16  ;;  %vm20139_vm6 = vmmov %vm20135_vm0 }
 0x2c8   : > { %13628 = vmatpush3.bf16.msra.mxu0 %v4924_v36  ;;  %13611 = vmatprep.mubr.msk.bf16.mxu0 %vm19880_vm14, %v19857_v1  ;;  %v7404_v36 = vld [vmem:[#allocation3 + $0x14] sm:$0xf]  ;;  %v4785_v14 = vsel %vm20139_vm6, %v4775_v37, %v4784_v50  ;;  %vm20140_vm10 = vmmov %vm20138_vm1  ;;  %v6182_v25 = vor.u32 %v6181_v44, %v6178_v61  ;;  %v8985_v61 = vrot.slane %v16034_v58, 3 }
 0x2c9   : > { %13847 = vmatprep.subr.bf16.mxu0 %v19857_v1  ;;  %v12241_v13 = vcombine.low %v7697_v51, %v7404_v36  ;;  %v7704_v51 = vrot.slane %v16030_v63, 3  ;;  %v7706_v36 = vrot.slane %v16031_v15, 3  ;;  %v19855_v15 = vrot.slane %v18038_v16, 3 }
 0x2cb   : > { %v7703_v56 = vrot.slane %v12241_v13, 3 }
 0x2cd   : > { %13806 = vmatmul.mubr.msk.bf16.vlgmr.msra.gmra.mrb[20].mxu1 %vm20133_vm12, %v6165_v20  ;;  %v18034_v20 = vld [vmem:[#allocation3 + $0x28] sm:$0xff]   ;;  %vm20141_vm12 = vmmov %vm20138_vm1 }
 0x2ce   : > { %13809 = vmatprep.mubr.msk.bf16.mxu1 %vm19880_vm14, %v19857_v1  ;;  %13826 = vmatpush3.bf16.msra.mxu1 %v6322_v48  ;;  %v4789_v48 = vrot.slane %v4787_v4, 2  ;;  %v19853_v37 = vrot.slane %v18034_v20, 3 }
 0x2cf   : > { %13612 = vmatmul.mubr.msk.bf16.gmra.mrb[24].mxu0 %vm20138_vm1, %v4776_v27  ;;  %14045 = vmatprep.subr.bf16.mxu1 %v19857_v1  ;;  %v4792_v27 = vrot.slane %v4790_v53, 3  ;;  %vm20142_vm1 = vcmask 1044480   ;;  %v12332_v53 = vcombine.low %v8979_v7, %v8688_v40  ;;  %v6190_v7 = vrot.slane %v6188_v19, 3 }
 0x2d0   : > { %13615 = vmatprep.mubr.msk.bf16.mxu0 %vm19880_vm14, %v19857_v1  ;;  %v18047_v4 = vsel %vm20142_vm1, %v7703_v56, %v7704_v51  ;;  %vm20143_vm0 = vmmov %vm20142_vm1  ;;  %v6187_v56 = vrot.slane %v6185_v34, 2 }
 0x2d1   : > { %v4793_v44 = vor.u32 %v4792_v27, %v4789_v48  ;;  %v18052_v63 = vsel %vm20143_vm0, %v7704_v51, %v7706_v36  ;;  %vm20144_vm6 = vmmov %vm20143_vm0 }
 0x2d2   : > { %v18057_v13 = vsel %vm20144_vm6, %v7706_v36, %v19853_v37  ;;  %vm20148_vm1 = vmmov %vm20143_vm0  ;;  %v6191_v51 = vor.u32 %v6190_v7, %v6187_v56  ;;  %v4900_v36 = vrot.slane %v17823_v41, 3  ;;  %v4902_v41 = vrot.slane %v17865_v21, 3 }
 0x2d3   : > { %v18067_v48 = vsel %vm20148_vm1, %v8985_v61, %v19855_v15  ;;  %vm20152_vm6 = vmmov %vm20151_vm7  ;;  %v6300_v21 = vrot.slane %v17886_v35, 3  ;;  %v4904_v7 = vrot.slane %v17890_v3, 3  ;;  %v6302_v35 = vrot.slane %v17909_v28, 3 }
 0x2d4   : > { %20149 = vst [vmem:[#allocation5_spill] sm:$0xff] %v18067_v48  ;;  %v6304_v28 = vrot.slane %v18031_v18, 3 }
 0x2d5   : > { %13810 = vmatmul.mubr.msk.bf16.gmra.mrb[24].mxu1 %vm20140_vm10, %v6174_v0  ;;  %v8984_v0 = vrot.slane %v12332_v53, 3  ;;  %vm20145_vm10 = vsmask.f32 5376 }
 0x2d6   : > { %13813 = vmatprep.mubr.msk.bf16.mxu1 %vm19880_vm14, %v19857_v1 }
 0x2d7   : > { %13616 = vmatmul.mubr.msk.bf16.gmra.mrb[28].mxu0 %vm20141_vm12, %v4785_v14  ;;  %v6183_v14 = vsel %vm20145_vm10, %v6173_v55, %v6182_v25  ;;  %vm20146_vm12 = vmmov %vm20143_vm0  ;;  %v4894_v55 = vld [vmem:[#allocation2 + $0x58] sm:$0x8] }
 0x2d8   : > { %13619 = vmatprep.mubr.msk.bf16.mxu0 %vm19880_vm14, %v19857_v1  ;;  %v18062_v58 = vsel %vm20146_vm12, %v8984_v0, %v8985_v61  ;;  %vm20150_vm0 = vmmov %vm20145_vm10  ;;  %v12071_v19 = vcombine.low %v4894_v55, %v17795_v43  ;;  %v12173_v43 = vld [vmem:[%s19816_s4 + $0x4] sm:$0xf]  ;;  %v6298_v0 = vrot.slane %v17855_v2, 3  ;;  %v4903_v2 = vsel %vm20148_vm1, %v4900_v36, %v4902_v41 }
 0x2d9   : > { %20147 = vst [vmem:[#allocation4_spill] sm:$0xff] %v18062_v58  ;;  %v4794_v27 = vsel %vm20150_vm0, %v4784_v50, %v4793_v44  ;;  %vm20153_vm10 = vmmov %vm20150_vm0  ;;  %v6292_v50 = vld [vmem:[#allocation2 + $0x7c] sm:$0x8]  ;;  %v4906_v55 = vrot.slane %v18016_v42, 3 }
 0x2da   : > { %v6192_v34 = vsel %vm20153_vm10, %v6182_v25, %v6191_v51  ;;  %vm20154_vm12 = vmmov %vm20152_vm6  ;;  %v4899_v40 = vrot.slane %v12071_v19, 3  ;;  %v12156_v53 = vcombine.low %v6292_v50, %v17836_v31  ;;  %v12264_v31 = vld [vmem:[%s19816_s4 + $0x4] sm:$0xf]  ;;  %v18126_v19 = vld [vmem:[#allocation3 + $0x4] sm:$0xf] }
 0x2db   : > { %vm20156_vm0 = vmmov %vm20152_vm6 }
 0x2dc   : > { %v4901_v25 = vsel %vm20148_vm1, %v4899_v40, %v4900_v36  ;;  %vm20158_vm10 = vmmov %vm20156_vm0  ;;  %v18140_v36 = vld [vmem:[#allocation3 + $0x8] sm:$0xff]  }
 0x2dd   : > { %13814 = vmatmul.mubr.msk.bf16.gmra.mrb[28].mxu1 %vm20151_vm7, %v6183_v14  ;;  %vm20155_vm7 = vmmov %vm20152_vm6 }
 0x2de   : > { %13817 = vmatprep.mubr.msk.bf16.mxu1 %vm19880_vm14, %v19857_v1 }
 0x2df   : > { %13620 = vmatmul.mubr.msk.bf16.gmra.mrb[32].mxu0 %vm20152_vm6, %v4794_v27  ;;  %vm20157_vm6 = vcmask 1043456  }
 0x2e0   : > { %13623 = vmatprep.mubr.msk.bf16.mxu0 %vm19880_vm14, %v19857_v1  ;;  %v6720_v61 = vsel %vm20157_vm6, %v12173_v43, 0  ;;  %v18143_v43 = vld [vmem:[#allocation3 + $0x28] sm:$0xf] }
 0x2e5   : > { %13818 = vmatmul.mubr.msk.bf16.gmra.mrb[32].mxu1 %vm20154_vm12, %v6192_v34  ;;  %vm20159_vm12 = vmmov %vm20148_vm1  ;;  %v6627_v34 = vld [vmem:[#allocation3] sm:$0xf] }
 0x2e6   : > { %13821 = vmatprep.mubr.msk.bf16.mxu1 %vm19880_vm14, %v19857_v1  ;;  %v18134_v40 = vcombine.low %v6627_v34, %v18126_v19 }
 0x2e7   : > { %13624 = vmatmul.mubr.msk.bf16.gmra.mrb[36].mxu0 %vm20155_vm7, %v4793_v44  ;;  %v6297_v44 = vrot.slane %v12156_v53, 3  ;;  %vm20160_vm7 = vmmov %vm20157_vm6 }
 0x2e8   : > { %13629 = vmatprep.mubr.msk.bf16.mxu0 %vm19880_vm14, %v19857_v1  ;;  %v8008_v56 = vsel %vm20160_vm7, %v12264_v31, 0  ;;  %vm20161_vm6 = vmmov %vm20156_vm0  ;;  %v6668_v53 = vshll.u32 %v18134_v40, 16  ;;  %v6666_v18 = vshrl.u32 %v18134_v40, 16 }
 0x2e9   : > { %v6299_v14 = vsel %vm20159_vm12, %v6297_v44, %v6298_v0  ;;  %vm20163_vm12 = vmmov %vm20148_vm1  ;;  %v6673_v44 = vshll.u32 %v18140_v36, 16 }
 0x2ea   : > { %vm20164_vm7 = vmmov %vm20156_vm0 }
 0x2ed   : > { %13822 = vmatmul.mubr.msk.bf16.gmra.mrb[36].mxu1 %vm20156_vm0, %v6191_v51  ;;  %v4905_v51 = vsel %vm20163_vm12, %v4902_v41, %v4904_v7  ;;  %v18156_v41 = vld [vmem:[#allocation3 + $0x2c] sm:$0xff]  }
 0x2ee   : > { %13827 = vmatprep.mubr.msk.bf16.mxu1 %vm19880_vm14, %v19857_v1 }
 0x2ef   : > { %13630 = vmatmul.mubr.msk.bf16.vlgmr.msra.gmra.mrb[20].mxu0 %vm20158_vm10, %v4901_v25  ;;  %vm20162_vm10 = vmmov %vm20148_vm1  ;;  %v7916_v25 = vld [vmem:[#allocation3 + $0x24] sm:$0xf] }
 0x2f0   : > { %13633 = vmatprep.mubr.msk.bf16.mxu0 %vm19880_vm14, %v19857_v1  ;;  %13848 = vmatpush3.bf16.msra.mxu0 %v6720_v61  ;;  %v6301_v27 = vsel %vm20162_vm10, %v6298_v0, %v6300_v21  ;;  %vm20165_vm1 = vmmov %vm20156_vm0  ;;  %v6670_v61 = vrot.slane %v6668_v53, 1  ;;  %v18151_v0 = vcombine.low %v7916_v25, %v18143_v43  ;;  %v18180_v25 = vld [vmem:[#allocation3 + $0x34] sm:$0xff]  }
 0x2f1   : > { %13869 = vmatprep.subr.bf16.mxu0 %v19857_v1  ;;  %vm20169_vm12 = vmmov %vm20165_vm1 }
 0x2f2   : > { %v6671_v31 = vor.u32 %v6670_v61, %v6666_v18  ;;  %v18182_v18 = vld [vmem:[#allocation3 + $0x18] sm:$0xff]  }
 0x2f5   : > { %13828 = vmatmul.mubr.msk.bf16.vlgmr.msra.gmra.mrb[20].mxu1 %vm20156_vm0, %v6299_v14  ;;  %vm20166_vm0 = vmmov %vm20162_vm10  ;;  %v6675_v14 = vrot.slane %v6673_v44, 1 }
 0x2f6   : > { %13831 = vmatprep.mubr.msk.bf16.mxu1 %vm19880_vm14, %v19857_v1  ;;  %14046 = vmatpush3.bf16.msra.mxu1 %v8008_v56  ;;  %v6303_v3 = vsel %vm20166_vm0, %v6300_v21, %v6302_v35  ;;  %vm20168_vm10 = vmmov %vm20165_vm1  ;;  %v7956_v56 = vshll.u32 %v18151_v0, 16  ;;  %v6636_v21 = vld [vmem:[%s19816_s4] sm:$0xf] }
 0x2f7   : > { %13634 = vmatmul.mubr.msk.bf16.gmra.mrb[24].mxu0 %vm20161_vm6, %v4903_v2  ;;  %14067 = vmatprep.subr.bf16.mxu1 %v19857_v1  ;;  %vm20167_vm6 = vmmov %vm20166_vm0  ;;  %v18159_v2 = vld [vmem:[#allocation3 + $0x10] sm:$0xff]  }
 0x2f8   : > { %13637 = vmatprep.mubr.msk.bf16.mxu0 %vm19880_vm14, %v19857_v1  ;;  %v4907_v50 = vsel %vm20167_vm6, %v4904_v7, %v4906_v55  ;;  %v7961_v7 = vshll.u32 %v18156_v41, 16 }
 0x2fa   : > { %v7963_v34 = vrot.slane %v7961_v7, 1  ;;  %v7969_v7 = vshll.u32 %v18180_v25, 16 }
 0x2fd   : > { %13832 = vmatmul.mubr.msk.bf16.gmra.mrb[24].mxu1 %vm20164_vm7, %v6301_v27  ;;  %vm20170_vm7 = vmmov %vm20166_vm0 }
 0x2fe   : > { %13835 = vmatprep.mubr.msk.bf16.mxu1 %vm19880_vm14, %v19857_v1  ;;  %v6305_v42 = vsel %vm20170_vm7, %v6302_v35, %v6304_v28  ;;  %vm20171_vm0 = vmmov %vm20165_vm1  ;;  %v7958_v35 = vrot.slane %v7956_v56, 1 }
 0x2ff   : > { %13638 = vmatmul.mubr.msk.bf16.gmra.mrb[28].mxu0 %vm20165_vm1, %v4905_v51  ;;  %vm20172_vm6 = vmmov %vm20171_vm0 }
 0x300   : > { %13641 = vmatprep.mubr.msk.bf16.mxu0 %vm19880_vm14, %v19857_v1  ;;  %vm20175_vm7 = vmmov %vm20171_vm0 }
 0x305   : > { %13836 = vmatmul.mubr.msk.bf16.gmra.mrb[28].mxu1 %vm20168_vm10, %v6303_v3  ;;  %vm20173_vm10 = vcmask 1043456   ;;  %v7954_v3 = vshrl.u32 %v18151_v0, 16 }
 0x306   : > { %13839 = vmatprep.mubr.msk.bf16.mxu1 %vm19880_vm14, %v19857_v1  ;;  %v6807_v27 = vsel %vm20173_vm10, %v6636_v21, 0  ;;  %v7965_v21 = vshrl.u32 %v18156_v41, 16 }
 0x307   : > { %13642 = vmatmul.mubr.msk.bf16.gmra.mrb[32].mxu0 %vm20169_vm12, %v4907_v50  ;;  %vm20174_vm12 = vsmask.f32 7424  ;;  %v7925_v50 = vld [vmem:[%s19816_s4] sm:$0xf] }
 0x308   : > { %13645 = vmatprep.mubr.msk.bf16.mxu0 %vm19880_vm14, %v19857_v1  ;;  %v6676_v51 = vsel %vm20174_vm12, %v6671_v31, %v6675_v14 }
 0x30d   : > { %13840 = vmatmul.mubr.msk.bf16.gmra.mrb[32].mxu1 %vm20165_vm1, %v6305_v42  ;;  %v6677_v42 = vshrl.u32 %v18140_v36, 16  ;;  %vm20176_vm1 = vmmov %vm20173_vm10 }
 0x30e   : > { %13843 = vmatprep.mubr.msk.bf16.mxu1 %vm19880_vm14, %v19857_v1  ;;  %v8095_v61 = vsel %vm20176_vm1, %v7925_v50, 0  ;;  %vm20181_vm1 = vmmov %vm20172_vm6 }
 0x30f   : > { %13646 = vmatmul.mubr.msk.bf16.gmra.mrb[36].mxu0 %vm20171_vm0, %v4906_v55  ;;  %v6681_v55 = vshll.u32 %v18159_v2, 16  ;;  %vm20177_vm0 = vmmov %vm20174_vm12  ;;  %v6679_v31 = vor.u32 %v6677_v42, %v6675_v14  ;;  %v18197_v14 = vld [vmem:[#allocation3 + $0x3c] sm:$0xff]  }
 0x310   : > { %13849 = vmatprep.mubr.msk.bf16.mxu0 %vm19880_vm14, %v19857_v1  ;;  %vm20178_vm10 = vmmov %vm20177_vm0  ;;  %v7981_v37 = vshrl.u32 %v18197_v14, 16 }
 0x311   : > { %v6683_v53 = vrot.slane %v6681_v55, 1  ;;  %vm20179_vm12 = vmmov %vm20172_vm6  ;;  %v7971_v55 = vrot.slane %v7969_v7, 1 }
 0x313   : > { %v6684_v56 = vsel %vm20178_vm10, %v6679_v31, %v6683_v53  ;;  %vm20183_vm10 = vmmov %vm20177_vm0 }
 0x315   : > { %13844 = vmatmul.mubr.msk.bf16.gmra.mrb[36].mxu1 %vm20172_vm6, %v6304_v28  ;;  %v7959_v28 = vor.u32 %v7958_v35, %v7954_v3  ;;  %v18199_v35 = vld [vmem:[#allocation3 + $0x20] sm:$0xf]  ;;  %v6685_v3 = vshrl.u32 %v18159_v2, 16 }
 0x316   : > { %14047 = vmatprep.mubr.msk.bf16.mxu1 %vm19880_vm14, %v19857_v1 }
 0x317   : > { %13850 = vmatmul.mubr.msk.bf16.vlgmr.msra.gmra.mrb[40].mxu0 %vm20175_vm7, %v6676_v51  ;;  %v7964_v44 = vsel %vm20177_vm0, %v7959_v28, %v7963_v34  ;;  %v7967_v51 = vor.u32 %v7965_v21, %v7963_v34  ;;  %v6637_v28 = vld [vmem:[#allocation3 + $0x24] sm:$0x1]  ;;  %vm20180_vm7 = vmmov %vm20177_vm0  ;;  %v7973_v21 = vshrl.u32 %v18180_v25, 16 }
 0x318   : > { %13853 = vmatprep.mubr.msk.bf16.mxu0 %vm19880_vm14, %v19857_v1  ;;  %13870 = vmatpush3.bf16.msra.mxu0 %v6807_v27  ;;  %v6689_v27 = vshll.u32 %v18182_v18, 16  ;;  %v18205_v31 = vcombine.low %v18199_v35, %v6637_v28 }
 0x319   : > { %13891 = vmatprep.subr.bf16.mxu0 %v19857_v1  ;;  %v7972_v42 = vsel %vm20180_vm7, %v7967_v51, %v7971_v55  ;;  %v7926_v51 = vld [vmem:[#allocation3 + $0x48] sm:$0x1]  ;;  %vm20185_vm7 = vmmov %vm20177_vm0 }
 0x31a   : > { %v6691_v50 = vrot.slane %v6689_v27, 1  ;;  %v6697_v27 = vshll.u32 %v18205_v31, 16 }
 0x31d   : > { %14048 = vmatmul.mubr.msk.bf16.vlgmr.msra.gmra.mrb[40].mxu1 %vm20172_vm6, %v7964_v44  ;;  %v7977_v44 = vshll.u32 %v18197_v14, 16  ;;  %vm20182_vm6 = vmmov %vm20181_vm1 }
 0x31e   : > { %14051 = vmatprep.mubr.msk.bf16.mxu1 %vm19880_vm14, %v19857_v1  ;;  %14068 = vmatpush3.bf16.msra.mxu1 %v8095_v61  ;;  %v6687_v61 = vor.u32 %v6685_v3, %v6683_v53  ;;  %v6693_v53 = vshrl.u32 %v18182_v18, 16  ;;  %v7975_v3 = vor.u32 %v7973_v21, %v7971_v55  ;;  %v6701_v21 = vshrl.u32 %v18205_v31, 16 }
 0x31f   : > { %13854 = vmatmul.mubr.msk.bf16.gmra.mrb[44].mxu0 %vm20179_vm12, %v6684_v56  ;;  %14089 = vmatprep.subr.bf16.mxu1 %v19857_v1  ;;  %v18212_v56 = vld [vmem:[#allocation3 + $0x44] sm:$0xf]  ;;  %v7979_v7 = vrot.slane %v7977_v44, 1  ;;  %vm20184_vm12 = vmmov %vm20181_vm1 }
 0x320   : > { %13857 = vmatprep.mubr.msk.bf16.mxu0 %vm19880_vm14, %v19857_v1  ;;  %v6692_v34 = vsel %vm20177_vm0, %v6687_v61, %v6691_v50  ;;  %v6695_v28 = vor.u32 %v6693_v53, %v6691_v50 }
 0x321   : > { %v7980_v61 = vsel %vm20183_vm10, %v7975_v3, %v7979_v7  ;;  %v7983_v55 = vor.u32 %v7981_v37, %v7979_v7  ;;  %vm20187_vm10 = vmmov %vm20181_vm1  ;;  %v12281_v3 = vld [vmem:[%s19816_s4 + $0x8] sm:$0xf] }
 0x325   : > { %14052 = vmatmul.mubr.msk.bf16.gmra.mrb[44].mxu1 %vm20181_vm1, %v7972_v42  ;;  %v18220_v42 = vcombine.low %v18212_v56, %v7926_v51 }
 0x326   : > { %14055 = vmatprep.mubr.msk.bf16.mxu1 %vm19880_vm14, %v19857_v1 }
 0x327   : > { %13858 = vmatmul.mubr.msk.bf16.gmra.mrb[48].mxu0 %vm20182_vm6, %v6692_v34  ;;  %v6699_v34 = vrot.slane %v6697_v27, 1  ;;  %v7985_v39 = vshll.u32 %v18220_v42, 16  ;;  %vm20186_vm6 = vmmov %vm20181_vm1  ;;  %v7989_v37 = vshrl.u32 %v18220_v42, 16 }
 0x328   : > { %13861 = vmatprep.mubr.msk.bf16.mxu0 %vm19880_vm14, %v19857_v1 }
 0x329   : > { %v6700_v44 = vsel %vm20185_vm7, %v6695_v28, %v6699_v34  ;;  %v7987_v50 = vrot.slane %v7985_v39, 1  ;;  %v6703_v27 = vor.u32 %v6701_v21, %v6699_v34  ;;  %v12190_v39 = vld [vmem:[%s19816_s4 + $0x8] sm:$0xf]  ;;  %vm20189_vm7 = vcmask 1043456  }
 0x32a   : > { %v6912_v51 = vsel %vm20189_vm7, %v12190_v39, 0 }
 0x32b   : > { %v7988_v53 = vsel %vm20177_vm0, %v7983_v55, %v7987_v50  ;;  %v7991_v7 = vor.u32 %v7989_v37, %v7987_v50  ;;  %vm20190_vm0 = vmmov %vm20189_vm7  ;;  %v12197_v55 = vld [vmem:[%s19816_s4 + $0xc] sm:$0xf]  ;;  %v8169_v50 = vld [vmem:[#allocation3 + $0x24] sm:$0xe]  ;;  %v6890_v37 = vrot.slane %v18159_v2, 1 }
 0x32c   : > { %v8199_v28 = vsel %vm20190_vm0, %v12281_v3, 0  ;;  %vm20194_vm7 = vmmov %vm20181_vm1 }
 0x32d   : > { %14056 = vmatmul.mubr.msk.bf16.gmra.mrb[48].mxu1 %vm20184_vm12, %v7980_v61  ;;  %vm20188_vm12 = vmmov %vm20181_vm1 }
 0x32e   : > { %14059 = vmatprep.mubr.msk.bf16.mxu1 %vm19880_vm14, %v19857_v1  ;;  %vm20195_vm0 = vmmov %vm20181_vm1 }
 0x32f   : > { %13862 = vmatmul.mubr.msk.bf16.gmra.mrb[52].mxu0 %vm20181_vm1, %v6700_v44  ;;  %v6888_v44 = vrot.slane %v18140_v36, 1 }
 0x330   : > { %13865 = vmatprep.mubr.msk.bf16.mxu0 %vm19880_vm14, %v19857_v1 }
 0x335   : > { %14060 = vmatmul.mubr.msk.bf16.gmra.mrb[52].mxu1 %vm20186_vm6, %v7988_v53  ;;  %vm20191_vm6 = vmmov %vm20181_vm1  ;;  %v12282_v53 = vcombine.low %v8169_v50, %v18143_v43 }
 0x336   : > { %14063 = vmatprep.mubr.msk.bf16.mxu1 %vm19880_vm14, %v19857_v1 }
 0x337   : > { %13866 = vmatmul.mubr.msk.bf16.gmra.mrb[56].mxu0 %vm20187_vm10, %v6703_v27  ;;  %vm20192_vm10 = vmmov %vm20181_vm1  ;;  %v8174_v27 = vrot.slane %v12282_v53, 1 }
 0x338   : > { %13871 = vmatprep.mubr.msk.bf16.mxu0 %vm19880_vm14, %v19857_v1 }
 0x33d   : > { %14064 = vmatmul.mubr.msk.bf16.gmra.mrb[56].mxu1 %vm20188_vm12, %v7991_v7  ;;  %vm20193_vm12 = vmmov %vm20181_vm1  ;;  %v6892_v7 = vrot.slane %v18182_v18, 1 }
 0x33e   : > { %14069 = vmatprep.mubr.msk.bf16.mxu1 %vm19880_vm14, %v19857_v1 }
 0x33f   : > { %13872 = vmatmul.mubr.msk.bf16.vlgmr.msra.gmra.mrb[40].mxu0 %vm20181_vm1, %v18134_v40  ;;  %v6881_v40 = vld [vmem:[#allocation3] sm:$0xe] }
 0x340   : > { %13875 = vmatprep.mubr.msk.bf16.mxu0 %vm19880_vm14, %v19857_v1  ;;  %13892 = vmatpush3.bf16.msra.mxu0 %v6912_v51  ;;  %v12191_v61 = vcombine.low %v6881_v40, %v18126_v19 }
 0x341   : > { %13913 = vmatprep.subr.bf16.mxu0 %v19857_v1 }
 0x342   : > { %v6887_v34 = vrot.slane %v12191_v61, 1 }
 0x345   : > { %14070 = vmatmul.mubr.msk.bf16.vlgmr.msra.gmra.mrb[40].mxu1 %vm20191_vm6, %v18151_v0  ;;  %vm20196_vm6 = vmmov %vm20195_vm0  ;;  %v12184_v0 = vcombine.low %v18199_v35, %v18199_v35  ;;  %v12275_v35 = vcombine.low %v18212_v56, %v18212_v56  ;;  %v12288_v56 = vld [vmem:[%s19816_s4 + $0xc] sm:$0xf] }
 0x346   : > { %14073 = vmatprep.mubr.msk.bf16.mxu1 %vm19880_vm14, %v19857_v1  ;;  %14090 = vmatpush3.bf16.msra.mxu1 %v8199_v28  ;;  %v8179_v28 = vrot.slane %v18197_v14, 1 }
 0x347   : > { %13876 = vmatmul.mubr.msk.bf16.gmra.mrb[44].mxu0 %vm20192_vm10, %v18140_v36  ;;  %14111 = vmatprep.subr.bf16.mxu1 %v19857_v1  ;;  %vm20197_vm10 = vmmov %vm20195_vm0  ;;  %v8175_v36 = vrot.slane %v18156_v41, 1 }
 0x348   : > { %13879 = vmatprep.mubr.msk.bf16.mxu0 %vm19880_vm14, %v19857_v1 }
 0x34d   : > { %14074 = vmatmul.mubr.msk.bf16.gmra.mrb[44].mxu1 %vm20193_vm12, %v18156_v41  ;;  %vm20198_vm12 = vmmov %vm20195_vm0 }
 0x34e   : > { %14077 = vmatprep.mubr.msk.bf16.mxu1 %vm19880_vm14, %v19857_v1 }
 0x34f   : > { %13880 = vmatmul.mubr.msk.bf16.gmra.mrb[48].mxu0 %vm20194_vm7, %v18159_v2  ;;  %vm20199_vm7 = vcmask 1043456   ;;  %v8177_v2 = vrot.slane %v18180_v25, 1 }
 0x350   : > { %13883 = vmatprep.mubr.msk.bf16.mxu0 %vm19880_vm14, %v19857_v1  ;;  %v7057_v19 = vsel %vm20199_vm7, %v12197_v55, 0  ;;  %v7033_v55 = vrot.slane %v17939_v17, 1 }
 0x355   : > { %14078 = vmatmul.mubr.msk.bf16.gmra.mrb[48].mxu1 %vm20181_vm1, %v18180_v25  ;;  %vm20200_vm1 = vcmask 1046528   ;;  %v6894_v25 = vrot.slane %v18205_v31, 1 }
 0x356   : > { %14081 = vmatprep.mubr.msk.bf16.mxu1 %vm19880_vm14, %v19857_v1  ;;  %v6889_v21 = vsel %vm20200_vm1, %v6887_v34, %v6888_v44  ;;  %v6995_v34 = vld [vmem:[#allocation3 + $0x8] sm:$0xe] }
 0x357   : > { %13884 = vmatmul.mubr.msk.bf16.gmra.mrb[52].mxu0 %vm20195_vm0, %v18182_v18 }
 0x358   : > { %13887 = vmatprep.mubr.msk.bf16.mxu0 %vm19880_vm14, %v19857_v1 }
 0x35d   : > { %14082 = vmatmul.mubr.msk.bf16.gmra.mrb[52].mxu1 %vm20196_vm6, %v18197_v14  ;;  %vm20201_vm6 = vmmov %vm20199_vm7  ;;  %v5174_v14 = vld [vmem:[#allocation3 + $0x6c] sm:$0x1] }
 0x35e   : > { %14085 = vmatprep.mubr.msk.bf16.mxu1 %vm19880_vm14, %v19857_v1  ;;  %v8343_v39 = vsel %vm20201_vm6, %v12288_v56, 0  ;;  %vm20204_vm7 = vmmov %vm20200_vm1  ;;  %v5175_v31 = vsel %vm16209_vm11, 0, %v5174_v14  ;;  %v309_v56 = vld [vmem:[#allocation3 + $0x98] sm:$0xe]  ;;  %v8323_v14 = vrot.slane %v17964_v52, 1 }
 0x35f   : > { %13888 = vmatmul.mubr.msk.bf16.gmra.mrb[56].mxu0 %vm20197_vm10, %v12184_v0  ;;  %vm20202_vm10 = vmmov %vm20200_vm1  ;;  %v6891_v41 = vsel %vm20204_vm7, %v6888_v44, %v6890_v37  ;;  %v8181_v0 = vrot.slane %v18220_v42, 1  ;;  %5176 = vst [vmem:[#allocation3 + $0x6c] sm:$0x1] %v5175_v31  ;;  %v18354_v42 = vcombine.low %v6995_v34, %v17943_v23  ;;  %v8282_v44 = vld [vmem:[#allocation3 + $0x2c] sm:$0xe] }
 0x360   : > { %13893 = vmatprep.mubr.msk.bf16.mxu0 %vm19880_vm14, %v19857_v1  ;;  %v8176_v43 = vsel %vm20202_vm10, %v8174_v27, %v8175_v36  ;;  %vm20205_vm1 = vmmov %vm20195_vm0  ;;  %v8319_v27 = vrot.slane %v17956_v24, 1  ;;  %v8291_v31 = vld [vmem:[#allocation3 + $0x50] sm:$0x1]  ;;  %v18407_v34 = vld [vmem:[#allocation3 + $0x4c] sm:$0xf] }
 0x361   : > { %vm20207_vm6 = vmmov %vm20205_vm1  ;;  %v7032_v50 = vrot.slane %v18354_v42, 1 }
 0x365   : > { %14086 = vmatmul.mubr.msk.bf16.gmra.mrb[56].mxu1 %vm20198_vm12, %v12275_v35  ;;  %vm20203_vm12 = vmmov %vm20195_vm0  ;;  %v12208_v35 = vld [vmem:[%s19816_s4 + $0x10] sm:$0xf] }
 0x366   : > { %14091 = vmatprep.mubr.msk.bf16.mxu1 %vm19880_vm14, %v19857_v1 }
 0x367   : > { %13894 = vmatmul.mubr.msk.bf16.vlgmr.msra.gmra.mrb[40].mxu0 %vm20195_vm0, %v6889_v21  ;;  %vm20206_vm0 = vmmov %vm20204_vm7 }
 0x368   : > { %13897 = vmatprep.mubr.msk.bf16.mxu0 %vm19880_vm14, %v19857_v1  ;;  %13914 = vmatpush3.bf16.msra.mxu0 %v7057_v19  ;;  %v8178_v51 = vsel %vm20206_vm0, %v8175_v36, %v8177_v2  ;;  %vm20208_vm10 = vmmov %vm20206_vm0  ;;  %v6895_v40 = vsel %vm20206_vm0, %v6892_v7, %v6894_v25  ;;  %v18362_v19 = vcombine.low %v8282_v44, %v17962_v45  ;;  %v12299_v45 = vld [vmem:[%s19816_s4 + $0x10] sm:$0xf]  ;;  %v6572_v36 = vld [vmem:[#allocation3 + $0x90] sm:$0x1] }
 0x369   : > { %13935 = vmatprep.subr.bf16.mxu0 %v19857_v1  ;;  %v6893_v3 = vsel %vm20208_vm10, %v6890_v37, %v6892_v7  ;;  %vm20210_vm7 = vmmov %vm20206_vm0  ;;  %v7035_v37 = vrot.slane %v17945_v60, 1 }
 0x36a   : > { %v8180_v18 = vsel %vm20210_vm7, %v8177_v2, %v8179_v28  ;;  %vm20212_vm10 = vmmov %vm20206_vm0  ;;  %vm20215_vm0 = vcmask 1043456   ;;  %v8318_v23 = vrot.slane %v18362_v19, 1 }
 0x36b   : > { %v8182_v61 = vsel %vm20212_vm10, %v8179_v28, %v8181_v0  ;;  %vm20214_vm7 = vmmov %vm20205_vm1  ;;  %v7206_v21 = vsel %vm20215_vm0, %v12208_v35, 0  ;;  %v7004_v28 = vld [vmem:[#allocation3 + $0x2c] sm:$0x1] }
 0x36d   : > { %14092 = vmatmul.mubr.msk.bf16.vlgmr.msra.gmra.mrb[40].mxu1 %vm20203_vm12, %v8176_v43  ;;  %vm20209_vm12 = vmmov %vm20205_vm1  ;;  %v310_v43 = vsel %vm16226_vm15, 0, %v309_v56 }
 0x36e   : > { %14095 = vmatprep.mubr.msk.bf16.mxu1 %vm19880_vm14, %v19857_v1  ;;  %14112 = vmatpush3.bf16.msra.mxu1 %v8343_v39  ;;  %v6573_v39 = vsel %vm16209_vm11, 0, %v6572_v36  ;;  %311 = vst [vmem:[#allocation3 + $0x98] sm:$0xe] %v310_v43  ;;  %v7150_v36 = vshll.u32 %v18354_v42, 16  ;;  %v8435_v43 = vshll.u32 %v18362_v19, 16 }
 0x36f   : > { %13898 = vmatmul.mubr.msk.bf16.gmra.mrb[44].mxu0 %vm20205_vm1, %v6891_v41  ;;  %14133 = vmatprep.subr.bf16.mxu1 %v19857_v1  ;;  %6574 = vst [vmem:[#allocation3 + $0x90] sm:$0x1] %v6573_v39  ;;  %v8432_v39 = vshrl.u32 %v18362_v19, 16 }
 0x370   : > { %13901 = vmatprep.mubr.msk.bf16.mxu0 %vm19880_vm14, %v19857_v1 }
 0x375   : > { %14096 = vmatmul.mubr.msk.bf16.gmra.mrb[44].mxu1 %vm20207_vm6, %v8178_v51  ;;  %vm20211_vm6 = vmmov %vm20205_vm1  ;;  %v8321_v51 = vrot.slane %v17958_v10, 1 }
 0x376   : > { %14099 = vmatprep.mubr.msk.bf16.mxu1 %vm19880_vm14, %v19857_v1 }
 0x377   : > { %13902 = vmatmul.mubr.msk.bf16.gmra.mrb[48].mxu0 %vm20209_vm12, %v6893_v3  ;;  %vm20213_vm12 = vmmov %vm20205_vm1  ;;  %v7037_v3 = vrot.slane %v17947_v49, 1 }
 0x378   : > { %13905 = vmatprep.mubr.msk.bf16.mxu0 %vm19880_vm14, %v19857_v1 }
 0x37d   : > { %14100 = vmatmul.mubr.msk.bf16.gmra.mrb[48].mxu1 %vm20205_vm1, %v8180_v18  ;;  %v18397_v18 = vld [vmem:[#allocation3 + $0x28] sm:$0xf] }
 0x37e   : > { %14103 = vmatprep.mubr.msk.bf16.mxu1 %vm19880_vm14, %v19857_v1 }
 0x37f   : > { %13906 = vmatmul.mubr.msk.bf16.gmra.mrb[52].mxu0 %vm20211_vm6, %v6895_v40  ;;  %vm20216_vm6 = vmmov %vm20212_vm10 }
 0x380   : > { %13909 = vmatprep.mubr.msk.bf16.mxu0 %vm19880_vm14, %v19857_v1  ;;  %v7034_v53 = vsel %vm20216_vm6, %v7032_v50, %v7033_v55  ;;  %vm20217_vm10 = vmmov %vm20205_vm1 }
 0x385   : > { %14104 = vmatmul.mubr.msk.bf16.gmra.mrb[52].mxu1 %vm20213_vm12, %v8182_v61  ;;  %vm20218_vm12 = vmmov %vm20215_vm0 }
 0x386   : > { %14107 = vmatprep.mubr.msk.bf16.mxu1 %vm19880_vm14, %v19857_v1  ;;  %v8491_v41 = vsel %vm20218_vm12, %v12299_v45, 0  ;;  %vm20220_vm0 = vmmov %vm20216_vm6  ;;  %v7147_v45 = vshrl.u32 %v18354_v42, 16  ;;  %v8440_v42 = vshrl.u32 %v17956_v24, 16 }
 0x387   : > { %13910 = vmatmul.mubr.msk.bf16.gmra.mrb[56].mxu0 %vm20214_vm7, %v6894_v25  ;;  %vm20219_vm7 = vmmov %vm20216_vm6  ;;  %v7036_v7 = vsel %vm20220_vm0, %v7033_v55, %v7035_v37  ;;  %v8324_v44 = vsel %vm20220_vm0, %v8321_v51, %v8323_v14  ;;  %v12293_v55 = vcombine.low %v18407_v34, %v8291_v31 }
 0x388   : > { %13915 = vmatprep.mubr.msk.bf16.mxu0 %vm19880_vm14, %v19857_v1  ;;  %v8320_v2 = vsel %vm20219_vm7, %v8318_v23, %v8319_v27  ;;  %vm20221_vm6 = vmmov %vm20205_vm1 }
 0x389   : > { %vm20223_vm12 = vmmov %vm20205_vm1  ;;  %v8325_v50 = vrot.slane %v12293_v55, 1  ;;  %v8452_v55 = vshll.u32 %v17958_v10, 16 }
 0x38a   : > { %vm20224_vm7 = vmmov %vm20220_vm0 }
 0x38b   : > { %v7038_v40 = vsel %vm20224_vm7, %v7035_v37, %v7037_v3  ;;  %vm20228_vm7 = vmmov %vm20220_vm0  ;;  %v7149_v37 = vrot.slane %v7147_v45, 1  ;;  %v7176_v45 = vshll.u32 %v17947_v49, 16 }
 0x38c   : > { %v8326_v23 = vsel %vm20228_vm7, %v8323_v14, %v8325_v50 }
 0x38d   : > { %14108 = vmatmul.mubr.msk.bf16.gmra.mrb[56].mxu1 %vm20205_vm1, %v8181_v0  ;;  %v12202_v0 = vcombine.low %v18397_v18, %v7004_v28 }
 0x38e   : > { %14113 = vmatprep.mubr.msk.bf16.mxu1 %vm19880_vm14, %v19857_v1 }
 0x38f   : > { %13916 = vmatmul.mubr.msk.bf16.vlgmr.msra.gmra.mrb[40].mxu0 %vm20217_vm10, %v7034_v53  ;;  %vm20222_vm10 = vmmov %vm20220_vm0  ;;  %v7039_v61 = vrot.slane %v12202_v0, 1  ;;  %v7158_v53 = vshll.u32 %v17939_v17, 16  ;;  %v8442_v0 = vrot.slane %v8440_v42, 1  ;;  %v7178_v42 = vrot.slane %v7176_v45, 2 }
 0x390   : > { %13919 = vmatprep.mubr.msk.bf16.mxu0 %vm19880_vm14, %v19857_v1  ;;  %13936 = vmatpush3.bf16.msra.mxu0 %v7206_v21  ;;  %v8322_v25 = vsel %vm20222_vm10, %v8319_v27, %v8321_v51  ;;  %vm20226_vm10 = vmmov %vm20220_vm0  ;;  %v7155_v21 = vshrl.u32 %v17939_v17, 16  ;;  %v7152_v17 = vrot.slane %v7150_v36, 2  ;;  %v7167_v51 = vshll.u32 %v17945_v60, 16 }
 0x391   : > { %13957 = vmatprep.subr.bf16.mxu0 %v19857_v1  ;;  %v7040_v35 = vsel %vm20226_vm10, %v7037_v3, %v7039_v61  ;;  %v7160_v27 = vrot.slane %v7158_v53, 2  ;;  %vm20229_vm0 = vmmov %vm20205_vm1  ;;  %v12215_v3 = vld [vmem:[%s19816_s4 + $0x14] sm:$0xf]  ;;  %vm20231_vm10 = vcmask 1043456  }
 0x392   : > { %v7157_v56 = vrot.slane %v7155_v21, 1  ;;  %v7153_v28 = vor.u32 %v7152_v17, %v7149_v37  ;;  %v7320_v19 = vsel %vm20231_vm10, %v12215_v3, 0  ;;  %vm20233_vm7 = vmmov %vm20229_vm0  ;;  %v8454_v37 = vrot.slane %v8452_v55, 2 }
 0x393   : > { %v8458_v17 = vshrl.u32 %v17964_v52, 16 }
 0x395   : > { %14114 = vmatmul.mubr.msk.bf16.vlgmr.msra.gmra.mrb[40].mxu1 %vm20205_vm1, %v8320_v2  ;;  %v8443_v2 = vshll.u32 %v17956_v24, 16 }
 0x396   : > { %14117 = vmatprep.mubr.msk.bf16.mxu1 %vm19880_vm14, %v19857_v1  ;;  %14134 = vmatpush3.bf16.msra.mxu1 %v8491_v41  ;;  %v7161_v41 = vor.u32 %v7160_v27, %v7157_v56 }
 0x397   : > { %13920 = vmatmul.mubr.msk.bf16.gmra.mrb[44].mxu0 %vm20221_vm6, %v7036_v7  ;;  %14155 = vmatprep.subr.bf16.mxu1 %v19857_v1  ;;  %vm20225_vm6 = vmmov %vm20205_vm1  ;;  %v7164_v7 = vshrl.u32 %v17945_v60, 16  ;;  %v8445_v24 = vrot.slane %v8443_v2, 2  ;;  %v7169_v60 = vrot.slane %v7167_v51, 2  ;;  %v8461_v2 = vshll.u32 %v17964_v52, 16 }
 0x398   : > { %13923 = vmatprep.mubr.msk.bf16.mxu0 %vm19880_vm14, %v19857_v1 }
 0x399   : > { %v7166_v31 = vrot.slane %v7164_v7, 1  ;;  %v8446_v21 = vor.u32 %v8445_v24, %v8442_v0 }
 0x39b   : > { %v7170_v53 = vor.u32 %v7169_v60, %v7166_v31 }
 0x39d   : > { %14118 = vmatmul.mubr.msk.bf16.gmra.mrb[44].mxu1 %vm20223_vm12, %v8322_v25  ;;  %vm20227_vm12 = vmmov %vm20205_vm1  ;;  %v8434_v25 = vrot.slane %v8432_v39, 1 }
 0x39e   : > { %14121 = vmatprep.mubr.msk.bf16.mxu1 %vm19880_vm14, %v19857_v1 }
 0x39f   : > { %13924 = vmatmul.mubr.msk.bf16.gmra.mrb[48].mxu0 %vm20205_vm1, %v7038_v40  ;;  %v8437_v40 = vrot.slane %v8435_v43, 2 }
 0x3a0   : > { %13927 = vmatprep.mubr.msk.bf16.mxu0 %vm19880_vm14, %v19857_v1 }
 0x3a5   : > { %14122 = vmatmul.mubr.msk.bf16.gmra.mrb[48].mxu1 %vm20225_vm6, %v8324_v44  ;;  %vm20230_vm6 = vmmov %vm20229_vm0  ;;  %v8449_v44 = vshrl.u32 %v17958_v10, 16 }
 0x3a6   : > { %14125 = vmatprep.mubr.msk.bf16.mxu1 %vm19880_vm14, %v19857_v1 }
 0x3a7   : > { %13928 = vmatmul.mubr.msk.bf16.gmra.mrb[52].mxu0 %vm20227_vm12, %v7040_v35  ;;  %vm20232_vm12 = vsmask.f32 6400  ;;  %v12306_v35 = vld [vmem:[%s19816_s4 + $0x14] sm:$0xf]  ;;  %v8451_v27 = vrot.slane %v8449_v44, 1 }
 0x3a8   : > { %13931 = vmatprep.mubr.msk.bf16.mxu0 %vm19880_vm14, %v19857_v1  ;;  %v7162_v14 = vsel %vm20232_vm12, %v7153_v28, %v7161_v41  ;;  %v8460_v28 = vrot.slane %v8458_v17, 1 }
 0x3ad   : > { %14126 = vmatmul.mubr.msk.bf16.gmra.mrb[52].mxu1 %vm20205_vm1, %v8326_v23  ;;  %v7173_v23 = vshrl.u32 %v17947_v49, 16  ;;  %vm20234_vm1 = vmmov %vm20231_vm10 }
 0x3ae   : > { %14129 = vmatprep.mubr.msk.bf16.mxu1 %vm19880_vm14, %v19857_v1  ;;  %v8604_v36 = vsel %vm20234_vm1, %v12306_v35, 0  ;;  %vm20239_vm1 = vmmov %vm20230_vm6 }
 0x3af   : > { %13932 = vmatmul.mubr.msk.bf16.gmra.mrb[56].mxu0 %vm20229_vm0, %v7039_v61  ;;  %v8438_v61 = vor.u32 %v8437_v40, %v8434_v25  ;;  %vm20235_vm0 = vmmov %vm20232_vm12  ;;  %v7175_v43 = vrot.slane %v7173_v23, 1  ;;  %v8463_v25 = vrot.slane %v8461_v2, 2  ;;  %v18474_v40 = vld [vmem:[%s19814_s2] ss:$0 sm:$0xff] }
 0x3b0   : > { %13937 = vmatprep.mubr.msk.bf16.mxu0 %vm19880_vm14, %v19857_v1  ;;  %vm20236_vm10 = vmmov %vm20235_vm0 }
 0x3b1   : > { %v8447_v10 = vsel %vm20235_vm0, %v8438_v61, %v8446_v21  ;;  %v7171_v39 = vsel %vm20236_vm10, %v7161_v41, %v7170_v53  ;;  %vm20237_vm12 = vmmov %vm20230_vm6  ;;  %v7179_v3 = vor.u32 %v7178_v42, %v7175_v43  ;;  %v18481_v61 = vld [vmem:[%s19815_s3] ss:$0 sm:$0xff] }
 0x3b2   : > { %vm20241_vm10 = vmmov %vm20235_vm0 }
 0x3b5   : > { %14130 = vmatmul.mubr.msk.bf16.gmra.mrb[56].mxu1 %vm20230_vm6, %v8325_v50  ;;  %v7140_v50 = vld [vmem:[#allocation3 + $0x2c] sm:$0x3] }
 0x3b6   : > { %14135 = vmatprep.mubr.msk.bf16.mxu1 %vm19880_vm14, %v19857_v1  ;;  %v18456_v56 = vcombine.low %v18397_v18, %v7140_v50  ;;  %v8455_v18 = vor.u32 %v8454_v37, %v8451_v27  ;;  %v7180_v50 = vsel %vm20235_vm0, %v7170_v53, %v7179_v3 }
 0x3b7   : > { %13938 = vmatmul.mubr.msk.bf16.vlgmr.msra.gmra.mrb[40].mxu0 %vm20233_vm7, %v7162_v14  ;;  %vm20238_vm7 = vmmov %vm20235_vm0 }
 0x3b8   : > { %13941 = vmatprep.mubr.msk.bf16.mxu0 %vm19880_vm14, %v19857_v1  ;;  %13958 = vmatpush3.bf16.msra.mxu0 %v7320_v19  ;;  %v7182_v7 = vshrl.u32 %v18456_v56, 16  ;;  %v7185_v41 = vshll.u32 %v18456_v56, 16  ;;  %v8456_v24 = vsel %vm20238_vm7, %v8446_v21, %v8455_v18  ;;  %v18489_v21 = vor.u32 %v8463_v25, %v8460_v28  ;;  %vm20243_vm7 = vmmov %vm20239_vm1 }
 0x3b9   : > { %13979 = vmatprep.subr.bf16.mxu0 %v19857_v1 }
 0x3ba   : > { %v7184_v31 = vrot.slane %v7182_v7, 1  ;;  %v7187_v60 = vrot.slane %v7185_v41, 2  ;;  %v8465_v42 = vsel %vm20241_vm10, %v8455_v18, %v18489_v21  ;;  %vm20246_vm10 = vmmov %vm20239_vm1 }
 0x3bd   : > { %14136 = vmatmul.mubr.msk.bf16.vlgmr.msra.gmra.mrb[40].mxu1 %vm20230_vm6, %v8447_v10  ;;  %vm20240_vm6 = vmmov %vm20239_vm1  ;;  %v18495_v10 = vor.u32 %v7187_v60, %v7184_v31  ;;  %v12222_v31 = vld [vmem:[%s19816_s4 + $0x18] sm:$0xf] }
 0x3be   : > { %14139 = vmatprep.mubr.msk.bf16.mxu1 %vm19880_vm14, %v19857_v1  ;;  %14156 = vmatpush3.bf16.msra.mxu1 %v8604_v36 }
 0x3bf   : > { %13942 = vmatmul.mubr.msk.bf16.gmra.mrb[44].mxu0 %vm20237_vm12, %v7171_v39  ;;  %14177 = vmatprep.subr.bf16.mxu1 %v19857_v1  ;;  %vm20242_vm12 = vmmov %vm20235_vm0  ;;  %vm20244_vm0 = vcmask 1043456  }
 0x3c0   : > { %13945 = vmatprep.mubr.msk.bf16.mxu0 %vm19880_vm14, %v19857_v1 }
 0x3c2   : > { %v4960_v51 = vpop.f32.mrb[20].mxu0 }
 0x3c3   : > { %v5007_v0 = vmul.f32 %v18474_v40, %v4960_v51  ;;  %v13631_v19 = vpop.f32.mrb[21].mxu0 }
 0x3c4   : > { %v4963_v14 = vpop.f32.mrb[22].mxu0 }
 0x3c5   : > { %v5016_v44 = vadd.f32 %v18481_v61, %v5007_v0  ;;  %v5008_v55 = vmul.f32 %v18474_v40, %v4963_v14  ;;  %v13632_v35 = vpop.f32.mrb[23].mxu0  ;;  %14140 = vmatmul.mubr.msk.bf16.gmra.mrb[44].mxu1 %vm20239_vm1, %v8456_v24  ;;  %v7189_v24 = vsel %vm20242_vm12, %v7179_v3, %v18495_v10 }
 0x3c6   : > { %14143 = vmatprep.mubr.msk.bf16.mxu1 %vm19880_vm14, %v19857_v1 }
 0x3c7   : > { %v5025_v23 = vmax.f32 %v5016_v44, 0.0  ;;  %v5017_v45 = vadd.f32 %v18481_v61, %v5008_v55  ;;  %13946 = vmatmul.mubr.msk.bf16.gmra.mrb[48].mxu0 %vm20240_vm6, %v7180_v50  ;;  %vm20245_vm6 = vcmask 60416  }
 0x3c8   : > { %v6358_v36 = vpop.f32.mrb[20].mxu1  ;;  %13949 = vmatprep.mubr.msk.bf16.mxu0 %vm19880_vm14, %v19857_v1  ;;  %vm20247_vm12 = vmmov %vm20245_vm6 }
 0x3c9   : > { %v12601_v27 = vpack.c.bf16 %v5025_v23, %v5025_v23  ;;  %v5026_v37 = vmax.f32 %v5017_v45, 0.0  ;;  %v6405_v53 = vmul.f32 %v18474_v40, %v6358_v36  ;;  %v13829_v17 = vpop.f32.mrb[21].mxu1 }
 0x3ca   : > { %v4968_v39 = vpop.f32.mrb[24].mxu0  ;;  %v6361_v43 = vpop.f32.mrb[22].mxu1  ;;  %v18517_v17 = vsel %vm20244_vm0, %v12222_v31, 0 }
 0x3cb   : > { %v5041_v2 = vshrl.u32 %v12601_v27, 16  ;;  %v5044_v7 = vshll.u32 %v12601_v27, 16  ;;  %v12602_v41 = vpack.c.bf16 %v5026_v37, %v5026_v37  ;;  %v6414_v51 = vadd.f32 %v18481_v61, %v6405_v53  ;;  %v13635_v28 = vpop.f32.mrb[25].mxu0  ;;  %v13830_v25 = vpop.f32.mrb[23].mxu1 }
 0x3cc   : > { %v5009_v0 = vmul.f32 %v18474_v40, %v4968_v39  ;;  %v6406_v19 = vmul.f32 %v18474_v40, %v6361_v43  ;;  %v4971_v14 = vpop.f32.mrb[26].mxu0  ;;  %v5062_v39 = vld [vmem:[#allocation3 + $0x50] sm:$0xe] }
 0x3cd   : > { %v5043_v60 = vrot.slane %v5041_v2, 6  ;;  %v5046_v44 = vrot.slane %v5044_v7, 7  ;;  %v5050_v55 = vshrl.u32 %v12602_v41, 16  ;;  %v5053_v35 = vshll.u32 %v12602_v41, 16  ;;  %v13636_v50 = vpop.f32.mrb[27].mxu0  ;;  %14144 = vmatmul.mubr.msk.bf16.gmra.mrb[48].mxu1 %vm20243_vm7, %v8465_v42  ;;  %vm20248_vm7 = vmmov %vm20245_vm6 }
 0x3ce   : > { %v6423_v23 = vmax.f32 %v6414_v51, 0.0  ;;  %v5018_v45 = vadd.f32 %v18481_v61, %v5009_v0  ;;  %v6415_v36 = vadd.f32 %v18481_v61, %v6406_v19  ;;  %v5010_v3 = vmul.f32 %v18474_v40, %v4971_v14  ;;  %14147 = vmatprep.mubr.msk.bf16.mxu1 %vm19880_vm14, %v19857_v1  ;;  %v5066_v14 = vld [vmem:[#allocation3 + $0x58] sm:$0x3] }
 0x3cf   : > { %v5047_v27 = vor.u32 %v5046_v44, %v5043_v60  ;;  %v5052_v37 = vrot.slane %v5050_v55, 6  ;;  %v5055_v53 = vrot.slane %v5053_v35, 7  ;;  %13950 = vmatmul.mubr.msk.bf16.gmra.mrb[52].mxu0 %vm20239_vm1, %v7189_v24 }
 0x3d0   : > { %v12612_v43 = vpack.c.bf16 %v6423_v23, %v6423_v23  ;;  %v5027_v42 = vmax.f32 %v5018_v45, 0.0  ;;  %v6424_v2 = vmax.f32 %v6415_v36, 0.0  ;;  %v5019_v7 = vadd.f32 %v18481_v61, %v5010_v3  ;;  %v6366_v41 = vpop.f32.mrb[24].mxu1  ;;  %13953 = vmatprep.mubr.msk.bf16.mxu0 %vm19880_vm14, %v19857_v1 }
 0x3d1   : > { %v5048_v51 = vrot.slane %v5047_v27, 4  ;;  %v5063_v28 = vsel %vm16226_vm15, %v5047_v27, %v5062_v39  ;;  %v5056_v25 = vor.u32 %v5055_v53, %v5052_v37  ;;  %v6407_v0 = vmul.f32 %v18474_v40, %v6366_v41  ;;  %v13833_v19 = vpop.f32.mrb[25].mxu1 }
 0x3d2   : > { %5064 = vst [vmem:[#allocation3 + $0x50] sm:$0xe] %v5063_v28  ;;  %v6439_v24 = vshrl.u32 %v12612_v43, 16  ;;  %v6442_v31 = vshll.u32 %v12612_v43, 16  ;;  %v12603_v60 = vpack.c.bf16 %v5027_v42, %v5027_v42  ;;  %v12613_v44 = vpack.c.bf16 %v6424_v2, %v6424_v2  ;;  %v4976_v55 = vpop.f32.mrb[28].mxu0  ;;  %v6369_v35 = vpop.f32.mrb[26].mxu1 }
 0x3d3   : > { %v5057_v50 = vsel %vm19932_vm13, %v5048_v51, %v5056_v25  ;;  %v5058_v23 = vrot.slane %v5056_v25, 4  ;;  %v5028_v45 = vmax.f32 %v5019_v7, 0.0  ;;  %v6416_v36 = vadd.f32 %v18481_v61, %v6407_v0  ;;  %v13639_v3 = vpop.f32.mrb[29].mxu0  ;;  %v13834_v27 = vpop.f32.mrb[27].mxu1 }
 0x3d4   : > { %5065 = vst.msk [vmem:[#allocation3 + $0x54] sm:$0xf] %vm20245_vm6, %v5057_v50  ;;  %v6441_v37 = vrot.slane %v6439_v24, 6  ;;  %v6444_v53 = vrot.slane %v6442_v31, 7  ;;  %v5083_v39 = vshrl.u32 %v12603_v60, 16  ;;  %v5086_v41 = vshll.u32 %v12603_v60, 16 }
 0x3d5   : > { %v4979_v43 = vpop.f32.mrb[30].mxu0  ;;  %v5067_v42 = vsel %vm16185_vm5, %v5058_v23, %v5066_v14  ;;  %v6448_v2 = vshrl.u32 %v12613_v44, 16  ;;  %v6451_v28 = vshll.u32 %v12613_v44, 16  ;;  %v12604_v19 = vpack.c.bf16 %v5028_v45, %v5028_v45 }
 0x3d6   : > { %v13640_v51 = vpop.f32.mrb[31].mxu0  ;;  %5068 = vst [vmem:[#allocation3 + $0x58] sm:$0x3] %v5067_v42  ;;  %v18531_v7 = vor.u32 %v6444_v53, %v6441_v37  ;;  %v5085_v25 = vrot.slane %v5083_v39, 6  ;;  %v5088_v0 = vrot.slane %v5086_v41, 7  ;;  %v6425_v3 = vmax.f32 %v6416_v36, 0.0 }
 0x3d7   : > { %v6450_v27 = vrot.slane %v6448_v2, 6  ;;  %v6453_v50 = vrot.slane %v6451_v28, 7  ;;  %v5092_v24 = vshrl.u32 %v12604_v19, 16  ;;  %v5095_v31 = vshll.u32 %v12604_v19, 16  ;;  %13954 = vmatmul.mubr.msk.bf16.gmra.mrb[56].mxu0 %vm20246_vm10, %v18495_v10  ;;  %v6464_v36 = vld [vmem:[#allocation3 + $0x7c] sm:$0x3] }
 0x3d8   : > { %v6446_v60 = vrot.slane %v18531_v7, 4  ;;  %v18536_v14 = vor.u32 %v5088_v0, %v5085_v25  ;;  %v12614_v44 = vpack.c.bf16 %v6425_v3, %v6425_v3  ;;  %v5011_v23 = vmul.f32 %v18474_v40, %v4976_v55  ;;  %v6374_v45 = vpop.f32.mrb[28].mxu1  ;;  %13959 = vmatprep.mubr.msk.bf16.mxu0 %vm19880_vm14, %v19857_v1 }
 0x3d9   : > { %v6454_v37 = vor.u32 %v6453_v50, %v6450_v27  ;;  %v5094_v53 = vrot.slane %v5092_v24, 6  ;;  %v5097_v39 = vrot.slane %v5095_v31, 7  ;;  %v6408_v41 = vmul.f32 %v18474_v40, %v6369_v35  ;;  %v13837_v42 = vpop.f32.mrb[29].mxu1 }
 0x3da   : > { %v5090_v10 = vrot.slane %v18536_v14, 4  ;;  %v6481_v2 = vshrl.u32 %v12614_v44, 16  ;;  %v6484_v28 = vshll.u32 %v12614_v44, 16  ;;  %v5020_v19 = vadd.f32 %v18481_v61, %v5011_v23  ;;  %v4984_v51 = vpop.f32.mrb[32].mxu0  ;;  %v6377_v25 = vpop.f32.mrb[30].mxu1 }
 0x3db   : > { %v6455_v55 = vsel %vm19932_vm13, %v6446_v60, %v6454_v37  ;;  %v6456_v0 = vrot.slane %v6454_v37, 4  ;;  %v18546_v3 = vor.u32 %v5097_v39, %v5094_v53  ;;  %v6417_v27 = vadd.f32 %v18481_v61, %v6408_v41  ;;  %v13643_v50 = vpop.f32.mrb[33].mxu0  ;;  %v13838_v24 = vpop.f32.mrb[31].mxu1 }
 0x3dc   : > { %6463 = vst.msk [vmem:[#allocation3 + $0x78] sm:$0xf] %vm20247_vm12, %v6455_v55  ;;  %v6483_v35 = vrot.slane %v6481_v2, 6  ;;  %v6486_v31 = vrot.slane %v6484_v28, 7  ;;  %v5029_v42 = vmax.f32 %v5020_v19, 0.0  ;;  %v5012_v44 = vmul.f32 %v18474_v40, %v4979_v43  ;;  %v4987_v23 = vpop.f32.mrb[34].mxu0 }
 0x3dd   : > { %v5069_v15 = vld [vmem:[#allocation3 + $0x58] sm:$0x6]  ;;  %v6465_v6 = vsel %vm16185_vm5, %v6456_v0, %v6464_v36  ;;  %v5099_v60 = vsel %vm19932_vm13, %v5090_v10, %v18546_v3  ;;  %v5100_v37 = vrot.slane %v18546_v3, 4  ;;  %v6426_v53 = vmax.f32 %v6417_v27, 0.0  ;;  %v13644_v39 = vpop.f32.mrb[35].mxu0  ;;  %vm20249_vm5 = vmmov %vm20239_vm1 }
 0x3de   : > { %v5070_v41 = vsel %vm16310_vm3, 0, %v5069_v15  ;;  %6466 = vst [vmem:[#allocation3 + $0x7c] sm:$0x3] %v6465_v6  ;;  %5116 = vst.msk [vmem:[#allocation3 + $0x5c] sm:$0xf] %vm20248_vm7, %v5099_v60  ;;  %v18560_v43 = vor.u32 %v6486_v31, %v6483_v35  ;;  %v12605_v2 = vpack.c.bf16 %v5029_v42, %v5029_v42  ;;  %v5021_v5 = vadd.f32 %v18481_v61, %v5012_v44 }
 0x3df   : > { %5071 = vst [vmem:[#allocation3 + $0x58] sm:$0x6] %v5070_v41  ;;  %v12615_v36 = vpack.c.bf16 %v6426_v53, %v6426_v53  ;;  %v6409_v28 = vmul.f32 %v18474_v40, %v6374_v45  ;;  %v5013_v10 = vmul.f32 %v18474_v40, %v4984_v51  ;;  %v6410_v19 = vmul.f32 %v18474_v40, %v6377_v25  ;;  %v5117_v35 = vld [vmem:[#allocation3 + $0x60] sm:$0x7] }
 0x3e0   : > { %13960 = vmatmul.mubr.msk.bf16.vlgmr.msra.gmra.mrb[40].mxu0 %vm20249_vm5, %v17982_v54  ;;  %v6488_v6 = vrot.slane %v18560_v43, 4  ;;  %v5102_v15 = vshrl.u32 %v12605_v2, 16  ;;  %v5105_v55 = vshll.u32 %v12605_v2, 16  ;;  %v5030_v0 = vmax.f32 %v5021_v5, 0.0  ;;  %v6382_v3 = vpop.f32.mrb[32].mxu1 }
 0x3e1   : > { %13963 = vmatprep.mubr.msk.bf16.mxu0 %vm19880_vm14, %v19857_v1  ;;  %13980 = vmatpush3.bf16.msra.mxu0 %v18517_v17  ;;  %v6490_v27 = vshrl.u32 %v12615_v36, 16  ;;  %v6493_v45 = vshll.u32 %v12615_v36, 16  ;;  %v6418_v51 = vadd.f32 %v18481_v61, %v6409_v28  ;;  %v5022_v25 = vadd.f32 %v18481_v61, %v5013_v10  ;;  %v13841_v50 = vpop.f32.mrb[33].mxu1 }
 0x3e2   : > { %14001 = vmatprep.subr.bf16.mxu0 %v19857_v1  ;;  %v5104_v54 = vrot.slane %v5102_v15, 6  ;;  %v18575_v24 = vrot.slane %v5105_v55, 7  ;;  %v12607_v31 = vpack.c.bf16 %v5030_v0, %v5030_v0  ;;  %v6419_v42 = vadd.f32 %v18481_v61, %v6410_v19  ;;  %v18578_v44 = vpop.f32.mrb[36].mxu0  ;;  %v18580_v60 = vpop.f32.mrb[34].mxu1 }
 0x3e3   : > { %v6492_v17 = vrot.slane %v6490_v27, 6  ;;  %v6495_v53 = vrot.slane %v6493_v45, 7  ;;  %v6427_v39 = vmax.f32 %v6418_v51, 0.0  ;;  %v5031_v41 = vmax.f32 %v5022_v25, 0.0  ;;  %v13647_v2 = vpop.f32.mrb[37].mxu0  ;;  %v13842_v5 = vpop.f32.mrb[35].mxu1 }
 0x3e4   : > { %v5108_v36 = vor.u32 %v18575_v24, %v5104_v54  ;;  %v5143_v28 = vshrl.u32 %v12607_v31, 16  ;;  %v5146_v10 = vshll.u32 %v12607_v31, 16  ;;  %v6428_v15 = vmax.f32 %v6419_v42, 0.0  ;;  %v4995_v55 = vpop.f32.mrb[38].mxu0 }
 0x3e5   : > { %v6467_v50 = vld [vmem:[#allocation3 + $0x7c] sm:$0x6]  ;;  %v6496_v0 = vor.u32 %v6495_v53, %v6492_v17  ;;  %v12616_v18 = vpack.c.bf16 %v6427_v39, %v6427_v39  ;;  %v12608_v19 = vpack.c.bf16 %v5031_v41, %v5031_v41  ;;  %v5014_v1 = vmul.f32 %v18474_v40, %v4987_v23  ;;  %v13648_v48 = vpop.f32.mrb[39].mxu0 }
 0x3e6   : > { %v5113_v58 = vld [vmem:[#allocation3 + $0x58] sm:$0xc]  ;;  %v6468_v27 = vsel %vm16310_vm3, 0, %v6467_v50  ;;  %v5109_v45 = vsel %vm19932_vm13, %v5100_v37, %v5108_v36  ;;  %v5141_v51 = vrot.slane %v5108_v36, 4  ;;  %v5145_v25 = vrot.slane %v5143_v28, 6  ;;  %vm20250_vm3 = vmmov %vm20245_vm6 }
 0x3e7   : > { %v5114_v54 = vsel %vm20097_vm8, %v18536_v14, %v5113_v58  ;;  %6469 = vst [vmem:[#allocation3 + $0x7c] sm:$0x6] %v6468_v27  ;;  %v5118_v31 = vsel %vm20098_vm2, %v5109_v45, %v5117_v35  ;;  %v6497_v48 = vsel %vm19932_vm13, %v6488_v6, %v6496_v0  ;;  %v6498_v23 = vrot.slane %v6496_v0, 4  ;;  %v6515_v27 = vld [vmem:[#allocation3 + $0x84] sm:$0x7]  ;;  %vm20252_vm0 = vmmov %vm20250_vm3 }
 0x3e8   : > { %13964 = vmatmul.mubr.msk.bf16.gmra.mrb[44].mxu0 %vm20239_vm1, %v17974_v29  ;;  %5115 = vst [vmem:[#allocation3 + $0x58] sm:$0xc] %v5114_v54  ;;  %5119 = vst [vmem:[#allocation3 + $0x60] sm:$0x7] %v5118_v31  ;;  %v5148_v59 = vrot.slane %v5146_v10, 7  ;;  %v6500_v37 = vshrl.u32 %v12616_v18, 16  ;;  %v12618_v53 = vpack.c.bf16 %v6428_v15, %v6428_v15  ;;  %v5023_v6 = vadd.f32 %v18481_v61, %v5014_v1 }
 0x3e9   : > { %6514 = vst.msk [vmem:[#allocation3 + $0x80] sm:$0xf] %vm20250_vm3, %v6497_v48  ;;  %v6503_v42 = vshll.u32 %v12616_v18, 16  ;;  %v5153_v17 = vshrl.u32 %v12608_v19, 16  ;;  %v18598_v58 = vpop.f32.mrb[36].mxu1  ;;  %v20251_v14 = vmov 0.0   ;;  %v6411_v39 = vmul.f32 %v18474_v40, %v6382_v3  ;;  %vm20253_vm6 = vmmov %vm20239_vm1 }
 0x3ea   : > { %13967 = vmatprep.mubr.msk.bf16.mxu0 %vm19880_vm14, %v20251_v14  ;;  %v5156_v35 = vshll.u32 %v12608_v19, 16  ;;  %v13845_v29 = vpop.f32.mrb[37].mxu1  ;;  %v5149_v41 = vor.u32 %v5148_v59, %v5145_v25  ;;  %v6502_v2 = vrot.slane %v6500_v37, 6  ;;  %v6541_v10 = vshrl.u32 %v12618_v53, 16  ;;  %v5168_v25 = vld [vmem:[#allocation3 + $0x68] sm:$0xf]  ;;  %vm20263_vm5 = vmmov %vm20252_vm0 }
 0x3eb   : > { %v18604_v5 = vrot.slane %v6503_v42, 7  ;;  %v5155_v36 = vrot.slane %v5153_v17, 6  ;;  %v6393_v28 = vpop.f32.mrb[38].mxu1  ;;  %v6544_v55 = vshll.u32 %v12618_v53, 16  ;;  %v5032_v50 = vmax.f32 %v5023_v6, 0.0 }
 0x3ec   : > { %v5158_v18 = vrot.slane %v5156_v35, 7  ;;  %v13846_v0 = vpop.f32.mrb[39].mxu1  ;;  %v5150_v19 = vsel %vm19932_vm13, %v5141_v51, %v5149_v41  ;;  %v5151_v15 = vrot.slane %v5149_v41, 4  ;;  %v6420_v3 = vadd.f32 %v18481_v61, %v6411_v39  ;;  %v8426_v29 = vld [vmem:[#allocation3 + $0x50] sm:$0x3] }
 0x3ed   : > { %v6506_v1 = vor.u32 %v18604_v5, %v6502_v2  ;;  %5167 = vst.msk [vmem:[#allocation3 + $0x64] sm:$0xf] %vm20252_vm0, %v5150_v19  ;;  %v6543_v54 = vrot.slane %v6541_v10, 6  ;;  %v6546_v31 = vrot.slane %v6544_v55, 7  ;;  %v12610_v48 = vpack.c.bf16 %v5032_v50, %v5032_v50 }
 0x3ee   : > { %v5159_v45 = vor.u32 %v5158_v18, %v5155_v36  ;;  %v6511_v59 = vld [vmem:[#allocation3 + $0x7c] sm:$0xc]  ;;  %v6429_v17 = vmax.f32 %v6420_v3, 0.0  ;;  %v5015_v51 = vmul.f32 %v18474_v40, %v18578_v44  ;;  %v20255_v41 = vrot.slane %v17947_v49, 2 }
 0x3ef   : > { %v6507_v37 = vsel %vm19932_vm13, %v6498_v23, %v6506_v1  ;;  %v6539_v42 = vrot.slane %v6506_v1, 4  ;;  %v6512_v35 = vsel %vm20097_vm8, %v18560_v43, %v6511_v59  ;;  %v5120_v53 = vld [vmem:[#allocation3 + $0x60] sm:$0xc]  ;;  %v20254_v23 = vrot.slane %v18456_v56, 2  ;;  %vm20257_vm8 = vmmov %vm20252_vm0 }
 0x3f0   : > { %v6516_v6 = vsel %vm20098_vm2, %v6507_v37, %v6515_v27  ;;  %v5160_v39 = vsel %vm19932_vm13, %v5151_v15, %v5159_v45  ;;  %13968 = vmatmul.mubr.msk.bf16.gmra.mrb[48].mxu0 %vm20253_vm6, %v17979_v26  ;;  %vm20256_vm10 = vcmask 1045504   ;;  %6513 = vst [vmem:[#allocation3 + $0x7c] sm:$0xc] %v6512_v35  ;;  %v5121_v47 = vsel %vm20103_vm4, 0, %v5120_v53  ;;  %v6566_v37 = vld [vmem:[#allocation3 + $0x8c] sm:$0xf]  ;;  %vm20258_vm2 = vmmov %vm20239_vm1 }
 0x3f1   : > { %v7303_v44 = vsel %vm20256_vm10, %v20255_v41, %v20254_v23  ;;  %6517 = vst [vmem:[#allocation3 + $0x84] sm:$0x7] %v6516_v6  ;;  %v5169_v11 = vsel %vm19971_vm9, %v5160_v39, %v5168_v25  ;;  %v6547_v43 = vor.u32 %v6546_v31, %v6543_v54  ;;  %v5197_v2 = vshrl.u32 %v12610_v48, 16  ;;  %13971 = vmatprep.mubr.msk.bf16.mxu0 %vm19880_vm14, %v20251_v14  ;;  %v5219_v54 = vld [vmem:[#allocation3 + $0x6c] sm:$0xf]  ;;  %vm20266_vm0 = vmmov %vm20239_vm1 }
 0x3f2   : > { %5122 = vst [vmem:[#allocation3 + $0x60] sm:$0xc] %v5121_v47  ;;  %5170 = vst [vmem:[#allocation3 + $0x68] sm:$0xf] %v5169_v11  ;;  %v5200_v26 = vshll.u32 %v12610_v48, 16  ;;  %v12619_v36 = vpack.c.bf16 %v6429_v17, %v6429_v17  ;;  %v5024_v49 = vadd.f32 %v18481_v61, %v5015_v51  ;;  %v6412_v28 = vmul.f32 %v18474_v40, %v18580_v60 }
 0x3f3   : > { %v5195_v18 = vrot.slane %v5159_v45, 4  ;;  %v6548_v10 = vsel %vm19932_vm13, %v6539_v42, %v6547_v43  ;;  %v5199_v55 = vrot.slane %v5197_v2, 6  ;;  %v18641_v50 = vcombine.low %v18407_v34, %v8426_v29  ;;  %vm20267_vm6 = vmmov %vm20256_vm10 }
 0x3f4   : > { %6565 = vst.msk [vmem:[#allocation3 + $0x88] sm:$0xf] %vm20257_vm8, %v6548_v10  ;;  %v5202_v0 = vrot.slane %v5200_v26, 7  ;;  %v6551_v19 = vshrl.u32 %v12619_v36, 16  ;;  %v6554_v15 = vshll.u32 %v12619_v36, 16  ;;  %v5033_v1 = vmax.f32 %v5024_v49, 0.0  ;;  %vm20271_vm8 = vmmov %vm20263_vm5 }
 0x3f5   : > { %v6421_v27 = vadd.f32 %v18481_v61, %v6412_v28  ;;  %v8467_v3 = vshrl.u32 %v18641_v50, 16  ;;  %v8470_v60 = vshll.u32 %v18641_v50, 16  ;;  %v6413_v45 = vmul.f32 %v18474_v40, %v18598_v58  ;;  %v5223_v49 = vld [vmem:[#allocation3 + $0x74] sm:$0x1] }
 0x3f6   : > { %v5203_v25 = vor.u32 %v5202_v0, %v5199_v55  ;;  %v6553_v31 = vrot.slane %v6551_v19, 6  ;;  %v6556_v34 = vrot.slane %v6554_v15, 7  ;;  %v12611_v48 = vpack.c.bf16 %v5033_v1, %v5033_v1 }
 0x3f7   : > { %v6549_v59 = vrot.slane %v6547_v43, 4  ;;  %v6430_v42 = vmax.f32 %v6421_v27, 0.0  ;;  %v8469_v17 = vrot.slane %v8467_v3, 1  ;;  %v8472_v51 = vrot.slane %v8470_v60, 2 }
 0x3f8   : > { %v6518_v35 = vld [vmem:[#allocation3 + $0x84] sm:$0xc]  ;;  %v5204_v53 = vsel %vm19932_vm13, %v5195_v18, %v5203_v25  ;;  %v6557_v6 = vor.u32 %v6556_v34, %v6553_v31  ;;  %v5207_v39 = vshrl.u32 %v12611_v48, 16  ;;  %v6422_v29 = vadd.f32 %v18481_v61, %v6413_v45  ;;  %13972 = vmatmul.mubr.msk.bf16.gmra.mrb[52].mxu0 %vm20258_vm2, %v7303_v44 }
 0x3f9   : > { %v5164_v40 = vld [vmem:[#allocation3 + $0x60] sm:$0x8]  ;;  %v6519_v58 = vsel %vm20103_vm4, 0, %v6518_v35  ;;  %v5171_v23 = vld [vmem:[#allocation3 + $0x68] sm:$0x8]  ;;  %vm20259_vm12 = vnez %v19868_v46  ;;  %v5210_v47 = vshll.u32 %v12611_v48, 16  ;;  %v12621_v11 = vpack.c.bf16 %v6430_v42, %v6430_v42  ;;  %13975 = vmatprep.mubr.msk.bf16.mxu0 %vm19880_vm14, %v20251_v14 }
 0x3fa   : > { %v5220_v41 = vsel %vm20259_vm12, %v5204_v53, %v5219_v54  ;;  %vm20260_vm7 = vnez %v19893_v62  ;;  %6520 = vst [vmem:[#allocation3 + $0x84] sm:$0xc] %v6519_v58  ;;  %v6558_v57 = vsel %vm19932_vm13, %v6549_v59, %v6557_v6  ;;  %v5209_v2 = vrot.slane %v5207_v39, 6  ;;  %v6617_v54 = vld [vmem:[#allocation3 + $0x90] sm:$0xf] }
 0x3fb   : > { %v5165_v43 = vsel %vm20260_vm7, %v18575_v24, %v5164_v40  ;;  %v5172_v61 = vsel %vm20260_vm7, 0, %v5171_v23  ;;  %5221 = vst [vmem:[#allocation3 + $0x6c] sm:$0xf] %v5220_v41  ;;  %v6567_v44 = vsel %vm19971_vm9, %v6558_v57, %v6566_v37  ;;  %v5212_v26 = vrot.slane %v5210_v47, 7  ;;  %vm20262_vm9 = vmmov %vm20239_vm1  ;;  %v16085_v59 = vld [vmem:[#allocation3 + $0x14] sm:$0xf] }
 0x3fc   : > { %5166 = vst [vmem:[#allocation3 + $0x60] sm:$0x8] %v5165_v43  ;;  %5173 = vst [vmem:[#allocation3 + $0x68] sm:$0x8] %v5172_v61  ;;  %v6595_v36 = vshrl.u32 %v12621_v11, 16  ;;  %v6598_v28 = vshll.u32 %v12621_v11, 16  ;;  %v8473_v24 = vor.u32 %v8472_v51, %v8469_v17  ;;  %v18683_v37 = vcombine.low %v7403_v22, %v16085_v59 }
 0x3fd   : > { %6568 = vst [vmem:[#allocation3 + $0x8c] sm:$0xf] %v6567_v44  ;;  %v6431_v18 = vmax.f32 %v6422_v29, 0.0  ;;  %v5205_v10 = vrot.slane %v5203_v25, 4  ;;  %v5213_v55 = vor.u32 %v5212_v26, %v5209_v2  ;;  %v5215_v0 = vrot.slane %v5209_v2, 4  ;;  %v18685_v42 = vld [vmem:[#allocation3 + $0x4c] sm:$0xff]  }
 0x3fe   : > { %v6597_v19 = vrot.slane %v6595_v36, 6  ;;  %v6593_v15 = vrot.slane %v6557_v6, 4  ;;  %v6600_v1 = vrot.slane %v6598_v28, 7  ;;  %vm20261_vm4 = vsmask.f32 6400  ;;  %v18694_v29 = vld [vmem:[#allocation3 + $0x18] sm:$0xff]  }
 0x3ff   : > { %v8474_v27 = vsel %vm20261_vm4, %v18489_v21, %v8473_v24  ;;  %v12622_v3 = vpack.c.bf16 %v6431_v18, %v6431_v18  ;;  %v5214_v60 = vsel %vm19932_vm13, %v5205_v10, %v5213_v55  ;;  %v5224_v45 = vsel %vm16209_vm11, %v5215_v0, %v5223_v49  ;;  %v12233_v58 = vld [vmem:[%s19816_s4 + $0x1c] sm:$0xf]  ;;  %vm20276_vm4 = vmmov %vm20266_vm0  ;;  %v7412_v0 = vld [vmem:[#allocation3 + $0x34] sm:$0x3] }
 0x400   : > { %14148 = vmatmul.mubr.msk.bf16.gmra.mrb[52].mxu1 %vm20262_vm9, %v8474_v27  ;;  %5222 = vst.msk [vmem:[#allocation3 + $0x70] sm:$0xf] %vm20263_vm5, %v5214_v60  ;;  %5225 = vst [vmem:[#allocation3 + $0x74] sm:$0x1] %v5224_v45  ;;  %v6601_v25 = vor.u32 %v6600_v1, %v6597_v19  ;;  %v20264_v21 = vrot.slane %v18456_v56, 2  ;;  %v7441_v40 = vrot.slane %v18694_v29, 2 }
 0x401   : > { %v6605_v31 = vshrl.u32 %v12622_v3, 16  ;;  %v6608_v34 = vshll.u32 %v12622_v3, 16  ;;  %14151 = vmatprep.mubr.msk.bf16.mxu1 %vm19880_vm14, %v20251_v14  ;;  %v6562_v48 = vld [vmem:[#allocation3 + $0x84] sm:$0x8]  ;;  %v6621_v56 = vld [vmem:[#allocation3 + $0x98] sm:$0x1]  ;;  %vm20277_vm9 = vmmov %vm20266_vm0 }
 0x402   : > { %13976 = vmatmul.mubr.msk.bf16.gmra.mrb[56].mxu0 %vm20239_vm1, %v20264_v21  ;;  %v6563_v17 = vsel %vm20260_vm7, %v18604_v5, %v6562_v48  ;;  %v6602_v51 = vsel %vm19932_vm13, %v6593_v15, %v6601_v25  ;;  %v6603_v41 = vrot.slane %v6601_v25, 4  ;;  %v7440_v46 = vrot.slane %v18683_v37, 2  ;;  %vm20279_vm5 = vmmov %vm20266_vm0  ;;  %v18779_v25 = vld [vmem:[#allocation3 + $0x58] sm:$0xff]   ;;  %v9837_v48 = vld [vmem:[#allocation3 + $0x50] sm:$0xc] }
 0x403   : > { %13981 = vmatprep.mubr.msk.bf16.mxu0 %vm19880_vm14, %v20251_v14  ;;  %v6607_v35 = vrot.slane %v6605_v31, 6  ;;  %6564 = vst [vmem:[#allocation3 + $0x84] sm:$0x8] %v6563_v17  ;;  %v6618_v6 = vsel %vm20259_vm12, %v6602_v51, %v6617_v54  ;;  %v6610_v39 = vrot.slane %v6608_v34, 7  ;;  %v8989_v11 = vrot.slane %v18685_v42, 3  ;;  %vm20274_vm12 = vmmov %vm20266_vm0  ;;  %v18788_v21 = vld [vmem:[#allocation3 + $0x60] sm:$0xff]  }
 0x404   : > { %v6569_v53 = vld [vmem:[#allocation3 + $0x8c] sm:$0x8]  ;;  %6619 = vst [vmem:[#allocation3 + $0x90] sm:$0xf] %v6618_v6  ;;  %vm20265_vm3 = vcmask 1043456   ;;  %v7442_v62 = vsel %vm20267_vm6, %v7440_v46, %v7441_v40  ;;  %v20268_v2 = vrot.slane %v18038_v16, 3  ;;  %vm20280_vm1 = vmmov %vm20266_vm0 }
 0x405   : > { %v6570_v5 = vsel %vm20260_vm7, 0, %v6569_v53  ;;  %v6613_v23 = vrot.slane %v6607_v35, 4  ;;  %v6611_v47 = vor.u32 %v6610_v39, %v6607_v35  ;;  %v7614_v61 = vsel %vm20265_vm3, %v12233_v58, 0  ;;  %v18730_v16 = vld [vmem:[#allocation3 + $0x20] sm:$0xff]   ;;  %vm20273_vm2 = vmmov %vm20265_vm3  ;;  %v18783_v31 = vld [vmem:[#allocation3 + $0x54] sm:$0xf] }
 0x406   : > { %6571 = vst [vmem:[#allocation3 + $0x8c] sm:$0x8] %v6570_v5  ;;  %vm20269_vm10 = vcmask 1044480   ;;  %v7443_v36 = vrot.slane %v18730_v16, 2  ;;  %v8748_v49 = vsel %vm20273_vm2, %v12313_v38, 0  ;;  %vm20275_vm7 = vmmov %vm20267_vm6  ;;  %v8586_v1 = vrot.slane %v18641_v50, 2 }
 0x407   : > { %v6622_v43 = vsel %vm16209_vm11, %v6613_v23, %v6621_v56  ;;  %v5226_v57 = vld [vmem:[#allocation3 + $0x74] sm:$0x3]  ;;  %v6612_v44 = vsel %vm19932_vm13, %v6603_v41, %v6611_v47  ;;  %v18716_v26 = vsel %vm20269_vm10, %v20268_v2, %v8989_v11  ;;  %vm20270_vm11 = vnez %v19872_v30  ;;  %vm20272_vm13 = vmmov %vm20266_vm0  ;;  %v18748_v30 = vld [vmem:[#allocation3 + $0x28] sm:$0xff]  }
 0x408   : > { %6623 = vst [vmem:[#allocation3 + $0x98] sm:$0x1] %v6622_v43  ;;  %14152 = vmatmul.mubr.msk.bf16.gmra.mrb[56].mxu1 %vm20266_vm0, %v8473_v24  ;;  %v5227_v12 = vsel %vm20270_vm11, 0, %v5226_v57  ;;  %6620 = vst.msk [vmem:[#allocation3 + $0x94] sm:$0xf] %vm20271_vm8, %v6612_v44  ;;  %v7444_v10 = vsel %vm20275_vm7, %v7441_v40, %v7443_v36  ;;  %v7563_v27 = vshrl.u32 %v18694_v29, 16  ;;  %v12400_v51 = vcombine.low %v9837_v48, %v18783_v31 }
 0x409   : > { %14157 = vmatprep.mubr.msk.bf16.mxu1 %vm19880_vm14, %v20251_v14  ;;  %5228 = vst [vmem:[#allocation3 + $0x74] sm:$0x3] %v5227_v12  ;;  %vm20281_vm3 = vmmov %vm20267_vm6  ;;  %v7566_v3 = vshll.u32 %v18694_v29, 16  ;;  %v20282_v22 = vrot.slane %v17964_v52, 2  ;;  %v7555_v60 = vshrl.u32 %v18683_v37, 16  ;;  %v7558_v45 = vshll.u32 %v18683_v37, 16 }
 0x40a   : > { %13982 = vmatmul.mubr.msk.bf16.vlgmr.msra.gmra.mrb[40].mxu0 %vm20272_vm13, %v7442_v62  ;;  %vm20284_vm10 = vmmov %vm20266_vm0  ;;  %v7565_v50 = vrot.slane %v7563_v27, 2  ;;  %v8687_v59 = vld [vmem:[#allocation3 + $0x34] sm:$0xc]  ;;  %v7572_v37 = vshrl.u32 %v18730_v16, 16  ;;  %v18791_v17 = vld [vmem:[#allocation3 + $0x68] sm:$0xff]   ;;  %v9843_v35 = vrot.slane %v18779_v25, 2 }
 0x40b   : > { %13985 = vmatprep.mubr.msk.bf16.mxu0 %vm19880_vm14, %v20251_v14  ;;  %14002 = vmatpush3.bf16.msra.mxu0 %v7614_v61  ;;  %v7568_v54 = vrot.slane %v7566_v3, 3  ;;  %v7557_v52 = vrot.slane %v7555_v60, 2  ;;  %v7560_v34 = vrot.slane %v7558_v45, 3  ;;  %v7575_v53 = vshll.u32 %v18730_v16, 16  ;;  %v12240_v6 = vld [vmem:[%s19816_s4 + $0x20] sm:$0xf]  ;;  %vm20286_vm8 = vmmov %vm20266_vm0 }
 0x40c   : > { %14023 = vmatprep.subr.bf16.mxu0 %v20251_v14  ;;  %v9842_v39 = vrot.slane %v12400_v51, 2  ;;  %v16089_v40 = vld [vmem:[#allocation3 + $0x38] sm:$0xf]  ;;  %v18801_v23 = vld [vmem:[#allocation3 + $0x7c] sm:$0xff]   ;;  %v18803_v41 = vld [vmem:[#allocation3 + $0x84] sm:$0xff]   ;;  %v9845_v46 = vrot.slane %v18788_v21, 2 }
 0x40d   : > { %v7569_v56 = vor.u32 %v7568_v54, %v7565_v50  ;;  %v18799_v58 = vcombine.low %v8687_v59, %v16089_v40  ;;  %v7561_v5 = vor.u32 %v7560_v34, %v7557_v52  ;;  %v18805_v47 = vld [vmem:[#allocation3 + $0x8c] sm:$0xff]   ;;  %v7574_v43 = vrot.slane %v7572_v37, 2  ;;  %vm20287_vm13 = vmmov %vm20273_vm2  ;;  %v18810_v57 = vld [vmem:[#allocation3 + $0x78] sm:$0xf] }
 0x40e   : > { %v7728_v61 = vsel %vm20287_vm13, %v12240_v6, 0  ;;  %vm20288_vm2 = vmmov %vm20281_vm3  ;;  %v9847_v62 = vrot.slane %v18791_v17, 2  ;;  %v7577_v12 = vrot.slane %v7575_v53, 3  ;;  %v18866_v54 = vld [vmem:[#allocation3 + $0x44] sm:$0xff]   ;;  %v10242_v6 = vld [vmem:[#allocation3 + $0x58] sm:$0x8] }
 0x40f   : > { %v6624_v28 = vld [vmem:[#allocation3 + $0x98] sm:$0x3]  ;;  %v18813_v44 = vsel %vm20288_vm2, %v9842_v39, %v9843_v35  ;;  %vm20290_vm7 = vmmov %vm20288_vm2  ;;  %v8726_v52 = vrot.slane %v18866_v54, 2  ;;  %v16070_v51 = vld [vmem:[#allocation3 + $0x60] sm:$0xff]  }
 0x410   : > { %v6625_v24 = vsel %vm20270_vm11, 0, %v6624_v28  ;;  %14158 = vmatmul.mubr.msk.bf16.vlgmr.msra.gmra.mrb[40].mxu1 %vm20274_vm12, %v17994_v9  ;;  %v6460_v18 = vld [vmem:[#allocation3 + $0x74] sm:$0xe]  ;;  %v7445_v9 = vrot.slane %v18748_v30, 2  ;;  %vm20285_vm11 = vmmov %vm20266_vm0  ;;  %vm20289_vm12 = vsmask.f32 5376  ;;  %v18820_v38 = vsel %vm20290_vm7, %v9843_v35, %v9845_v46 }
 0x411   : > { %6626 = vst [vmem:[#allocation3 + $0x98] sm:$0x3] %v6625_v24  ;;  %14178 = vmatpush3.bf16.msra.mxu1 %v8748_v49  ;;  %14161 = vmatprep.mubr.msk.bf16.mxu1 %vm19880_vm14, %v20251_v14  ;;  %v6461_v55 = vsel %vm16226_vm15, %v18531_v7, %v6460_v18  ;;  %vm20278_vm15 = vmmov %vm20267_vm6  ;;  %v18757_v7 = vld [vmem:[#allocation3 + $0x30] sm:$0xf]  ;;  %v7570_v2 = vsel %vm20289_vm12, %v7561_v5, %v7569_v56  ;;  %v8728_v35 = vrot.slane %v18685_v42, 2  ;;  %v16071_v40 = vld [vmem:[#allocation3 + $0x68] sm:$0xff]  }
 0x412   : > { %13986 = vmatmul.mubr.msk.bf16.gmra.mrb[44].mxu0 %vm20276_vm4, %v7444_v10  ;;  %14199 = vmatprep.subr.bf16.mxu1 %v20251_v14  ;;  %6462 = vst [vmem:[#allocation3 + $0x74] sm:$0xe] %v6461_v55  ;;  %v7446_v32 = vsel %vm20278_vm15, %v7443_v36, %v7445_v9  ;;  %v12227_v19 = vcombine.low %v18757_v7, %v7412_v0  ;;  %vm20283_vm6 = vmmov %vm20281_vm3  ;;  %v18823_v36 = vld [vmem:[#allocation3 + $0x3c] sm:$0xff]   ;;  %v12324_v24 = vld [vmem:[%s19816_s4 + $0x1c] sm:$0xf]  ;;  %v11106_v10 = vrot.slane %v18801_v23, 2 }
 0x413   : > { %13989 = vmatprep.mubr.msk.bf16.mxu0 %vm19880_vm14, %v20251_v14  ;;  %v8724_v49 = vrot.slane %v18823_v36, 2  ;;  %vm20291_vm4 = vmmov %vm20266_vm0  ;;  %v11108_v55 = vrot.slane %v18803_v41, 2  ;;  %v8723_v0 = vrot.slane %v18799_v58, 2  ;;  %v8696_v39 = vld [vmem:[#allocation3 + $0x58] sm:$0x3] }
 0x414   : > { %v7447_v15 = vrot.slane %v12227_v19, 2  ;;  %v7584_v19 = vshll.u32 %v18748_v30, 16  ;;  %vm20293_vm15 = vmmov %vm20288_vm2 }
 0x416   : > { %v7586_v45 = vrot.slane %v7584_v19, 3  ;;  %v10250_v19 = vrot.slane %v16071_v40, 3 }
 0x418   : > { %14162 = vmatmul.mubr.msk.bf16.gmra.mrb[44].mxu1 %vm20277_vm9, %v17997_v33  ;;  %v7448_v33 = vsel %vm20281_vm3, %v7445_v9, %v7447_v15  ;;  %vm20292_vm9 = vmmov %vm20288_vm2  ;;  %v11110_v9 = vrot.slane %v18805_v47, 2 }
 0x419   : > { %14165 = vmatprep.mubr.msk.bf16.mxu1 %vm19880_vm14, %v20251_v14  ;;  %v11100_v29 = vld [vmem:[#allocation3 + $0x74] sm:$0xc]  ;;  %v18830_v28 = vsel %vm20292_vm9, %v9845_v46, %v9847_v62  ;;  %vm20296_vm3 = vmmov %vm20287_vm13 }
 0x41a   : > { %13990 = vmatmul.mubr.msk.bf16.gmra.mrb[48].mxu0 %vm20279_vm5, %v7446_v32  ;;  %v12493_v16 = vcombine.low %v11100_v29, %v18810_v57  ;;  %v7581_v32 = vshrl.u32 %v18748_v30, 16  ;;  %vm20294_vm5 = vmmov %vm20288_vm2  ;;  %v8896_v3 = vsel %vm20296_vm3, %v12324_v24, 0  ;;  %v7548_v30 = vld [vmem:[#allocation3 + $0x34] sm:$0x7]  ;;  %v9951_v29 = vld [vmem:[#allocation3 + $0x5c] sm:$0xf] }
 0x41b   : > { %13993 = vmatprep.mubr.msk.bf16.mxu0 %vm19880_vm14, %v20251_v14  ;;  %v18864_v50 = vcombine.low %v18757_v7, %v7548_v30  ;;  %vm20302_vm13 = vmmov %vm20291_vm4  ;;  %v18882_v5 = vld [vmem:[#allocation3 + $0x70] sm:$0xff]   ;;  %v11505_v24 = vld [vmem:[#allocation3 + $0x7c] sm:$0x8] }
 0x41c   : > { %v11105_v18 = vrot.slane %v12493_v16, 2  ;;  %v7583_v60 = vrot.slane %v7581_v32, 2  ;;  %v18884_v46 = vld [vmem:[#allocation3 + $0x54] sm:$0xf] }
 0x41d   : > { %v7590_v59 = vshrl.u32 %v18864_v50, 16  ;;  %v7593_v37 = vshll.u32 %v18864_v50, 16  ;;  %v18892_v32 = vld [vmem:[#allocation3 + $0x94] sm:$0xff]  }
 0x41e   : > { %v7587_v34 = vor.u32 %v7586_v45, %v7583_v60 }
 0x41f   : > { %v7595_v53 = vrot.slane %v7593_v37, 3 }
 0x420   : > { %14166 = vmatmul.mubr.msk.bf16.gmra.mrb[48].mxu1 %vm20280_vm1, %v18003_v8  ;;  %v8587_v8 = vsel %vm20283_vm6, %v20282_v22, %v8586_v1  ;;  %vm20295_vm1 = vmmov %vm20288_vm2 }
 0x421   : > { %14169 = vmatprep.mubr.msk.bf16.mxu1 %vm19880_vm14, %v20251_v14  ;;  %v18853_v27 = vsel %vm20295_vm1, %v11108_v55, %v11110_v9  ;;  %vm20298_vm6 = vmmov %vm20291_vm4 }
 0x422   : > { %13994 = vmatmul.mubr.msk.bf16.gmra.mrb[52].mxu0 %vm20266_vm0, %v7448_v33  ;;  %v18845_v33 = vsel %vm20293_vm15, %v11105_v18, %v11106_v10  ;;  %vm20297_vm0 = vmmov %vm20295_vm1 }
 0x423   : > { %13997 = vmatprep.mubr.msk.bf16.mxu0 %vm19880_vm14, %v20251_v14  ;;  %v8725_v22 = vsel %vm20297_vm0, %v8723_v0, %v8724_v49  ;;  %vm20305_vm7 = vmmov %vm20297_vm0  ;;  %v16077_v0 = vld [vmem:[#allocation3 + $0x8c] sm:$0xff]  }
 0x424   : > { %vm20307_vm15 = vmmov %vm20291_vm4 }
 0x428   : > { %14170 = vmatmul.mubr.msk.bf16.gmra.mrb[52].mxu1 %vm20284_vm10, %v8587_v8  ;;  %vm20299_vm10 = vmmov %vm20289_vm12 }
 0x429   : > { %14173 = vmatprep.mubr.msk.bf16.mxu1 %vm19880_vm14, %v20251_v14  ;;  %vm20303_vm2 = vmmov %vm20299_vm10 }
 0x42a   : > { %13998 = vmatmul.mubr.msk.bf16.gmra.mrb[56].mxu0 %vm20285_vm11, %v7447_v15  ;;  %v7578_v15 = vor.u32 %v7577_v12, %v7574_v43  ;;  %vm20300_vm11 = vmmov %vm20291_vm4  ;;  %v12425_v43 = vcombine.low %v10242_v6, %v9951_v29  ;;  %v12318_v12 = vcombine.low %v18884_v46, %v8696_v39  ;;  %v8840_v6 = vshll.u32 %v18799_v58, 16  ;;  %v12357_v39 = vld [vmem:[%s19816_s4 + $0x4] sm:$0xf] }
 0x42b   : > { %14003 = vmatprep.mubr.msk.bf16.mxu0 %vm19880_vm14, %v20251_v14  ;;  %vm20304_vm12 = vmmov %vm20291_vm4 }
 0x42c   : > { %v7579_v8 = vsel %vm20299_vm10, %v7569_v56, %v7578_v15  ;;  %v7588_v7 = vsel %vm20303_vm2, %v7578_v15, %v7587_v34  ;;  %v7592_v56 = vrot.slane %v7590_v59, 2  ;;  %v10247_v18 = vrot.slane %v12425_v43, 3  ;;  %vm20306_vm9 = vmmov %vm20303_vm2 }
 0x42d   : > { %v10252_v15 = vrot.slane %v18882_v5, 3  ;;  %v8730_v30 = vrot.slane %v12318_v12, 2  ;;  %vm20317_vm2 = vmmov %vm20291_vm4  ;;  %v8854_v12 = vshrl.u32 %v18866_v54, 16 }
 0x42e   : > { %v7596_v16 = vor.u32 %v7595_v53, %v7592_v56  ;;  %v8845_v56 = vshrl.u32 %v18823_v36, 16  ;;  %v8848_v53 = vshll.u32 %v18823_v36, 16 }
 0x430   : > { %14174 = vmatmul.mubr.msk.bf16.gmra.mrb[56].mxu1 %vm20286_vm8, %v8586_v1  ;;  %v18848_v1 = vsel %vm20294_vm5, %v11106_v10, %v11108_v55  ;;  %vm20301_vm8 = vmmov %vm20297_vm0  ;;  %v7597_v10 = vsel %vm20306_vm9, %v7587_v34, %v7596_v16  ;;  %v11214_v55 = vld [vmem:[#allocation3 + $0x80] sm:$0xf]  ;;  %vm20308_vm5 = vcmask 1044480   ;;  %v11513_v34 = vrot.slane %v16077_v0, 3 }
 0x431   : > { %14179 = vmatprep.mubr.msk.bf16.mxu1 %vm19880_vm14, %v20251_v14  ;;  %v8727_v48 = vsel %vm20301_vm8, %v8724_v49, %v8726_v52  ;;  %v16074_v49 = vld [vmem:[#allocation3 + $0x84] sm:$0xff]   ;;  %vm20309_vm1 = vmmov %vm20308_vm5  ;;  %v8847_v29 = vrot.slane %v8845_v56, 2  ;;  %v8850_v40 = vrot.slane %v8848_v53, 3  ;;  %v8866_v0 = vshll.u32 %v18685_v42, 16 }
 0x432   : > { %14004 = vmatmul.mubr.msk.bf16.vlgmr.msra.gmra.mrb[40].mxu0 %vm20291_vm4, %v7570_v2  ;;  %v8729_v2 = vsel %vm20305_vm7, %v8726_v52, %v8728_v35  ;;  %vm20310_vm3 = vmmov %vm20309_vm1  ;;  %v11511_v45 = vrot.slane %v16074_v49, 3 }
 0x433   : > { %14007 = vmatprep.mubr.msk.bf16.mxu0 %vm19880_vm14, %v20251_v14  ;;  %14024 = vmatpush3.bf16.msra.mxu0 %v7728_v61  ;;  %v10248_v61 = vrot.slane %v16070_v51, 3  ;;  %v18907_v60 = vsel %vm20310_vm3, %v10250_v19, %v10252_v15  ;;  %vm20311_vm0 = vmmov %vm20309_vm1 }
 0x434   : > { %14243 = vmatprep.subr.bf16.mxu0 %v20251_v14  ;;  %vm20313_vm10 = vmmov %vm20311_vm0 }
 0x435   : > { %vm20315_vm8 = vmmov %vm20291_vm4 }
 0x436   : > { %vm20324_vm3 = vmmov %vm20317_vm2 }
 0x438   : > { %14180 = vmatmul.mubr.msk.bf16.vlgmr.msra.gmra.mrb[40].mxu1 %vm20298_vm6, %v8725_v22  ;;  %v12518_v22 = vcombine.low %v11505_v24, %v11214_v55  ;;  %vm20312_vm6 = vmmov %vm20305_vm7  ;;  %v8863_v55 = vshrl.u32 %v18685_v42, 16 }
 0x439   : > { %14200 = vmatpush3.bf16.msra.mxu1 %v8896_v3  ;;  %14183 = vmatprep.mubr.msk.bf16.mxu1 %vm19880_vm14, %v20251_v14  ;;  %v18897_v3 = vsel %vm20308_vm5, %v10247_v18, %v10248_v61  ;;  %v8731_v37 = vsel %vm20312_vm6, %v8728_v35, %v8730_v30  ;;  %v8837_v35 = vshrl.u32 %v18799_v58, 16  ;;  %vm20319_vm7 = vmmov %vm20317_vm2  ;;  %v12331_v58 = vld [vmem:[%s19816_s4 + $0x20] sm:$0xf]  ;;  %v8856_v18 = vrot.slane %v8854_v12, 2 }
 0x43a   : > { %14008 = vmatmul.mubr.msk.bf16.gmra.mrb[44].mxu0 %vm20300_vm11, %v7579_v8  ;;  %14221 = vmatprep.subr.bf16.mxu1 %v20251_v14  ;;  %v18902_v8 = vsel %vm20309_vm1, %v10248_v61, %v10250_v19  ;;  %v11510_v52 = vrot.slane %v12518_v22, 3  ;;  %vm20314_vm11 = vmmov %vm20311_vm0  ;;  %v8842_v61 = vrot.slane %v8840_v6, 3  ;;  %v8831_v19 = vld [vmem:[#allocation3 + $0x58] sm:$0x7]  ;;  %v18977_v6 = vld [vmem:[#allocation3 + $0x4c] sm:$0xf] }
 0x43b   : > { %14011 = vmatprep.mubr.msk.bf16.mxu0 %vm19880_vm14, %v20251_v14  ;;  %v8839_v36 = vrot.slane %v8837_v35, 2  ;;  %vm20322_vm5 = vmmov %vm20317_vm2  ;;  %v18962_v22 = vcombine.low %v18884_v46, %v8831_v19  ;;  %v7710_v35 = vrot.slane %v18864_v50, 3  ;;  %v19021_v19 = vld [vmem:[#allocation3 + $0x60] sm:$0xff]  }
 0x43c   : > { %v18911_v59 = vsel %vm20311_vm0, %v11510_v52, %v11511_v45  ;;  %vm20323_vm1 = vmmov %vm20306_vm9  ;;  %v8868_v52 = vrot.slane %v8866_v0, 3 }
 0x43d   : > { %v8843_v49 = vor.u32 %v8842_v61, %v8839_v36  ;;  %vm20325_vm0 = vmmov %vm20317_vm2 }
 0x43e   : > { %vm20326_vm6 = vmmov %vm20323_vm1 }
 0x440   : > { %14184 = vmatmul.mubr.msk.bf16.gmra.mrb[44].mxu1 %vm20302_vm13, %v8727_v48  ;;  %v11515_v48 = vrot.slane %v18892_v32, 3  ;;  %vm20316_vm13 = vmmov %vm20291_vm4 }
 0x441   : > { %14187 = vmatprep.mubr.msk.bf16.mxu1 %vm19880_vm14, %v20251_v14 }
 0x442   : > { %14012 = vmatmul.mubr.msk.bf16.gmra.mrb[48].mxu0 %vm20304_vm12, %v7588_v7  ;;  %v18915_v7 = vsel %vm20313_vm10, %v11511_v45, %v11513_v34  ;;  %v18920_v51 = vsel %vm20314_vm11, %v11513_v34, %v11515_v48  ;;  %vm20318_vm12 = vcmask 1043456   ;;  %v8865_v45 = vrot.slane %v8863_v55, 2  ;;  %vm20327_vm10 = vmmov %vm20325_vm0 }
 0x443   : > { %14015 = vmatprep.mubr.msk.bf16.mxu0 %vm19880_vm14, %v20251_v14  ;;  %v9271_v43 = vsel %vm20318_vm12, %v12357_v39, 0  ;;  %v8872_v34 = vshrl.u32 %v18962_v22, 16 }
 0x445   : > { %v8874_v56 = vrot.slane %v8872_v34, 2  ;;  %v9240_v34 = vshll.u32 %v19021_v19, 16 }
 0x448   : > { %14188 = vmatmul.mubr.msk.bf16.gmra.mrb[48].mxu1 %vm20291_vm4, %v8729_v2  ;;  %v8851_v2 = vor.u32 %v8850_v40, %v8847_v29  ;;  %vm20320_vm4 = vmmov %vm20318_vm12  ;;  %v9179_v29 = vld [vmem:[#allocation3 + $0x48] sm:$0xf] }
 0x449   : > { %14191 = vmatprep.mubr.msk.bf16.mxu1 %vm19880_vm14, %v20251_v14  ;;  %v9009_v24 = vsel %vm20320_vm4, %v12331_v58, 0  ;;  %v18988_v50 = vcombine.low %v9179_v29, %v18977_v6  ;;  %vm20332_vm12 = vmmov %vm20325_vm0 }
 0x44a   : > { %14016 = vmatmul.mubr.msk.bf16.gmra.mrb[52].mxu0 %vm20307_vm15, %v7597_v10  ;;  %vm20321_vm15 = vmmov %vm20317_vm2 }
 0x44b   : > { %14019 = vmatprep.mubr.msk.bf16.mxu0 %vm19880_vm14, %v20251_v14  ;;  %v9219_v61 = vshll.u32 %v18988_v50, 16  ;;  %v9217_v58 = vshrl.u32 %v18988_v50, 16 }
 0x450   : > { %14192 = vmatmul.mubr.msk.bf16.gmra.mrb[52].mxu1 %vm20315_vm8, %v8731_v37  ;;  %v8875_v37 = vshll.u32 %v18962_v22, 16  ;;  %vm20329_vm8 = vmmov %vm20325_vm0 }
 0x451   : > { %14195 = vmatprep.mubr.msk.bf16.mxu1 %vm19880_vm14, %v20251_v14 }
 0x452   : > { %14020 = vmatmul.mubr.msk.bf16.gmra.mrb[56].mxu0 %vm20316_vm13, %v7596_v16  ;;  %v8857_v16 = vshll.u32 %v18866_v54, 16  ;;  %v8877_v53 = vrot.slane %v8875_v37, 3  ;;  %vm20330_vm13 = vmmov %vm20323_vm1  ;;  %v19034_v37 = vld [vmem:[#allocation3 + $0x68] sm:$0xf] }
 0x453   : > { %14025 = vmatprep.mubr.msk.bf16.mxu0 %vm19880_vm14, %v20251_v14 }
 0x454   : > { %v8859_v10 = vrot.slane %v8857_v16, 3  ;;  %v8878_v40 = vor.u32 %v8877_v53, %v8874_v56  ;;  %v19002_v16 = vld [vmem:[#allocation3 + $0x58] sm:$0xff]   ;;  %v9242_v56 = vrot.slane %v9240_v34, 1  ;;  %v9189_v53 = vld [vmem:[#allocation3 + $0x6c] sm:$0x1] }
 0x456   : > { %v8860_v54 = vor.u32 %v8859_v10, %v8856_v18  ;;  %v9232_v10 = vshll.u32 %v19002_v16, 16 }
 0x458   : > { %14196 = vmatmul.mubr.msk.bf16.gmra.mrb[56].mxu1 %vm20317_vm2, %v8730_v30  ;;  %v8861_v30 = vsel %vm20323_vm1, %v8851_v2, %v8860_v54  ;;  %vm20331_vm2 = vmmov %vm20325_vm0  ;;  %v9234_v0 = vrot.slane %v9232_v10, 1 }
 0x459   : > { %14201 = vmatprep.mubr.msk.bf16.mxu1 %vm19880_vm14, %v20251_v14  ;;  %vm20338_vm1 = vmmov %vm20325_vm0 }
 0x45a   : > { %14026 = vmatmul.mubr.msk.bf16.vlgmr.msra.gmra.mrb[40].mxu0 %vm20319_vm7, %v18047_v4  ;;  %v8852_v4 = vsel %vm20306_vm9, %v8843_v49, %v8851_v2  ;;  %v9221_v2 = vrot.slane %v9219_v61, 1  ;;  %v9188_v49 = vld [vmem:[%s19816_s4] sm:$0xf]  ;;  %vm20333_vm7 = vmmov %vm20325_vm0  ;;  %vm20334_vm9 = vsmask.f32 7424 }
 0x45b   : > { %14029 = vmatprep.mubr.msk.bf16.mxu0 %vm19880_vm14, %v20251_v14  ;;  %14244 = vmatpush3.bf16.msra.mxu0 %v9271_v43  ;;  %v18990_v43 = vld [vmem:[#allocation3 + $0x50] sm:$0xff]  }
 0x45c   : > { %14265 = vmatprep.subr.bf16.mxu0 %v20251_v14  ;;  %v9228_v55 = vshrl.u32 %v18990_v43, 16 }
 0x460   : > { %14202 = vmatmul.mubr.msk.bf16.vlgmr.msra.gmra.mrb[40].mxu1 %vm20321_vm15, %v8852_v4  ;;  %v9358_v4 = vsel %vm20320_vm4, %v9188_v49, 0  ;;  %vm20335_vm15 = vmmov %vm20325_vm0 }
 0x461   : > { %14222 = vmatpush3.bf16.msra.mxu1 %v9009_v24  ;;  %14205 = vmatprep.mubr.msk.bf16.mxu1 %vm19880_vm14, %v20251_v14  ;;  %v9222_v24 = vor.u32 %v9221_v2, %v9217_v58  ;;  %v8991_v58 = vrot.slane %v18962_v22, 3 }
 0x462   : > { %14030 = vmatmul.mubr.msk.bf16.gmra.mrb[44].mxu0 %vm20322_vm5, %v18052_v63  ;;  %14441 = vmatprep.subr.bf16.mxu1 %v20251_v14  ;;  %v8869_v63 = vor.u32 %v8868_v52, %v8865_v45  ;;  %vm20336_vm5 = vmmov %vm20320_vm4  ;;  %v20337_v52 = vld [vmem:[#allocation4_spill] sm:$0xff] }
 0x463   : > { %14033 = vmatprep.mubr.msk.bf16.mxu0 %vm19880_vm14, %v20251_v14  ;;  %vm20349_vm4 = vmmov %vm20325_vm0 }
 0x464   : > { %v8870_v46 = vsel %vm20326_vm6, %v8860_v54, %v8869_v63  ;;  %v8879_v36 = vsel %vm20330_vm13, %v8869_v63, %v8878_v40  ;;  %v12450_v54 = vld [vmem:[%s19816_s4 + $0x4] sm:$0xf]  ;;  %vm20341_vm6 = vmmov %vm20325_vm0 }
 0x468   : > { %14206 = vmatmul.mubr.msk.bf16.gmra.mrb[44].mxu1 %vm20324_vm3, %v8861_v30  ;;  %v10534_v30 = vsel %vm20336_vm5, %v12450_v54, 0  ;;  %vm20339_vm3 = vmmov %vm20334_vm9 }
 0x469   : > { %14209 = vmatprep.mubr.msk.bf16.mxu1 %vm19880_vm14, %v20251_v14  ;;  %vm20345_vm13 = vmmov %vm20339_vm3 }
 0x46a   : > { %14034 = vmatmul.mubr.msk.bf16.gmra.mrb[48].mxu0 %vm20325_vm0, %v18057_v13  ;;  %v20328_v13 = vrot.slane %v18034_v20, 3  ;;  %v9224_v20 = vshll.u32 %v18990_v43, 16 }
 0x46b   : > { %14037 = vmatprep.mubr.msk.bf16.mxu0 %vm19880_vm14, %v20251_v14 }
 0x46c   : > { %v7711_v39 = vsel %vm20314_vm11, %v20328_v13, %v7710_v35  ;;  %v9226_v12 = vrot.slane %v9224_v20, 1  ;;  %v19038_v13 = vcombine.low %v19034_v37, %v9189_v53  ;;  %vm20343_vm11 = vmmov %vm20325_vm0 }
 0x46e   : > { %v9227_v18 = vsel %vm20334_vm9, %v9222_v24, %v9226_v12  ;;  %v9230_v45 = vor.u32 %v9228_v55, %v9226_v12  ;;  %v19059_v12 = vld [vmem:[#allocation3 + $0x70] sm:$0xf]  ;;  %v9252_v49 = vshrl.u32 %v19038_v13, 16  ;;  %v10442_v24 = vld [vmem:[#allocation3 + $0x6c] sm:$0xf]  ;;  %vm20350_vm9 = vmmov %vm20325_vm0 }
 0x46f   : > { %v19069_v22 = vcombine.low %v10442_v24, %v19059_v12 }
 0x470   : > { %14210 = vmatmul.mubr.msk.bf16.gmra.mrb[48].mxu1 %vm20327_vm10, %v8870_v46  ;;  %v9235_v63 = vsel %vm20339_vm3, %v9230_v45, %v9234_v0  ;;  %v9236_v46 = vshrl.u32 %v19002_v16, 16  ;;  %vm20342_vm10 = vmmov %vm20339_vm3  ;;  %v10451_v45 = vld [vmem:[%s19816_s4] sm:$0xf] }
 0x471   : > { %14213 = vmatprep.mubr.msk.bf16.mxu1 %vm19880_vm14, %v20251_v14  ;;  %v10482_v42 = vshll.u32 %v19069_v22, 16 }
 0x472   : > { %14038 = vmatmul.mubr.msk.bf16.gmra.mrb[52].mxu0 %vm20329_vm8, %v7711_v39  ;;  %v20340_v39 = vld [vmem:[#allocation5_spill] sm:$0xff]  ;;  %vm20344_vm8 = vmmov %vm20325_vm0 }
 0x473   : > { %14041 = vmatprep.mubr.msk.bf16.mxu0 %vm19880_vm14, %v20251_v14  ;;  %v10484_v55 = vrot.slane %v10482_v42, 1 }
 0x478   : > { %14214 = vmatmul.mubr.msk.bf16.gmra.mrb[52].mxu1 %vm20331_vm2, %v8879_v36  ;;  %v9248_v36 = vshll.u32 %v19038_v13, 16  ;;  %vm20346_vm2 = vmmov %vm20325_vm0 }
 0x479   : > { %14217 = vmatprep.mubr.msk.bf16.mxu1 %vm19880_vm14, %v20251_v14 }
 0x47a   : > { %14042 = vmatmul.mubr.msk.bf16.gmra.mrb[56].mxu0 %vm20332_vm12, %v7710_v35  ;;  %v9238_v35 = vor.u32 %v9236_v46, %v9234_v0  ;;  %v9250_v20 = vrot.slane %v9248_v36, 1  ;;  %vm20347_vm12 = vcmask 1044480   ;;  %v10480_v0 = vshrl.u32 %v19069_v22, 16  ;;  %v19115_v36 = vld [vmem:[#allocation3 + $0x8c] sm:$0xf] }
 0x47b   : > { %14245 = vmatprep.mubr.msk.bf16.mxu0 %vm19880_vm14, %v20251_v14 }
 0x47c   : > { %v9243_v29 = vsel %vm20342_vm10, %v9238_v35, %v9242_v56  ;;  %v19106_v35 = vld [vmem:[#allocation3 + $0x84] sm:$0xff]   ;;  %vm20355_vm10 = vmmov %vm20339_vm3 }
 0x47d   : > { %v10507_v24 = vshrl.u32 %v19106_v35, 16 }
 0x480   : > { %14218 = vmatmul.mubr.msk.bf16.gmra.mrb[56].mxu1 %vm20333_vm7, %v8878_v40  ;;  %v9244_v40 = vshrl.u32 %v19021_v19, 16  ;;  %vm20348_vm7 = vmmov %vm20325_vm0 }
 0x481   : > { %14223 = vmatprep.mubr.msk.bf16.mxu1 %vm19880_vm14, %v20251_v14 }
 0x482   : > { %14246 = vmatmul.mubr.msk.bf16.vlgmr.msra.gmra.mrb[60].mxu0 %vm20335_vm15, %v9227_v18  ;;  %v9246_v61 = vor.u32 %v9244_v40, %v9242_v56  ;;  %v19072_v18 = vld [vmem:[#allocation3 + $0x74] sm:$0xff]   ;;  %vm20351_vm15 = vmmov %vm20336_vm5  ;;  %v10503_v40 = vshll.u32 %v19106_v35, 16 }
 0x483   : > { %14249 = vmatprep.mubr.msk.bf16.mxu0 %vm19880_vm14, %v20251_v14  ;;  %14266 = vmatpush3.bf16.msra.mxu0 %v9358_v4  ;;  %v9254_v4 = vor.u32 %v9252_v49, %v9250_v20  ;;  %v10487_v10 = vshll.u32 %v19072_v18, 16  ;;  %vm20352_vm5 = vmmov %vm20325_vm0  ;;  %v10491_v46 = vshrl.u32 %v19072_v18, 16 }
 0x484   : > { %14287 = vmatprep.subr.bf16.mxu0 %v20251_v14  ;;  %v9251_v2 = vsel %vm20345_vm13, %v9246_v61, %v9250_v20  ;;  %v10505_v20 = vrot.slane %v10503_v40, 1  ;;  %vm20358_vm13 = vmmov %vm20339_vm3  ;;  %v9582_v40 = vrot.slane %v18779_v25, 1 }
 0x486   : > { %v10509_v42 = vor.u32 %v10507_v24, %v10505_v20 }
 0x488   : > { %14224 = vmatmul.mubr.msk.bf16.vlgmr.msra.gmra.mrb[40].mxu1 %vm20338_vm1, %v20337_v52  ;;  %v10485_v52 = vor.u32 %v10484_v55, %v10480_v0  ;;  %vm20353_vm1 = vmmov %vm20351_vm15  ;;  %v9432_v55 = vld [vmem:[#allocation3 + $0x48] sm:$0xe] }
 0x489   : > { %14442 = vmatpush3.bf16.msra.mxu1 %v10534_v30  ;;  %14227 = vmatprep.mubr.msk.bf16.mxu1 %vm19880_vm14, %v20251_v14  ;;  %v10489_v30 = vrot.slane %v10487_v10, 1  ;;  %v10621_v34 = vsel %vm20353_vm1, %v10451_v45, 0  ;;  %v12375_v0 = vcombine.low %v9432_v55, %v18977_v6  ;;  %v9438_v45 = vrot.slane %v18990_v43, 1  ;;  %v12467_v6 = vld [vmem:[%s19816_s4 + $0x8] sm:$0xf] }
 0x48a   : > { %14250 = vmatmul.mubr.msk.bf16.gmra.mrb[64].mxu0 %vm20325_vm0, %v9235_v63  ;;  %14463 = vmatprep.subr.bf16.mxu1 %v20251_v14  ;;  %v19094_v63 = vld [vmem:[#allocation3 + $0x7c] sm:$0xff]   ;;  %v9586_v55 = vrot.slane %v18791_v17, 1 }
 0x48b   : > { %14253 = vmatprep.mubr.msk.bf16.mxu0 %vm19880_vm14, %v20251_v14  ;;  %v10495_v56 = vshll.u32 %v19094_v63, 16  ;;  %v10493_v53 = vor.u32 %v10491_v46, %v10489_v30  ;;  %v10499_v61 = vshrl.u32 %v19094_v63, 16 }
 0x490   : > { %14228 = vmatmul.mubr.msk.bf16.gmra.mrb[44].mxu1 %vm20341_vm6, %v20340_v39  ;;  %vm20354_vm6 = vmmov %vm20325_vm0  ;;  %v10497_v39 = vrot.slane %v10495_v56, 1 }
 0x491   : > { %14231 = vmatprep.mubr.msk.bf16.mxu1 %vm19880_vm14, %v20251_v14 }
 0x492   : > { %14254 = vmatmul.mubr.msk.bf16.gmra.mrb[68].mxu0 %vm20343_vm11, %v9243_v29  ;;  %v10498_v29 = vsel %vm20355_vm10, %v10493_v53, %v10497_v39  ;;  %vm20356_vm11 = vmmov %vm20325_vm0 }
 0x493   : > { %14257 = vmatprep.mubr.msk.bf16.mxu0 %vm19880_vm14, %v20251_v14 }
 0x498   : > { %14232 = vmatmul.mubr.msk.bf16.gmra.mrb[48].mxu1 %vm20344_vm8, %v18716_v26  ;;  %v8992_v26 = vsel %vm20347_vm12, %v8989_v11, %v8991_v58  ;;  %v12374_v11 = vld [vmem:[%s19816_s4 + $0x8] sm:$0xf]  ;;  %vm20357_vm8 = vmmov %vm20325_vm0 }
 0x499   : > { %14235 = vmatprep.mubr.msk.bf16.mxu1 %vm19880_vm14, %v20251_v14  ;;  %v9462_v54 = vsel %vm20351_vm15, %v12374_v11, 0  ;;  %vm20360_vm12 = vmmov %vm20325_vm0 }
 0x49a   : > { %14258 = vmatmul.mubr.msk.bf16.gmra.mrb[72].mxu0 %vm20346_vm2, %v9251_v2  ;;  %v10452_v2 = vld [vmem:[#allocation3 + $0x90] sm:$0x1]  ;;  %vm20359_vm2 = vmmov %vm20325_vm0 }
 0x49b   : > { %14261 = vmatprep.mubr.msk.bf16.mxu0 %vm19880_vm14, %v20251_v14  ;;  %v19123_v49 = vcombine.low %v19115_v36, %v10452_v2  ;;  %vm20364_vm15 = vmmov %vm20325_vm0 }
 0x4a0   : > { %14236 = vmatmul.mubr.msk.bf16.gmra.mrb[52].mxu1 %vm20348_vm7, %v8992_v26  ;;  %vm20361_vm7 = vmmov %vm20339_vm3 }
 0x4a1   : > { %14239 = vmatprep.mubr.msk.bf16.mxu1 %vm19880_vm14, %v20251_v14 }
 0x4a2   : > { %14262 = vmatmul.mubr.msk.bf16.gmra.mrb[76].mxu0 %vm20349_vm4, %v9254_v4  ;;  %v10511_v4 = vshll.u32 %v19123_v49, 16  ;;  %vm20362_vm4 = vmmov %vm20325_vm0 }
 0x4a3   : > { %14267 = vmatprep.mubr.msk.bf16.mxu0 %vm19880_vm14, %v20251_v14 }
 0x4a4   : > { %v10513_v11 = vrot.slane %v10511_v4, 1  ;;  %v10701_v4 = vrot.slane %v19072_v18, 1 }
 0x4a6   : > { %v10514_v10 = vsel %vm20361_vm7, %v10509_v42, %v10513_v11 }
 0x4a8   : > { %14240 = vmatmul.mubr.msk.bf16.gmra.mrb[56].mxu1 %vm20350_vm9, %v8991_v58  ;;  %v10501_v58 = vor.u32 %v10499_v61, %v10497_v39  ;;  %vm20363_vm9 = vmmov %vm20325_vm0  ;;  %v9444_v39 = vrot.slane %v19038_v13, 1  ;;  %v9545_v13 = vld [vmem:[#allocation3 + $0x50] sm:$0xe]  ;;  %v12392_v61 = vld [vmem:[%s19816_s4 + $0x10] sm:$0xf] }
 0x4a9   : > { %14443 = vmatprep.mubr.msk.bf16.mxu1 %vm19880_vm14, %v20251_v14 }
 0x4aa   : > { %14268 = vmatmul.mubr.msk.bf16.vlgmr.msra.gmra.mrb[60].mxu0 %vm20352_vm5, %v18988_v50  ;;  %v10490_v50 = vsel %vm20339_vm3, %v10485_v52, %v10489_v30  ;;  %v10506_v26 = vsel %vm20358_vm13, %v10501_v58, %v10505_v20  ;;  %v10515_v30 = vshrl.u32 %v19123_v49, 16  ;;  %v12381_v52 = vld [vmem:[%s19816_s4 + $0xc] sm:$0xf]  ;;  %vm20365_vm5 = vmmov %vm20353_vm1  ;;  %vm20366_vm1 = vcmask 1046528   ;;  %v10695_v58 = vld [vmem:[#allocation3 + $0x6c] sm:$0xe] }
 0x4ab   : > { %14271 = vmatprep.mubr.msk.bf16.mxu0 %vm19880_vm14, %v20251_v14  ;;  %14288 = vmatpush3.bf16.msra.mxu0 %v9462_v54  ;;  %v12368_v54 = vcombine.low %v19034_v37, %v19034_v37  ;;  %vm20367_vm3 = vmmov %vm20325_vm0  ;;  %v12461_v20 = vcombine.low %v19115_v36, %v19115_v36  ;;  %v12474_v36 = vld [vmem:[%s19816_s4 + $0xc] sm:$0xf] }
 0x4ac   : > { %14309 = vmatprep.subr.bf16.mxu0 %v20251_v14  ;;  %v10517_v37 = vor.u32 %v10515_v30, %v10513_v11  ;;  %vm20370_vm10 = vmmov %vm20366_vm1  ;;  %v9584_v11 = vrot.slane %v18788_v21, 1 }
 0x4ad   : > { %vm20373_vm13 = vmmov %vm20366_vm1 }
 0x4ae   : > { %vm20375_vm7 = vmmov %vm20366_vm1 }
 0x4b0   : > { %14444 = vmatmul.mubr.msk.bf16.vlgmr.msra.gmra.mrb[60].mxu1 %vm20325_vm0, %v10490_v50  ;;  %v9606_v50 = vsel %vm20365_vm5, %v12381_v52, 0  ;;  %vm20368_vm0 = vmmov %vm20365_vm5 }
 0x4b1   : > { %14464 = vmatpush3.bf16.msra.mxu1 %v10621_v34  ;;  %14447 = vmatprep.mubr.msk.bf16.mxu1 %vm19880_vm14, %v20251_v14  ;;  %v9437_v34 = vrot.slane %v12375_v0, 1  ;;  %v10725_v56 = vsel %vm20368_vm0, %v12467_v6, 0  ;;  %vm20379_vm5 = vmmov %vm20359_vm2  ;;  %v9554_v0 = vld [vmem:[#allocation3 + $0x74] sm:$0x1]  ;;  %v10707_v6 = vrot.slane %v19123_v49, 1 }
 0x4b2   : > { %14272 = vmatmul.mubr.msk.bf16.gmra.mrb[64].mxu0 %vm20354_vm6, %v18990_v43  ;;  %14485 = vmatprep.subr.bf16.mxu1 %v20251_v14  ;;  %v9440_v43 = vrot.slane %v19002_v16, 1  ;;  %vm20369_vm6 = vmmov %vm20359_vm2 }
 0x4b3   : > { %14275 = vmatprep.mubr.msk.bf16.mxu0 %vm19880_vm14, %v20251_v14  ;;  %v9439_v46 = vsel %vm20366_vm1, %v9437_v34, %v9438_v45  ;;  %vm20380_vm1 = vmmov %vm20368_vm0  ;;  %v10705_v34 = vrot.slane %v19106_v35, 1 }
 0x4b4   : > { %v9441_v53 = vsel %vm20370_vm10, %v9438_v45, %v9440_v43  ;;  %vm20382_vm0 = vmmov %vm20359_vm2  ;;  %v9553_v45 = vld [vmem:[#allocation3 + $0x70] sm:$0xf] }
 0x4b8   : > { %14448 = vmatmul.mubr.msk.bf16.gmra.mrb[64].mxu1 %vm20356_vm11, %v10498_v29  ;;  %vm20371_vm11 = vmmov %vm20359_vm2  ;;  %v12382_v29 = vcombine.low %v9545_v13, %v18783_v31  ;;  %v12468_v31 = vcombine.low %v10695_v58, %v19059_v12  ;;  %v10808_v13 = vld [vmem:[#allocation3 + $0x74] sm:$0xe] }
 0x4b9   : > { %14451 = vmatprep.mubr.msk.bf16.mxu1 %vm19880_vm14, %v20251_v14 }
 0x4ba   : > { %14276 = vmatmul.mubr.msk.bf16.gmra.mrb[68].mxu0 %vm20357_vm8, %v19002_v16  ;;  %v9442_v16 = vrot.slane %v19021_v19, 1  ;;  %vm20372_vm8 = vmmov %vm20359_vm2  ;;  %v9581_v2 = vrot.slane %v12382_v29, 1  ;;  %v10700_v42 = vrot.slane %v12468_v31, 1 }
 0x4bb   : > { %14279 = vmatprep.mubr.msk.bf16.mxu0 %vm19880_vm14, %v20251_v14 }
 0x4c0   : > { %14452 = vmatmul.mubr.msk.bf16.gmra.mrb[68].mxu1 %vm20359_vm2, %v10506_v26  ;;  %v9754_v26 = vsel %vm20380_vm1, %v12392_v61, 0  ;;  %v12399_v61 = vld [vmem:[%s19816_s4 + $0x14] sm:$0xf] }
 0x4c1   : > { %14455 = vmatprep.mubr.msk.bf16.mxu1 %vm19880_vm14, %v20251_v14 }
 0x4c2   : > { %14280 = vmatmul.mubr.msk.bf16.gmra.mrb[72].mxu0 %vm20360_vm12, %v19021_v19  ;;  %vm20374_vm12 = vmmov %vm20359_vm2  ;;  %v9445_v19 = vsel %vm20375_vm7, %v9442_v16, %v9444_v39 }
 0x4c3   : > { %14283 = vmatprep.mubr.msk.bf16.mxu0 %vm19880_vm14, %v20251_v14 }
 0x4c8   : > { %14456 = vmatmul.mubr.msk.bf16.gmra.mrb[72].mxu1 %vm20362_vm4, %v10514_v10  ;;  %vm20376_vm4 = vmmov %vm20359_vm2 }
 0x4c9   : > { %14459 = vmatprep.mubr.msk.bf16.mxu1 %vm19880_vm14, %v20251_v14 }
 0x4ca   : > { %14284 = vmatmul.mubr.msk.bf16.gmra.mrb[76].mxu0 %vm20363_vm9, %v12368_v54  ;;  %vm20377_vm9 = vmmov %vm20359_vm2  ;;  %v10703_v54 = vrot.slane %v19094_v63, 1 }
 0x4cb   : > { %14289 = vmatprep.mubr.msk.bf16.mxu0 %vm19880_vm14, %v20251_v14 }
 0x4d0   : > { %14460 = vmatmul.mubr.msk.bf16.gmra.mrb[76].mxu1 %vm20364_vm15, %v10517_v37  ;;  %vm20378_vm15 = vmmov %vm20359_vm2  ;;  %v12386_v37 = vcombine.low %v9553_v45, %v9554_v0 }
 0x4d1   : > { %14465 = vmatprep.mubr.msk.bf16.mxu1 %vm19880_vm14, %v20251_v14 }
 0x4d2   : > { %14290 = vmatmul.mubr.msk.bf16.vlgmr.msra.gmra.mrb[60].mxu0 %vm20367_vm3, %v9439_v46  ;;  %vm20381_vm3 = vmmov %vm20375_vm7 }
 0x4d3   : > { %14293 = vmatprep.mubr.msk.bf16.mxu0 %vm19880_vm14, %v20251_v14  ;;  %14310 = vmatpush3.bf16.msra.mxu0 %v9606_v50  ;;  %v9583_v24 = vsel %vm20381_vm3, %v9581_v2, %v9582_v40  ;;  %vm20384_vm10 = vmmov %vm20381_vm3 }
 0x4d4   : > { %14331 = vmatprep.subr.bf16.mxu0 %v20251_v14  ;;  %v10702_v10 = vsel %vm20384_vm10, %v10700_v42, %v10701_v4  ;;  %vm20398_vm10 = vmmov %vm20382_vm0  ;;  %v9721_v42 = vshrl.u32 %v18791_v17, 16 }
 0x4d8   : > { %14466 = vmatmul.mubr.msk.bf16.vlgmr.msra.gmra.mrb[60].mxu1 %vm20369_vm6, %v19069_v22  ;;  %v9443_v22 = vsel %vm20373_vm13, %v9440_v43, %v9442_v16  ;;  %vm20383_vm6 = vmmov %vm20380_vm1  ;;  %v9706_v43 = vshll.u32 %v18779_v25, 16  ;;  %v9698_v16 = vshll.u32 %v12382_v29, 16 }
 0x4d9   : > { %14486 = vmatpush3.bf16.msra.mxu1 %v10725_v56  ;;  %14469 = vmatprep.mubr.msk.bf16.mxu1 %vm19880_vm14, %v20251_v14  ;;  %v10869_v12 = vsel %vm20383_vm6, %v12474_v36, 0  ;;  %vm20387_vm13 = vmmov %vm20382_vm0 }
 0x4da   : > { %14294 = vmatmul.mubr.msk.bf16.gmra.mrb[64].mxu0 %vm20371_vm11, %v9441_v53  ;;  %14507 = vmatprep.subr.bf16.mxu1 %v20251_v14  ;;  %vm20385_vm11 = vmmov %vm20382_vm0  ;;  %v9695_v53 = vshrl.u32 %v12382_v29, 16  ;;  %v9715_v29 = vshll.u32 %v18788_v21, 16 }
 0x4db   : > { %14297 = vmatprep.mubr.msk.bf16.mxu0 %vm19880_vm14, %v20251_v14  ;;  %vm20395_vm1 = vmmov %vm20382_vm0 }
 0x4dc   : > { %vm20397_vm6 = vmmov %vm20382_vm0  ;;  %v9697_v49 = vrot.slane %v9695_v53, 1 }
 0x4e0   : > { %14470 = vmatmul.mubr.msk.bf16.gmra.mrb[64].mxu1 %vm20372_vm8, %v19072_v18  ;;  %vm20386_vm8 = vmmov %vm20381_vm3 }
 0x4e1   : > { %14473 = vmatprep.mubr.msk.bf16.mxu1 %vm19880_vm14, %v20251_v14  ;;  %v9585_v18 = vsel %vm20386_vm8, %v9582_v40, %v9584_v11  ;;  %v9712_v40 = vshrl.u32 %v18788_v21, 16  ;;  %vm20400_vm8 = vsmask.f32 6400 }
 0x4e2   : > { %14298 = vmatmul.mubr.msk.bf16.gmra.mrb[68].mxu0 %vm20359_vm2, %v9443_v22  ;;  %vm20388_vm2 = vmmov %vm20381_vm3 }
 0x4e3   : > { %14301 = vmatprep.mubr.msk.bf16.mxu0 %vm19880_vm14, %v20251_v14  ;;  %v10704_v30 = vsel %vm20388_vm2, %v10701_v4, %v10703_v54  ;;  %vm20390_vm7 = vmmov %vm20388_vm2  ;;  %v9714_v31 = vrot.slane %v9712_v40, 1  ;;  %v10845_v4 = vrot.slane %v18801_v23, 1  ;;  %v12249_v40 = vld [vmem:[%s16202_s10 + $0x10] sm:$0xff] }
 0x4e4   : > { %v9587_v52 = vsel %vm20390_vm7, %v9584_v11, %v9586_v55  ;;  %vm20396_vm3 = vmmov %vm20388_vm2  ;;  %v9724_v11 = vshll.u32 %v18791_v17, 16 }
 0x4e5   : > { %v10708_v56 = vsel %vm20396_vm3, %v10705_v34, %v10707_v6  ;;  %vm20404_vm7 = vmmov %vm20382_vm0 }
 0x4e6   : > { %v9726_v0 = vrot.slane %v9724_v11, 2 }
 0x4e8   : > { %14474 = vmatmul.mubr.msk.bf16.gmra.mrb[68].mxu1 %vm20374_vm12, %v19094_v63  ;;  %vm20389_vm12 = vmmov %vm20382_vm0  ;;  %v9588_v63 = vrot.slane %v12386_v37, 1 }
 0x4e9   : > { %14477 = vmatprep.mubr.msk.bf16.mxu1 %vm19880_vm14, %v20251_v14 }
 0x4ea   : > { %14302 = vmatmul.mubr.msk.bf16.gmra.mrb[72].mxu0 %vm20376_vm4, %v9445_v19  ;;  %vm20391_vm4 = vmmov %vm20382_vm0  ;;  %v9700_v19 = vrot.slane %v9698_v16, 2 }
 0x4eb   : > { %14305 = vmatprep.mubr.msk.bf16.mxu0 %vm19880_vm14, %v20251_v14 }
 0x4ec   : > { %v9701_v2 = vor.u32 %v9700_v19, %v9697_v49 }
 0x4f0   : > { %14478 = vmatmul.mubr.msk.bf16.gmra.mrb[72].mxu1 %vm20377_vm9, %v19106_v35  ;;  %vm20392_vm9 = vmmov %vm20388_vm2  ;;  %v9703_v35 = vshrl.u32 %v18779_v25, 16 }
 0x4f1   : > { %14481 = vmatprep.mubr.msk.bf16.mxu1 %vm19880_vm14, %v20251_v14  ;;  %v10706_v50 = vsel %vm20392_vm9, %v10703_v54, %v10705_v34  ;;  %vm20406_vm9 = vmmov %vm20382_vm0 }
 0x4f2   : > { %14306 = vmatmul.mubr.msk.bf16.gmra.mrb[76].mxu0 %vm20378_vm15, %v9444_v39  ;;  %vm20393_vm15 = vmmov %vm20382_vm0  ;;  %v9705_v22 = vrot.slane %v9703_v35, 1  ;;  %v9708_v39 = vrot.slane %v9706_v43, 2  ;;  %v7841_v35 = vld [vmem:[%s16202_s10] sm:$0xff] }
 0x4f3   : > { %14311 = vmatprep.mubr.msk.bf16.mxu0 %vm19880_vm14, %v20251_v14 }
 0x4f4   : > { %v9709_v25 = vor.u32 %v9708_v39, %v9705_v22  ;;  %v7842_v22 = vld [vmem:[%s16202_s10 + $0x8] sm:$0xff] }
 0x4f8   : > { %14482 = vmatmul.mubr.msk.bf16.gmra.mrb[76].mxu1 %vm20379_vm5, %v12461_v20  ;;  %vm20394_vm5 = vmmov %vm20388_vm2  ;;  %v19265_v20 = vcombine.low %v10808_v13, %v18810_v57  ;;  %v12485_v57 = vld [vmem:[%s19816_s4 + $0x10] sm:$0xf] }
 0x4f9   : > { %14487 = vmatprep.mubr.msk.bf16.mxu1 %vm19880_vm14, %v20251_v14  ;;  %v9589_v46 = vsel %vm20394_vm5, %v9586_v55, %v9588_v63  ;;  %v9723_v55 = vrot.slane %v9721_v42, 1  ;;  %vm20408_vm5 = vmmov %vm20382_vm0 }
 0x4fa   : > { %14312 = vmatmul.mubr.msk.bf16.vlgmr.msra.gmra.mrb[60].mxu0 %vm20382_vm0, %v9583_v24  ;;  %v9717_v24 = vrot.slane %v9715_v29, 2  ;;  %v10844_v21 = vrot.slane %v19265_v20, 1  ;;  %v12250_v29 = vld [vmem:[%s16202_s10 + $0x18] sm:$0xff] }
 0x4fb   : > { %14315 = vmatprep.mubr.msk.bf16.mxu0 %vm19880_vm14, %v20251_v14  ;;  %14332 = vmatpush3.bf16.msra.mxu0 %v9754_v26  ;;  %v9710_v26 = vsel %vm20400_vm8, %v9701_v2, %v9709_v25  ;;  %v9727_v34 = vor.u32 %v9726_v0, %v9723_v55  ;;  %v10817_v2 = vld [vmem:[#allocation3 + $0x98] sm:$0x1] }
 0x4fc   : > { %14353 = vmatprep.subr.bf16.mxu0 %v20251_v14  ;;  %v9718_v36 = vor.u32 %v9717_v24, %v9714_v31  ;;  %v7854_v24 = vrot.slane %v12249_v40, 6 }
 0x500   : > { %14488 = vmatmul.mubr.msk.bf16.vlgmr.msra.gmra.mrb[60].mxu1 %vm20385_vm11, %v10702_v10  ;;  %vm20399_vm11 = vcmask 1043456   ;;  %v9689_v10 = vld [vmem:[#allocation3 + $0x74] sm:$0x3] }
 0x501   : > { %14508 = vmatpush3.bf16.msra.mxu1 %v10869_v12  ;;  %14491 = vmatprep.mubr.msk.bf16.mxu1 %vm19880_vm14, %v20251_v14  ;;  %v9867_v58 = vsel %vm20399_vm11, %v12399_v61, 0  ;;  %vm20402_vm2 = vmmov %vm20399_vm11  ;;  %v19286_v54 = vcombine.low %v9553_v45, %v9689_v10  ;;  %v19304_v45 = vld [vmem:[%s19818_s6] ss:$0 sm:$0xff]  ;;  %v10849_v61 = vrot.slane %v18805_v47, 1 }
 0x502   : > { %14316 = vmatmul.mubr.msk.bf16.gmra.mrb[64].mxu0 %vm20387_vm13, %v9585_v18  ;;  %14529 = vmatprep.subr.bf16.mxu1 %v20251_v14  ;;  %vm20401_vm13 = vmmov %vm20382_vm0  ;;  %v11017_v12 = vsel %vm20402_vm2, %v12485_v57, 0 }
 0x503   : > { %14319 = vmatprep.mubr.msk.bf16.mxu0 %vm19880_vm14, %v20251_v14  ;;  %vm20412_vm11 = vmmov %vm20382_vm0 }
 0x504   : > { %vm20415_vm2 = vmmov %vm20382_vm0 }
 0x508   : > { %14492 = vmatmul.mubr.msk.bf16.gmra.mrb[64].mxu1 %vm20389_vm12, %v10704_v30  ;;  %vm20403_vm12 = vmmov %vm20396_vm3  ;;  %v10847_v30 = vrot.slane %v18803_v41, 1  ;;  %v9733_v41 = vshll.u32 %v19286_v54, 16 }
 0x509   : > { %14495 = vmatprep.mubr.msk.bf16.mxu1 %vm19880_vm14, %v20251_v14  ;;  %v10846_v18 = vsel %vm20403_vm12, %v10844_v21, %v10845_v4  ;;  %v7855_v21 = vrot.slane %v12250_v29, 6 }
 0x50a   : > { %14320 = vmatmul.mubr.msk.bf16.gmra.mrb[68].mxu0 %vm20391_vm4, %v9587_v52  ;;  %vm20405_vm4 = vmmov %vm20400_vm8  ;;  %v19297_v52 = vld [vmem:[%s19817_s5] ss:$0 sm:$0xff]  ;;  %v9735_v19 = vrot.slane %v9733_v41, 2 }
 0x50b   : > { %14323 = vmatprep.mubr.msk.bf16.mxu0 %vm19880_vm14, %v20251_v14  ;;  %v9719_v23 = vsel %vm20405_vm4, %v9709_v25, %v9718_v36  ;;  %vm20413_vm8 = vmmov %vm20382_vm0 }
 0x510   : > { %14496 = vmatmul.mubr.msk.bf16.gmra.mrb[68].mxu1 %vm20393_vm15, %v10706_v50  ;;  %vm20407_vm15 = vmmov %vm20396_vm3 }
 0x511   : > { %14499 = vmatprep.mubr.msk.bf16.mxu1 %vm19880_vm14, %v20251_v14  ;;  %vm20410_vm3 = vmmov %vm20382_vm0 }
 0x512   : > { %14324 = vmatmul.mubr.msk.bf16.gmra.mrb[72].mxu0 %vm20395_vm1, %v9589_v46  ;;  %vm20409_vm1 = vmmov %vm20405_vm4 }
 0x513   : > { %14327 = vmatprep.mubr.msk.bf16.mxu0 %vm19880_vm14, %v20251_v14  ;;  %v9728_v39 = vsel %vm20409_vm1, %v9718_v36, %v9727_v34  ;;  %vm20417_vm4 = vmmov %vm20382_vm0 }
 0x518   : > { %14500 = vmatmul.mubr.msk.bf16.gmra.mrb[72].mxu1 %vm20382_vm0, %v10708_v56 }
 0x519   : > { %14503 = vmatprep.mubr.msk.bf16.mxu1 %vm19880_vm14, %v20251_v14 }
 0x51a   : > { %14328 = vmatmul.mubr.msk.bf16.gmra.mrb[76].mxu0 %vm20397_vm6, %v9588_v63  ;;  %v9730_v63 = vshrl.u32 %v19286_v54, 16  ;;  %vm7853_vm6 = vcmask 1041408  }
 0x51b   : > { %14333 = vmatprep.mubr.msk.bf16.mxu0 %vm19880_vm14, %v20251_v14 }
 0x51c   : > { %v9732_v49 = vrot.slane %v9730_v63, 1 }
 0x51e   : > { %v9736_v57 = vor.u32 %v9735_v19, %v9732_v49 }
 0x520   : > { %14504 = vmatmul.mubr.msk.bf16.gmra.mrb[76].mxu1 %vm20398_vm10, %v10707_v6  ;;  %v10848_v6 = vsel %vm20407_vm15, %v10845_v4, %v10847_v30  ;;  %v19332_v4 = vld [vmem:[#allocation3 + $0x94] sm:$0xf]  ;;  %vm20411_vm10 = vmmov %vm20403_vm12  ;;  %vm7867_vm12 = vcmask 64514   ;;  %vm20419_vm15 = vcmask 1043456  }
 0x521   : > { %14509 = vmatprep.mubr.msk.bf16.mxu1 %vm19880_vm14, %v20251_v14  ;;  %v12479_v10 = vcombine.low %v19332_v4, %v10817_v2 }
 0x522   : > { %14334 = vmatmul.mubr.msk.bf16.vlgmr.msra.gmra.mrb[60].mxu0 %vm20401_vm13, %v9710_v26  ;;  %vm20414_vm13 = vmmov %vm20409_vm1  ;;  %vm7889_vm1 = vcmask 64516  }
 0x523   : > { %14337 = vmatprep.mubr.msk.bf16.mxu0 %vm19880_vm14, %v20251_v14  ;;  %14354 = vmatpush3.bf16.msra.mxu0 %v9867_v58 }
 0x524   : > { %14375 = vmatprep.subr.bf16.mxu0 %v20251_v14 }
 0x528   : > { %14510 = vmatmul.mubr.msk.bf16.vlgmr.msra.gmra.mrb[60].mxu1 %vm20404_vm7, %v10846_v18  ;;  %vm20416_vm7 = vmmov %vm20411_vm10 }
 0x529   : > { %14530 = vmatpush3.bf16.msra.mxu1 %v11017_v12  ;;  %14513 = vmatprep.mubr.msk.bf16.mxu1 %vm19880_vm14, %v20251_v14  ;;  %v10850_v12 = vsel %vm20411_vm10, %v10847_v30, %v10849_v61  ;;  %v9737_v30 = vsel %vm20414_vm13, %v9727_v34, %v9736_v57  ;;  %vm20422_vm10 = vmmov %vm20382_vm0 }
 0x52a   : > { %14338 = vmatmul.mubr.msk.bf16.gmra.mrb[64].mxu0 %vm20406_vm9, %v9719_v23  ;;  %14551 = vmatprep.subr.bf16.mxu1 %v20251_v14  ;;  %vm20418_vm9 = vmmov %vm20382_vm0 }
 0x52b   : > { %14341 = vmatprep.mubr.msk.bf16.mxu0 %vm19880_vm14, %v20251_v14  ;;  %vm20425_vm13 = vmmov %vm20382_vm0 }
 0x52d   : > { %v7764_v37 = vpop.f32.mrb[40].mxu0 }
 0x52e   : > { %v7817_v50 = vmul.f32 %v19297_v52, %v7764_v37  ;;  %v14027_v46 = vpop.f32.mrb[41].mxu0  ;;  %v7856_v37 = vsel %vm7853_vm6, %v7854_v24, %v7855_v21 }
 0x52f   : > { %v7767_v43 = vpop.f32.mrb[42].mxu0  ;;  %v12255_v46 = vld [vmem:[%s16202_s10 + $0x28] sm:$0xff] }
 0x530   : > { %14514 = vmatmul.mubr.msk.bf16.gmra.mrb[64].mxu1 %vm20408_vm5, %v10848_v6  ;;  %v7832_v56 = vadd.f32 %v19304_v45, %v7817_v50  ;;  %v7818_v53 = vmul.f32 %v19297_v52, %v7767_v43  ;;  %v14028_v16 = vpop.f32.mrb[43].mxu0  ;;  %v12254_v50 = vld [vmem:[%s16202_s10 + $0x20] sm:$0xff]  ;;  %v10851_v6 = vrot.slane %v12479_v10, 1  ;;  %vm20420_vm5 = vmmov %vm20382_vm0 }
 0x531   : > { %14517 = vmatprep.mubr.msk.bf16.mxu1 %vm19880_vm14, %v20251_v14  ;;  %v7877_v16 = vrot.slane %v12255_v46, 4 }
 0x532   : > { %v7843_v13 = vadd.f32 %v7841_v35, %v7832_v56  ;;  %v7833_v25 = vadd.f32 %v19304_v45, %v7818_v53  ;;  %14342 = vmatmul.mubr.msk.bf16.gmra.mrb[68].mxu0 %vm20410_vm3, %v9728_v39  ;;  %v7876_v53 = vrot.slane %v12254_v50, 4  ;;  %v10852_v49 = vsel %vm20416_vm7, %v10849_v61, %v10851_v6  ;;  %v12259_v61 = vld [vmem:[%s16202_s10 + $0x30] sm:$0xff] }
 0x533   : > { %14345 = vmatprep.mubr.msk.bf16.mxu0 %vm19880_vm14, %v20251_v14  ;;  %vm20421_vm3 = vcmask 58368  }
 0x534   : > { %v7845_v58 = vmax.f32 %v7843_v13, 0.0  ;;  %v7844_v26 = vadd.f32 %v7842_v22, %v7833_v25  ;;  %v7878_v29 = vsel %vm20419_vm15, %v7876_v53, %v7877_v16 }
 0x535   : > { %v7772_v31 = vpop.f32.mrb[44].mxu0 }
 0x536   : > { %7847 = vst.msk [vmem:[%s19328_s18] sm:$0xff] %vm20382_vm0, %v7845_v58  ;;  %v7846_v36 = vmax.f32 %v7844_v26, 0.0  ;;  %v7819_v42 = vmul.f32 %v19297_v52, %v7772_v31  ;;  %v14031_v11 = vpop.f32.mrb[45].mxu0  ;;  %v19370_v31 = vld [vmem:[%s16202_s10 + $0x38] sm:$0xff] }
 0x537   : > { %v7775_v18 = vpop.f32.mrb[46].mxu0 }
 0x538   : > { %14518 = vmatmul.mubr.msk.bf16.gmra.mrb[68].mxu1 %vm20412_vm11, %v10850_v12  ;;  %7848 = vst.msk [vmem:[%s19328_s18 + $0x8] sm:$0xff] %vm20413_vm8, %v7846_v36  ;;  %v7834_v23 = vadd.f32 %v19304_v45, %v7819_v42  ;;  %v7820_v55 = vmul.f32 %v19297_v52, %v7775_v18  ;;  %v14032_v0 = vpop.f32.mrb[47].mxu0  ;;  %v10961_v36 = vshll.u32 %v19265_v20, 16  ;;  %v16092_v42 = vld [vmem:[#allocation3 + $0x7c] sm:$0xff]   ;;  %vm20423_vm11 = vmmov %vm20419_vm15  ;;  %vm20424_vm8 = vcmask 1045504  }
 0x539   : > { %14521 = vmatprep.mubr.msk.bf16.mxu1 %vm19880_vm14, %v20251_v14  ;;  %v12406_v0 = vld [vmem:[%s19816_s4 + $0x18] sm:$0xf]  ;;  %vm20426_vm7 = vmmov %vm20423_vm11 }
 0x53a   : > { %v7860_v63 = vadd.f32 %v7854_v24, %v7834_v23  ;;  %v7835_v41 = vadd.f32 %v19304_v45, %v7820_v55  ;;  %14346 = vmatmul.mubr.msk.bf16.gmra.mrb[72].mxu0 %vm20415_vm2, %v9737_v30  ;;  %v10958_v24 = vshrl.u32 %v19265_v20, 16  ;;  %v7898_v23 = vrot.slane %v12259_v61, 2  ;;  %vm20429_vm15 = vmmov %vm20382_vm0 }
 0x53b   : > { %14349 = vmatprep.mubr.msk.bf16.mxu0 %vm19880_vm14, %v20251_v14  ;;  %v7899_v55 = vrot.slane %v19370_v31, 2  ;;  %vm7911_vm2 = vcmask 64518  }
 0x53c   : > { %v7863_v35 = vmax.f32 %v7860_v63, 0.0  ;;  %v7861_v43 = vadd.f32 %v7856_v37, %v7835_v41  ;;  %v10960_v63 = vrot.slane %v10958_v24, 1  ;;  %v10963_v41 = vrot.slane %v10961_v36, 2 }
 0x53d   : > { %v7780_v56 = vpop.f32.mrb[48].mxu0 }
 0x53e   : > { %12251 = vst.msk [vmem:[%s19328_s18 + $0xe] sm:$0xfc] %vm7867_vm12, %v7863_v35  ;;  %v7864_v34 = vmax.f32 %v7861_v43, 0.0  ;;  %v7821_v22 = vmul.f32 %v19297_v52, %v7780_v56  ;;  %v14035_v39 = vpop.f32.mrb[49].mxu0  ;;  %v10011_v56 = vsel %vm20423_vm11, %v12406_v0, 0  ;;  %v16094_v0 = vld [vmem:[#allocation3 + $0x8c] sm:$0xff]  }
 0x53f   : > { %v7783_v19 = vpop.f32.mrb[50].mxu0 }
 0x540   : > { %14522 = vmatmul.mubr.msk.bf16.gmra.mrb[72].mxu1 %vm20417_vm4, %v10852_v49  ;;  %12252 = vst.msk [vmem:[%s19328_s18 + $0x16] sm:$0xff] %vm20418_vm9, %v7864_v34  ;;  %v7836_v13 = vadd.f32 %v19304_v45, %v7821_v22  ;;  %v7822_v25 = vmul.f32 %v19297_v52, %v7783_v19  ;;  %v14036_v40 = vpop.f32.mrb[51].mxu0  ;;  %v7900_v22 = vsel %vm20424_vm8, %v7898_v23, %v7899_v55  ;;  %vm20427_vm4 = vcmask 60416  }
 0x541   : > { %14525 = vmatprep.mubr.msk.bf16.mxu1 %vm19880_vm14, %v20251_v14  ;;  %v10964_v19 = vor.u32 %v10963_v41, %v10960_v63  ;;  %vm20428_vm9 = vsmask.f32 6400 }
 0x542   : > { %v7862_v2 = vadd.f32 %v7855_v21, %v7836_v13  ;;  %v7882_v58 = vadd.f32 %v7876_v53, %v7836_v13  ;;  %v7837_v26 = vadd.f32 %v19304_v45, %v7822_v25  ;;  %14350 = vmatmul.mubr.msk.bf16.gmra.mrb[76].mxu0 %vm20420_vm5, %v9736_v57  ;;  %v10966_v21 = vshrl.u32 %v16092_v42, 16  ;;  %v12492_v13 = vld [vmem:[%s19816_s4 + $0x14] sm:$0xf]  ;;  %vm20430_vm5 = vmmov %vm20382_vm0 }
 0x543   : > { %14355 = vmatprep.mubr.msk.bf16.mxu0 %vm19880_vm14, %v20251_v14  ;;  %v10969_v57 = vshll.u32 %v16092_v42, 16  ;;  %v16093_v25 = vld [vmem:[#allocation3 + $0x84] sm:$0xff]   ;;  %v11130_v61 = vsel %vm20426_vm7, %v12492_v13, 0 }
 0x544   : > { %v7865_v11 = vmax.f32 %v7862_v2, 0.0  ;;  %v7885_v12 = vmax.f32 %v7882_v58, 0.0  ;;  %v7883_v10 = vadd.f32 %v7878_v29, %v7837_v26  ;;  %v10968_v53 = vrot.slane %v10966_v21, 1 }
 0x545   : > { %v7788_v18 = vpop.f32.mrb[52].mxu0  ;;  %v10971_v34 = vrot.slane %v10969_v57, 2  ;;  %v10975_v40 = vshrl.u32 %v16093_v25, 16  ;;  %v10978_v29 = vshll.u32 %v16093_v25, 16 }
 0x546   : > { %12253 = vst.msk [vmem:[%s19328_s18 + $0x1e] sm:$0x3] %vm20421_vm3, %v7865_v11  ;;  %v7886_v20 = vmax.f32 %v7883_v10, 0.0  ;;  %v7823_v37 = vmul.f32 %v19297_v52, %v7788_v18  ;;  %v14039_v30 = vpop.f32.mrb[53].mxu0  ;;  %vm20431_vm3 = vmmov %vm20382_vm0 }
 0x547   : > { %12256 = vst.msk [vmem:[%s19328_s18 + $0x1c] sm:$0xf0] %vm7889_vm1, %v7885_v12  ;;  %v7791_v50 = vpop.f32.mrb[54].mxu0  ;;  %v10977_v21 = vrot.slane %v10975_v40, 1  ;;  %v10980_v11 = vrot.slane %v10978_v29, 2  ;;  %vm20433_vm11 = vmmov %vm20431_vm3 }
 0x548   : > { %14526 = vmatmul.mubr.msk.bf16.gmra.mrb[76].mxu1 %vm20382_vm0, %v10851_v6  ;;  %12257 = vst.msk [vmem:[%s19328_s18 + $0x24] sm:$0xff] %vm20422_vm10, %v7886_v20  ;;  %v7838_v46 = vadd.f32 %v19304_v45, %v7823_v37  ;;  %v7824_v35 = vmul.f32 %v19297_v52, %v7791_v50  ;;  %v14040_v43 = vpop.f32.mrb[55].mxu0  ;;  %v10984_v20 = vshrl.u32 %v16094_v0, 16  ;;  %v10987_v37 = vshll.u32 %v16094_v0, 16  ;;  %v10952_v30 = vld [vmem:[#allocation3 + $0x98] sm:$0x3]  ;;  %vm20432_vm10 = vmmov %vm20428_vm9 }
 0x549   : > { %14531 = vmatprep.mubr.msk.bf16.mxu1 %vm19880_vm14, %v20251_v14  ;;  %vm7914_vm0 = vcmask 62464   ;;  %vm20434_vm8 = vmmov %vm20431_vm3 }
 0x54a   : > { %v7884_v39 = vadd.f32 %v7877_v16, %v7838_v46  ;;  %v7904_v49 = vadd.f32 %v7898_v23, %v7838_v46  ;;  %v7839_v6 = vadd.f32 %v19304_v45, %v7824_v35  ;;  %14356 = vmatmul.mubr.msk.bf16.vlgmr.msra.gmra.mrb[60].mxu0 %vm20425_vm13, %v18813_v44  ;;  %v10972_v44 = vor.u32 %v10971_v34, %v10968_v53  ;;  %v12338_v34 = vld [vmem:[%s16202_s10 + $0x40] sm:$0xff]  ;;  %vm20435_vm13 = vmmov %vm20428_vm9 }
 0x54b   : > { %14359 = vmatprep.mubr.msk.bf16.mxu0 %vm19880_vm14, %v20251_v14  ;;  %14376 = vmatpush3.bf16.msra.mxu0 %v10011_v56  ;;  %v10981_v23 = vor.u32 %v10980_v11, %v10977_v21  ;;  %v10986_v41 = vrot.slane %v10984_v20, 1  ;;  %v10989_v50 = vrot.slane %v10987_v37, 2  ;;  %vm20436_vm7 = vmmov %vm20431_vm3  ;;  %v12347_v20 = vld [vmem:[%s16202_s10 + $0x60] sm:$0xff]  ;;  %v12348_v37 = vld [vmem:[%s16202_s10 + $0x68] sm:$0xff] }
 0x54c   : > { %v7887_v16 = vmax.f32 %v7884_v39, 0.0  ;;  %v7907_v2 = vmax.f32 %v7904_v49, 0.0  ;;  %v7905_v58 = vadd.f32 %v7900_v22, %v7839_v6  ;;  %14397 = vmatprep.subr.bf16.mxu0 %v20251_v14  ;;  %v10973_v42 = vsel %vm20428_vm9, %v10964_v19, %v10972_v44  ;;  %v12339_v19 = vld [vmem:[%s16202_s10 + $0x48] sm:$0xff]  ;;  %vm20438_vm9 = vmmov %vm20431_vm3 }
 0x54d   : > { %v7796_v26 = vpop.f32.mrb[56].mxu0  ;;  %v10990_v35 = vor.u32 %v10989_v50, %v10986_v41  ;;  %v9849_v39 = vrot.slane %v19286_v54, 2  ;;  %v9143_v50 = vrot.slane %v12347_v20, 4 }
 0x54e   : > { %12258 = vst.msk [vmem:[%s19328_s18 + $0x2c] sm:$0xf] %vm20427_vm4, %v7887_v16  ;;  %v7908_v31 = vmax.f32 %v7905_v58, 0.0  ;;  %v7825_v24 = vmul.f32 %v19297_v52, %v7796_v26  ;;  %v14043_v36 = vpop.f32.mrb[57].mxu0  ;;  %v12343_v58 = vld [vmem:[%s16202_s10 + $0x58] sm:$0xff]  ;;  %vm20437_vm4 = vcmask 1045504  }
 0x54f   : > { %12261 = vst.msk [vmem:[%s19328_s18 + $0x2a] sm:$0xc0] %vm7911_vm2, %v7907_v2  ;;  %v7799_v12 = vpop.f32.mrb[58].mxu0  ;;  %v10991_v13 = vsel %vm20435_vm13, %v10981_v23, %v10990_v35  ;;  %v12342_v2 = vld [vmem:[%s16202_s10 + $0x50] sm:$0xff]  ;;  %v9850_v54 = vsel %vm20437_vm4, %v9847_v62, %v9849_v39  ;;  %vm20445_vm13 = vcmask 1043456  }
 0x550   : > { %14532 = vmatmul.mubr.msk.bf16.vlgmr.msra.gmra.mrb[60].mxu1 %vm20429_vm15, %v10973_v42  ;;  %12262 = vst.msk [vmem:[%s19328_s18 + $0x32] sm:$0xff] %vm20430_vm5, %v7908_v31  ;;  %v7840_v10 = vadd.f32 %v19304_v45, %v7825_v24  ;;  %v14044_v57 = vpop.f32.mrb[59].mxu0  ;;  %v9123_v31 = vrot.slane %v12342_v2, 6  ;;  %v9124_v24 = vrot.slane %v12343_v58, 6  ;;  %vm20439_vm15 = vmmov %vm20431_vm3  ;;  %v12352_v2 = vld [vmem:[%s16202_s10 + $0x70] sm:$0xff]  ;;  %v12353_v58 = vld [vmem:[%s16202_s10 + $0x78] sm:$0xff] }
 0x551   : > { %14552 = vmatpush3.bf16.msra.mxu1 %v11130_v61  ;;  %14535 = vmatprep.mubr.msk.bf16.mxu1 %vm19880_vm14, %v20251_v14  ;;  %vm20440_vm5 = vmmov %vm20431_vm3 }
 0x552   : > { %v7906_v18 = vadd.f32 %v7899_v55, %v7840_v10  ;;  %14360 = vmatmul.mubr.msk.bf16.gmra.mrb[64].mxu0 %vm20431_vm3, %v18820_v38  ;;  %14573 = vmatprep.subr.bf16.mxu1 %v20251_v14  ;;  %v19424_v55 = vcombine.low %v19332_v4, %v10952_v30  ;;  %v10982_v38 = vsel %vm20432_vm10, %v10972_v44, %v10981_v23  ;;  %vm20441_vm3 = vmmov %vm20432_vm10  ;;  %v9950_v30 = vld [vmem:[#allocation3 + $0x58] sm:$0xc] }
 0x553   : > { %14363 = vmatprep.mubr.msk.bf16.mxu0 %vm19880_vm14, %v20251_v14  ;;  %v9125_v57 = vsel %vm7853_vm6, %v9123_v31, %v9124_v24  ;;  %vm20442_vm10 = vmmov %vm20440_vm5 }
 0x554   : > { %v7909_v63 = vmax.f32 %v7906_v18, 0.0  ;;  %v10993_v43 = vshrl.u32 %v19424_v55, 16  ;;  %v10996_v4 = vshll.u32 %v19424_v55, 16  ;;  %vm20447_vm4 = vmmov %vm20445_vm13 }
 0x556   : > { %12263 = vst.msk [vmem:[%s19328_s18 + $0x3a] sm:$0x3f] %vm7914_vm0, %v7909_v63  ;;  %v10995_v25 = vrot.slane %v10993_v43, 1  ;;  %v10998_v40 = vrot.slane %v10996_v4, 2 }
 0x558   : > { %14536 = vmatmul.mubr.msk.bf16.gmra.mrb[64].mxu1 %vm20433_vm11, %v10982_v38  ;;  %v10999_v36 = vor.u32 %v10998_v40, %v10995_v25  ;;  %vm20443_vm11 = vmmov %vm20440_vm5 }
 0x559   : > { %14539 = vmatprep.mubr.msk.bf16.mxu1 %vm19880_vm14, %v20251_v14 }
 0x55a   : > { %14364 = vmatmul.mubr.msk.bf16.gmra.mrb[68].mxu0 %vm20434_vm8, %v18830_v28  ;;  %v11000_v18 = vsel %vm20441_vm3, %v10990_v35, %v10999_v36  ;;  %v16095_v35 = vld [vmem:[#allocation3 + $0x5c] sm:$0xf]  ;;  %vm20444_vm8 = vmmov %vm20440_vm5 }
 0x55b   : > { %v9045_v46 = vpop.f32.mrb[40].mxu1  ;;  %14367 = vmatprep.mubr.msk.bf16.mxu0 %vm19880_vm14, %v20251_v14  ;;  %v19473_v43 = vcombine.low %v9950_v30, %v16095_v35 }
 0x55c   : > { %v9092_v56 = vmul.f32 %v19297_v52, %v9045_v46  ;;  %v14225_v53 = vpop.f32.mrb[41].mxu1  ;;  %v9144_v46 = vrot.slane %v12348_v37, 4 }
 0x55d   : > { %v9048_v22 = vpop.f32.mrb[42].mxu1  ;;  %v9986_v25 = vrot.slane %v19473_v43, 2 }
 0x55e   : > { %v9101_v28 = vadd.f32 %v19304_v45, %v9092_v56  ;;  %v9093_v49 = vmul.f32 %v19297_v52, %v9048_v22  ;;  %v14226_v6 = vpop.f32.mrb[43].mxu1  ;;  %v19478_v22 = vld [vmem:[#allocation3 + $0x60] sm:$0xff]  }
 0x560   : > { %v9112_v29 = vadd.f32 %v12338_v34, %v9101_v28  ;;  %v9102_v16 = vadd.f32 %v19304_v45, %v9093_v49  ;;  %14540 = vmatmul.mubr.msk.bf16.gmra.mrb[68].mxu1 %vm20436_vm7, %v10991_v13  ;;  %v12417_v28 = vld [vmem:[%s19816_s4 + $0x1c] sm:$0xf]  ;;  %v9145_v13 = vsel %vm20445_vm13, %v9143_v50, %v9144_v46  ;;  %vm20446_vm7 = vmmov %vm20440_vm5 }
 0x561   : > { %14543 = vmatprep.mubr.msk.bf16.mxu1 %vm19880_vm14, %v20251_v14  ;;  %vm20451_vm3 = vmmov %vm20446_vm7 }
 0x562   : > { %v9114_v44 = vmax.f32 %v9112_v29, 0.0  ;;  %v9113_v26 = vadd.f32 %v12339_v19, %v9102_v16  ;;  %14368 = vmatmul.mubr.msk.bf16.gmra.mrb[72].mxu0 %vm20438_vm9, %v9850_v54  ;;  %v10159_v54 = vsel %vm20447_vm4, %v12417_v28, 0  ;;  %vm20448_vm9 = vcmask 1045504  }
 0x563   : > { %v9053_v61 = vpop.f32.mrb[44].mxu1  ;;  %14371 = vmatprep.mubr.msk.bf16.mxu0 %vm19880_vm14, %v20251_v14  ;;  %vm20455_vm13 = vmmov %vm20448_vm9 }
 0x564   : > { %12340 = vst.msk [vmem:[%s19328_s18 + $0x40] sm:$0xff] %vm20439_vm15, %v9114_v44  ;;  %v9115_v42 = vmax.f32 %v9113_v26, 0.0  ;;  %v9094_v17 = vmul.f32 %v19297_v52, %v9053_v61  ;;  %v14229_v21 = vpop.f32.mrb[45].mxu1  ;;  %vm20449_vm15 = vmmov %vm20440_vm5 }
 0x565   : > { %v9056_v62 = vpop.f32.mrb[46].mxu1 }
 0x566   : > { %12341 = vst.msk [vmem:[%s19328_s18 + $0x48] sm:$0xff] %vm20440_vm5, %v9115_v42  ;;  %v9103_v11 = vadd.f32 %v19304_v45, %v9094_v17  ;;  %v9095_v12 = vmul.f32 %v19297_v52, %v9056_v62  ;;  %v14230_v10 = vpop.f32.mrb[47].mxu1  ;;  %v9163_v42 = vrot.slane %v12352_v2, 2  ;;  %v12499_v17 = vld [vmem:[%s19816_s4 + $0x18] sm:$0xf]  ;;  %vm20450_vm5 = vcmask 58368  }
 0x567   : > { %v19510_v10 = vld [vmem:[#allocation3 + $0x68] sm:$0xff]  }
 0x568   : > { %v9129_v23 = vadd.f32 %v9123_v31, %v9103_v11  ;;  %v9104_v0 = vadd.f32 %v19304_v45, %v9095_v12  ;;  %14544 = vmatmul.mubr.msk.bf16.gmra.mrb[72].mxu1 %vm20442_vm10, %v11000_v18  ;;  %vm20452_vm10 = vmmov %vm20447_vm4  ;;  %vm20457_vm4 = vcmask 60416  }
 0x569   : > { %14547 = vmatprep.mubr.msk.bf16.mxu1 %vm19880_vm14, %v20251_v14  ;;  %v11274_v20 = vsel %vm20452_vm10, %v12499_v17, 0  ;;  %vm20461_vm10 = vmmov %vm20451_vm3 }
 0x56a   : > { %v9132_v63 = vmax.f32 %v9129_v23, 0.0  ;;  %v9130_v38 = vadd.f32 %v9125_v57, %v9104_v0  ;;  %14372 = vmatmul.mubr.msk.bf16.gmra.mrb[76].mxu0 %vm20443_vm11, %v9849_v39  ;;  %v9987_v39 = vrot.slane %v19478_v22, 2  ;;  %v9989_v57 = vrot.slane %v19510_v10, 2  ;;  %vm20453_vm11 = vmmov %vm20448_vm9 }
 0x56b   : > { %v9061_v41 = vpop.f32.mrb[48].mxu1  ;;  %14377 = vmatprep.mubr.msk.bf16.mxu0 %vm19880_vm14, %v20251_v14 }
 0x56c   : > { %12344 = vst.msk [vmem:[%s19328_s18 + $0x4e] sm:$0xfc] %vm7867_vm12, %v9132_v63  ;;  %v9133_v4 = vmax.f32 %v9130_v38, 0.0  ;;  %v9096_v56 = vmul.f32 %v19297_v52, %v9061_v41  ;;  %v14233_v53 = vpop.f32.mrb[49].mxu1  ;;  %v9988_v44 = vsel %vm20448_vm9, %v9986_v25, %v9987_v39  ;;  %v9990_v41 = vsel %vm20455_vm13, %v9987_v39, %v9989_v57  ;;  %v19534_v39 = vld [vmem:[#allocation3 + $0x70] sm:$0xff]   ;;  %vm20458_vm9 = vmmov %vm20451_vm3 }
 0x56d   : > { %v9064_v34 = vpop.f32.mrb[50].mxu1  ;;  %v9991_v28 = vrot.slane %v19534_v39, 2 }
 0x56e   : > { %12345 = vst.msk [vmem:[%s19328_s18 + $0x56] sm:$0xff] %vm20444_vm8, %v9133_v4  ;;  %v9105_v49 = vadd.f32 %v19304_v45, %v9096_v56  ;;  %v9097_v6 = vmul.f32 %v19297_v52, %v9064_v34  ;;  %v14234_v19 = vpop.f32.mrb[51].mxu1  ;;  %vm20454_vm8 = vmmov %vm20451_vm3 }
 0x570   : > { %v9131_v40 = vadd.f32 %v9124_v24, %v9105_v49  ;;  %v9149_v29 = vadd.f32 %v9143_v50, %v9105_v49  ;;  %v9106_v16 = vadd.f32 %v19304_v45, %v9097_v6  ;;  %14548 = vmatmul.mubr.msk.bf16.gmra.mrb[76].mxu1 %vm20446_vm7, %v10999_v36  ;;  %v9164_v36 = vrot.slane %v12353_v58, 2  ;;  %vm20456_vm7 = vmmov %vm20451_vm3 }
 0x571   : > { %14553 = vmatprep.mubr.msk.bf16.mxu1 %vm19880_vm14, %v20251_v14  ;;  %v11112_v58 = vrot.slane %v19424_v55, 2 }
 0x572   : > { %v9134_v26 = vmax.f32 %v9131_v40, 0.0  ;;  %v9152_v61 = vmax.f32 %v9149_v29, 0.0  ;;  %v9150_v31 = vadd.f32 %v9145_v13, %v9106_v16  ;;  %14378 = vmatmul.mubr.msk.bf16.vlgmr.msra.gmra.mrb[60].mxu0 %vm20449_vm15, %v9988_v44  ;;  %v9165_v37 = vsel %vm20453_vm11, %v9163_v42, %v9164_v36  ;;  %vm20459_vm15 = vmmov %vm20451_vm3  ;;  %v9959_v13 = vld [vmem:[#allocation3 + $0x7c] sm:$0x3]  ;;  %v9958_v29 = vld [vmem:[#allocation3 + $0x78] sm:$0xf] }
 0x573   : > { %v9069_v24 = vpop.f32.mrb[52].mxu1  ;;  %14381 = vmatprep.mubr.msk.bf16.mxu0 %vm19880_vm14, %v20251_v14  ;;  %14398 = vmatpush3.bf16.msra.mxu0 %v10159_v54  ;;  %v12411_v16 = vcombine.low %v9958_v29, %v9959_v13  ;;  %v10108_v54 = vshrl.u32 %v19478_v22, 16  ;;  %v10111_v44 = vshll.u32 %v19478_v22, 16 }
 0x574   : > { %12346 = vst.msk [vmem:[%s19328_s18 + $0x5e] sm:$0x3] %vm20450_vm5, %v9134_v26  ;;  %v9153_v21 = vmax.f32 %v9150_v31, 0.0  ;;  %v9098_v62 = vmul.f32 %v19297_v52, %v9069_v24  ;;  %v14237_v11 = vpop.f32.mrb[53].mxu1  ;;  %14419 = vmatprep.subr.bf16.mxu0 %v20251_v14  ;;  %vm20460_vm5 = vmmov %vm20453_vm11  ;;  %v10100_v26 = vshrl.u32 %v19473_v43, 16 }
 0x575   : > { %12349 = vst.msk [vmem:[%s19328_s18 + $0x5c] sm:$0xf0] %vm7889_vm1, %v9152_v61  ;;  %v9072_v12 = vpop.f32.mrb[54].mxu1  ;;  %v9992_v25 = vsel %vm20460_vm5, %v9989_v57, %v9991_v28  ;;  %v9993_v2 = vrot.slane %v12411_v16, 2  ;;  %vm20462_vm11 = vmmov %vm20460_vm5  ;;  %v10103_v61 = vshll.u32 %v19473_v43, 16  ;;  %v10110_v55 = vrot.slane %v10108_v54, 2 }
 0x576   : > { %12350 = vst.msk [vmem:[%s19328_s18 + $0x64] sm:$0xff] %vm20451_vm3, %v9153_v21  ;;  %v9107_v18 = vadd.f32 %v19304_v45, %v9098_v62  ;;  %v9099_v23 = vmul.f32 %v19297_v52, %v9072_v12  ;;  %v14238_v0 = vpop.f32.mrb[55].mxu1  ;;  %vm20464_vm13 = vmmov %vm20460_vm5  ;;  %v10113_v31 = vrot.slane %v10111_v44, 3  ;;  %v10102_v22 = vrot.slane %v10100_v26, 2  ;;  %v12424_v43 = vld [vmem:[%s19816_s4 + $0x20] sm:$0xf] }
 0x577   : > { %v10105_v47 = vrot.slane %v10103_v61, 3  ;;  %v16099_v62 = vld [vmem:[#allocation3 + $0x80] sm:$0xf]  ;;  %vm20469_vm5 = vsmask.f32 5376 }
 0x578   : > { %v9151_v30 = vadd.f32 %v9144_v46, %v9107_v18  ;;  %v9169_v63 = vadd.f32 %v9163_v42, %v9107_v18  ;;  %v9108_v38 = vadd.f32 %v19304_v45, %v9099_v23  ;;  %14554 = vmatmul.mubr.msk.bf16.vlgmr.msra.gmra.mrb[60].mxu1 %vm20454_vm8, %v18845_v33  ;;  %vm20463_vm8 = vmmov %vm20451_vm3  ;;  %v10114_v24 = vor.u32 %v10113_v31, %v10110_v55  ;;  %v16100_v18 = vld [vmem:[#allocation3 + $0x84] sm:$0xff]   ;;  %v12510_v0 = vld [vmem:[%s19816_s4 + $0x1c] sm:$0xf] }
 0x579   : > { %14574 = vmatpush3.bf16.msra.mxu1 %v11274_v20  ;;  %14557 = vmatprep.mubr.msk.bf16.mxu1 %vm19880_vm14, %v20251_v14  ;;  %v10120_v42 = vshll.u32 %v19510_v10, 16  ;;  %v10106_v17 = vor.u32 %v10105_v47, %v10102_v22  ;;  %v11250_v23 = vrot.slane %v16100_v18, 2  ;;  %v11222_v16 = vld [vmem:[#allocation3 + $0xa0] sm:$0x3]  ;;  %v11371_v26 = vshrl.u32 %v16100_v18, 16 }
 0x57a   : > { %v9154_v50 = vmax.f32 %v9151_v30, 0.0  ;;  %v9172_v35 = vmax.f32 %v9169_v63, 0.0  ;;  %v9170_v4 = vadd.f32 %v9165_v37, %v9108_v38  ;;  %14382 = vmatmul.mubr.msk.bf16.gmra.mrb[64].mxu0 %vm20456_vm7, %v9990_v41  ;;  %14595 = vmatprep.subr.bf16.mxu1 %v20251_v14  ;;  %vm20465_vm7 = vmmov %vm20451_vm3  ;;  %v10126_v30 = vshrl.u32 %v19534_v39, 16 }
 0x57b   : > { %v9077_v46 = vpop.f32.mrb[56].mxu1  ;;  %14385 = vmatprep.mubr.msk.bf16.mxu0 %vm19880_vm14, %v20251_v14  ;;  %v10115_v12 = vsel %vm20469_vm5, %v10106_v17, %v10114_v24  ;;  %v10129_v63 = vshll.u32 %v19534_v39, 16  ;;  %v11374_v61 = vshll.u32 %v16100_v18, 16  ;;  %v11373_v22 = vrot.slane %v11371_v26, 2 }
 0x57c   : > { %12351 = vst.msk [vmem:[%s19328_s18 + $0x6c] sm:$0xf] %vm20457_vm4, %v9154_v50  ;;  %v9173_v33 = vmax.f32 %v9170_v4, 0.0  ;;  %v9100_v56 = vmul.f32 %v19297_v52, %v9077_v46  ;;  %v14241_v53 = vpop.f32.mrb[57].mxu1  ;;  %vm20466_vm4 = vmmov %vm20451_vm3  ;;  %v10094_v50 = vld [vmem:[#allocation3 + $0x7c] sm:$0x7] }
 0x57d   : > { %12354 = vst.msk [vmem:[%s19328_s18 + $0x6a] sm:$0xc0] %vm7911_vm2, %v9172_v35  ;;  %v9080_v34 = vpop.f32.mrb[58].mxu1  ;;  %v10128_v4 = vrot.slane %v10126_v30, 2  ;;  %v10131_v46 = vrot.slane %v10129_v63, 3  ;;  %v11376_v47 = vrot.slane %v11374_v61, 3 }
 0x57e   : > { %12355 = vst.msk [vmem:[%s19328_s18 + $0x72] sm:$0xff] %vm20458_vm9, %v9173_v33  ;;  %v9109_v49 = vadd.f32 %v19304_v45, %v9100_v56  ;;  %v14242_v6 = vpop.f32.mrb[59].mxu1  ;;  %vm20467_vm9 = vmmov %vm20451_vm3  ;;  %v19601_v33 = vcombine.low %v9958_v29, %v10094_v50  ;;  %v16101_v56 = vld [vmem:[#allocation3 + $0x8c] sm:$0xff]   ;;  %v11221_v29 = vld [vmem:[#allocation3 + $0x9c] sm:$0xf] }
 0x57f   : > { %v11252_v53 = vrot.slane %v16101_v56, 2  ;;  %v10132_v34 = vor.u32 %v10131_v46, %v10128_v4  ;;  %v11383_v17 = vshll.u32 %v16101_v56, 16 }
 0x580   : > { %v9171_v19 = vadd.f32 %v9164_v36, %v9109_v49  ;;  %14558 = vmatmul.mubr.msk.bf16.gmra.mrb[64].mxu1 %vm20459_vm15, %v18848_v1  ;;  %v9994_v1 = vsel %vm20462_vm11, %v9991_v28, %v9993_v2  ;;  %v11213_v36 = vld [vmem:[#allocation3 + $0x7c] sm:$0xc]  ;;  %vm20468_vm15 = vcmask 1043456   ;;  %v10135_v28 = vshrl.u32 %v19601_v33, 16 }
 0x581   : > { %14561 = vmatprep.mubr.msk.bf16.mxu1 %vm19880_vm14, %v20251_v14  ;;  %v10272_v21 = vsel %vm20468_vm15, %v12424_v43, 0  ;;  %v19581_v11 = vcombine.low %v11213_v36, %v16099_v62  ;;  %v10138_v49 = vshll.u32 %v19601_v33, 16  ;;  %v12517_v43 = vld [vmem:[%s19816_s4 + $0x20] sm:$0xf]  ;;  %v11380_v36 = vshrl.u32 %v16101_v56, 16 }
 0x582   : > { %v9174_v40 = vmax.f32 %v9171_v19, 0.0  ;;  %14386 = vmatmul.mubr.msk.bf16.gmra.mrb[68].mxu0 %vm20451_vm3, %v9992_v25  ;;  %v16102_v19 = vld [vmem:[#allocation3 + $0x94] sm:$0xff]   ;;  %v10137_v25 = vrot.slane %v10135_v28, 2  ;;  %v10254_v4 = vrot.slane %v19601_v33, 3 }
 0x583   : > { %14389 = vmatprep.mubr.msk.bf16.mxu0 %vm19880_vm14, %v20251_v14  ;;  %v11249_v20 = vrot.slane %v19581_v11, 2  ;;  %v11254_v13 = vrot.slane %v16102_v19, 2  ;;  %v11363_v55 = vshrl.u32 %v19581_v11, 16  ;;  %v11366_v31 = vshll.u32 %v19581_v11, 16  ;;  %v12431_v33 = vld [vmem:[%s16202_s10 + $0x80] sm:$0xff] }
 0x584   : > { %12356 = vst.msk [vmem:[%s19328_s18 + $0x7a] sm:$0x3f] %vm7914_vm0, %v9174_v40  ;;  %v10140_v40 = vrot.slane %v10138_v49, 3  ;;  %v11392_v18 = vshll.u32 %v16102_v19, 16 }
 0x585   : > { %v11251_v41 = vsel %vm20462_vm11, %v11249_v20, %v11250_v23 }
 0x586   : > { %v11394_v30 = vrot.slane %v11392_v18, 3 }
 0x588   : > { %14562 = vmatmul.mubr.msk.bf16.gmra.mrb[68].mxu1 %vm20461_vm10, %v18853_v27  ;;  %v11113_v27 = vsel %vm20464_vm13, %v11110_v9, %v11112_v58  ;;  %v10117_v9 = vshrl.u32 %v19510_v10, 16  ;;  %v10122_v10 = vrot.slane %v10120_v42, 3  ;;  %vm20470_vm10 = vmmov %vm20468_vm15  ;;  %v11377_v42 = vor.u32 %v11376_v47, %v11373_v22  ;;  %v12441_v22 = vld [vmem:[%s16202_s10 + $0xa8] sm:$0xff] }
 0x589   : > { %14565 = vmatprep.mubr.msk.bf16.mxu1 %vm19880_vm14, %v20251_v14  ;;  %v11422_v38 = vsel %vm20470_vm10, %v12510_v0, 0  ;;  %vm20472_vm13 = vmmov %vm20469_vm5 }
 0x58a   : > { %14390 = vmatmul.mubr.msk.bf16.gmra.mrb[72].mxu0 %vm20463_vm8, %v9994_v1  ;;  %v10119_v57 = vrot.slane %v10117_v9, 2  ;;  %vm20471_vm8 = vmmov %vm20451_vm3  ;;  %v12504_v1 = vcombine.low %v11221_v29, %v11222_v16  ;;  %v11368_v9 = vrot.slane %v11366_v31, 3  ;;  %v12440_v31 = vld [vmem:[%s16202_s10 + $0xa0] sm:$0xff] }
 0x58b   : > { %14393 = vmatprep.mubr.msk.bf16.mxu0 %vm19880_vm14, %v20251_v14  ;;  %vm20476_vm15 = vmmov %vm20469_vm5 }
 0x58c   : > { %v10123_v37 = vor.u32 %v10122_v10, %v10119_v57  ;;  %vm20477_vm5 = vmmov %vm20451_vm3  ;;  %v11256_v44 = vrot.slane %v12504_v1, 2  ;;  %v11385_v57 = vrot.slane %v11383_v17, 3  ;;  %v11389_v10 = vshrl.u32 %v16102_v19, 16 }
 0x58d   : > { %vm20479_vm10 = vmmov %vm20477_vm5 }
 0x58e   : > { %v10124_v35 = vsel %vm20472_vm13, %v10114_v24, %v10123_v37  ;;  %v10133_v6 = vsel %vm20476_vm15, %v10123_v37, %v10132_v34  ;;  %v11365_v24 = vrot.slane %v11363_v55, 2  ;;  %v11391_v37 = vrot.slane %v11389_v10, 2 }
 0x590   : > { %14566 = vmatmul.mubr.msk.bf16.gmra.mrb[72].mxu1 %vm20465_vm7, %v11113_v27  ;;  %vm20473_vm7 = vmmov %vm20451_vm3 }
 0x591   : > { %14569 = vmatprep.mubr.msk.bf16.mxu1 %vm19880_vm14, %v20251_v14 }
 0x592   : > { %14394 = vmatmul.mubr.msk.bf16.gmra.mrb[76].mxu0 %vm20466_vm4, %v9993_v2  ;;  %vm20474_vm4 = vmmov %vm20462_vm11 }
 0x593   : > { %14399 = vmatprep.mubr.msk.bf16.mxu0 %vm19880_vm14, %v20251_v14  ;;  %v11253_v39 = vsel %vm20474_vm4, %v11250_v23, %v11252_v53  ;;  %vm20480_vm11 = vmmov %vm20472_vm13  ;;  %v11357_v23 = vld [vmem:[#allocation3 + $0xa0] sm:$0x7] }
 0x594   : > { %v12511_v0 = vcombine.low %v11221_v29, %v11357_v23 }
 0x596   : > { %v11398_v63 = vshrl.u32 %v12511_v0, 16  ;;  %v11517_v5 = vrot.slane %v12511_v0, 3 }
 0x598   : > { %14570 = vmatmul.mubr.msk.bf16.gmra.mrb[76].mxu1 %vm20467_vm9, %v11112_v58  ;;  %vm20475_vm9 = vmmov %vm20451_vm3  ;;  %v10141_v58 = vor.u32 %v10140_v40, %v10137_v25  ;;  %v11400_v50 = vrot.slane %v11398_v63, 2 }
 0x599   : > { %14575 = vmatprep.mubr.msk.bf16.mxu1 %vm19880_vm14, %v20251_v14 }
 0x59a   : > { %14400 = vmatmul.mubr.msk.bf16.vlgmr.msra.gmra.mrb[60].mxu0 %vm20451_vm3, %v10115_v12  ;;  %vm20478_vm3 = vmmov %vm20474_vm4  ;;  %v10142_v54 = vsel %vm20480_vm11, %v10132_v34, %v10141_v58  ;;  %v11382_v12 = vrot.slane %v11380_v36, 2 }
 0x59b   : > { %14403 = vmatprep.mubr.msk.bf16.mxu0 %vm19880_vm14, %v20251_v14  ;;  %14420 = vmatpush3.bf16.msra.mxu0 %v10272_v21  ;;  %v11255_v2 = vsel %vm20478_vm3, %v11252_v53, %v11254_v13  ;;  %vm20482_vm13 = vmmov %vm20478_vm3  ;;  %v11369_v21 = vor.u32 %v11368_v9, %v11365_v24 }
 0x59c   : > { %v11257_v27 = vsel %vm20482_vm13, %v11254_v13, %v11256_v44  ;;  %vm20484_vm4 = vmmov %vm20477_vm5 }
 0x59d   : > { %vm20486_vm15 = vmmov %vm20484_vm4 }
 0x59e   : > { %vm20488_vm3 = vmmov %vm20480_vm11 }
 0x59f   : > { %v11378_v11 = vsel %vm20488_vm3, %v11369_v21, %v11377_v42  ;;  %vm20490_vm11 = vmmov %vm20484_vm4 }
 0x5a0   : > { %14576 = vmatmul.mubr.msk.bf16.vlgmr.msra.gmra.mrb[60].mxu1 %vm20471_vm8, %v11251_v41  ;;  %vm20481_vm8 = vmmov %vm20477_vm5 }
 0x5a1   : > { %14596 = vmatpush3.bf16.msra.mxu1 %v11422_v38  ;;  %14579 = vmatprep.mubr.msk.bf16.mxu1 %vm19880_vm14, %v20251_v14  ;;  %vm20492_vm13 = vmmov %vm20484_vm4  ;;  %v11401_v38 = vshll.u32 %v12511_v0, 16  ;;  %v12445_v0 = vld [vmem:[%s16202_s10 + $0xb0] sm:$0xff] }
 0x5a2   : > { %14404 = vmatmul.mubr.msk.bf16.gmra.mrb[64].mxu0 %vm20473_vm7, %v10124_v35  ;;  %14617 = vmatprep.subr.bf16.mxu1 %v20251_v14  ;;  %vm20483_vm7 = vmmov %vm20477_vm5 }
 0x5a3   : > { %14407 = vmatprep.mubr.msk.bf16.mxu0 %vm19880_vm14, %v20251_v14  ;;  %v11403_v35 = vrot.slane %v11401_v38, 3  ;;  %v10426_v38 = vrot.slane %v12445_v0, 2 }
 0x5a5   : > { %v11404_v46 = vor.u32 %v11403_v35, %v11400_v50  ;;  %v19734_v50 = vld [vmem:[%s19817_s5] ss:$0 sm:$0xff] }
 0x5a8   : > { %14580 = vmatmul.mubr.msk.bf16.gmra.mrb[64].mxu1 %vm20475_vm9, %v11253_v39  ;;  %vm20485_vm9 = vmmov %vm20484_vm4  ;;  %v12432_v39 = vld [vmem:[%s16202_s10 + $0x88] sm:$0xff] }
 0x5a9   : > { %14583 = vmatprep.mubr.msk.bf16.mxu1 %vm19880_vm14, %v20251_v14 }
 0x5aa   : > { %14408 = vmatmul.mubr.msk.bf16.gmra.mrb[68].mxu0 %vm20477_vm5, %v10133_v6  ;;  %vm20487_vm5 = vcmask 1043456   ;;  %v12436_v6 = vld [vmem:[%s16202_s10 + $0x98] sm:$0xff] }
 0x5ab   : > { %14411 = vmatprep.mubr.msk.bf16.mxu0 %vm19880_vm14, %v20251_v14  ;;  %v11535_v62 = vsel %vm20487_vm5, %v12517_v43, 0  ;;  %v10387_v29 = vrot.slane %v12436_v6, 6  ;;  %v10407_v43 = vrot.slane %v12441_v22, 4 }
 0x5b0   : > { %14584 = vmatmul.mubr.msk.bf16.gmra.mrb[68].mxu1 %vm20479_vm10, %v11255_v2  ;;  %vm20489_vm10 = vmmov %vm20484_vm4 }
 0x5b1   : > { %14587 = vmatprep.mubr.msk.bf16.mxu1 %vm19880_vm14, %v20251_v14 }
 0x5b2   : > { %14412 = vmatmul.mubr.msk.bf16.gmra.mrb[72].mxu0 %vm20481_vm8, %v10142_v54  ;;  %vm20491_vm8 = vmmov %vm20488_vm3 }
 0x5b3   : > { %14415 = vmatprep.mubr.msk.bf16.mxu0 %vm19880_vm14, %v20251_v14 }
 0x5b8   : > { %14588 = vmatmul.mubr.msk.bf16.gmra.mrb[72].mxu1 %vm20483_vm7, %v11257_v27  ;;  %vm20493_vm7 = vmmov %vm20484_vm4 }
 0x5b9   : > { %14591 = vmatprep.mubr.msk.bf16.mxu1 %vm19880_vm14, %v20251_v14  ;;  %vm20497_vm5 = vmmov %vm20493_vm7 }
 0x5ba   : > { %14416 = vmatmul.mubr.msk.bf16.gmra.mrb[76].mxu0 %vm20484_vm4, %v10141_v58  ;;  %vm20494_vm4 = vmmov %vm20488_vm3 }
 0x5bb   : > { %14421 = vmatprep.mubr.msk.bf16.mxu0 %vm19880_vm14, %v20251_v14 }
 0x5c0   : > { %14592 = vmatmul.mubr.msk.bf16.gmra.mrb[76].mxu1 %vm20485_vm9, %v11256_v44  ;;  %vm20495_vm9 = vmmov %vm20493_vm7 }
 0x5c1   : > { %14597 = vmatprep.mubr.msk.bf16.mxu1 %vm19880_vm14, %v20251_v14 }
 0x5c2   : > { %14422 = vmatmul.mubr.msk.bf16.vlgmr.msra.gmra.mrb[60].mxu0 %vm20486_vm15, %v18897_v3  ;;  %v11386_v3 = vor.u32 %v11385_v57, %v11382_v12  ;;  %vm20496_vm15 = vcmask 1044480  }
 0x5c3   : > { %14425 = vmatprep.mubr.msk.bf16.mxu0 %vm19880_vm14, %v20251_v14 }
 0x5c4   : > { %v11387_v20 = vsel %vm20491_vm8, %v11377_v42, %v11386_v3  ;;  %vm20500_vm8 = vmmov %vm20497_vm5  ;;  %v10406_v42 = vrot.slane %v12440_v31, 4 }
 0x5c8   : > { %14598 = vmatmul.mubr.msk.bf16.vlgmr.msra.gmra.mrb[60].mxu1 %vm20489_vm10, %v11378_v11  ;;  %vm20498_vm10 = vmmov %vm20497_vm5 }
 0x5c9   : > { %14618 = vmatpush3.bf16.msra.mxu1 %v11535_v62  ;;  %14601 = vmatprep.mubr.msk.bf16.mxu1 %vm19880_vm14, %v20251_v14 }
 0x5ca   : > { %14426 = vmatmul.mubr.msk.bf16.gmra.mrb[64].mxu0 %vm20490_vm11, %v18902_v8  ;;  %v11395_v8 = vor.u32 %v11394_v30, %v11391_v37  ;;  %vm20499_vm11 = vmmov %vm20497_vm5 }
 0x5cb   : > { %14429 = vmatprep.mubr.msk.bf16.mxu0 %vm19880_vm14, %v20251_v14 }
 0x5cc   : > { %v11396_v41 = vsel %vm20494_vm4, %v11386_v3, %v11395_v8  ;;  %v11405_v56 = vsel %vm20488_vm3, %v11395_v8, %v11404_v46  ;;  %vm20503_vm4 = vmmov %vm20497_vm5 }
 0x5cd   : > { %vm20508_vm3 = vmmov %vm20503_vm4 }
 0x5d0   : > { %14602 = vmatmul.mubr.msk.bf16.gmra.mrb[64].mxu1 %vm20492_vm13, %v11387_v20  ;;  %vm20501_vm13 = vmmov %vm20497_vm5  ;;  %v12446_v20 = vld [vmem:[%s16202_s10 + $0xb8] sm:$0xff] }
 0x5d1   : > { %14605 = vmatprep.mubr.msk.bf16.mxu1 %vm19880_vm14, %v20251_v14 }
 0x5d2   : > { %14430 = vmatmul.mubr.msk.bf16.gmra.mrb[68].mxu0 %vm20493_vm7, %v18907_v60  ;;  %v10255_v60 = vsel %vm20496_vm15, %v10252_v15, %v10254_v4  ;;  %vm20502_vm7 = vmmov %vm20497_vm5 }
 0x5d3   : > { %14433 = vmatprep.mubr.msk.bf16.mxu0 %vm19880_vm14, %v20251_v14 }
 0x5d8   : > { %14606 = vmatmul.mubr.msk.bf16.gmra.mrb[68].mxu1 %vm20495_vm9, %v11396_v41  ;;  %vm20504_vm9 = vmmov %vm20496_vm15  ;;  %v10427_v41 = vrot.slane %v12446_v20, 2 }
 0x5d9   : > { %14609 = vmatprep.mubr.msk.bf16.mxu1 %vm19880_vm14, %v20251_v14  ;;  %v11518_v15 = vsel %vm20504_vm9, %v11515_v48, %v11517_v5  ;;  %vm20505_vm15 = vmmov %vm20503_vm4 }
 0x5da   : > { %14434 = vmatmul.mubr.msk.bf16.gmra.mrb[72].mxu0 %vm20497_vm5, %v10255_v60  ;;  %vm20506_vm5 = vmmov %vm20503_vm4  ;;  %v19742_v60 = vld [vmem:[%s19818_s6] ss:$0 sm:$0xff] }
 0x5db   : > { %14437 = vmatprep.mubr.msk.bf16.mxu0 %vm19880_vm14, %v20251_v14  ;;  %vm20515_vm9 = vmmov %vm20508_vm3 }
 0x5e0   : > { %14610 = vmatmul.mubr.msk.bf16.gmra.mrb[72].mxu1 %vm20498_vm10, %v11405_v56  ;;  %vm20509_vm10 = vmmov %vm20508_vm3 }
 0x5e1   : > { %14613 = vmatprep.mubr.msk.bf16.mxu1 %vm19880_vm14, %v20251_v14 }
 0x5e2   : > { %14438 = vmatmul.mubr.msk.bf16.gmra.mrb[76].mxu0 %vm20499_vm11, %v10254_v4  ;;  %vm20510_vm11 = vcmask 1043456  }
 0x5e3   : > { %v10408_v3 = vsel %vm20510_vm11, %v10406_v42, %v10407_v43 }
 0x5e8   : > { %14614 = vmatmul.mubr.msk.bf16.gmra.mrb[76].mxu1 %vm20500_vm8, %v11404_v46  ;;  %vm20511_vm8 = vcmask 58368  }
 0x5e9   : > { %14619 = vmatprep.mubr.msk.bf16.mxu1 %vm19880_vm14, %v20251_v14 }
 0x5f0   : > { %14620 = vmatmul.mubr.msk.bf16.vlgmr.msra.gmra.mrb[60].mxu1 %vm20501_vm13, %v18911_v59  ;;  %vm20512_vm13 = vmmov %vm20508_vm3 }
 0x5f1   : > { %14623 = vmatprep.mubr.msk.bf16.mxu1 %vm19880_vm14, %v20251_v14 }
 0x5f8   : > { %14624 = vmatmul.mubr.msk.bf16.gmra.mrb[64].mxu1 %vm20502_vm7, %v18915_v7  ;;  %vm20513_vm7 = vcmask 1045504  }
 0x5f9   : > { %14627 = vmatprep.mubr.msk.bf16.mxu1 %vm19880_vm14, %v20251_v14 }
 0x600   : > { %14628 = vmatmul.mubr.msk.bf16.gmra.mrb[68].mxu1 %vm20503_vm4, %v18920_v51 }
 0x601   : > { %14631 = vmatprep.mubr.msk.bf16.mxu1 %vm19880_vm14, %v20251_v14 }
 0x608   : > { %14632 = vmatmul.mubr.msk.bf16.gmra.mrb[72].mxu1 %vm20505_vm15, %v11518_v15  ;;  %v10428_v15 = vsel %vm20513_vm7, %v10426_v38, %v10427_v41  ;;  %vm20516_vm15 = vmmov %vm20508_vm3 }
 0x609   : > { %14635 = vmatprep.mubr.msk.bf16.mxu1 %vm19880_vm14, %v20251_v14  ;;  %v12435_v14 = vld [vmem:[%s16202_s10 + $0x90] sm:$0xff]  ;;  %vm20507_vm14 = vmmov %vm20503_vm4  ;;  %vm20514_vm4 = vcmask 60416  }
 0x60a   : > { %v10386_v40 = vrot.slane %v12435_v14, 6 }
 0x60c   : > { %v10388_v26 = vsel %vm7853_vm6, %v10386_v40, %v10387_v29 }
 0x610   : > { %14636 = vmatmul.mubr.msk.bf16.gmra.mrb[76].mxu1 %vm20506_vm5, %v11517_v5  ;;  %vm20517_vm5 = vmmov %vm20508_vm3 }
 0x695   : > { %v10308_v59 = vpop.f32.mrb[60].mxu0 }
 0x696   : > { %v10355_v7 = vmul.f32 %v19297_v52, %v10308_v59  ;;  %v14423_v51 = vpop.f32.mrb[61].mxu0 }
 0x697   : > { %v10311_v53 = vpop.f32.mrb[62].mxu0 }
 0x698   : > { %v10364_v32 = vadd.f32 %v19304_v45, %v10355_v7  ;;  %v10356_v34 = vmul.f32 %v19297_v52, %v10311_v53  ;;  %v14424_v48 = vpop.f32.mrb[63].mxu0 }
 0x69a   : > { %v10375_v28 = vadd.f32 %v12431_v33, %v10364_v32  ;;  %v10365_v49 = vadd.f32 %v19304_v45, %v10356_v34 }
 0x69c   : > { %v10377_v19 = vmax.f32 %v10375_v28, 0.0  ;;  %v10376_v13 = vadd.f32 %v12432_v39, %v10365_v49 }
 0x69d   : > { %v10316_v25 = vpop.f32.mrb[64].mxu0 }
 0x69e   : > { %12433 = vst.msk [vmem:[%s19328_s18 + $0x80] sm:$0xff] %vm20507_vm14, %v10377_v19  ;;  %v10378_v16 = vmax.f32 %v10376_v13, 0.0  ;;  %v10357_v2 = vmul.f32 %v19297_v52, %v10316_v25  ;;  %v14427_v1 = vpop.f32.mrb[65].mxu0  ;;  %vm20519_vm14 = vmmov %vm20510_vm11 }
 0x69f   : > { %v10319_v58 = vpop.f32.mrb[66].mxu0  ;;  %vm20523_vm11 = vmmov %vm20508_vm3 }
 0x6a0   : > { %12434 = vst.msk [vmem:[%s19328_s18 + $0x88] sm:$0xff] %vm20508_vm3, %v10378_v16  ;;  %v10366_v54 = vadd.f32 %v19304_v45, %v10357_v2  ;;  %v10358_v44 = vmul.f32 %v19297_v52, %v10319_v58  ;;  %v14428_v27 = vpop.f32.mrb[67].mxu0  ;;  %v12524_v16 = vld [vmem:[%s16202_s10 + $0xc0] sm:$0xff] }
 0x6a2   : > { %v10392_v61 = vadd.f32 %v10386_v40, %v10366_v54  ;;  %v10367_v55 = vadd.f32 %v19304_v45, %v10358_v44  ;;  %v12525_v44 = vld [vmem:[%s16202_s10 + $0xc8] sm:$0xff] }
 0x6a4   : > { %v10395_v47 = vmax.f32 %v10392_v61, 0.0  ;;  %v10393_v24 = vadd.f32 %v10388_v26, %v10367_v55  ;;  %v12528_v61 = vld [vmem:[%s16202_s10 + $0xd0] sm:$0xff]  ;;  %v12529_v55 = vld [vmem:[%s16202_s10 + $0xd8] sm:$0xff] }
 0x6a5   : > { %v10324_v9 = vpop.f32.mrb[68].mxu0 }
 0x6a6   : > { %12437 = vst.msk [vmem:[%s19328_s18 + $0x8e] sm:$0xfc] %vm7867_vm12, %v10395_v47  ;;  %v10396_v36 = vmax.f32 %v10393_v24, 0.0  ;;  %v10359_v17 = vmul.f32 %v19297_v52, %v10324_v9  ;;  %v14431_v21 = vpop.f32.mrb[69].mxu0  ;;  %v11649_v24 = vrot.slane %v12528_v61, 6  ;;  %v11650_v9 = vrot.slane %v12529_v55, 6 }
 0x6a7   : > { %v10327_v62 = vpop.f32.mrb[70].mxu0 }
 0x6a8   : > { %12438 = vst.msk [vmem:[%s19328_s18 + $0x96] sm:$0xff] %vm20509_vm10, %v10396_v36  ;;  %v10368_v11 = vadd.f32 %v19304_v45, %v10359_v17  ;;  %v10360_v12 = vmul.f32 %v19297_v52, %v10327_v62  ;;  %v14432_v57 = vpop.f32.mrb[71].mxu0  ;;  %vm20521_vm10 = vmmov %vm20513_vm7 }
 0x6aa   : > { %v10394_v10 = vadd.f32 %v10387_v29, %v10368_v11  ;;  %v10412_v18 = vadd.f32 %v10406_v42, %v10368_v11  ;;  %v10369_v23 = vadd.f32 %v19304_v45, %v10360_v12  ;;  %v11651_v12 = vsel %vm7853_vm6, %v11649_v24, %v11650_v9  ;;  %vm20518_vm6 = vmmov %vm20508_vm3 }
 0x6ac   : > { %v10397_v37 = vmax.f32 %v10394_v10, 0.0  ;;  %v10415_v30 = vmax.f32 %v10412_v18, 0.0  ;;  %v10413_v8 = vadd.f32 %v10408_v3, %v10369_v23  ;;  %v12533_v10 = vld [vmem:[%s16202_s10 + $0xe0] sm:$0xff]  ;;  %v12534_v18 = vld [vmem:[%s16202_s10 + $0xe8] sm:$0xff] }
 0x6ad   : > { %v10332_v63 = vpop.f32.mrb[72].mxu0 }
 0x6ae   : > { %12439 = vst.msk [vmem:[%s19328_s18 + $0x9e] sm:$0x3] %vm20511_vm8, %v10397_v37  ;;  %v10416_v52 = vmax.f32 %v10413_v8, 0.0  ;;  %v10361_v45 = vmul.f32 %v19734_v50, %v10332_v63  ;;  %v14435_v35 = vpop.f32.mrb[73].mxu0  ;;  %v11669_v37 = vrot.slane %v12533_v10, 4 }
 0x6af   : > { %12442 = vst.msk [vmem:[%s19328_s18 + $0x9c] sm:$0xf0] %vm7889_vm1, %v10415_v30  ;;  %v10335_v4 = vpop.f32.mrb[74].mxu0  ;;  %v11670_v30 = vrot.slane %v12534_v18, 4 }
 0x6b0   : > { %12443 = vst.msk [vmem:[%s19328_s18 + $0xa4] sm:$0xff] %vm20512_vm13, %v10416_v52  ;;  %v10370_v46 = vadd.f32 %v19742_v60, %v10361_v45  ;;  %v10362_v56 = vmul.f32 %v19734_v50, %v10335_v4  ;;  %v14436_v5 = vpop.f32.mrb[75].mxu0 }
 0x6b1   : > { %v11671_v4 = vsel %vm20519_vm14, %v11669_v37, %v11670_v30 }
 0x6b2   : > { %v10414_v59 = vadd.f32 %v10407_v43, %v10370_v46  ;;  %v10432_v7 = vadd.f32 %v10426_v38, %v10370_v46  ;;  %v10371_v51 = vadd.f32 %v19742_v60, %v10362_v56 }
 0x6b4   : > { %v10417_v33 = vmax.f32 %v10414_v59, 0.0  ;;  %v10435_v53 = vmax.f32 %v10432_v7, 0.0  ;;  %v10433_v32 = vadd.f32 %v10428_v15, %v10371_v51  ;;  %v12538_v15 = vld [vmem:[%s16202_s10 + $0xf0] sm:$0xff]  ;;  %v12539_v59 = vld [vmem:[%s16202_s10 + $0xf8] sm:$0xff] }
 0x6b5   : > { %v10340_v34 = vpop.f32.mrb[76].mxu0 }
 0x6b6   : > { %12444 = vst.msk [vmem:[%s19328_s18 + $0xac] sm:$0xf] %vm20514_vm4, %v10417_v33  ;;  %v10436_v48 = vmax.f32 %v10433_v32, 0.0  ;;  %v10363_v39 = vmul.f32 %v19734_v50, %v10340_v34  ;;  %v14439_v28 = vpop.f32.mrb[77].mxu0  ;;  %v11689_v32 = vrot.slane %v12538_v15, 2  ;;  %v11690_v34 = vrot.slane %v12539_v59, 2 }
 0x6b7   : > { %12447 = vst.msk [vmem:[%s19328_s18 + $0xaa] sm:$0xc0] %vm7911_vm2, %v10435_v53  ;;  %v10343_v49 = vpop.f32.mrb[78].mxu0 }
 0x6b8   : > { %12448 = vst.msk [vmem:[%s19328_s18 + $0xb2] sm:$0xff] %vm20515_vm9, %v10436_v48  ;;  %v10372_v14 = vadd.f32 %v19742_v60, %v10363_v39  ;;  %v14440_v6 = vpop.f32.mrb[79].mxu0 }
 0x6ba   : > { %v10434_v19 = vadd.f32 %v10427_v41, %v10372_v14 }
 0x6bc   : > { %v10437_v13 = vmax.f32 %v10434_v19, 0.0 }
 0x6be   : > { %12449 = vst.msk [vmem:[%s19328_s18 + $0xba] sm:$0x3f] %vm7914_vm0, %v10437_v13  ;;  %v11691_v13 = vsel %vm20521_vm10, %v11689_v32, %v11690_v34 }
 0x6c3   : > { %v11571_v25 = vpop.f32.mrb[60].mxu1 }
 0x6c4   : > { %v11618_v40 = vmul.f32 %v19734_v50, %v11571_v25  ;;  %v14621_v29 = vpop.f32.mrb[61].mxu1 }
 0x6c5   : > { %v11574_v2 = vpop.f32.mrb[62].mxu1 }
 0x6c6   : > { %v11627_v1 = vadd.f32 %v19742_v60, %v11618_v40  ;;  %v11619_v58 = vmul.f32 %v19734_v50, %v11574_v2  ;;  %v14622_v54 = vpop.f32.mrb[63].mxu1 }
 0x6c8   : > { %v11638_v27 = vadd.f32 %v12524_v16, %v11627_v1  ;;  %v11628_v26 = vadd.f32 %v19742_v60, %v11619_v58 }
 0x6ca   : > { %v11640_v31 = vmax.f32 %v11638_v27, 0.0  ;;  %v11639_v22 = vadd.f32 %v12525_v44, %v11628_v26 }
 0x6cb   : > { %v11579_v47 = vpop.f32.mrb[64].mxu1 }
 0x6cc   : > { %12526 = vst.msk [vmem:[%s19328_s18 + $0xc0] sm:$0xff] %vm20516_vm15, %v11640_v31  ;;  %v11641_v42 = vmax.f32 %v11639_v22, 0.0  ;;  %v11620_v43 = vmul.f32 %v19734_v50, %v11579_v47  ;;  %v14625_v36 = vpop.f32.mrb[65].mxu1 }
 0x6cd   : > { %v11582_v17 = vpop.f32.mrb[66].mxu1 }
 0x6ce   : > { %12527 = vst.msk [vmem:[%s19328_s18 + $0xc8] sm:$0xff] %vm20517_vm5, %v11641_v42  ;;  %v11629_v21 = vadd.f32 %v19742_v60, %v11620_v43  ;;  %v11621_v62 = vmul.f32 %v19734_v50, %v11582_v17  ;;  %v14626_v11 = vpop.f32.mrb[67].mxu1 }
 0x6d0   : > { %v11655_v57 = vadd.f32 %v11649_v24, %v11629_v21  ;;  %v11630_v3 = vadd.f32 %v19742_v60, %v11621_v62 }
 0x6d2   : > { %v11658_v23 = vmax.f32 %v11655_v57, 0.0  ;;  %v11656_v0 = vadd.f32 %v11651_v12, %v11630_v3 }
 0x6d3   : > { %v11587_v20 = vpop.f32.mrb[68].mxu1 }
 0x6d4   : > { %12530 = vst.msk [vmem:[%s19328_s18 + $0xce] sm:$0xfc] %vm7867_vm12, %v11658_v23  ;;  %v11659_v8 = vmax.f32 %v11656_v0, 0.0  ;;  %v11622_v63 = vmul.f32 %v19734_v50, %v11587_v20  ;;  %v14629_v38 = vpop.f32.mrb[69].mxu1  ;;  %vm20520_vm12 = vmmov %vm20511_vm8 }
 0x6d5   : > { %v11590_v41 = vpop.f32.mrb[70].mxu1 }
 0x6d6   : > { %12531 = vst.msk [vmem:[%s19328_s18 + $0xd6] sm:$0xff] %vm20518_vm6, %v11659_v8  ;;  %v11631_v52 = vadd.f32 %v19742_v60, %v11622_v63  ;;  %v11623_v45 = vmul.f32 %v19734_v50, %v11590_v41  ;;  %v14630_v35 = vpop.f32.mrb[71].mxu1 }
 0x6d8   : > { %v11657_v46 = vadd.f32 %v11650_v9, %v11631_v52  ;;  %v11675_v56 = vadd.f32 %v11669_v37, %v11631_v52  ;;  %v11632_v5 = vadd.f32 %v19742_v60, %v11623_v45 }
 0x6da   : > { %v11660_v7 = vmax.f32 %v11657_v46, 0.0  ;;  %v11678_v51 = vmax.f32 %v11675_v56, 0.0  ;;  %v11676_v33 = vadd.f32 %v11671_v4, %v11632_v5 }
 0x6db   : > { %v11595_v53 = vpop.f32.mrb[72].mxu1 }
 0x6dc   : > { %12532 = vst.msk [vmem:[%s19328_s18 + $0xde] sm:$0x3] %vm20520_vm12, %v11660_v7  ;;  %v11679_v48 = vmax.f32 %v11676_v33, 0.0  ;;  %v11624_v39 = vmul.f32 %v19734_v50, %v11595_v53  ;;  %v14633_v28 = vpop.f32.mrb[73].mxu1 }
 0x6dd   : > { %12535 = vst.msk [vmem:[%s19328_s18 + $0xdc] sm:$0xf0] %vm7889_vm1, %v11678_v51  ;;  %v11598_v49 = vpop.f32.mrb[74].mxu1  ;;  %vm20522_vm1 = vmmov %vm20514_vm4 }
 0x6de   : > { %12536 = vst.msk [vmem:[%s19328_s18 + $0xe4] sm:$0xff] %vm20508_vm3, %v11679_v48  ;;  %v11633_v14 = vadd.f32 %v19742_v60, %v11624_v39  ;;  %v11625_v6 = vmul.f32 %v19734_v50, %v11598_v49  ;;  %v14634_v19 = vpop.f32.mrb[75].mxu1 }
 0x6e0   : > { %v11677_v25 = vadd.f32 %v11670_v30, %v11633_v14  ;;  %v11695_v40 = vadd.f32 %v11689_v32, %v11633_v14  ;;  %v11634_v29 = vadd.f32 %v19742_v60, %v11625_v6 }
 0x6e2   : > { %v11680_v16 = vmax.f32 %v11677_v25, 0.0  ;;  %v11698_v2 = vmax.f32 %v11695_v40, 0.0  ;;  %v11696_v1 = vadd.f32 %v11691_v13, %v11634_v29 }
 0x6e3   : > { %v11603_v58 = vpop.f32.mrb[76].mxu1 }
 0x6e4   : > { %12537 = vst.msk [vmem:[%s19328_s18 + $0xec] sm:$0xf] %vm20522_vm1, %v11680_v16  ;;  %v11699_v54 = vmax.f32 %v11696_v1, 0.0  ;;  %v11626_v44 = vmul.f32 %v19734_v50, %v11603_v58  ;;  %v14637_v27 = vpop.f32.mrb[77].mxu1 }
 0x6e5   : > { %12540 = vst.msk [vmem:[%s19328_s18 + $0xea] sm:$0xc0] %vm7911_vm2, %v11698_v2  ;;  %v11606_v26 = vpop.f32.mrb[78].mxu1 }
 0x6e6   : > { %12541 = vst.msk [vmem:[%s19328_s18 + $0xf2] sm:$0xff] %vm20523_vm11, %v11699_v54  ;;  %v11635_v61 = vadd.f32 %v19742_v60, %v11626_v44  ;;  %v14638_v55 = vpop.f32.mrb[79].mxu1 }
 0x6e8   : > { %v11697_v31 = vadd.f32 %v11690_v34, %v11635_v61 }
 0x6ea   : > { %v11700_v22 = vmax.f32 %v11697_v31, 0.0 }
 0x6ec   : > { %12542 = vst.msk [vmem:[%s19328_s18 + $0xfa] sm:$0x3f] %vm7914_vm0, %v11700_v22 }
 0x6ed PF: > { %s17_s24 = sadd.s32 1, %s16111_s24  }
 0x6ee   : > { %p14_p4 = scmp.ge.s32.totalorder %s17_s24, 4  }
 0x6f0   :  { %16 = sbr.rel (!%p14_p4) target bundleno = 1 (0x1), region = 124 }

</bundles_post_ra>
